<compile_context>
chip_gen: v5e
topology: v5e:2x2
jax: 0.10.0
libtpu: 0.0.40
codegen_flags: <defaults>
</compile_context>

<pallas_src>
import jax
import jax.numpy as jnp
from jax import lax
from jax.experimental import pallas as pl
from jax.experimental.pallas import tpu as pltpu


# ------------------------------ helpers --------------------------------------

def _round_up(x, m):
    return ((x + m - 1) // m) * m


def _pick_strip_height(H):
    """Largest multiple-of-8 divisor of H, capped at 32 (4-row halo <= 12.5%)."""
    best = None
    for th in range(8, min(H, 32) + 1, 8):
        if H % th == 0:
            best = th
    return best if best is not None else H   # ragged H: one full-image strip


def _vmem_limit_bytes():
    # v5e/v6e: 128 MiB physical -> 96 MiB cap; v7x: 64 MiB physical -> 48 MiB cap.
    try:
        cap = pltpu.get_tpu_info().vmem_capacity_bytes
    except Exception:
        cap = 128 * 1024 * 1024
    return int(min(cap * 3 // 4, 96 * 1024 * 1024))


# ------------------------------ forward wrapper ------------------------------

def inception_forward(x_nchw, params):
    f32, bf16 = jnp.float32, jnp.bfloat16
    x = jnp.transpose(x_nchw, (0, 2, 3, 1)).astype(f32)           # NCHW -> NHWC
    N, H, W, Ci = x.shape

    C1 = params["w1"].shape[1]
    C2R, C2 = params["w2a"].shape[1], params["w2b"].shape[-1]
    C3R, C3 = params["w3a"].shape[1], params["w3b"].shape[-1]
    C4 = params["w4"].shape[1]
    Cred = C1 + C2R + C3R
    Ctot = C1 + C2 + C3 + C4

    TH = _pick_strip_height(H)
    S = H // TH

    # Width padding so the flattening reshapes are layout no-ops.
    Wk = _round_up(W, 8)            # kernel output width (cropped back to W)
    Wp = _round_up(Wk + 4, 8)       # padded-image width (= Wk + 8)
    Hp = H + 4

    # one shared zero-padded copy of x (halo 2 covers the 3x3, 5x5 and the pool)
    xp = jnp.pad(x, ((0, 0), (2, 2), (2, Wp - W - 2), (0, 0))).astype(bf16)

    w_red = jnp.concatenate(
        [params["w1"], params["w2a"], params["w3a"]], axis=1).astype(bf16)
    b_red = jnp.concatenate(
        [params["b1"], params["b2a"], params["b3a"]]).reshape(1, Cred).astype(f32)
    w2b = params["w2b"].reshape(3, 3 * C2R, C2).astype(bf16)      # (ky, kx*ci, co)
    w3b = params["w3b"].reshape(5, 5 * C3R, C3).astype(bf16)
    w4 = params["w4"].astype(bf16)
    b2b = params["b2b"].reshape(1, C2).astype(f32)
    b3b = params["b3b"].reshape(1, C3).astype(f32)
    b4 = params["b4"].reshape(1, C4).astype(f32)

    def kernel(xp_ref, wred_ref, bred_ref, w2b_ref, b2b_ref,
               w3b_ref, b3b_ref, w4_ref, b4_ref, out_ref):
        s = pl.program_id(1)
        row0 = pl.multiple_of(s * TH, TH)            # strip top in padded coords
        slab = xp_ref[pl.ds(row0, TH + 4), :, :]     # (TH+4, Wp, Ci) bf16

        # validity mask of real-image pixels inside the zero-padded slab
        rows = row0 + lax.broadcasted_iota(jnp.int32, (TH + 4, Wp, 1), 0)
        cols = lax.broadcasted_iota(jnp.int32, (TH + 4, Wp, 1), 1)
        valid = (rows >= 2) & (rows < H + 2) & (cols >= 2) & (cols < W + 2)

        # ---- fused 1x1 reduce convs (w1 | w2a | w3a): one deep MXU matmul.
        # Bias only on real pixels so the conv halo of r2/r3 stays exactly zero.
        red = jnp.dot(slab.reshape((TH + 4) * Wp, Ci), wred_ref[...],
                      preferred_element_type=f32).reshape(TH + 4, Wp, Cred)
        red = red + valid.astype(f32) * bred_ref[...]

        # branch 1: retire straight into its output channel slice
        out_ref[:, :, 0:C1] = red[2:TH + 2, 2:Wk + 2, 0:C1].astype(out_ref.dtype)

        r2 = red[:, :, C1:C1 + C2R].astype(bf16)                 # halo 2 (use +1)
        r3 = red[:, :, C1 + C2R:Cred].astype(bf16)               # halo 2 (use +0)

        def conv_kxk(r, K, off, w_ref, b_ref):
            # Per-ky accumulation of a (K*Cr)-deep contraction: small gather
            # temps, deep MXU matmuls.
            cr = r.shape[-1]
            co = w_ref.shape[-1]
            acc = jnp.zeros((TH * Wk, co), f32)
            for ky in range(K):
                win = jnp.concatenate(
                    [r[off + ky:off + ky + TH, off + kx:off + kx + Wk, :]
                     for kx in range(K)], axis=-1)               # (TH, Wk, K*cr)
                acc = acc + jnp.dot(win.reshape(TH * Wk, K * cr), w_ref[ky],
                                    preferred_element_type=f32)
            return (acc + b_ref[...]).reshape(TH, Wk, co)

        out_ref[:, :, C1:C1 + C2] = \
            conv_kxk(r2, 3, 1, w2b_ref, b2b_ref).astype(out_ref.dtype)
        out_ref[:, :, C1 + C2:C1 + C2 + C3] = \
            conv_kxk(r3, 5, 0, w3b_ref, b3b_ref).astype(out_ref.dtype)

        # ---- branch 4: 3x3 stride-1 max pool (padding acts as -inf) + 1x1 proj.
        # Pool is done in bf16: exact for max, halves VALU/vreg cost.
        neg_inf = jnp.full((), -jnp.inf, slab.dtype)
        xf = jnp.where(valid, slab, neg_inf)
        pooled = xf[1:TH + 1, 1:Wk + 1, :]
        for dy in range(3):
            for dx in range(3):
                if dy == 0 and dx == 0:
                    continue
                pooled = jnp.maximum(
                    pooled, xf[1 + dy:1 + dy + TH, 1 + dx:1 + dx + Wk, :])
        # NOTE: pooled can be -inf only in the cropped (padded) columns; a matmul
        # row never contaminates other rows, so this is harmless.
        b4o = jnp.dot(pooled.reshape(TH * Wk, Ci), w4_ref[...],
                      preferred_element_type=f32) + b4_ref[...]
        out_ref[:, :, C1 + C2 + C3:Ctot] = \
            b4o.reshape(TH, Wk, C4).astype(out_ref.dtype)

    flops = 2 * N * ((H + 4) * Wp * Ci * Cred
                     + H * Wk * (9 * C2R * C2 + 25 * C3R * C3 + Ci * C4))
    bytes_accessed = (xp.size * 2
                      + (w_red.size + w2b.size + w3b.size + w4.size) * 2
                      + (b_red.size + b2b.size + b3b.size + b4.size) * 4
                      + N * H * Wk * Ctot * 4)

    # TODO(synk): for very large H*W*Ci feature maps, switch the resident padded
    # image block to per-strip manual DMA with halo to stay inside v7x's VMEM.
    out = pl.pallas_call(
        kernel,
        out_shape=jax.ShapeDtypeStruct((N, H, Wk, Ctot), f32),
        grid=(N, S),
        in_specs=[
            # padded image: resident across the strip axis (index independent of s)
            pl.BlockSpec((None, Hp, Wp, Ci), lambda n, s: (n, 0, 0, 0)),
            pl.BlockSpec((Ci, Cred), lambda n, s: (0, 0)),
            pl.BlockSpec((1, Cred), lambda n, s: (0, 0)),
            pl.BlockSpec((3, 3 * C2R, C2), lambda n, s: (0, 0, 0)),
            pl.BlockSpec((1, C2), lambda n, s: (0, 0)),
            pl.BlockSpec((5, 5 * C3R, C3), lambda n, s: (0, 0, 0)),
            pl.BlockSpec((1, C3), lambda n, s: (0, 0)),
            pl.BlockSpec((Ci, C4), lambda n, s: (0, 0)),
            pl.BlockSpec((1, C4), lambda n, s: (0, 0)),
        ],
        out_specs=pl.BlockSpec((None, TH, Wk, Ctot), lambda n, s: (n, s, 0, 0)),
        compiler_params=pltpu.CompilerParams(
            dimension_semantics=("parallel", "parallel"),
            vmem_limit_bytes=_vmem_limit_bytes()),
        cost_estimate=pl.CostEstimate(flops=int(flops), transcendentals=0,
                                      bytes_accessed=int(bytes_accessed)),
    )(xp, w_red, b_red, w2b, b2b, w3b, b3b, w4, b4)

    if Wk != W:
        out = out[:, :, :W, :]
    return jnp.transpose(out, (0, 3, 1, 2))                      # NHWC -> NCHW


# --------------------------- deterministic params ----------------------------

def init_params(key, in_c, ch1x1, ch3x3red, ch3x3, ch5x5red, ch5x5, pool_proj):
    ks = jax.random.split(key, 12)
    w = lambda k, shape: 0.1 * jax.random.normal(k, shape, jnp.float32)
    return dict(
        w1=w(ks[0], (in_c, ch1x1)),            b1=w(ks[1], (ch1x1,)),
        w2a=w(ks[2], (in_c, ch3x3red)),        b2a=w(ks[3], (ch3x3red,)),
        w2b=w(ks[4], (3, 3, ch3x3red, ch3x3)), b2b=w(ks[5], (ch3x3,)),
        w3a=w(ks[6], (in_c, ch5x5red)),        b3a=w(ks[7], (ch5x5red,)),
        w3b=w(ks[8], (5, 5, ch5x5red, ch5x5)), b3b=w(ks[9], (ch5x5,)),
        w4=w(ks[10], (in_c, pool_proj)),       b4=w(ks[11], (pool_proj,)),
    )


# --------------------------- pure-JAX reference -------------------------------

def reference_forward(x_nchw, params):
    x = jnp.transpose(x_nchw, (0, 2, 3, 1)).astype(jnp.float32)
    dn = ("NHWC", "HWIO", "NHWC")

    def conv(xin, w, b, pad):
        return lax.conv_general_dilated(xin, w, (1, 1),
                                        [(pad, pad), (pad, pad)],
                                        dimension_numbers=dn) + b

    def c1(xin, w, b):
        return conv(xin, w.reshape(1, 1, *w.shape), b, 0)

    b1 = c1(x, params["w1"], params["b1"])
    b2 = conv(c1(x, params["w2a"], params["b2a"]), params["w2b"], params["b2b"], 1)
    b3 = conv(c1(x, params["w3a"], params["b3a"]), params["w3b"], params["b3b"], 2)
    pooled = lax.reduce_window(x, -jnp.inf, lax.max, (1, 3, 3, 1), (1, 1, 1, 1),
                               [(0, 0), (1, 1), (1, 1), (0, 0)])
    b4 = c1(pooled, params["w4"], params["b4"])
    out = jnp.concatenate([b1, b2, b3, b4], axis=-1)
    return jnp.transpose(out, (0, 3, 1, 2))


if __name__ == "__main__":
    key = jax.random.PRNGKey(0)
    k_x, k_p = jax.random.split(key)

    in_c, ch1x1, ch3x3red, ch3x3, ch5x5red, ch5x5, pool_proj = 4, 8, 4, 8, 4, 8, 8
    x = jax.random.normal(k_x, (2, in_c, 16, 16), jnp.float32)    # NCHW like PyTorch
    params = init_params(k_p, in_c, ch1x1, ch3x3red, ch3x3, ch5x5red, ch5x5, pool_proj)

    out = jax.block_until_ready(inception_forward(x, params))
    ref = jax.block_until_ready(reference_forward(x, params))

    assert out.shape == (2, ch1x1 + ch3x3 + ch5x5 + pool_proj, 16, 16), out.shape
    max_err = float(jnp.max(jnp.abs(out - ref)))
    # bf16 MXU inputs (f32 accumulation) -> slightly looser tolerance than pure f32
    assert max_err < 2e-2, f"max abs error vs reference: {max_err}"
    print("KERNEL_OK")
</pallas_src>

<mosaic_0001>
module attributes {stable_mosaic.version = 11 : i64} {
  func.func @kernel(%arg0: i32, %arg1: i32, %arg2: memref<1x20x24x4xbf16, #tpu.memory_space<vmem>>, %arg3: memref<4x16xbf16, #tpu.memory_space<vmem>>, %arg4: memref<1x16xf32, #tpu.memory_space<vmem>>, %arg5: memref<3x12x8xbf16, #tpu.memory_space<vmem>>, %arg6: memref<1x8xf32, #tpu.memory_space<vmem>>, %arg7: memref<5x20x8xbf16, #tpu.memory_space<vmem>>, %arg8: memref<1x8xf32, #tpu.memory_space<vmem>>, %arg9: memref<4x8xbf16, #tpu.memory_space<vmem>>, %arg10: memref<1x8xf32, #tpu.memory_space<vmem>>, %arg11: memref<1x16x16x32xf32, #tpu.memory_space<vmem>>) attributes {dimension_semantics = [#tpu.dimension_semantics<parallel>, #tpu.dimension_semantics<parallel>], iteration_bounds = array<i64: 2, 1>, scalar_prefetch = 0 : i64, scratch_operands = 0 : i64, tpu.core_type = #tpu.core_type<tc>, window_params = [{transform_indices = @transform_0, window_bounds = array<i64: 1, 20, 24, 4>}, {pipeline_mode = #tpu.pipeline_mode<synchronous>, transform_indices = @transform_1, window_bounds = array<i64: 4, 16>}, {pipeline_mode = #tpu.pipeline_mode<synchronous>, transform_indices = @transform_2, window_bounds = array<i64: 1, 16>}, {pipeline_mode = #tpu.pipeline_mode<synchronous>, transform_indices = @transform_3, window_bounds = array<i64: 3, 12, 8>}, {pipeline_mode = #tpu.pipeline_mode<synchronous>, transform_indices = @transform_4, window_bounds = array<i64: 1, 8>}, {pipeline_mode = #tpu.pipeline_mode<synchronous>, transform_indices = @transform_5, window_bounds = array<i64: 5, 20, 8>}, {pipeline_mode = #tpu.pipeline_mode<synchronous>, transform_indices = @transform_6, window_bounds = array<i64: 1, 8>}, {pipeline_mode = #tpu.pipeline_mode<synchronous>, transform_indices = @transform_7, window_bounds = array<i64: 4, 8>}, {pipeline_mode = #tpu.pipeline_mode<synchronous>, transform_indices = @transform_8, window_bounds = array<i64: 1, 8>}, {transform_indices = @transform_9, window_bounds = array<i64: 1, 16, 16, 32>}]} {
    %c16_i32 = arith.constant 16 : i32
    %0 = arith.muli %arg1, %c16_i32 : i32
    %1 = tpu.assume_multiple %0, 16 : i32
    %c0 = arith.constant 0 : index
    %2 = arith.index_cast %1 : i32 to index
    %c0_0 = arith.constant 0 : index
    %c0_1 = arith.constant 0 : index
    %3 = vector.load %arg2[%c0, %2, %c0_0, %c0_1] : memref<1x20x24x4xbf16, #tpu.memory_space<vmem>>, vector<1x20x24x4xbf16>
    %4 = vector.shape_cast %3 : vector<1x20x24x4xbf16> to vector<20x24x4xbf16>
    %5 = tpu.iota {dimensions = array<i32: 0>} : vector<20x24x1xi32>
    %6 = vector.broadcast %1 : i32 to vector<20x24x1xi32>
    %7 = arith.addi %6, %5 : vector<20x24x1xi32>
    %8 = tpu.iota {dimensions = array<i32: 1>} : vector<20x24x1xi32>
    %c2_i32 = arith.constant 2 : i32
    %9 = vector.broadcast %c2_i32 : i32 to vector<20x24x1xi32>
    %10 = arith.cmpi sge, %7, %9 : vector<20x24x1xi32>
    %c18_i32 = arith.constant 18 : i32
    %11 = vector.broadcast %c18_i32 : i32 to vector<20x24x1xi32>
    %12 = arith.cmpi slt, %7, %11 : vector<20x24x1xi32>
    %13 = arith.andi %10, %12 : vector<20x24x1xi1>
    %c2_i32_2 = arith.constant 2 : i32
    %14 = vector.broadcast %c2_i32_2 : i32 to vector<20x24x1xi32>
    %15 = arith.cmpi sge, %8, %14 : vector<20x24x1xi32>
    %16 = arith.andi %13, %15 : vector<20x24x1xi1>
    %c18_i32_3 = arith.constant 18 : i32
    %17 = vector.broadcast %c18_i32_3 : i32 to vector<20x24x1xi32>
    %18 = arith.cmpi slt, %8, %17 : vector<20x24x1xi32>
    %19 = arith.andi %16, %18 : vector<20x24x1xi1>
    %20 = vector.shape_cast %4 : vector<20x24x4xbf16> to vector<480x4xbf16>
    %c0_4 = arith.constant 0 : index
    %c0_5 = arith.constant 0 : index
    %21 = vector.load %arg3[%c0_4, %c0_5] : memref<4x16xbf16, #tpu.memory_space<vmem>>, vector<4x16xbf16>
    %cst = arith.constant dense<0.000000e+00> : vector<480x16xf32>
    %22 = tpu.matmul %20, %21, %cst {dimension_numbers = #tpu.dot_dimension_numbers<[1], [0], [0], [1], [0, 0, 1, 1], [], []>} : vector<480x4xbf16>, vector<4x16xbf16>, vector<480x16xf32> -> vector<480x16xf32>
    %23 = vector.shape_cast %22 : vector<480x16xf32> to vector<20x24x16xf32>
    %24 = arith.extui %19 : vector<20x24x1xi1> to vector<20x24x1xi32>
    %25 = arith.sitofp %24 : vector<20x24x1xi32> to vector<20x24x1xf32>
    %c0_6 = arith.constant 0 : index
    %c0_7 = arith.constant 0 : index
    %26 = vector.load %arg4[%c0_6, %c0_7] : memref<1x16xf32, #tpu.memory_space<vmem>>, vector<1x16xf32>
    %27 = vector.shape_cast %26 : vector<1x16xf32> to vector<1x1x16xf32>
    %28 = vector.broadcast %25 : vector<20x24x1xf32> to vector<20x24x16xf32>
    %29 = vector.broadcast %27 : vector<1x1x16xf32> to vector<20x24x16xf32>
    %30 = arith.mulf %28, %29 : vector<20x24x16xf32>
    %31 = arith.addf %23, %30 : vector<20x24x16xf32>
    %32 = vector.extract_strided_slice %31 {offsets = [2, 2, 0], sizes = [16, 16, 8], strides = [1, 1, 1]} : vector<20x24x16xf32> to vector<16x16x8xf32>
    %c0_8 = arith.constant 0 : index
    %c0_9 = arith.constant 0 : index
    %c0_10 = arith.constant 0 : index
    %c0_11 = arith.constant 0 : index
    %33 = vector.load %arg11[%c0_8, %c0_9, %c0_10, %c0_11] : memref<1x16x16x32xf32, #tpu.memory_space<vmem>>, vector<1x16x16x8xf32>
    %34 = vector.shape_cast %33 : vector<1x16x16x8xf32> to vector<16x16x8xf32>
    %35 = vector.shape_cast %32 : vector<16x16x8xf32> to vector<1x16x16x8xf32>
    tpu.vector_store %arg11[%c0_8, %c0_9, %c0_10, %c0_11], %35 {strides = array<i32>} : memref<1x16x16x32xf32, #tpu.memory_space<vmem>>, vector<1x16x16x8xf32>,
    %36 = vector.extract_strided_slice %31 {offsets = [0, 0, 8], sizes = [20, 24, 4], strides = [1, 1, 1]} : vector<20x24x16xf32> to vector<20x24x4xf32>
    %37 = arith.truncf %36 : vector<20x24x4xf32> to vector<20x24x4xbf16>
    %38 = vector.extract_strided_slice %31 {offsets = [0, 0, 12], sizes = [20, 24, 4], strides = [1, 1, 1]} : vector<20x24x16xf32> to vector<20x24x4xf32>
    %39 = arith.truncf %38 : vector<20x24x4xf32> to vector<20x24x4xbf16>
    %cst_12 = arith.constant 0.000000e+00 : f32
    %40 = vector.broadcast %cst_12 : f32 to vector<256x8xf32>
    %41 = vector.extract_strided_slice %37 {offsets = [1, 1, 0], sizes = [16, 16, 4], strides = [1, 1, 1]} : vector<20x24x4xbf16> to vector<16x16x4xbf16>
    %42 = vector.extract_strided_slice %37 {offsets = [1, 2, 0], sizes = [16, 16, 4], strides = [1, 1, 1]} : vector<20x24x4xbf16> to vector<16x16x4xbf16>
    %43 = vector.extract_strided_slice %37 {offsets = [1, 3, 0], sizes = [16, 16, 4], strides = [1, 1, 1]} : vector<20x24x4xbf16> to vector<16x16x4xbf16>
    %44 = tpu.concatenate %41, %42, %43 in 2 : vector<16x16x4xbf16>, vector<16x16x4xbf16>, vector<16x16x4xbf16> -> vector<16x16x12xbf16>
    %45 = vector.shape_cast %44 : vector<16x16x12xbf16> to vector<256x12xbf16>
    %c0_13 = arith.constant 0 : index
    %c0_14 = arith.constant 0 : index
    %c0_15 = arith.constant 0 : index
    %46 = vector.load %arg5[%c0_13, %c0_14, %c0_15] : memref<3x12x8xbf16, #tpu.memory_space<vmem>>, vector<1x12x8xbf16>
    %47 = vector.shape_cast %46 : vector<1x12x8xbf16> to vector<12x8xbf16>
    %cst_16 = arith.constant dense<0.000000e+00> : vector<256x8xf32>
    %48 = tpu.matmul %45, %47, %cst_16 {dimension_numbers = #tpu.dot_dimension_numbers<[1], [0], [0], [1], [0, 0, 1, 1], [], []>} : vector<256x12xbf16>, vector<12x8xbf16>, vector<256x8xf32> -> vector<256x8xf32>
    %49 = arith.addf %40, %48 : vector<256x8xf32>
    %50 = vector.extract_strided_slice %37 {offsets = [2, 1, 0], sizes = [16, 16, 4], strides = [1, 1, 1]} : vector<20x24x4xbf16> to vector<16x16x4xbf16>
    %51 = vector.extract_strided_slice %37 {offsets = [2, 2, 0], sizes = [16, 16, 4], strides = [1, 1, 1]} : vector<20x24x4xbf16> to vector<16x16x4xbf16>
    %52 = vector.extract_strided_slice %37 {offsets = [2, 3, 0], sizes = [16, 16, 4], strides = [1, 1, 1]} : vector<20x24x4xbf16> to vector<16x16x4xbf16>
    %53 = tpu.concatenate %50, %51, %52 in 2 : vector<16x16x4xbf16>, vector<16x16x4xbf16>, vector<16x16x4xbf16> -> vector<16x16x12xbf16>
    %54 = vector.shape_cast %53 : vector<16x16x12xbf16> to vector<256x12xbf16>
    %c1 = arith.constant 1 : index
    %c0_17 = arith.constant 0 : index
    %c0_18 = arith.constant 0 : index
    %55 = vector.load %arg5[%c1, %c0_17, %c0_18] : memref<3x12x8xbf16, #tpu.memory_space<vmem>>, vector<1x12x8xbf16>
    %56 = vector.shape_cast %55 : vector<1x12x8xbf16> to vector<12x8xbf16>
    %cst_19 = arith.constant dense<0.000000e+00> : vector<256x8xf32>
    %57 = tpu.matmul %54, %56, %cst_19 {dimension_numbers = #tpu.dot_dimension_numbers<[1], [0], [0], [1], [0, 0, 1, 1], [], []>} : vector<256x12xbf16>, vector<12x8xbf16>, vector<256x8xf32> -> vector<256x8xf32>
    %58 = arith.addf %49, %57 : vector<256x8xf32>
    %59 = vector.extract_strided_slice %37 {offsets = [3, 1, 0], sizes = [16, 16, 4], strides = [1, 1, 1]} : vector<20x24x4xbf16> to vector<16x16x4xbf16>
    %60 = vector.extract_strided_slice %37 {offsets = [3, 2, 0], sizes = [16, 16, 4], strides = [1, 1, 1]} : vector<20x24x4xbf16> to vector<16x16x4xbf16>
    %61 = vector.extract_strided_slice %37 {offsets = [3, 3, 0], sizes = [16, 16, 4], strides = [1, 1, 1]} : vector<20x24x4xbf16> to vector<16x16x4xbf16>
    %62 = tpu.concatenate %59, %60, %61 in 2 : vector<16x16x4xbf16>, vector<16x16x4xbf16>, vector<16x16x4xbf16> -> vector<16x16x12xbf16>
    %63 = vector.shape_cast %62 : vector<16x16x12xbf16> to vector<256x12xbf16>
    %c2 = arith.constant 2 : index
    %c0_20 = arith.constant 0 : index
    %c0_21 = arith.constant 0 : index
    %64 = vector.load %arg5[%c2, %c0_20, %c0_21] : memref<3x12x8xbf16, #tpu.memory_space<vmem>>, vector<1x12x8xbf16>
    %65 = vector.shape_cast %64 : vector<1x12x8xbf16> to vector<12x8xbf16>
    %cst_22 = arith.constant dense<0.000000e+00> : vector<256x8xf32>
    %66 = tpu.matmul %63, %65, %cst_22 {dimension_numbers = #tpu.dot_dimension_numbers<[1], [0], [0], [1], [0, 0, 1, 1], [], []>} : vector<256x12xbf16>, vector<12x8xbf16>, vector<256x8xf32> -> vector<256x8xf32>
    %67 = arith.addf %58, %66 : vector<256x8xf32>
    %c0_23 = arith.constant 0 : index
    %c0_24 = arith.constant 0 : index
    %68 = vector.load %arg6[%c0_23, %c0_24] : memref<1x8xf32, #tpu.memory_space<vmem>>, vector<1x8xf32>
    %69 = vector.broadcast %68 : vector<1x8xf32> to vector<256x8xf32>
    %70 = arith.addf %67, %69 : vector<256x8xf32>
    %71 = vector.shape_cast %70 : vector<256x8xf32> to vector<16x16x8xf32>
    %c0_25 = arith.constant 0 : index
    %c0_26 = arith.constant 0 : index
    %c0_27 = arith.constant 0 : index
    %c8 = arith.constant 8 : index
    %72 = vector.load %arg11[%c0_25, %c0_26, %c0_27, %c8] : memref<1x16x16x32xf32, #tpu.memory_space<vmem>>, vector<1x16x16x8xf32>
    %73 = vector.shape_cast %72 : vector<1x16x16x8xf32> to vector<16x16x8xf32>
    %74 = vector.shape_cast %71 : vector<16x16x8xf32> to vector<1x16x16x8xf32>
    tpu.vector_store %arg11[%c0_25, %c0_26, %c0_27, %c8], %74 {strides = array<i32>} : memref<1x16x16x32xf32, #tpu.memory_space<vmem>>, vector<1x16x16x8xf32>,
    %cst_28 = arith.constant 0.000000e+00 : f32
    %75 = vector.broadcast %cst_28 : f32 to vector<256x8xf32>
    %76 = vector.extract_strided_slice %39 {offsets = [0, 0, 0], sizes = [16, 16, 4], strides = [1, 1, 1]} : vector<20x24x4xbf16> to vector<16x16x4xbf16>
    %77 = vector.extract_strided_slice %39 {offsets = [0, 1, 0], sizes = [16, 16, 4], strides = [1, 1, 1]} : vector<20x24x4xbf16> to vector<16x16x4xbf16>
    %78 = vector.extract_strided_slice %39 {offsets = [0, 2, 0], sizes = [16, 16, 4], strides = [1, 1, 1]} : vector<20x24x4xbf16> to vector<16x16x4xbf16>
    %79 = vector.extract_strided_slice %39 {offsets = [0, 3, 0], sizes = [16, 16, 4], strides = [1, 1, 1]} : vector<20x24x4xbf16> to vector<16x16x4xbf16>
    %80 = vector.extract_strided_slice %39 {offsets = [0, 4, 0], sizes = [16, 16, 4], strides = [1, 1, 1]} : vector<20x24x4xbf16> to vector<16x16x4xbf16>
    %81 = tpu.concatenate %76, %77, %78, %79, %80 in 2 : vector<16x16x4xbf16>, vector<16x16x4xbf16>, vector<16x16x4xbf16>, vector<16x16x4xbf16>, vector<16x16x4xbf16> -> vector<16x16x20xbf16>
    %82 = vector.shape_cast %81 : vector<16x16x20xbf16> to vector<256x20xbf16>
    %c0_29 = arith.constant 0 : index
    %c0_30 = arith.constant 0 : index
    %c0_31 = arith.constant 0 : index
    %83 = vector.load %arg7[%c0_29, %c0_30, %c0_31] : memref<5x20x8xbf16, #tpu.memory_space<vmem>>, vector<1x20x8xbf16>
    %84 = vector.shape_cast %83 : vector<1x20x8xbf16> to vector<20x8xbf16>
    %cst_32 = arith.constant dense<0.000000e+00> : vector<256x8xf32>
    %85 = tpu.matmul %82, %84, %cst_32 {dimension_numbers = #tpu.dot_dimension_numbers<[1], [0], [0], [1], [0, 0, 1, 1], [], []>} : vector<256x20xbf16>, vector<20x8xbf16>, vector<256x8xf32> -> vector<256x8xf32>
    %86 = arith.addf %75, %85 : vector<256x8xf32>
    %87 = vector.extract_strided_slice %39 {offsets = [1, 0, 0], sizes = [16, 16, 4], strides = [1, 1, 1]} : vector<20x24x4xbf16> to vector<16x16x4xbf16>
    %88 = vector.extract_strided_slice %39 {offsets = [1, 1, 0], sizes = [16, 16, 4], strides = [1, 1, 1]} : vector<20x24x4xbf16> to vector<16x16x4xbf16>
    %89 = vector.extract_strided_slice %39 {offsets = [1, 2, 0], sizes = [16, 16, 4], strides = [1, 1, 1]} : vector<20x24x4xbf16> to vector<16x16x4xbf16>
    %90 = vector.extract_strided_slice %39 {offsets = [1, 3, 0], sizes = [16, 16, 4], strides = [1, 1, 1]} : vector<20x24x4xbf16> to vector<16x16x4xbf16>
    %91 = vector.extract_strided_slice %39 {offsets = [1, 4, 0], sizes = [16, 16, 4], strides = [1, 1, 1]} : vector<20x24x4xbf16> to vector<16x16x4xbf16>
    %92 = tpu.concatenate %87, %88, %89, %90, %91 in 2 : vector<16x16x4xbf16>, vector<16x16x4xbf16>, vector<16x16x4xbf16>, vector<16x16x4xbf16>, vector<16x16x4xbf16> -> vector<16x16x20xbf16>
    %93 = vector.shape_cast %92 : vector<16x16x20xbf16> to vector<256x20xbf16>
    %c1_33 = arith.constant 1 : index
    %c0_34 = arith.constant 0 : index
    %c0_35 = arith.constant 0 : index
    %94 = vector.load %arg7[%c1_33, %c0_34, %c0_35] : memref<5x20x8xbf16, #tpu.memory_space<vmem>>, vector<1x20x8xbf16>
    %95 = vector.shape_cast %94 : vector<1x20x8xbf16> to vector<20x8xbf16>
    %cst_36 = arith.constant dense<0.000000e+00> : vector<256x8xf32>
    %96 = tpu.matmul %93, %95, %cst_36 {dimension_numbers = #tpu.dot_dimension_numbers<[1], [0], [0], [1], [0, 0, 1, 1], [], []>} : vector<256x20xbf16>, vector<20x8xbf16>, vector<256x8xf32> -> vector<256x8xf32>
    %97 = arith.addf %86, %96 : vector<256x8xf32>
    %98 = vector.extract_strided_slice %39 {offsets = [2, 0, 0], sizes = [16, 16, 4], strides = [1, 1, 1]} : vector<20x24x4xbf16> to vector<16x16x4xbf16>
    %99 = vector.extract_strided_slice %39 {offsets = [2, 1, 0], sizes = [16, 16, 4], strides = [1, 1, 1]} : vector<20x24x4xbf16> to vector<16x16x4xbf16>
    %100 = vector.extract_strided_slice %39 {offsets = [2, 2, 0], sizes = [16, 16, 4], strides = [1, 1, 1]} : vector<20x24x4xbf16> to vector<16x16x4xbf16>
    %101 = vector.extract_strided_slice %39 {offsets = [2, 3, 0], sizes = [16, 16, 4], strides = [1, 1, 1]} : vector<20x24x4xbf16> to vector<16x16x4xbf16>
    %102 = vector.extract_strided_slice %39 {offsets = [2, 4, 0], sizes = [16, 16, 4], strides = [1, 1, 1]} : vector<20x24x4xbf16> to vector<16x16x4xbf16>
    %103 = tpu.concatenate %98, %99, %100, %101, %102 in 2 : vector<16x16x4xbf16>, vector<16x16x4xbf16>, vector<16x16x4xbf16>, vector<16x16x4xbf16>, vector<16x16x4xbf16> -> vector<16x16x20xbf16>
    %104 = vector.shape_cast %103 : vector<16x16x20xbf16> to vector<256x20xbf16>
    %c2_37 = arith.constant 2 : index
    %c0_38 = arith.constant 0 : index
    %c0_39 = arith.constant 0 : index
    %105 = vector.load %arg7[%c2_37, %c0_38, %c0_39] : memref<5x20x8xbf16, #tpu.memory_space<vmem>>, vector<1x20x8xbf16>
    %106 = vector.shape_cast %105 : vector<1x20x8xbf16> to vector<20x8xbf16>
    %cst_40 = arith.constant dense<0.000000e+00> : vector<256x8xf32>
    %107 = tpu.matmul %104, %106, %cst_40 {dimension_numbers = #tpu.dot_dimension_numbers<[1], [0], [0], [1], [0, 0, 1, 1], [], []>} : vector<256x20xbf16>, vector<20x8xbf16>, vector<256x8xf32> -> vector<256x8xf32>
    %108 = arith.addf %97, %107 : vector<256x8xf32>
    %109 = vector.extract_strided_slice %39 {offsets = [3, 0, 0], sizes = [16, 16, 4], strides = [1, 1, 1]} : vector<20x24x4xbf16> to vector<16x16x4xbf16>
    %110 = vector.extract_strided_slice %39 {offsets = [3, 1, 0], sizes = [16, 16, 4], strides = [1, 1, 1]} : vector<20x24x4xbf16> to vector<16x16x4xbf16>
    %111 = vector.extract_strided_slice %39 {offsets = [3, 2, 0], sizes = [16, 16, 4], strides = [1, 1, 1]} : vector<20x24x4xbf16> to vector<16x16x4xbf16>
    %112 = vector.extract_strided_slice %39 {offsets = [3, 3, 0], sizes = [16, 16, 4], strides = [1, 1, 1]} : vector<20x24x4xbf16> to vector<16x16x4xbf16>
    %113 = vector.extract_strided_slice %39 {offsets = [3, 4, 0], sizes = [16, 16, 4], strides = [1, 1, 1]} : vector<20x24x4xbf16> to vector<16x16x4xbf16>
    %114 = tpu.concatenate %109, %110, %111, %112, %113 in 2 : vector<16x16x4xbf16>, vector<16x16x4xbf16>, vector<16x16x4xbf16>, vector<16x16x4xbf16>, vector<16x16x4xbf16> -> vector<16x16x20xbf16>
    %115 = vector.shape_cast %114 : vector<16x16x20xbf16> to vector<256x20xbf16>
    %c3 = arith.constant 3 : index
    %c0_41 = arith.constant 0 : index
    %c0_42 = arith.constant 0 : index
    %116 = vector.load %arg7[%c3, %c0_41, %c0_42] : memref<5x20x8xbf16, #tpu.memory_space<vmem>>, vector<1x20x8xbf16>
    %117 = vector.shape_cast %116 : vector<1x20x8xbf16> to vector<20x8xbf16>
    %cst_43 = arith.constant dense<0.000000e+00> : vector<256x8xf32>
    %118 = tpu.matmul %115, %117, %cst_43 {dimension_numbers = #tpu.dot_dimension_numbers<[1], [0], [0], [1], [0, 0, 1, 1], [], []>} : vector<256x20xbf16>, vector<20x8xbf16>, vector<256x8xf32> -> vector<256x8xf32>
    %119 = arith.addf %108, %118 : vector<256x8xf32>
    %120 = vector.extract_strided_slice %39 {offsets = [4, 0, 0], sizes = [16, 16, 4], strides = [1, 1, 1]} : vector<20x24x4xbf16> to vector<16x16x4xbf16>
    %121 = vector.extract_strided_slice %39 {offsets = [4, 1, 0], sizes = [16, 16, 4], strides = [1, 1, 1]} : vector<20x24x4xbf16> to vector<16x16x4xbf16>
    %122 = vector.extract_strided_slice %39 {offsets = [4, 2, 0], sizes = [16, 16, 4], strides = [1, 1, 1]} : vector<20x24x4xbf16> to vector<16x16x4xbf16>
    %123 = vector.extract_strided_slice %39 {offsets = [4, 3, 0], sizes = [16, 16, 4], strides = [1, 1, 1]} : vector<20x24x4xbf16> to vector<16x16x4xbf16>
    %124 = vector.extract_strided_slice %39 {offsets = [4, 4, 0], sizes = [16, 16, 4], strides = [1, 1, 1]} : vector<20x24x4xbf16> to vector<16x16x4xbf16>
    %125 = tpu.concatenate %120, %121, %122, %123, %124 in 2 : vector<16x16x4xbf16>, vector<16x16x4xbf16>, vector<16x16x4xbf16>, vector<16x16x4xbf16>, vector<16x16x4xbf16> -> vector<16x16x20xbf16>
    %126 = vector.shape_cast %125 : vector<16x16x20xbf16> to vector<256x20xbf16>
    %c4 = arith.constant 4 : index
    %c0_44 = arith.constant 0 : index
    %c0_45 = arith.constant 0 : index
    %127 = vector.load %arg7[%c4, %c0_44, %c0_45] : memref<5x20x8xbf16, #tpu.memory_space<vmem>>, vector<1x20x8xbf16>
    %128 = vector.shape_cast %127 : vector<1x20x8xbf16> to vector<20x8xbf16>
    %cst_46 = arith.constant dense<0.000000e+00> : vector<256x8xf32>
    %129 = tpu.matmul %126, %128, %cst_46 {dimension_numbers = #tpu.dot_dimension_numbers<[1], [0], [0], [1], [0, 0, 1, 1], [], []>} : vector<256x20xbf16>, vector<20x8xbf16>, vector<256x8xf32> -> vector<256x8xf32>
    %130 = arith.addf %119, %129 : vector<256x8xf32>
    %c0_47 = arith.constant 0 : index
    %c0_48 = arith.constant 0 : index
    %131 = vector.load %arg8[%c0_47, %c0_48] : memref<1x8xf32, #tpu.memory_space<vmem>>, vector<1x8xf32>
    %132 = vector.broadcast %131 : vector<1x8xf32> to vector<256x8xf32>
    %133 = arith.addf %130, %132 : vector<256x8xf32>
    %134 = vector.shape_cast %133 : vector<256x8xf32> to vector<16x16x8xf32>
    %c0_49 = arith.constant 0 : index
    %c0_50 = arith.constant 0 : index
    %c0_51 = arith.constant 0 : index
    %c16 = arith.constant 16 : index
    %135 = vector.load %arg11[%c0_49, %c0_50, %c0_51, %c16] : memref<1x16x16x32xf32, #tpu.memory_space<vmem>>, vector<1x16x16x8xf32>
    %136 = vector.shape_cast %135 : vector<1x16x16x8xf32> to vector<16x16x8xf32>
    %137 = vector.shape_cast %134 : vector<16x16x8xf32> to vector<1x16x16x8xf32>
    tpu.vector_store %arg11[%c0_49, %c0_50, %c0_51, %c16], %137 {strides = array<i32>} : memref<1x16x16x32xf32, #tpu.memory_space<vmem>>, vector<1x16x16x8xf32>,
    %cst_52 = arith.constant 0xFF80 : bf16
    %138 = vector.shape_cast %19 : vector<20x24x1xi1> to vector<20x24x1xi1>
    %139 = vector.broadcast %138 : vector<20x24x1xi1> to vector<20x24x4xi1>
    %140 = vector.broadcast %cst_52 : bf16 to vector<20x24x4xbf16>
    %141 = arith.select %139, %4, %140 : vector<20x24x4xi1>, vector<20x24x4xbf16>
    %142 = vector.extract_strided_slice %141 {offsets = [1, 1, 0], sizes = [16, 16, 4], strides = [1, 1, 1]} : vector<20x24x4xbf16> to vector<16x16x4xbf16>
    %143 = vector.extract_strided_slice %141 {offsets = [1, 2, 0], sizes = [16, 16, 4], strides = [1, 1, 1]} : vector<20x24x4xbf16> to vector<16x16x4xbf16>
    %144 = arith.maximumf %142, %143 : vector<16x16x4xbf16>
    %145 = vector.extract_strided_slice %141 {offsets = [1, 3, 0], sizes = [16, 16, 4], strides = [1, 1, 1]} : vector<20x24x4xbf16> to vector<16x16x4xbf16>
    %146 = arith.maximumf %144, %145 : vector<16x16x4xbf16>
    %147 = vector.extract_strided_slice %141 {offsets = [2, 1, 0], sizes = [16, 16, 4], strides = [1, 1, 1]} : vector<20x24x4xbf16> to vector<16x16x4xbf16>
    %148 = arith.maximumf %146, %147 : vector<16x16x4xbf16>
    %149 = vector.extract_strided_slice %141 {offsets = [2, 2, 0], sizes = [16, 16, 4], strides = [1, 1, 1]} : vector<20x24x4xbf16> to vector<16x16x4xbf16>
    %150 = arith.maximumf %148, %149 : vector<16x16x4xbf16>
    %151 = vector.extract_strided_slice %141 {offsets = [2, 3, 0], sizes = [16, 16, 4], strides = [1, 1, 1]} : vector<20x24x4xbf16> to vector<16x16x4xbf16>
    %152 = arith.maximumf %150, %151 : vector<16x16x4xbf16>
    %153 = vector.extract_strided_slice %141 {offsets = [3, 1, 0], sizes = [16, 16, 4], strides = [1, 1, 1]} : vector<20x24x4xbf16> to vector<16x16x4xbf16>
    %154 = arith.maximumf %152, %153 : vector<16x16x4xbf16>
    %155 = vector.extract_strided_slice %141 {offsets = [3, 2, 0], sizes = [16, 16, 4], strides = [1, 1, 1]} : vector<20x24x4xbf16> to vector<16x16x4xbf16>
    %156 = arith.maximumf %154, %155 : vector<16x16x4xbf16>
    %157 = vector.extract_strided_slice %141 {offsets = [3, 3, 0], sizes = [16, 16, 4], strides = [1, 1, 1]} : vector<20x24x4xbf16> to vector<16x16x4xbf16>
    %158 = arith.maximumf %156, %157 : vector<16x16x4xbf16>
    %159 = vector.shape_cast %158 : vector<16x16x4xbf16> to vector<256x4xbf16>
    %c0_53 = arith.constant 0 : index
    %c0_54 = arith.constant 0 : index
    %160 = vector.load %arg9[%c0_53, %c0_54] : memref<4x8xbf16, #tpu.memory_space<vmem>>, vector<4x8xbf16>
    %cst_55 = arith.constant dense<0.000000e+00> : vector<256x8xf32>
    %161 = tpu.matmul %159, %160, %cst_55 {dimension_numbers = #tpu.dot_dimension_numbers<[1], [0], [0], [1], [0, 0, 1, 1], [], []>} : vector<256x4xbf16>, vector<4x8xbf16>, vector<256x8xf32> -> vector<256x8xf32>
    %c0_56 = arith.constant 0 : index
    %c0_57 = arith.constant 0 : index
    %162 = vector.load %arg10[%c0_56, %c0_57] : memref<1x8xf32, #tpu.memory_space<vmem>>, vector<1x8xf32>
    %163 = vector.broadcast %162 : vector<1x8xf32> to vector<256x8xf32>
    %164 = arith.addf %161, %163 : vector<256x8xf32>
    %165 = vector.shape_cast %164 : vector<256x8xf32> to vector<16x16x8xf32>
    %c0_58 = arith.constant 0 : index
    %c0_59 = arith.constant 0 : index
    %c0_60 = arith.constant 0 : index
    %c24 = arith.constant 24 : index
    %166 = vector.load %arg11[%c0_58, %c0_59, %c0_60, %c24] : memref<1x16x16x32xf32, #tpu.memory_space<vmem>>, vector<1x16x16x8xf32>
    %167 = vector.shape_cast %166 : vector<1x16x16x8xf32> to vector<16x16x8xf32>
    %168 = vector.shape_cast %165 : vector<16x16x8xf32> to vector<1x16x16x8xf32>
    tpu.vector_store %arg11[%c0_58, %c0_59, %c0_60, %c24], %168 {strides = array<i32>} : memref<1x16x16x32xf32, #tpu.memory_space<vmem>>, vector<1x16x16x8xf32>,
    return
  }
  func.func @transform_0(%arg0: i32, %arg1: i32) -> (i32, i32, i32, i32) {
    %c0_i32 = arith.constant 0 : i32
    %c0_i32_0 = arith.constant 0 : i32
    %c0_i32_1 = arith.constant 0 : i32
    %c0_i32_2 = arith.constant 0 : i32
    return %arg0, %c0_i32, %c0_i32_0, %c0_i32_1 : i32, i32, i32, i32
  }
  func.func @transform_1(%arg0: i32, %arg1: i32) -> (i32, i32) {
    %c0_i32 = arith.constant 0 : i32
    %c0_i32_0 = arith.constant 0 : i32
    %c0_i32_1 = arith.constant 0 : i32
    return %c0_i32, %c0_i32_0 : i32, i32
  }
  func.func @transform_2(%arg0: i32, %arg1: i32) -> (i32, i32) {
    %c0_i32 = arith.constant 0 : i32
    %c0_i32_0 = arith.constant 0 : i32
    %c0_i32_1 = arith.constant 0 : i32
    return %c0_i32, %c0_i32_0 : i32, i32
  }
  func.func @transform_3(%arg0: i32, %arg1: i32) -> (i32, i32, i32) {
    %c0_i32 = arith.constant 0 : i32
    %c0_i32_0 = arith.constant 0 : i32
    %c0_i32_1 = arith.constant 0 : i32
    %c0_i32_2 = arith.constant 0 : i32
    return %c0_i32, %c0_i32_0, %c0_i32_1 : i32, i32, i32
  }
  func.func @transform_4(%arg0: i32, %arg1: i32) -> (i32, i32) {
    %c0_i32 = arith.constant 0 : i32
    %c0_i32_0 = arith.constant 0 : i32
    %c0_i32_1 = arith.constant 0 : i32
    return %c0_i32, %c0_i32_0 : i32, i32
  }
  func.func @transform_5(%arg0: i32, %arg1: i32) -> (i32, i32, i32) {
    %c0_i32 = arith.constant 0 : i32
    %c0_i32_0 = arith.constant 0 : i32
    %c0_i32_1 = arith.constant 0 : i32
    %c0_i32_2 = arith.constant 0 : i32
    return %c0_i32, %c0_i32_0, %c0_i32_1 : i32, i32, i32
  }
  func.func @transform_6(%arg0: i32, %arg1: i32) -> (i32, i32) {
    %c0_i32 = arith.constant 0 : i32
    %c0_i32_0 = arith.constant 0 : i32
    %c0_i32_1 = arith.constant 0 : i32
    return %c0_i32, %c0_i32_0 : i32, i32
  }
  func.func @transform_7(%arg0: i32, %arg1: i32) -> (i32, i32) {
    %c0_i32 = arith.constant 0 : i32
    %c0_i32_0 = arith.constant 0 : i32
    %c0_i32_1 = arith.constant 0 : i32
    return %c0_i32, %c0_i32_0 : i32, i32
  }
  func.func @transform_8(%arg0: i32, %arg1: i32) -> (i32, i32) {
    %c0_i32 = arith.constant 0 : i32
    %c0_i32_0 = arith.constant 0 : i32
    %c0_i32_1 = arith.constant 0 : i32
    return %c0_i32, %c0_i32_0 : i32, i32
  }
  func.func @transform_9(%arg0: i32, %arg1: i32) -> (i32, i32, i32, i32) {
    %c0_i32 = arith.constant 0 : i32
    %c0_i32_0 = arith.constant 0 : i32
    %c0_i32_1 = arith.constant 0 : i32
    return %arg0, %arg1, %c0_i32, %c0_i32_0 : i32, i32, i32, i32
  }
}

</mosaic_0001>

<bundles_post_ra>
// kernel: tpu_custom_call.1
= control target key start
LH: loop header
LB: loop body
LE: loop exit
PB: predicated region body
PF: predicated region fallthrough
CT: control target
= control target key end

     0   :  { %14 = vsyncpa [#allocation3], 0  ;;  %s11698_s0 = inlined_call_operand.vmem [shape: bf16[2,20,24,4], index: 0, kind: input, shape index: {}]   ;;  %s11699_s1 = inlined_call_operand.vmem [shape: bf16[4,16], index: 1, kind: input, shape index: {}]   ;;  %s11700_s2 = inlined_call_operand.vmem [shape: f32[1,16], index: 2, kind: input, shape index: {}]   ;;  %s11701_s3 = inlined_call_operand.vmem [shape: bf16[3,12,8], index: 3, kind: input, shape index: {}]   ;;  %s11702_s4 = inlined_call_operand.vmem [shape: f32[1,8], index: 4, kind: input, shape index: {}]   ;;  %s11703_s5 = inlined_call_operand.vmem [shape: bf16[5,20,8], index: 5, kind: input, shape index: {}]   ;;  %s11704_s6 = inlined_call_operand.vmem [shape: f32[1,8], index: 6, kind: input, shape index: {}]   ;;  %s11705_s7 = inlined_call_operand.vmem [shape: bf16[4,8], index: 7, kind: input, shape index: {}]   ;;  %s11706_s8 = inlined_call_operand.vmem [shape: f32[1,8], index: 8, kind: input, shape index: {}]   ;;  %s11707_s9 = inlined_call_operand.hbm [shape: f32[2,16,16,32], index: 9, kind: output, shape index: {}]  }
   0x1   :  { %16 = vsyncpa [#allocation3 + $0x1], 0  ;;  %s7516_s30 = smov 0   ;;  %s7518_s10 = smov 0  }
   0x2   :  { %s7520_s11 = smov 0   ;;  %s7522_s12 = smov 0  }
   0x3   :  { %s7524_s13 = smov 0   ;;  %s7526_s14 = smov 0  }
   0x4 LB: > { %s6871_s15 = sadd.s32 4294967295, %s7453_s14   ;;  %s6872_s16 = sadd.s32 4294967294, %s7453_s14   ;;  %s7453_s14 = sphi %s7526_s14, %s22_s14   ;;  %s7449_s13 = sphi %s7524_s13, %s12117_s13   ;;  %s7445_s12 = sphi %s7522_s12, %s12116_s12   ;;  %s7441_s11 = sphi %s7520_s11, %s12115_s11   ;;  %s7437_s10 = sphi %s7518_s10, %s12114_s10   ;;  %s7433_s30 = sphi %s7516_s30, %s12113_s30  }
   0x5   : > { %s34_s17 = sadd.s32 1, %s7449_s13  ;;  %s237_s18 = sadd.s32 1, %s7441_s11 }
   0x6   : > { %p36_p0 = scmp.ge.s32.totalorder %s34_s17, 2  ;;  %p247_p1 = scmp.ne.s32.totalorder %s7441_s11, %s7437_s10 }
   0x7   : > { %p248_p2 = scmp.eq.s32.totalorder %s6871_s15, 1  ;;  %p253_p3 = scmp.ne.s32.totalorder %s7437_s10, %s7433_s30 }
   0x8   : > { %s12119_s17 = smov (%p36_p0, %s34_s17), 0  ;;  %p254_p5 = scmp.eq.s32.totalorder %s6872_s16, 1 }
   0x9   : > { %p7556_p4 = por %p248_p2, %p247_p1  ;;  %s232_s20 = ssub.s32 %s7449_s13, %s12119_s17 }
   0xa   : > { %p6875_p6 = scmp.ge.s32.totalorder %s7453_s14, 1  ;;  %p235_p7 = scmp.eq.s32.totalorder %s232_s20, 0 }
   0xb   : > { %p7563_p8 = por %p254_p5, %p253_p3  ;;  %p304_p9 = scmp.lt.s32.totalorder %s7453_s14, 3 }
   0xc   : > { %s7569_s22 = scalar_select %p235_p7, %s7441_s11, %s237_s18  }
   0xd   : > { %p305_p10 = pnand %p6875_p6, %p304_p9 }
   0xf   : > { %308 = sbr.rel (%p305_p10) target bundleno = 1611 (0x64b), region = 56 }
  0x14   : > { %v622_v0 = vld [vmem:[%s11699_s1] sm:$0x3]  ;;  %vm864_vm0 = vcmask 1041408   ;;  %p340_p11 = scmp.lt.s32.totalorder %s7445_s12, 1  ;;  %vm773_vm1 = vcmask 31744   ;;  %vm1863_vm2 = vcmask 1046528   ;;  %v432_v51 = vlaneseq }
  0x15   : > { %v866_v1 = vsel %vm864_vm0, %v622_v0, 0  ;;  %v7601_v10 = vld [vmem:[%s11700_s2] ss:$0 sm:$0xff]  ;;  %vm2344_vm3 = vcmask 1045504   ;;  %vm1574_vm4 = vsmask.f32 7424 }
  0x16   : > { %875 = vmatpush.bf16.msra.mxu0 %v866_v1  ;;  %s341_s25 = scalar_select %p340_p11, %s7445_s12, 1  ;;  %7296 = vmatpush.bf16.msra.mxu3 %v866_v1  ;;  %v7605_v13 = vmul.f32 0.0, %v7601_v10  ;;  %vm3041_vm5 = vsmask.f32 6400  ;;  %v7635_v57 = vshrl.u32 %v432_v51, 7  ;;  %v7456_v1 = vmov 0.0  }
  0x17   : > { %s7455_s18 = smov 120   ;;  %s337_s20 = sand.u32 1, %s7437_s10   ;;  %vm1271_vm7 = vcmask 64514   ;;  %vm1273_vm9 = vcmask 64512   ;;  %vm1275_vm10 = vcmask 58368   ;;  %vm2295_vm11 = vcmask 97280  }
  0x18   : > { %s7299_s26 = smul.u32 240, %s341_s25  ;;  %11792 = vst [vmem:[#allocation5_spill] sm:$0xff] %v7605_v13  ;;  %vm496_vm6 = vcmp.ge.s32.totalorder %v7635_v57, 2  ;;  %s6876_s23 = sshll.u32 %s337_s20, 8  ;;  %vm3349_vm12 = vcmask 130048   ;;  %vm3425_vm13 = vcmask 162816  }
  0x19   : > { %11794 = vst [vmem:[#allocation7_spill] sm:$0xff] %v7635_v57  ;;  %s7664_s24 = scalar_lea.vmem [#allocation2], %s6876_s23  ;;  %s7457_s25 = smov 124   ;;  %vm7461_vm14 = vmmov 0  }
  0x1a   : > { %s7580_s29 = scalar_lea.vmem %s11698_s0, %s7299_s26  ;;  %s7458_s16 = smov 116   ;;  %vm9440_vm15 = vmpackc.low %vm7461_vm14, %vm7461_vm14 }
  0x1b   : > { %v7257_v2 = vld [vmem:[%s7580_s29] sm:$0xff]  ;;  %v7258_v3 = vld [vmem:[%s7580_s29 + $0x8] sm:$0xff]  ;;  %v7259_v4 = vld [vmem:[%s7580_s29 + $0x10] sm:$0xff]  ;;  %s7459_s23 = smov 4   ;;  %s7463_s26 = smov 24  }
  0x1c   : > { %6998 = vmatmul.msk.bf16.vlgmr.msra.gmra.mxu0 %vm773_vm1, %v7257_v2  ;;  %v7260_v5 = vld [vmem:[%s7580_s29 + $0x18] sm:$0xff]  ;;  %v7261_v6 = vld [vmem:[%s7580_s29 + $0x20] sm:$0xff]  ;;  %v7262_v7 = vld [vmem:[%s7580_s29 + $0x28] sm:$0xff]  ;;  %v7028_v2 = vsel %vm496_vm6, 1.0, %v7456_v1  ;;  %s7464_s28 = smov 16   ;;  %s7395_s15 = scalar_lea.hbm %s11707_s9, 512 }
  0x1d   : > { %v7263_v8 = vld [vmem:[%s7580_s29 + $0x30] sm:$0xff]  ;;  %v7264_v9 = vld [vmem:[%s7580_s29 + $0x38] sm:$0xff]  ;;  %v7265_v11 = vld [vmem:[%s7580_s29 + $0x40] sm:$0xff] }
  0x1e   : > { %v7266_v22 = vld [vmem:[%s7580_s29 + $0x48] sm:$0xff]  ;;  %v7267_v50 = vld [vmem:[%s7580_s29 + $0x50] sm:$0xff] }
  0x2c   : > { %6999 = vmatmul.msk.bf16.gmra.mxu0 %vm773_vm1, %v7258_v3 }
  0x3c   : > { %7000 = vmatmul.msk.bf16.gmra.mxu0 %vm773_vm1, %v7259_v4 }
  0x4c   : > { %7001 = vmatmul.msk.bf16.gmra.mxu0 %vm773_vm1, %v7260_v5 }
  0x5c   : > { %7002 = vmatmul.msk.bf16.gmra.mxu0 %vm773_vm1, %v7261_v6 }
  0x6c   : > { %7003 = vmatmul.msk.bf16.gmra.mxu0 %vm773_vm1, %v7262_v7  ;;  %v7651_v7 = vmul.f32 %v7601_v10, %v7028_v2 }
  0x7c   : > { %7004 = vmatmul.msk.bf16.gmra.mxu0 %vm773_vm1, %v7263_v8 }
  0x8c   : > { %7005 = vmatmul.msk.bf16.gmra.mxu0 %vm773_vm1, %v7264_v9 }
  0x99   : > { %v877_v12 = vpop.f32.mrf.mxu0 }
  0x9a   : > { %v1211_v14 = vadd.f32 %v7605_v13, %v877_v12 }
  0x9c   : > { %7006 = vmatmul.msk.bf16.gmra.mxu0 %vm773_vm1, %v7265_v11  ;;  %v1376_v16 = vpack.c.bf16 %v1211_v14, %v1211_v14  ;;  %v7268_v11 = vld [vmem:[%s7580_s29 + $0x58] sm:$0xff] }
  0x9e   : > { %v2924_v19 = vunpack.c.l.b16 %v1376_v16 }
  0xa1   : > { %v879_v15 = vpop.f32.mrf.mxu0 }
  0xa2   : > { %v1212_v17 = vadd.f32 %v7605_v13, %v879_v15 }
  0xa4   : > { %v1377_v18 = vpack.c.bf16 %v1212_v17, %v1212_v17 }
  0xa6   : > { %v2925_v20 = vunpack.c.l.b16 %v1377_v18  ;;  %v7662_v18 = vadd.s32 16, %v7635_v57 }
  0xa8   : > { %v7610_v21 = vpack.c.b16 %v2925_v20, %v2924_v19  ;;  %11795 = vst [vmem:[#allocation8_spill] sm:$0xff] %v7662_v18  ;;  %vm561_vm8 = vcmp.lt.s32.totalorder %v7662_v18, 18 }
  0xa9   : > { %v882_v23 = vpop.f32.mrf.mxu0 }
  0xaa   : > { %v1213_v24 = vadd.f32 %v7605_v13, %v882_v23  ;;  %v2963_v25 = vshrl.u32 %v7610_v21, 16  ;;  %v2965_v26 = vshll.u32 %v7610_v21, 16  ;;  %v3006_v36 = vrot.slane %v7610_v21, 1 }
  0xab   : > { %v3157_v39 = vrot.slane %v7610_v21, 2 }
  0xac   : > { %v1378_v27 = vpack.c.bf16 %v1213_v24, %v1213_v24  ;;  %7007 = vmatmul.msk.bf16.gmra.mxu0 %vm773_vm1, %v7266_v22  ;;  %v3042_v28 = vrot.slane %v2963_v25, 1  ;;  %v3043_v29 = vrot.slane %v2965_v26, 2  ;;  %v2967_v34 = vrot.slane %v2965_v26, 1 }
  0xae   : > { %v2960_v30 = vunpack.c.l.b16 %v1378_v27  ;;  %v3044_v31 = vor.u32 %v3043_v29, %v3042_v28  ;;  %v2968_v43 = vor.u32 %v2967_v34, %v2963_v25 }
  0xb0   : > { %v2961_v32 = vpack.c.b16 %v2960_v30, %v2960_v30  ;;  %v7029_v30 = vsel %vm561_vm8, 1.0, %v7456_v1 }
  0xb1   : > { %v884_v33 = vpop.f32.mrf.mxu0  ;;  %v7685_v34 = vmul.f32 %v7601_v10, %v7029_v30 }
  0xb2   : > { %v3045_v35 = vshrl.u32 %v2961_v32, 16  ;;  %v3007_v37 = vrot.slane %v2961_v32, 1  ;;  %v2970_v38 = vshll.u32 %v2961_v32, 16  ;;  %v3158_v40 = vrot.slane %v2961_v32, 2 }
  0xb3   : > { %v1214_v47 = vadd.f32 %v7605_v13, %v884_v33 }
  0xb4   : > { %v3047_v41 = vrot.slane %v3045_v35, 1  ;;  %v7620_v42 = vsel %vm1863_vm2, %v3006_v36, %v3007_v37  ;;  %v2972_v44 = vrot.slane %v2970_v38, 1  ;;  %v3048_v45 = vrot.slane %v2970_v38, 2  ;;  %v7269_v36 = vld [vmem:[%s7580_s29 + $0x60] sm:$0xff] }
  0xb5   : > { %v7623_v46 = vsel %vm2344_vm3, %v3157_v39, %v3158_v40  ;;  %v1322_v54 = vpack.c.bf16 %v1214_v47, %v1214_v47 }
  0xb6   : > { %v7627_v48 = vsel %vm1574_vm4, %v2968_v43, %v2972_v44  ;;  %v3049_v49 = vor.u32 %v3048_v45, %v3047_v41 }
  0xb7   : > { %v1430_v58 = vunpack.c.l.b16 %v1322_v54 }
  0xb8   : > { %v7631_v53 = vsel %vm3041_vm5, %v3044_v31, %v3049_v49 }
  0xb9   : > { %v887_v52 = vpop.f32.mrf.mxu0  ;;  %11793 = vst [vmem:[#allocation6_spill] sm:$0xff] %v7631_v53 }
  0xba   : > { %v1215_v55 = vadd.f32 %v7605_v13, %v887_v52 }
  0xbc   : > { %v1323_v56 = vpack.c.bf16 %v1215_v55, %v1215_v55  ;;  %7008 = vmatmul.msk.bf16.gmra.mxu0 %vm773_vm1, %v7267_v50 }
  0xbe   : > { %v1431_v59 = vunpack.c.l.b16 %v1323_v56 }
  0xc0   : > { %v7637_v60 = vpack.c.b16 %v1431_v59, %v1430_v58 }
  0xc1   : > { %v889_v61 = vpop.f32.mrf.mxu0 }
  0xc2   : > { %v1216_v62 = vadd.f32 %v7605_v13, %v889_v61  ;;  %1510 = vrot.lane.b32.xlu0 %v7637_v60, %s7455_s18  ;;  %v1576_v63 = vshrl.u32 %v7637_v60, 16  ;;  %v1578_v0 = vshll.u32 %v7637_v60, 16 }
  0xc4   : > { %v1324_v3 = vpack.c.bf16 %v1216_v62, %v1216_v62  ;;  %v3051_v4 = vrot.slane %v1576_v63, 1  ;;  %v3052_v5 = vrot.slane %v1578_v0, 2  ;;  %v1580_v12 = vrot.slane %v1578_v0, 1  ;;  %v7270_v0 = vld [vmem:[%s7580_s29 + $0x68] sm:$0xff] }
  0xc6   : > { %v1432_v6 = vunpack.c.l.b16 %v1324_v3  ;;  %v3053_v8 = vor.u32 %v3052_v5, %v3051_v4  ;;  %v1581_v19 = vor.u32 %v1580_v12, %v1576_v63 }
  0xc8   : > { %v7653_v9 = vpack.c.b16 %v1432_v6, %v1432_v6 }
  0xc9   : > { %v892_v14 = vpop.f32.mrf.mxu0 }
  0xca   : > { %v1217_v15 = vadd.f32 %v7651_v7, %v892_v14  ;;  %1512 = vrot.lane.b32.xlu1 %v7653_v9, %s7455_s18  ;;  %v1583_v16 = vshll.u32 %v7653_v9, 16  ;;  %v1587_v17 = vshrl.u32 %v7653_v9, 16 }
  0xcc   : > { %1272 = vst.msk [vmem:[%s7664_s24 - $0x2] sm:$0xfc] %vm1271_vm7, %v1217_v15  ;;  %7009 = vmatmul.msk.bf16.gmra.mxu0 %vm773_vm1, %v7268_v11  ;;  %v1585_v20 = vrot.slane %v1583_v16, 1  ;;  %v3054_v22 = vrot.slane %v1587_v17, 1  ;;  %v3055_v23 = vrot.slane %v1583_v16, 2  ;;  %v1325_v28 = vpack.c.bf16 %v1217_v15, %v1217_v15 }
  0xce   : > { %v7670_v24 = vsel %vm1574_vm4, %v1581_v19, %v1585_v20  ;;  %v3056_v25 = vor.u32 %v3055_v23, %v3054_v22  ;;  %v1433_v32 = vunpack.c.l.b16 %v1325_v28 }
  0xcf   : > { %1799 = vrot.lane.b32.xlu0 %v7670_v24, %s7457_s25 }
  0xd0   : > { %v7676_v26 = vsel %vm3041_vm5, %v3053_v8, %v3056_v25 }
  0xd1   : > { %11796 = vst [vmem:[#allocation9_spill] sm:$0xff] %v7676_v26  ;;  %v894_v27 = vpop.f32.mrf.mxu0 }
  0xd2   : > { %v1218_v29 = vadd.f32 %v7601_v10, %v894_v27  ;;  %1801 = vrot.lane.b32.xlu1 %v1587_v17, %s7457_s25  ;;  %v7271_v27 = vld [vmem:[%s7580_s29 + $0x70] sm:$0xff] }
  0xd4   : > { %1274 = vst.msk [vmem:[%s7664_s24 + $0x6] sm:$0xff] %vm1273_vm9, %v1218_v29  ;;  %v1326_v31 = vpack.c.bf16 %v1218_v29, %v1218_v29 }
  0xd6   : > { %v1434_v33 = vunpack.c.l.b16 %v1326_v31 }
  0xd8   : > { %v7687_v35 = vpack.c.b16 %v1434_v33, %v1433_v32 }
  0xd9   : > { %v897_v37 = vpop.f32.mrf.mxu0 }
  0xda   : > { %v1219_v38 = vadd.f32 %v7685_v34, %v897_v37  ;;  %1514 = vrot.lane.b32.xlu2 %v7687_v35, %s7455_s18  ;;  %v1590_v39 = vshrl.u32 %v7687_v35, 16  ;;  %v1592_v40 = vshll.u32 %v7687_v35, 16 }
  0xdc   : > { %1276 = vst.msk [vmem:[%s7664_s24 + $0xe] sm:$0x3] %vm1275_vm10, %v1219_v38  ;;  %v1327_v41 = vpack.c.bf16 %v1219_v38, %v1219_v38  ;;  %7010 = vmatmul.msk.bf16.gmra.mxu0 %vm773_vm1, %v7269_v36  ;;  %v3058_v43 = vrot.slane %v1590_v39, 1  ;;  %v3059_v44 = vrot.slane %v1592_v40, 2  ;;  %v1594_v50 = vrot.slane %v1592_v40, 1 }
  0xde   : > { %v1435_v45 = vunpack.c.l.b16 %v1327_v41  ;;  %v3060_v47 = vor.u32 %v3059_v44, %v3058_v43  ;;  %v1595_v59 = vor.u32 %v1594_v50, %v1590_v39 }
  0xe0   : > { %v7698_v49 = vpack.c.b16 %v1435_v45, %v1435_v45 }
  0xe1   : > { %v899_v51 = vpop.f32.mrf.mxu0 }
  0xe2   : > { %v1220_v52 = vadd.f32 %v7651_v7, %v899_v51  ;;  %1516 = vrot.lane.b32.xlu0 %v7698_v49, %s7455_s18  ;;  %v1601_v54 = vshrl.u32 %v7698_v49, 16  ;;  %v1597_v55 = vshll.u32 %v7698_v49, 16 }
  0xe4   : > { %1277 = vst.msk [vmem:[%s7664_s24 + $0xe] sm:$0xfc] %vm1271_vm7, %v1220_v52  ;;  %1805 = vrot.lane.b32.xlu1 %v1601_v54, %s7457_s25  ;;  %v3061_v56 = vrot.slane %v1601_v54, 1  ;;  %v3062_v58 = vrot.slane %v1597_v55, 2  ;;  %v1599_v61 = vrot.slane %v1597_v55, 1  ;;  %v1328_v3 = vpack.c.bf16 %v1220_v52, %v1220_v52  ;;  %v7272_v54 = vld [vmem:[%s7580_s29 + $0x78] sm:$0xff] }
  0xe6   : > { %v3063_v62 = vor.u32 %v3062_v58, %v3061_v56  ;;  %v7709_v63 = vsel %vm1574_vm4, %v1595_v59, %v1599_v61  ;;  %v1436_v6 = vunpack.c.l.b16 %v1328_v3 }
  0xe7   : > { %1803 = vrot.lane.b32.xlu2 %v7709_v63, %s7457_s25 }
  0xe8   : > { %v7715_v1 = vsel %vm3041_vm5, %v3060_v47, %v3063_v62 }
  0xe9   : > { %11797 = vst [vmem:[#allocation10_spill] sm:$0xff] %v7715_v1  ;;  %v902_v2 = vpop.f32.mrf.mxu0 }
  0xea   : > { %v1221_v4 = vadd.f32 %v7601_v10, %v902_v2 }
  0xec   : > { %1278 = vst.msk [vmem:[%s7664_s24 + $0x16] sm:$0xff] %vm1273_vm9, %v1221_v4  ;;  %v1329_v5 = vpack.c.bf16 %v1221_v4, %v1221_v4  ;;  %7011 = vmatmul.msk.bf16.gmra.mxu0 %vm773_vm1, %v7270_v0 }
  0xee   : > { %v1437_v8 = vunpack.c.l.b16 %v1329_v5 }
  0xf0   : > { %v7721_v11 = vpack.c.b16 %v1437_v8, %v1436_v6 }
  0xf1   : > { %v904_v12 = vpop.f32.mrf.mxu0 }
  0xf2   : > { %v1222_v14 = vadd.f32 %v7685_v34, %v904_v12  ;;  %1518 = vrot.lane.b32.xlu2 %v7721_v11, %s7455_s18  ;;  %v1604_v15 = vshrl.u32 %v7721_v11, 16  ;;  %v1606_v16 = vshll.u32 %v7721_v11, 16 }
  0xf4   : > { %1279 = vst.msk [vmem:[%s7664_s24 + $0x1e] sm:$0x3] %vm1275_vm10, %v1222_v14  ;;  %v1330_v17 = vpack.c.bf16 %v1222_v14, %v1222_v14  ;;  %v3065_v19 = vrot.slane %v1604_v15, 1  ;;  %v3066_v20 = vrot.slane %v1606_v16, 2  ;;  %v1608_v28 = vrot.slane %v1606_v16, 1 }
  0xf6   : > { %v1438_v22 = vunpack.c.l.b16 %v1330_v17  ;;  %v3067_v23 = vor.u32 %v3066_v20, %v3065_v19  ;;  %v1609_v37 = vor.u32 %v1608_v28, %v1604_v15 }
  0xf8   : > { %v7730_v25 = vpack.c.b16 %v1438_v22, %v1438_v22 }
  0xf9   : > { %v907_v29 = vpop.f32.mrf.mxu0 }
  0xfa   : > { %v1223_v30 = vadd.f32 %v7651_v7, %v907_v29  ;;  %1520 = vrot.lane.b32.xlu1 %v7730_v25, %s7455_s18  ;;  %v1615_v31 = vshrl.u32 %v7730_v25, 16  ;;  %v1611_v32 = vshll.u32 %v7730_v25, 16 }
  0xfc   : > { %1280 = vst.msk [vmem:[%s7664_s24 + $0x1e] sm:$0xfc] %vm1271_vm7, %v1223_v30  ;;  %7012 = vmatmul.msk.bf16.gmra.mxu0 %vm773_vm1, %v7271_v27  ;;  %1809 = vrot.lane.b32.xlu2 %v1615_v31, %s7457_s25  ;;  %v3068_v33 = vrot.slane %v1615_v31, 1  ;;  %v3069_v36 = vrot.slane %v1611_v32, 2  ;;  %v1613_v38 = vrot.slane %v1611_v32, 1  ;;  %v1331_v44 = vpack.c.bf16 %v1223_v30, %v1223_v30 }
  0xfe   : > { %v3070_v39 = vor.u32 %v3069_v36, %v3068_v33  ;;  %v7743_v40 = vsel %vm1574_vm4, %v1609_v37, %v1613_v38  ;;  %v1439_v50 = vunpack.c.l.b16 %v1331_v44 }
  0xff   : > { %1807 = vrot.lane.b32.xlu0 %v7743_v40, %s7457_s25 }
 0x100   : > { %v7748_v41 = vsel %vm3041_vm5, %v3067_v23, %v3070_v39  ;;  %v7273_v23 = vld [vmem:[%s7580_s29 + $0x80] sm:$0xff] }
 0x101   : > { %11798 = vst [vmem:[#allocation11_spill] sm:$0xff] %v7748_v41  ;;  %v909_v43 = vpop.f32.mrf.mxu0 }
 0x102   : > { %v1224_v45 = vadd.f32 %v7601_v10, %v909_v43 }
 0x104   : > { %1281 = vst.msk [vmem:[%s7664_s24 + $0x26] sm:$0xff] %vm1273_vm9, %v1224_v45  ;;  %v1332_v47 = vpack.c.bf16 %v1224_v45, %v1224_v45 }
 0x106   : > { %v1440_v51 = vunpack.c.l.b16 %v1332_v47 }
 0x108   : > { %v7753_v52 = vpack.c.b16 %v1440_v51, %v1439_v50 }
 0x109   : > { %v912_v55 = vpop.f32.mrf.mxu0 }
 0x10a   : > { %v1225_v56 = vadd.f32 %v7685_v34, %v912_v55  ;;  %1522 = vrot.lane.b32.xlu0 %v7753_v52, %s7455_s18  ;;  %v1618_v58 = vshrl.u32 %v7753_v52, 16  ;;  %v1620_v59 = vshll.u32 %v7753_v52, 16  ;;  %v7287_v55 = vld [vmem:[%s11701_s3] sm:$0x30] }
 0x10c   : > { %1282 = vst.msk [vmem:[%s7664_s24 + $0x2e] sm:$0x3] %vm1275_vm10, %v1225_v56  ;;  %v1333_v61 = vpack.c.bf16 %v1225_v56, %v1225_v56  ;;  %7013 = vmatmul.msk.bf16.gmra.mxu0 %vm773_vm1, %v7272_v54  ;;  %v3072_v62 = vrot.slane %v1618_v58, 1  ;;  %v3073_v0 = vrot.slane %v1620_v59, 2  ;;  %v1622_v5 = vrot.slane %v1620_v59, 1 }
 0x10d   : > { %v7084_v54 = vld [vmem:[%s11701_s3] sm:$0xf] }
 0x10e   : > { %v1441_v2 = vunpack.c.l.b16 %v1333_v61  ;;  %v3074_v3 = vor.u32 %v3073_v0, %v3072_v62  ;;  %v1623_v17 = vor.u32 %v1622_v5, %v1618_v58  ;;  %v7274_v58 = vld [vmem:[%s7580_s29 + $0x88] sm:$0xff]  ;;  %v7085_v61 = vor.u32 %v7287_v55, %v7084_v54 }
 0x110   : > { %v7764_v4 = vpack.c.b16 %v1441_v2, %v1441_v2  ;;  %v7811_v5 = vsel %vm2344_vm3, %v7085_v61, 0  ;;  %v1865_v61 = vrot.slane %v7653_v9, 1 }
 0x111   : > { %v914_v6 = vpop.f32.mrf.mxu0  ;;  %2455 = vmatpush.bf16.msra.mxu2 %v7811_v5 }
 0x112   : > { %v1226_v8 = vadd.f32 %v7651_v7, %v914_v6  ;;  %1524 = vrot.lane.b32.xlu2 %v7764_v4, %s7455_s18  ;;  %v1629_v12 = vshrl.u32 %v7764_v4, 16  ;;  %v1625_v14 = vshll.u32 %v7764_v4, 16 }
 0x114   : > { %1283 = vst.msk [vmem:[%s7664_s24 + $0x2e] sm:$0xfc] %vm1271_vm7, %v1226_v8  ;;  %1813 = vrot.lane.b32.xlu0 %v1629_v12, %s7457_s25  ;;  %v3075_v15 = vrot.slane %v1629_v12, 1  ;;  %v3076_v16 = vrot.slane %v1625_v14, 2  ;;  %v1627_v19 = vrot.slane %v1625_v14, 1  ;;  %v1334_v29 = vpack.c.bf16 %v1226_v8, %v1226_v8 }
 0x116   : > { %v3077_v20 = vor.u32 %v3076_v16, %v3075_v15  ;;  %v7775_v22 = vsel %vm1574_vm4, %v1623_v17, %v1627_v19  ;;  %v1442_v32 = vunpack.c.l.b16 %v1334_v29 }
 0x117   : > { %1811 = vrot.lane.b32.xlu1 %v7775_v22, %s7457_s25 }
 0x118   : > { %v7781_v27 = vsel %vm3041_vm5, %v3074_v3, %v3077_v20 }
 0x119   : > { %11799 = vst [vmem:[#allocation12_spill] sm:$0xff] %v7781_v27  ;;  %v917_v28 = vpop.f32.mrf.mxu0 }
 0x11a   : > { %v1227_v30 = vadd.f32 %v7601_v10, %v917_v28 }
 0x11c   : > { %1284 = vst.msk [vmem:[%s7664_s24 + $0x36] sm:$0xff] %vm1273_vm9, %v1227_v30  ;;  %v1335_v31 = vpack.c.bf16 %v1227_v30, %v1227_v30  ;;  %7014 = vmatmul.msk.bf16.gmra.mxu0 %vm773_vm1, %v7273_v23 }
 0x11e   : > { %v1443_v33 = vunpack.c.l.b16 %v1335_v31 }
 0x120   : > { %v7787_v36 = vpack.c.b16 %v1443_v33, %v1442_v32  ;;  %v7275_v32 = vld [vmem:[%s7580_s29 + $0x90] sm:$0xff] }
 0x121   : > { %v919_v37 = vpop.f32.mrf.mxu0 }
 0x122   : > { %v1228_v38 = vadd.f32 %v7685_v34, %v919_v37  ;;  %1526 = vrot.lane.b32.xlu1 %v7787_v36, %s7455_s18  ;;  %v1632_v39 = vshrl.u32 %v7787_v36, 16  ;;  %v1634_v43 = vshll.u32 %v7787_v36, 16 }
 0x124   : > { %1285 = vst.msk [vmem:[%s7664_s24 + $0x3e] sm:$0x3] %vm1275_vm10, %v1228_v38  ;;  %v1336_v44 = vpack.c.bf16 %v1228_v38, %v1228_v38  ;;  %v3079_v45 = vrot.slane %v1632_v39, 1  ;;  %v3080_v47 = vrot.slane %v1634_v43, 2  ;;  %v1636_v59 = vrot.slane %v1634_v43, 1 }
 0x125   : > { %v7064_v38 = vld [vmem:[%s11701_s3 + $0x8] sm:$0xf] }
 0x126   : > { %v1444_v50 = vunpack.c.l.b16 %v1336_v44  ;;  %v3081_v51 = vor.u32 %v3080_v47, %v3079_v45  ;;  %v1637_v12 = vor.u32 %v1636_v59, %v1632_v39  ;;  %v7288_v39 = vld [vmem:[%s11701_s3 + $0x8] sm:$0x30] }
 0x127   : > { %v7065_v47 = vor.u32 %v7288_v39, %v7064_v38 }
 0x128   : > { %v7802_v56 = vpack.c.b16 %v1444_v50, %v1444_v50 }
 0x129   : > { %v922_v62 = vpop.f32.mrf.mxu0 }
 0x12a   : > { %v1229_v0 = vadd.f32 %v7651_v7, %v922_v62  ;;  %1528 = vrot.lane.b32.xlu0 %v7802_v56, %s7455_s18  ;;  %v1643_v2 = vshrl.u32 %v7802_v56, 16  ;;  %v1639_v3 = vshll.u32 %v7802_v56, 16 }
 0x12c   : > { %1286 = vst.msk [vmem:[%s7664_s24 + $0x3e] sm:$0xfc] %vm1271_vm7, %v1229_v0  ;;  %7015 = vmatmul.msk.bf16.gmra.mxu0 %vm773_vm1, %v7274_v58  ;;  %1817 = vrot.lane.b32.xlu1 %v1643_v2, %s7457_s25  ;;  %v3082_v6 = vrot.slane %v1643_v2, 1  ;;  %v3083_v8 = vrot.slane %v1639_v3, 2  ;;  %v1641_v14 = vrot.slane %v1639_v3, 1  ;;  %v1337_v20 = vpack.c.bf16 %v1229_v0, %v1229_v0 }
 0x12d   : > { %v2346_v58 = vsel %vm2344_vm3, %v7065_v47, 0  ;;  %v1864_v2 = vrot.slane %v7637_v60, 1 }
 0x12e   : > { %v3084_v15 = vor.u32 %v3083_v8, %v3082_v6  ;;  %v7819_v16 = vsel %vm1574_vm4, %v1637_v12, %v1641_v14  ;;  %v1445_v29 = vunpack.c.l.b16 %v1337_v20  ;;  %2355 = vmatpush.bf16.msra.mxu1 %v2346_v58  ;;  %7297 = vmatpush.bf16.msrb.mxu3 %v2346_v58 }
 0x12f   : > { %1815 = vrot.lane.b32.xlu2 %v7819_v16, %s7457_s25  ;;  %v7852_v12 = vsel %vm1863_vm2, %v1864_v2, %v1865_v61 }
 0x130   : > { %v7824_v17 = vsel %vm3041_vm5, %v3081_v51, %v3084_v15 }
 0x131   : > { %11800 = vst [vmem:[#allocation13_spill] sm:$0xff] %v7824_v17  ;;  %v924_v19 = vpop.f32.mrf.mxu0 }
 0x132   : > { %v1230_v23 = vadd.f32 %v7601_v10, %v924_v19 }
 0x134   : > { %1287 = vst.msk [vmem:[%s7664_s24 + $0x46] sm:$0xff] %vm1273_vm9, %v1230_v23  ;;  %v1338_v28 = vpack.c.bf16 %v1230_v23, %v1230_v23  ;;  %v1511_v33 = vpop.permute.xlu0 %1510  ;;  %v1515_v3 = vpop.permute.xlu2 %1514 }
 0x136   : > { %v1446_v30 = vunpack.c.l.b16 %v1338_v28 }
 0x138   : > { %v7829_v31 = vpack.c.b16 %v1446_v30, %v1445_v29 }
 0x139   : > { %v927_v37 = vpop.f32.mrf.mxu0 }
 0x13a   : > { %v1231_v43 = vadd.f32 %v7685_v34, %v927_v37  ;;  %1530 = vrot.lane.b32.xlu0 %v7829_v31, %s7455_s18  ;;  %v1646_v44 = vshrl.u32 %v7829_v31, 16  ;;  %v1648_v45 = vshll.u32 %v7829_v31, 16 }
 0x13c   : > { %1288 = vst.msk [vmem:[%s7664_s24 + $0x4e] sm:$0x3] %vm1275_vm10, %v1231_v43  ;;  %v1339_v50 = vpack.c.bf16 %v1231_v43, %v1231_v43  ;;  %v1513_v51 = vpop.permute.xlu1 %1512  ;;  %7016 = vmatmul.msk.bf16.gmra.mxu0 %vm773_vm1, %v7275_v32  ;;  %v3086_v54 = vrot.slane %v1646_v44, 1  ;;  %v3087_v55 = vrot.slane %v1648_v45, 2  ;;  %v1650_v8 = vrot.slane %v1648_v45, 1 }
 0x13e   : > { %v1447_v59 = vunpack.c.l.b16 %v1339_v50  ;;  %v3088_v62 = vor.u32 %v3087_v55, %v3086_v54  ;;  %v1651_v38 = vor.u32 %v1650_v8, %v1646_v44 }
 0x140   : > { %v7848_v0 = vpack.c.b16 %v1447_v59, %v1447_v59  ;;  %v7276_v59 = vld [vmem:[%s7580_s29 + $0x98] sm:$0xff] }
 0x141   : > { %v1800_v6 = vpop.permute.xlu0 %1799  ;;  %v929_v15 = vpop.f32.mrf.mxu0 }
 0x142   : > { %11801 = vst [vmem:[#allocation14_spill] sm:$0xff] %v7848_v0  ;;  %v1914_v14 = vsel %vm773_vm1, %v1511_v33, %v1800_v6  ;;  %1532 = vrot.lane.b32.xlu2 %v7848_v0, %s7455_s18  ;;  %v1657_v19 = vshrl.u32 %v7848_v0, 16  ;;  %v1653_v20 = vshll.u32 %v7848_v0, 16  ;;  %v1232_v28 = vadd.f32 %v7651_v7, %v929_v15  ;;  %v1804_v2 = vpop.permute.xlu2 %1803 }
 0x143   : > { %v2009_v23 = vsel %vm1273_vm9, %v1914_v14, %v7852_v12 }
 0x144   : > { %v2074_v29 = vshll.u32 %v2009_v23, 16  ;;  %v1802_v30 = vpop.permute.xlu1 %1801  ;;  %1821 = vrot.lane.b32.xlu0 %v1657_v19, %s7457_s25  ;;  %1289 = vst.msk [vmem:[%s7664_s24 + $0x4e] sm:$0xfc] %vm1271_vm7, %v1232_v28  ;;  %v3089_v33 = vrot.slane %v1657_v19, 1  ;;  %v3090_v37 = vrot.slane %v1653_v20, 2  ;;  %v2072_v39 = vshrl.u32 %v2009_v23, 16 }
 0x145   : > { %v1917_v32 = vsel %vm773_vm1, %v1513_v51, %v1802_v30  ;;  %v1655_v47 = vrot.slane %v1653_v20, 1  ;;  %v1868_v51 = vrot.slane %v7698_v49, 1  ;;  %v1340_v8 = vpack.c.bf16 %v1232_v28, %v1232_v28 }
 0x146   : > { %v2076_v43 = vrot.slane %v2074_v29, 1  ;;  %v2011_v45 = vsel %vm1273_vm9, %v1917_v32, %v1865_v61  ;;  %v3091_v54 = vor.u32 %v3090_v37, %v3089_v33  ;;  %v1867_v19 = vrot.slane %v7687_v35, 1 }
 0x147   : > { %v2078_v50 = vshll.u32 %v2011_v45, 16  ;;  %v7868_v55 = vsel %vm1574_vm4, %v1651_v38, %v1655_v47  ;;  %v1920_v20 = vsel %vm773_vm1, %v1515_v3, %v1804_v2  ;;  %v1448_v29 = vunpack.c.l.b16 %v1340_v8 }
 0x148   : > { %11802 = vst [vmem:[#allocation15_spill] sm:$0xff] %v7868_v55  ;;  %v2077_v58 = vor.u32 %v2076_v43, %v2072_v39  ;;  %1819 = vrot.lane.b32.xlu1 %v7868_v55, %s7457_s25  ;;  %v7874_v44 = vsel %vm3041_vm5, %v3088_v62, %v3091_v54  ;;  %v7886_v23 = vsel %vm1863_vm2, %v1867_v19, %v1868_v51 }
 0x149   : > { %v2080_v6 = vrot.slane %v2078_v50, 1  ;;  %11803 = vst [vmem:[#allocation16_spill] sm:$0xff] %v7874_v44  ;;  %v932_v61 = vpop.f32.mrf.mxu0  ;;  %v2013_v28 = vsel %vm1273_vm9, %v1920_v20, %v7886_v23 }
 0x14a   : > { %v1233_v14 = vadd.f32 %v7601_v10, %v932_v61  ;;  %v2084_v33 = vshll.u32 %v2013_v28, 16  ;;  %v2082_v61 = vshrl.u32 %v2013_v28, 16 }
 0x14b   : > { %v2081_v15 = vsel %vm1574_vm4, %v2077_v58, %v2080_v6 }
 0x14c   : > { %7086 = vmatmul.msk.bf16.vlgmr.msra.gmra.mxu2 %vm2295_vm11, %v2081_v15  ;;  %7017 = vmatmul.msk.bf16.gmra.mxu0 %vm773_vm1, %v7276_v59  ;;  %1290 = vst.msk [vmem:[%s7664_s24 + $0x56] sm:$0xff] %vm1273_vm9, %v1233_v14  ;;  %v1341_v62 = vpack.c.bf16 %v1233_v14, %v1233_v14  ;;  %v2086_v50 = vrot.slane %v2084_v33, 1  ;;  %v7277_v14 = vld [vmem:[%s7580_s29 + $0xa0] sm:$0xff] }
 0x14e   : > { %v1449_v30 = vunpack.c.l.b16 %v1341_v62  ;;  %v2087_v62 = vor.u32 %v2086_v50, %v2082_v61 }
 0x150   : > { %v7890_v32 = vpack.c.b16 %v1449_v30, %v1448_v29 }
 0x151   : > { %v934_v3 = vpop.f32.mrf.mxu0 }
 0x152   : > { %v1234_v37 = vadd.f32 %v7685_v34, %v934_v3  ;;  %1534 = vrot.lane.b32.xlu2 %v7890_v32, %s7455_s18  ;;  %v11710_v38 = vshrl.u32 %v7890_v32, 16  ;;  %v11716_v39 = vshll.u32 %v7890_v32, 16  ;;  %v11826_v53 = vshll.u32 %v7890_v32, 16 }
 0x154   : > { %1291 = vst.msk [vmem:[%s7664_s24 + $0x5e] sm:$0x3] %vm1275_vm10, %v1234_v37  ;;  %v1342_v43 = vpack.c.bf16 %v1234_v37, %v1234_v37  ;;  %v3093_v45 = vrot.slane %v11710_v38, 1  ;;  %v3094_v47 = vrot.slane %v11716_v39, 2  ;;  %v1517_v54 = vpop.permute.xlu0 %1516  ;;  %v1664_v13 = vrot.slane %v11826_v53, 1 }
 0x155   : > { %v11830_v53 = vshrl.u32 %v7890_v32, 16 }
 0x156   : > { %v1806_v58 = vpop.permute.xlu1 %1805  ;;  %v1450_v59 = vunpack.c.l.b16 %v1342_v43  ;;  %v3095_v6 = vor.u32 %v3094_v47, %v3093_v45 }
 0x157   : > { %v1923_v2 = vsel %vm773_vm1, %v1517_v54, %v1806_v58  ;;  %v1519_v58 = vpop.permute.xlu2 %1518 }
 0x158   : > { %v2015_v8 = vsel %vm1273_vm9, %v1923_v2, %v1868_v51  ;;  %v7906_v15 = vpack.c.b16 %v1450_v59, %v1450_v59 }
 0x159   : > { %v2088_v19 = vshll.u32 %v2015_v8, 16  ;;  %v937_v20 = vpop.f32.mrf.mxu0  ;;  %v7278_v8 = vld [vmem:[%s7580_s29 + $0xa8] sm:$0xff] }
 0x15a   : > { %v1235_v30 = vadd.f32 %v7651_v7, %v937_v20  ;;  %v11712_v33 = vshll.u32 %v7906_v15, 16  ;;  %v11711_v3 = vshrl.u32 %v7906_v15, 16 }
 0x15b   : > { %v2090_v29 = vrot.slane %v2088_v19, 1 }
 0x15c   : > { %7018 = vmatmul.msk.bf16.gmra.mxu0 %vm773_vm1, %v7277_v14  ;;  %1292 = vst.msk [vmem:[%s7664_s24 + $0x5e] sm:$0xfc] %vm1271_vm7, %v1235_v30  ;;  %v3096_v28 = vrot.slane %v11711_v3, 1  ;;  %v3097_v37 = vrot.slane %v11712_v33, 2  ;;  %v1343_v50 = vpack.c.bf16 %v1235_v30, %v1235_v30 }
 0x15d   : > { %v2091_v51 = vsel %vm1574_vm4, %v2087_v62, %v2090_v29 }
 0x15e   : > { %7066 = vmatmul.msk.bf16.vlgmr.msra.gmra.mxu1 %vm2295_vm11, %v2091_v51  ;;  %7087 = vmatmul.msk.bf16.gmra.mxu2 %vm2295_vm11, %v2091_v51  ;;  %v3098_v43 = vor.u32 %v3097_v37, %v3096_v28  ;;  %v1451_v2 = vunpack.c.l.b16 %v1343_v50  ;;  %v1871_v37 = vrot.slane %v7730_v25, 1 }
 0x15f   : > { %v1810_v30 = vpop.permute.xlu2 %1809 }
 0x160   : > { %v7922_v45 = vsel %vm3041_vm5, %v3095_v6, %v3098_v43 }
 0x161   : > { %11804 = vst [vmem:[#allocation17_spill] sm:$0xff] %v7922_v45  ;;  %v939_v47 = vpop.f32.mrf.mxu0 }
 0x162   : > { %v1236_v54 = vadd.f32 %v7601_v10, %v939_v47 }
 0x164   : > { %1293 = vst.msk [vmem:[%s7664_s24 + $0x66] sm:$0xff] %vm1273_vm9, %v1236_v54  ;;  %v1344_v59 = vpack.c.bf16 %v1236_v54, %v1236_v54  ;;  %v1870_v54 = vrot.slane %v7721_v11, 1 }
 0x166   : > { %v1452_v61 = vunpack.c.l.b16 %v1344_v59 }
 0x168   : > { %v7928_v14 = vpack.c.b16 %v1452_v61, %v1451_v2 }
 0x169   : > { %v942_v19 = vpop.f32.mrf.mxu0 }
 0x16a   : > { %v1237_v20 = vadd.f32 %v7685_v34, %v942_v19  ;;  %v11708_v6 = vshrl.u32 %v7928_v14, 16  ;;  %v11709_v62 = vshll.u32 %v7928_v14, 16  ;;  %v7947_v19 = vsel %vm1863_vm2, %v1870_v54, %v1871_v37 }
 0x16c   : > { %v1521_v29 = vpop.permute.xlu1 %1520  ;;  %7019 = vmatmul.msk.bf16.gmra.mxu0 %vm773_vm1, %v7278_v8  ;;  %1294 = vst.msk [vmem:[%s7664_s24 + $0x6e] sm:$0x3] %vm1275_vm10, %v1237_v20  ;;  %v1345_v51 = vpack.c.bf16 %v1237_v20, %v1237_v20  ;;  %v3100_v28 = vrot.slane %v11708_v6, 1  ;;  %v3101_v47 = vrot.slane %v11709_v62, 2  ;;  %v7279_v62 = vld [vmem:[%s7580_s29 + $0xb0] sm:$0xff] }
 0x16d   : > { %v1929_v43 = vsel %vm773_vm1, %v1521_v29, %v1810_v30 }
 0x16e   : > { %v1453_v50 = vunpack.c.l.b16 %v1345_v51  ;;  %v3102_v59 = vor.u32 %v3101_v47, %v3100_v28  ;;  %v2019_v61 = vsel %vm1273_vm9, %v1929_v43, %v1871_v37 }
 0x16f   : > { %v2098_v47 = vshll.u32 %v2019_v61, 16 }
 0x170   : > { %v7943_v2 = vpack.c.b16 %v1453_v50, %v1453_v50 }
 0x171   : > { %v1808_v8 = vpop.permute.xlu0 %1807  ;;  %v944_v29 = vpop.f32.mrf.mxu0 }
 0x172   : > { %v1926_v20 = vsel %vm773_vm1, %v1519_v58, %v1808_v8  ;;  %v1238_v51 = vadd.f32 %v7651_v7, %v944_v29  ;;  %v11714_v6 = vshll.u32 %v7943_v2, 16  ;;  %v11713_v28 = vshrl.u32 %v7943_v2, 16 }
 0x173   : > { %v2017_v30 = vsel %vm1273_vm9, %v1926_v20, %v7947_v19  ;;  %v2100_v20 = vrot.slane %v2098_v47, 1 }
 0x174   : > { %v2094_v50 = vshll.u32 %v2017_v30, 16  ;;  %1295 = vst.msk [vmem:[%s7664_s24 + $0x6e] sm:$0xfc] %vm1271_vm7, %v1238_v51  ;;  %v3103_v37 = vrot.slane %v11713_v28, 1  ;;  %v3104_v58 = vrot.slane %v11714_v6, 2  ;;  %v2092_v43 = vshrl.u32 %v2017_v30, 16 }
 0x175   : > { %v1346_v33 = vpack.c.bf16 %v1238_v51, %v1238_v51 }
 0x176   : > { %v2096_v54 = vrot.slane %v2094_v50, 1  ;;  %v3105_v8 = vor.u32 %v3104_v58, %v3103_v37 }
 0x177   : > { %v1454_v47 = vunpack.c.l.b16 %v1346_v33 }
 0x178   : > { %v2097_v29 = vor.u32 %v2096_v54, %v2092_v43  ;;  %v7963_v38 = vsel %vm3041_vm5, %v3102_v59, %v3105_v8 }
 0x179   : > { %11805 = vst [vmem:[#allocation18_spill] sm:$0xff] %v7963_v38  ;;  %v947_v61 = vpop.f32.mrf.mxu0 }
 0x17a   : > { %v7966_v3 = vsel %vm1574_vm4, %v2097_v29, %v2100_v20  ;;  %v1239_v28 = vadd.f32 %v7601_v10, %v947_v61  ;;  %v1874_v20 = vrot.slane %v7764_v4, 1 }
 0x17b   : > { %11806 = vst [vmem:[#allocation19_spill] sm:$0xff] %v7966_v3  ;;  %7067 = vmatmul.msk.bf16.gmra.mxu1 %vm2295_vm11, %v7966_v3  ;;  %7088 = vmatmul.msk.bf16.gmra.mxu2 %vm2295_vm11, %v7966_v3 }
 0x17c   : > { %7020 = vmatmul.msk.bf16.gmra.mxu0 %vm773_vm1, %v7279_v62  ;;  %1296 = vst.msk [vmem:[%s7664_s24 + $0x76] sm:$0xff] %vm1273_vm9, %v1239_v28  ;;  %v1347_v59 = vpack.c.bf16 %v1239_v28, %v1239_v28  ;;  %v1523_v30 = vpop.permute.xlu0 %1522  ;;  %v1525_v28 = vpop.permute.xlu2 %1524 }
 0x17e   : > { %v1455_v50 = vunpack.c.l.b16 %v1347_v59 }
 0x180   : > { %v7976_v37 = vpack.c.b16 %v1455_v50, %v1454_v47  ;;  %v1873_v50 = vrot.slane %v7753_v52, 1 }
 0x181   : > { %v949_v51 = vpop.f32.mrf.mxu0 }
 0x182   : > { %v1240_v58 = vadd.f32 %v7685_v34, %v949_v51  ;;  %v11715_v43 = vshrl.u32 %v7976_v37, 16  ;;  %v11717_v54 = vshll.u32 %v7976_v37, 16  ;;  %v7280_v51 = vld [vmem:[%s7580_s29 + $0xb8] sm:$0xff]  ;;  %v7995_v39 = vsel %vm1863_vm2, %v1873_v50, %v1874_v20 }
 0x184   : > { %1297 = vst.msk [vmem:[%s7664_s24 + $0x7e] sm:$0x3] %vm1275_vm10, %v1240_v58  ;;  %v1348_v8 = vpack.c.bf16 %v1240_v58, %v1240_v58  ;;  %v3107_v62 = vrot.slane %v11715_v43, 1  ;;  %v3108_v33 = vrot.slane %v11717_v54, 2 }
 0x186   : > { %v1814_v29 = vpop.permute.xlu0 %1813  ;;  %v1456_v61 = vunpack.c.l.b16 %v1348_v8  ;;  %v3109_v47 = vor.u32 %v3108_v33, %v3107_v62 }
 0x187   : > { %v1935_v59 = vsel %vm773_vm1, %v1525_v28, %v1814_v29 }
 0x188   : > { %v7991_v6 = vpack.c.b16 %v1456_v61, %v1456_v61  ;;  %v2023_v58 = vsel %vm1273_vm9, %v1935_v59, %v1874_v20 }
 0x189   : > { %v1812_v43 = vpop.permute.xlu1 %1811  ;;  %v952_v18 = vpop.f32.mrf.mxu0  ;;  %v2108_v28 = vshll.u32 %v2023_v58, 16 }
 0x18a   : > { %v1932_v54 = vsel %vm773_vm1, %v1523_v30, %v1812_v43  ;;  %v1241_v62 = vadd.f32 %v7651_v7, %v952_v18  ;;  %v11720_v33 = vshll.u32 %v7991_v6, 16  ;;  %v11721_v61 = vshrl.u32 %v7991_v6, 16 }
 0x18b   : > { %v2021_v8 = vsel %vm1273_vm9, %v1932_v54, %v7995_v39  ;;  %v2110_v18 = vrot.slane %v2108_v28, 1  ;;  %v1816_v28 = vpop.permute.xlu2 %1815 }
 0x18c   : > { %v2104_v29 = vshll.u32 %v2021_v8, 16  ;;  %7021 = vmatmul.msk.bf16.gmra.mxu0 %vm773_vm1, %v7280_v51  ;;  %1298 = vst.msk [vmem:[%s7664_s24 + $0x7e] sm:$0xfc] %vm1271_vm7, %v1241_v62  ;;  %v3111_v20 = vrot.slane %v11720_v33, 2  ;;  %v2102_v30 = vshrl.u32 %v2021_v8, 16  ;;  %v3110_v54 = vrot.slane %v11721_v61, 1 }
 0x18d   : > { %v1877_v51 = vrot.slane %v7802_v56, 1  ;;  %v1349_v33 = vpack.c.bf16 %v1241_v62, %v1241_v62 }
 0x18e   : > { %v2106_v43 = vrot.slane %v2104_v29, 1  ;;  %v3112_v50 = vor.u32 %v3111_v20, %v3110_v54  ;;  %v1876_v20 = vrot.slane %v7787_v36, 1 }
 0x190   : > { %v2107_v59 = vor.u32 %v2106_v43, %v2102_v30  ;;  %v8015_v38 = vsel %vm3041_vm5, %v3109_v47, %v3112_v50  ;;  %v8027_v62 = vsel %vm1863_vm2, %v1876_v20, %v1877_v51 }
 0x191   : > { %v954_v58 = vpop.f32.mrf.mxu0  ;;  %11808 = vst [vmem:[#allocation21_spill] sm:$0xff] %v8015_v38 }
 0x192   : > { %v8011_v57 = vsel %vm1574_vm4, %v2107_v59, %v2110_v18  ;;  %v1242_v8 = vadd.f32 %v7601_v10, %v954_v58  ;;  %11809 = vst [vmem:[#allocation22_spill] sm:$0xff] %v8027_v62  ;;  %v1457_v10 = vunpack.c.l.b16 %v1349_v33  ;;  %v7281_v18 = vld [vmem:[%s7580_s29 + $0xc0] sm:$0xff] }
 0x193   : > { %11807 = vst [vmem:[#allocation20_spill] sm:$0xff] %v8011_v57  ;;  %7068 = vmatmul.msk.bf16.gmra.mxu1 %vm2295_vm11, %v8011_v57  ;;  %7089 = vmatmul.msk.bf16.gmra.mxu2 %vm2295_vm11, %v8011_v57 }
 0x194   : > { %v1527_v29 = vpop.permute.xlu1 %1526  ;;  %1299 = vst.msk [vmem:[%s7664_s24 + $0x86] sm:$0xff] %vm1273_vm9, %v1242_v8  ;;  %v1350_v30 = vpack.c.bf16 %v1242_v8, %v1242_v8 }
 0x195   : > { %v1938_v47 = vsel %vm773_vm1, %v1527_v29, %v1816_v28 }
 0x196   : > { %v1458_v43 = vunpack.c.l.b16 %v1350_v30  ;;  %v2025_v54 = vsel %vm1273_vm9, %v1938_v47, %v8027_v62 }
 0x197   : > { %v2114_v50 = vshll.u32 %v2025_v54, 16  ;;  %v2112_v45 = vshrl.u32 %v2025_v54, 16 }
 0x198   : > { %v8032_v59 = vpack.c.b16 %v1458_v43, %v1457_v10 }
 0x199   : > { %v957_v58 = vpop.f32.mrf.mxu0  ;;  %v2116_v20 = vrot.slane %v2114_v50, 1 }
 0x19a   : > { %v1243_v61 = vadd.f32 %v7685_v34, %v957_v58  ;;  %v11722_v38 = vshrl.u32 %v8032_v59, 16  ;;  %v11723_v8 = vshll.u32 %v8032_v59, 16 }
 0x19c   : > { %7022 = vmatmul.msk.bf16.gmra.mxu0 %vm773_vm1, %v7281_v18  ;;  %1300 = vst.msk [vmem:[%s7664_s24 + $0x8e] sm:$0x3] %vm1275_vm10, %v1243_v61  ;;  %v1351_v33 = vpack.c.bf16 %v1243_v61, %v1243_v61  ;;  %v3114_v28 = vrot.slane %v11722_v38, 1  ;;  %v3115_v29 = vrot.slane %v11723_v8, 2  ;;  %v1529_v30 = vpop.permute.xlu0 %1528  ;;  %v2117_v38 = vor.u32 %v2116_v20, %v2112_v45  ;;  %v7282_v45 = vld [vmem:[%s7580_s29 + $0xc8] sm:$0xff] }
 0x19d   : > { %v8071_v20 = vld [vmem:[%s11700_s2] ss:$0 sm:$0xff] }
 0x19e   : > { %v1818_v47 = vpop.permute.xlu1 %1817  ;;  %v1459_v10 = vunpack.c.l.b16 %v1351_v33  ;;  %v3116_v58 = vor.u32 %v3115_v29, %v3114_v28 }
 0x19f   : > { %v1941_v43 = vsel %vm773_vm1, %v1529_v30, %v1818_v47 }
 0x1a0   : > { %v2027_v18 = vsel %vm1273_vm9, %v1941_v43, %v1877_v51  ;;  %v8046_v44 = vpack.c.b16 %v1459_v10, %v1459_v10 }
 0x1a1   : > { %v2118_v61 = vshll.u32 %v2027_v18, 16  ;;  %v959_v17 = vpop.f32.mrf.mxu0 }
 0x1a2   : > { %v1244_v8 = vadd.f32 %v7651_v7, %v959_v17  ;;  %v11725_v50 = vshll.u32 %v8046_v44, 16  ;;  %v11724_v33 = vshrl.u32 %v8046_v44, 16 }
 0x1a3   : > { %v2120_v1 = vrot.slane %v2118_v61, 1 }
 0x1a4   : > { %1301 = vst.msk [vmem:[%s7664_s24 + $0x8e] sm:$0xfc] %vm1271_vm7, %v1244_v8  ;;  %v3117_v51 = vrot.slane %v11724_v33, 1  ;;  %v3118_v28 = vrot.slane %v11725_v50, 2  ;;  %v7283_v33 = vld [vmem:[%s7580_s29 + $0xd0] sm:$0xff] }
 0x1a5   : > { %v8054_v54 = vsel %vm1574_vm4, %v2117_v38, %v2120_v1  ;;  %v1352_v38 = vpack.c.bf16 %v1244_v8, %v1244_v8 }
 0x1a6   : > { %11810 = vst [vmem:[#allocation23_spill] sm:$0xff] %v8054_v54  ;;  %7069 = vmatmul.msk.bf16.gmra.mxu1 %vm2295_vm11, %v8054_v54  ;;  %7090 = vmatmul.msk.bf16.gmra.mxu2 %vm2295_vm11, %v8054_v54  ;;  %v3119_v17 = vor.u32 %v3118_v28, %v3117_v51 }
 0x1a7   : > { %v1460_v43 = vunpack.c.l.b16 %v1352_v38 }
 0x1a8   : > { %v8066_v29 = vsel %vm3041_vm5, %v3116_v58, %v3119_v17 }
 0x1a9   : > { %11811 = vst [vmem:[#allocation24_spill] sm:$0xff] %v8066_v29  ;;  %v962_v1 = vpop.f32.mrf.mxu0 }
 0x1aa   : > { %v1245_v30 = vadd.f32 %v8071_v20, %v962_v1 }
 0x1ac   : > { %7023 = vmatmul.msk.bf16.gmra.mxu0 %vm773_vm1, %v7282_v45  ;;  %1302 = vst.msk [vmem:[%s7664_s24 + $0x96] sm:$0xff] %vm1273_vm9, %v1245_v30  ;;  %v1353_v47 = vpack.c.bf16 %v1245_v30, %v1245_v30  ;;  %v1531_v10 = vpop.permute.xlu0 %1530  ;;  %v1533_v30 = vpop.permute.xlu2 %1532 }
 0x1ae   : > { %v1461_v18 = vunpack.c.l.b16 %v1353_v47 }
 0x1b0   : > { %v8077_v58 = vpack.c.b16 %v1461_v18, %v1460_v43  ;;  %v1880_v18 = vrot.slane %v7848_v0, 1 }
 0x1b1   : > { %v964_v61 = vpop.f32.mrf.mxu0 }
 0x1b2   : > { %v1246_v8 = vadd.f32 %v7685_v34, %v964_v61  ;;  %v11726_v51 = vshrl.u32 %v8077_v58, 16  ;;  %v11728_v28 = vshll.u32 %v8077_v58, 16 }
 0x1b4   : > { %1303 = vst.msk [vmem:[%s7664_s24 + $0x9e] sm:$0x3] %vm1275_vm10, %v1246_v8  ;;  %v1354_v17 = vpack.c.bf16 %v1246_v8, %v1246_v8  ;;  %v3121_v45 = vrot.slane %v11726_v51, 1  ;;  %v3122_v1 = vrot.slane %v11728_v28, 2  ;;  %v1879_v8 = vrot.slane %v7829_v31, 1 }
 0x1b6   : > { %v1822_v38 = vpop.permute.xlu0 %1821  ;;  %v1462_v47 = vunpack.c.l.b16 %v1354_v17  ;;  %v3123_v43 = vor.u32 %v3122_v1, %v3121_v45  ;;  %v8099_v45 = vsel %vm1863_vm2, %v1879_v8, %v1880_v18 }
 0x1b7   : > { %v1947_v61 = vsel %vm773_vm1, %v1533_v30, %v1822_v38  ;;  %11812 = vst [vmem:[#allocation25_spill] sm:$0xff] %v8099_v45 }
 0x1b8   : > { %v8091_v50 = vpack.c.b16 %v1462_v47, %v1462_v47  ;;  %v2031_v51 = vsel %vm1273_vm9, %v1947_v61, %v1880_v18 }
 0x1b9   : > { %v967_v29 = vpop.f32.mrf.mxu0  ;;  %v2128_v30 = vshll.u32 %v2031_v51, 16 }
 0x1ba   : > { %v1820_v54 = vpop.permute.xlu1 %1819  ;;  %v1247_v28 = vadd.f32 %v7651_v7, %v967_v29  ;;  %v11733_v27 = vshll.u32 %v8091_v50, 16  ;;  %v11730_v17 = vshrl.u32 %v8091_v50, 16 }
 0x1bb   : > { %v1944_v1 = vsel %vm773_vm1, %v1531_v10, %v1820_v54  ;;  %v2130_v54 = vrot.slane %v2128_v30, 1 }
 0x1bc   : > { %7024 = vmatmul.msk.bf16.gmra.mxu0 %vm773_vm1, %v7283_v33  ;;  %v2029_v38 = vsel %vm1273_vm9, %v1944_v1, %v8099_v45  ;;  %1304 = vst.msk [vmem:[%s7664_s24 + $0x9e] sm:$0xfc] %vm1271_vm7, %v1247_v28  ;;  %v3124_v29 = vrot.slane %v11730_v17, 1  ;;  %v3125_v61 = vrot.slane %v11733_v27, 2  ;;  %v1355_v26 = vpack.c.bf16 %v1247_v28, %v1247_v28 }
 0x1bd   : > { %v2124_v47 = vshll.u32 %v2029_v38, 16  ;;  %v2122_v18 = vshrl.u32 %v2029_v38, 16 }
 0x1be   : > { %v3126_v57 = vor.u32 %v3125_v61, %v3124_v29  ;;  %v1463_v38 = vunpack.c.l.b16 %v1355_v26 }
 0x1bf   : > { %v2126_v8 = vrot.slane %v2124_v47, 1 }
 0x1c0   : > { %v8112_v1 = vsel %vm3041_vm5, %v3123_v43, %v3126_v57 }
 0x1c1   : > { %v969_v10 = vpop.f32.mrf.mxu0  ;;  %v2127_v33 = vor.u32 %v2126_v8, %v2122_v18  ;;  %11813 = vst [vmem:[#allocation26_spill] sm:$0xff] %v8112_v1 }
 0x1c2   : > { %v1248_v41 = vadd.f32 %v8071_v20, %v969_v10 }
 0x1c3   : > { %v8116_v17 = vsel %vm1574_vm4, %v2127_v33, %v2130_v54 }
 0x1c4   : > { %11814 = vst [vmem:[#allocation27_spill] sm:$0xff] %v8116_v17  ;;  %v1356_v51 = vpack.c.bf16 %v1248_v41, %v1248_v41  ;;  %7070 = vmatmul.msk.bf16.gmra.mxu1 %vm2295_vm11, %v8116_v17  ;;  %7091 = vmatmul.msk.bf16.gmra.mxu2 %vm2295_vm11, %v8116_v17 }
 0x1c5   : > { %1305 = vst.msk [vmem:[%s7664_s24 + $0xa6] sm:$0xff] %vm1273_vm9, %v1248_v41 }
 0x1c6   : > { %v1464_v29 = vunpack.c.l.b16 %v1356_v51 }
 0x1c8   : > { %v8124_v30 = vpack.c.b16 %v1464_v29, %v1463_v38 }
 0x1c9   : > { %v972_v57 = vpop.f32.mrf.mxu0 }
 0x1ca   : > { %v1249_v28 = vadd.f32 %v7685_v34, %v972_v57  ;;  %v11731_v43 = vshrl.u32 %v8124_v30, 16  ;;  %v11732_v47 = vshll.u32 %v8124_v30, 16 }
 0x1cc   : > { %1306 = vst.msk [vmem:[%s7664_s24 + $0xae] sm:$0x3] %vm1275_vm10, %v1249_v28  ;;  %v1357_v41 = vpack.c.bf16 %v1249_v28, %v1249_v28  ;;  %v3128_v61 = vrot.slane %v11731_v43, 1  ;;  %v3129_v26 = vrot.slane %v11732_v47, 2 }
 0x1ce   : > { %v1465_v18 = vunpack.c.l.b16 %v1357_v41  ;;  %v3130_v8 = vor.u32 %v3129_v26, %v3128_v61 }
 0x1cf   : > { %v2457_v26 = vpop.f32.mrf.mxu2 }
 0x1d0   : > { %v8135_v54 = vpack.c.b16 %v1465_v18, %v1465_v18 }
 0x1d1   : > { %v974_v10 = vpop.f32.mrf.mxu0 }
 0x1d2   : > { %v1250_v33 = vadd.f32 %v7651_v7, %v974_v10  ;;  %v11736_v51 = vshll.u32 %v8135_v54, 16  ;;  %v11734_v38 = vshrl.u32 %v8135_v54, 16 }
 0x1d4   : > { %1307 = vst.msk [vmem:[%s7664_s24 + $0xae] sm:$0xfc] %vm1271_vm7, %v1250_v33  ;;  %v3131_v29 = vrot.slane %v11734_v38, 1  ;;  %v3132_v57 = vrot.slane %v11736_v51, 2  ;;  %v1358_v18 = vpack.c.bf16 %v1250_v33, %v1250_v33 }
 0x1d6   : > { %v3133_v28 = vor.u32 %v3132_v57, %v3131_v29  ;;  %v1466_v38 = vunpack.c.l.b16 %v1358_v18 }
 0x1d8   : > { %v8147_v41 = vsel %vm3041_vm5, %v3130_v8, %v3133_v28 }
 0x1d9   : > { %11815 = vst [vmem:[#allocation28_spill] sm:$0xff] %v8147_v41  ;;  %v977_v61 = vpop.f32.mrf.mxu0 }
 0x1da   : > { %v1251_v10 = vadd.f32 %v8071_v20, %v977_v61 }
 0x1db   : > { %v2357_v43 = vpop.f32.mrf.mxu1 }
 0x1dc   : > { %v8150_v47 = vadd.f32 %v2457_v26, %v2357_v43  ;;  %1308 = vst.msk [vmem:[%s7664_s24 + $0xb6] sm:$0xff] %vm1273_vm9, %v1251_v10  ;;  %v1359_v27 = vpack.c.bf16 %v1251_v10, %v1251_v10 }
 0x1de   : > { %11816 = vst [vmem:[#allocation29_spill] sm:$0xff] %v8150_v47  ;;  %v1467_v1 = vunpack.c.l.b16 %v1359_v27 }
 0x1e0   : > { %v8154_v17 = vpack.c.b16 %v1467_v1, %v1466_v38 }
 0x1e1   : > { %v979_v29 = vpop.f32.mrf.mxu0 }
 0x1e2   : > { %v1252_v8 = vadd.f32 %v7685_v34, %v979_v29  ;;  %v11737_v57 = vshrl.u32 %v8154_v17, 16  ;;  %v11738_v33 = vshll.u32 %v8154_v17, 16 }
 0x1e4   : > { %1309 = vst.msk [vmem:[%s7664_s24 + $0xbe] sm:$0x3] %vm1275_vm10, %v1252_v8  ;;  %v1360_v28 = vpack.c.bf16 %v1252_v8, %v1252_v8  ;;  %v3135_v43 = vrot.slane %v11737_v57, 1  ;;  %v3136_v61 = vrot.slane %v11738_v33, 2 }
 0x1e6   : > { %v1468_v27 = vunpack.c.l.b16 %v1360_v28  ;;  %v3137_v1 = vor.u32 %v3136_v61, %v3135_v43  ;;  %v8176_v43 = vpop.f32.mrf.mxu2  ;;  %v8178_v61 = vpop.f32.mrf.mxu1 }
 0x1e7   : > { %11817 = vst [vmem:[#allocation30_spill] sm:$0xff] %v8176_v43 }
 0x1e8   : > { %v8165_v38 = vpack.c.b16 %v1468_v27, %v1468_v27  ;;  %11818 = vst [vmem:[#allocation31_spill] sm:$0xff] %v8178_v61 }
 0x1e9   : > { %v982_v26 = vpop.f32.mrf.mxu0 }
 0x1ea   : > { %v1253_v18 = vadd.f32 %v7651_v7, %v982_v26  ;;  %v11741_v10 = vshll.u32 %v8165_v38, 16  ;;  %v11739_v29 = vshrl.u32 %v8165_v38, 16 }
 0x1ec   : > { %1310 = vst.msk [vmem:[%s7664_s24 + $0xbe] sm:$0xfc] %vm1271_vm7, %v1253_v18  ;;  %v3138_v8 = vrot.slane %v11739_v29, 1  ;;  %v3139_v51 = vrot.slane %v11741_v10, 2  ;;  %v1361_v57 = vpack.c.bf16 %v1253_v18, %v1253_v18 }
 0x1ee   : > { %v3140_v28 = vor.u32 %v3139_v51, %v3138_v8  ;;  %v1469_v29 = vunpack.c.l.b16 %v1361_v57  ;;  %v2462_v3 = vpop.f32.mrf.mxu2 }
 0x1f0   : > { %v8181_v27 = vsel %vm3041_vm5, %v3137_v1, %v3140_v28 }
 0x1f1   : > { %11819 = vst [vmem:[#allocation32_spill] sm:$0xff] %v8181_v27  ;;  %v984_v26 = vpop.f32.mrf.mxu0 }
 0x1f2   : > { %v1254_v33 = vadd.f32 %v8071_v20, %v984_v26 }
 0x1f4   : > { %1311 = vst.msk [vmem:[%s7664_s24 + $0xc6] sm:$0xff] %vm1273_vm9, %v1254_v33  ;;  %v1362_v41 = vpack.c.bf16 %v1254_v33, %v1254_v33 }
 0x1f6   : > { %v1470_v47 = vunpack.c.l.b16 %v1362_v41 }
 0x1f8   : > { %v2362_v10 = vpop.f32.mrf.mxu1  ;;  %v8186_v51 = vpack.c.b16 %v1470_v47, %v1469_v29 }
 0x1f9   : > { %v8188_v8 = vadd.f32 %v2462_v3, %v2362_v10  ;;  %v987_v43 = vpop.f32.mrf.mxu0 }
 0x1fa   : > { %11820 = vst [vmem:[#allocation33_spill] sm:$0xff] %v8186_v51  ;;  %v1255_v1 = vadd.f32 %v7685_v34, %v987_v43  ;;  %1562 = vrot.lane.b32.xlu2 %v8186_v51, %s7455_s18  ;;  %v1758_v18 = vshrl.u32 %v8186_v51, 16  ;;  %v1760_v28 = vshll.u32 %v8186_v51, 16 }
 0x1fb   : > { %11821 = vst [vmem:[#allocation34_spill] sm:$0xff] %v8188_v8 }
 0x1fc   : > { %1312 = vst.msk [vmem:[%s7664_s24 + $0xce] sm:$0x3] %vm1275_vm10, %v1255_v1  ;;  %v1363_v41 = vpack.c.bf16 %v1255_v1, %v1255_v1  ;;  %v3142_v57 = vrot.slane %v1758_v18, 1  ;;  %v3143_v33 = vrot.slane %v1760_v28, 2  ;;  %v1762_v10 = vrot.slane %v1760_v28, 1 }
 0x1fe   : > { %v1471_v47 = vunpack.c.l.b16 %v1363_v41  ;;  %v3144_v29 = vor.u32 %v3143_v33, %v3142_v57  ;;  %v1763_v57 = vor.u32 %v1762_v10, %v1758_v18  ;;  %v11828_v10 = vshll.u32 %v7906_v15, 16 }
 0x200   : > { %v8197_v3 = vpack.c.b16 %v1471_v47, %v1471_v47  ;;  %v8212_v61 = vpop.f32.mrf.mxu1 }
 0x201   : > { %v989_v26 = vpop.f32.mrf.mxu0  ;;  %11825 = vst [vmem:[#allocation38_spill] sm:$0xff] %v8212_v61 }
 0x202   : > { %11822 = vst [vmem:[#allocation35_spill] sm:$0xff] %v8197_v3  ;;  %v1256_v43 = vadd.f32 %v7651_v7, %v989_v26  ;;  %1564 = vrot.lane.b32.xlu1 %v8197_v3, %s7455_s18  ;;  %v1769_v27 = vshrl.u32 %v8197_v3, 16  ;;  %v1765_v8 = vshll.u32 %v8197_v3, 16  ;;  %v8210_v26 = vpop.f32.mrf.mxu2 }
 0x203   : > { %11824 = vst [vmem:[#allocation37_spill] sm:$0xff] %v8210_v26 }
 0x204   : > { %1313 = vst.msk [vmem:[%s7664_s24 + $0xce] sm:$0xfc] %vm1271_vm7, %v1256_v43  ;;  %1853 = vrot.lane.b32.xlu2 %v1769_v27, %s7457_s25  ;;  %v3145_v1 = vrot.slane %v1769_v27, 1  ;;  %v3146_v41 = vrot.slane %v1765_v8, 2  ;;  %v1767_v33 = vrot.slane %v1765_v8, 1  ;;  %v1364_v18 = vpack.c.bf16 %v1256_v43, %v1256_v43 }
 0x206   : > { %v3147_v28 = vor.u32 %v3146_v41, %v3145_v1  ;;  %v8208_v47 = vsel %vm1574_vm4, %v1763_v57, %v1767_v33  ;;  %v1669_v1 = vrot.slane %v11828_v10, 1  ;;  %v11829_v57 = vshrl.u32 %v7906_v15, 16 }
 0x207   : > { %11823 = vst [vmem:[#allocation36_spill] sm:$0xff] %v8208_v47  ;;  %1851 = vrot.lane.b32.xlu0 %v8208_v47, %s7457_s25  ;;  %v1472_v43 = vunpack.c.l.b16 %v1364_v18 }
 0x208   : > { %v8219_v27 = vsel %vm3041_vm5, %v3144_v29, %v3147_v28  ;;  %v1665_v29 = vor.u32 %v1664_v13, %v11830_v53 }
 0x209   : > { %11827 = vst [vmem:[#allocation39_spill] sm:$0xff] %v8219_v27  ;;  %v992_v55 = vpop.f32.mrf.mxu0 }
 0x20a   : > { %v1257_v8 = vadd.f32 %v8071_v20, %v992_v55  ;;  %1536 = vrot.lane.b32.xlu1 %v7906_v15, %s7455_s18  ;;  %v8234_v55 = vsel %vm1574_vm4, %v1665_v29, %v1669_v1  ;;  %v2467_v28 = vpop.f32.mrf.mxu2 }
 0x20b   : > { %11831 = vst [vmem:[#allocation40_spill] sm:$0xff] %v8234_v55 }
 0x20c   : > { %1314 = vst.msk [vmem:[%s7664_s24 + $0xd6] sm:$0xff] %vm1273_vm9, %v1257_v8  ;;  %v1365_v41 = vpack.c.bf16 %v1257_v8, %v1257_v8  ;;  %1825 = vrot.lane.b32.xlu2 %v11829_v57, %s7457_s25 }
 0x20e   : > { %v1473_v33 = vunpack.c.l.b16 %v1365_v41 }
 0x20f   : > { %1823 = vrot.lane.b32.xlu0 %v8234_v55, %s7457_s25 }
 0x210   : > { %v2367_v10 = vpop.f32.mrf.mxu1  ;;  %v8238_v27 = vpack.c.b16 %v1473_v33, %v1472_v43 }
 0x211   : > { %v8240_v8 = vadd.f32 %v2467_v28, %v2367_v10  ;;  %v994_v26 = vpop.f32.mrf.mxu0 }
 0x212   : > { %v1258_v57 = vadd.f32 %v7685_v34, %v994_v26  ;;  %1538 = vrot.lane.b32.xlu1 %v7928_v14, %s7455_s18  ;;  %v1772_v13 = vshrl.u32 %v8238_v27, 16  ;;  %v1774_v18 = vshll.u32 %v8238_v27, 16  ;;  %v8251_v26 = vpop.f32.mrf.mxu2 }
 0x213   : > { %11832 = vst [vmem:[#allocation41_spill] sm:$0xff] %v8240_v8 }
 0x214   : > { %1315 = vst.msk [vmem:[%s7664_s24 + $0xde] sm:$0x3] %vm1275_vm10, %v1258_v57  ;;  %v1366_v1 = vpack.c.bf16 %v1258_v57, %v1258_v57  ;;  %v3149_v41 = vrot.slane %v1772_v13, 1  ;;  %v3150_v53 = vrot.slane %v1774_v18, 2  ;;  %v1776_v28 = vrot.slane %v1774_v18, 1 }
 0x215   : > { %11833 = vst [vmem:[#allocation42_spill] sm:$0xff] %v8251_v26 }
 0x216   : > { %v1474_v29 = vunpack.c.l.b16 %v1366_v1  ;;  %v3151_v43 = vor.u32 %v3150_v53, %v3149_v41  ;;  %v1777_v18 = vor.u32 %v1776_v28, %v1772_v13 }
 0x218   : > { %v8249_v33 = vpack.c.b16 %v1474_v29, %v1474_v29  ;;  %v8253_v8 = vpop.f32.mrf.mxu1 }
 0x219   : > { %v997_v10 = vpop.f32.mrf.mxu0  ;;  %11834 = vst [vmem:[#allocation43_spill] sm:$0xff] %v8253_v8  ;;  %v11836_v8 = vshll.u32 %v7928_v14, 16 }
 0x21a   : > { %v1259_v61 = vadd.f32 %v7651_v7, %v997_v10  ;;  %1566 = vrot.lane.b32.xlu1 %v8238_v27, %s7455_s18  ;;  %1568 = vrot.lane.b32.xlu0 %v8249_v33, %s7455_s18  ;;  %v1779_v57 = vshll.u32 %v8249_v33, 16  ;;  %v1783_v1 = vshrl.u32 %v8249_v33, 16  ;;  %v2472_v0 = vpop.f32.mrf.mxu2 }
 0x21b   : > { %v1678_v47 = vrot.slane %v11836_v8, 1 }
 0x21c   : > { %1316 = vst.msk [vmem:[%s7664_s24 + $0xde] sm:$0xfc] %vm1271_vm7, %v1259_v61  ;;  %v1781_v41 = vrot.slane %v1779_v57, 1  ;;  %v3152_v53 = vrot.slane %v1783_v1, 1  ;;  %v3153_v29 = vrot.slane %v1779_v57, 2  ;;  %v1367_v13 = vpack.c.bf16 %v1259_v61, %v1259_v61 }
 0x21e   : > { %v8265_v26 = vsel %vm1574_vm4, %v1777_v18, %v1781_v41  ;;  %v3154_v10 = vor.u32 %v3153_v29, %v3152_v53  ;;  %v11838_v18 = vshll.u32 %v7943_v2, 16  ;;  %v1475_v29 = vunpack.c.l.b16 %v1367_v13 }
 0x21f   : > { %11835 = vst [vmem:[#allocation44_spill] sm:$0xff] %v8265_v26  ;;  %1855 = vrot.lane.b32.xlu2 %v8265_v26, %s7457_s25 }
 0x220   : > { %v8272_v55 = vsel %vm3041_vm5, %v3151_v43, %v3154_v10  ;;  %v1683_v41 = vrot.slane %v11838_v18, 1  ;;  %v11840_v43 = vshrl.u32 %v7928_v14, 16 }
 0x221   : > { %11837 = vst [vmem:[#allocation45_spill] sm:$0xff] %v8272_v55  ;;  %v999_v45 = vpop.f32.mrf.mxu0 }
 0x222   : > { %v1260_v28 = vadd.f32 %v8071_v20, %v999_v45  ;;  %1540 = vrot.lane.b32.xlu0 %v7943_v2, %s7455_s18  ;;  %1857 = vrot.lane.b32.xlu1 %v1783_v1, %s7457_s25  ;;  %v1679_v61 = vor.u32 %v1678_v47, %v11840_v43 }
 0x223   : > { %v2372_v57 = vpop.f32.mrf.mxu1 }
 0x224   : > { %v8280_v53 = vadd.f32 %v2472_v0, %v2372_v57  ;;  %1317 = vst.msk [vmem:[%s7664_s24 + $0xe6] sm:$0xff] %vm1273_vm9, %v1260_v28  ;;  %v1368_v8 = vpack.c.bf16 %v1260_v28, %v1260_v28  ;;  %v8287_v10 = vsel %vm1574_vm4, %v1679_v61, %v1683_v41 }
 0x225   : > { %11841 = vst [vmem:[#allocation47_spill] sm:$0xff] %v8287_v10 }
 0x226   : > { %11839 = vst [vmem:[#allocation46_spill] sm:$0xff] %v8280_v53  ;;  %v1476_v45 = vunpack.c.l.b16 %v1368_v8 }
 0x227   : > { %1827 = vrot.lane.b32.xlu2 %v8287_v10, %s7457_s25 }
 0x228   : > { %v8291_v1 = vpack.c.b16 %v1476_v45, %v1475_v29 }
 0x229   : > { %v1002_v55 = vpop.f32.mrf.mxu0 }
 0x22a   : > { %v1261_v0 = vadd.f32 %v7685_v34, %v1002_v55  ;;  %1570 = vrot.lane.b32.xlu0 %v8291_v1, %s7455_s18  ;;  %v1786_v28 = vshrl.u32 %v8291_v1, 16  ;;  %v1788_v47 = vshll.u32 %v8291_v1, 16 }
 0x22b   : > { %v8320_v26 = vpop.f32.mrf.mxu1 }
 0x22c   : > { %1318 = vst.msk [vmem:[%s7664_s24 + $0xee] sm:$0x3] %vm1275_vm10, %v1261_v0  ;;  %v1369_v13 = vpack.c.bf16 %v1261_v0, %v1261_v0  ;;  %v3391_v57 = vrot.slane %v1786_v28, 1  ;;  %v3392_v18 = vrot.slane %v1788_v47, 2  ;;  %v1790_v61 = vrot.slane %v1788_v47, 1 }
 0x22d   : > { %11845 = vst [vmem:[#allocation51_spill] sm:$0xff] %v8320_v26 }
 0x22e   : > { %v1477_v41 = vunpack.c.l.b16 %v1369_v13  ;;  %v3393_v8 = vor.u32 %v3392_v18, %v3391_v57  ;;  %v1791_v57 = vor.u32 %v1790_v61, %v1786_v28 }
 0x230   : > { %v8300_v43 = vpack.c.b16 %v1477_v41, %v1477_v41 }
 0x231   : > { %v1004_v29 = vpop.f32.mrf.mxu0 }
 0x232   : > { %v1262_v55 = vadd.f32 %v7651_v7, %v1004_v29  ;;  %1572 = vrot.lane.b32.xlu2 %v8300_v43, %s7455_s18  ;;  %v1797_v45 = vshrl.u32 %v8300_v43, 16  ;;  %v1793_v53 = vshll.u32 %v8300_v43, 16  ;;  %v8315_v7 = vpop.f32.mrf.mxu2 }
 0x233   : > { %11843 = vst [vmem:[#allocation49_spill] sm:$0xff] %v8315_v7  ;;  %v11851_v7 = vshrl.u32 %v7976_v37, 16 }
 0x234   : > { %1319 = vst.msk [vmem:[%s7664_s24 + $0xee] sm:$0xfc] %vm1271_vm7, %v1262_v55  ;;  %1861 = vrot.lane.b32.xlu0 %v1797_v45, %s7457_s25  ;;  %v3394_v0 = vrot.slane %v1797_v45, 1  ;;  %v3395_v13 = vrot.slane %v1793_v53, 2  ;;  %v1795_v18 = vrot.slane %v1793_v53, 1  ;;  %v1370_v62 = vpack.c.bf16 %v1262_v55, %v1262_v55 }
 0x235   : > { %v3384_v53 = vld [vmem:[%s11703_s5 + $0x8] sm:$0x3] }
 0x236   : > { %v3396_v47 = vor.u32 %v3395_v13, %v3394_v0  ;;  %v8311_v41 = vsel %vm1574_vm4, %v1791_v57, %v1795_v18  ;;  %v3555_v28 = vunpack.c.l.b16 %v3384_v53  ;;  %v2237_v13 = vunpack.c.l.b16 %v1370_v62 }
 0x237   : > { %11842 = vst [vmem:[#allocation48_spill] sm:$0xff] %v8311_v41  ;;  %1859 = vrot.lane.b32.xlu1 %v8311_v41, %s7457_s25  ;;  %v11846_v57 = vshrl.u32 %v7943_v2, 16 }
 0x238   : > { %v8318_v29 = vsel %vm3041_vm5, %v3393_v8, %v3396_v47  ;;  %v3557_v0 = vpack.c.b16 %v3555_v28, %v3555_v28 }
 0x239   : > { %11844 = vst [vmem:[#allocation50_spill] sm:$0xff] %v8318_v29  ;;  %v1007_v10 = vpop.f32.mrf.mxu0 }
 0x23a   : > { %v1263_v45 = vadd.f32 %v8071_v20, %v1007_v10  ;;  %v3562_v55 = vsel %vm864_vm0, %v3557_v0, 0  ;;  %v2477_v20 = vpop.f32.mrf.mxu2 }
 0x23b   : > { %3570 = vmatpush.bf16.msrb.mxu2 %v3562_v55 }
 0x23c   : > { %1320 = vst.msk [vmem:[%s7664_s24 + $0xf6] sm:$0xff] %vm1273_vm9, %v1263_v45  ;;  %v1371_v61 = vpack.c.bf16 %v1263_v45, %v1263_v45 }
 0x23e   : > { %v2238_v8 = vunpack.c.l.b16 %v1371_v61  ;;  %v7285_v61 = vld [vmem:[%s7580_s29 + $0xe0] sm:$0xff] }
 0x23f   : > { %1829 = vrot.lane.b32.xlu1 %v11846_v57, %s7457_s25  ;;  %7026 = vmatmul.msk.bf16.vlgmr.msra.gmra.mxu3 %vm773_vm1, %v7285_v61 }
 0x240   : > { %v8332_v10 = vpack.c.b16 %v2238_v8, %v2237_v13  ;;  %7298 = vmatpush.bf16.msra.mxu3 %v7811_v5 }
 0x241   : > { %v2377_v18 = vpop.f32.mrf.mxu1  ;;  %v1009_v47 = vpop.f32.mrf.mxu0 }
 0x242   : > { %v8334_v53 = vadd.f32 %v2477_v20, %v2377_v18  ;;  %v1264_v45 = vadd.f32 %v7685_v34, %v1009_v47  ;;  %2242 = vrot.lane.b32.xlu2 %v8332_v10, %s7455_s18  ;;  %v2247_v62 = vshrl.u32 %v8332_v10, 16  ;;  %v2249_v28 = vshll.u32 %v8332_v10, 16 }
 0x244   : > { %11847 = vst [vmem:[#allocation52_spill] sm:$0xff] %v8334_v53  ;;  %v1372_v0 = vpack.c.bf16 %v1264_v45, %v1264_v45  ;;  %v3659_v13 = vrot.slane %v2247_v62, 1  ;;  %v3660_v8 = vrot.slane %v2249_v28, 2  ;;  %v2251_v20 = vrot.slane %v2249_v28, 1 }
 0x245   : > { %1321 = vst.msk [vmem:[%s7664_s24 + $0xfe] sm:$0x3] %vm1275_vm10, %v1264_v45  ;;  %v11848_v45 = vshll.u32 %v7976_v37, 16  ;;  %vm6037_vm10 = vsmask.f32 7440 }
 0x246   : > { %v2239_v57 = vunpack.c.l.b16 %v1372_v0  ;;  %v3661_v55 = vor.u32 %v3660_v8, %v3659_v13  ;;  %v2252_v0 = vor.u32 %v2251_v20, %v2247_v62  ;;  %v11849_v8 = vshll.u32 %v7991_v6, 16  ;;  %v7286_v62 = vld [vmem:[%s7580_s29 + $0xe8] sm:$0xff] }
 0x247   : > { %v1692_v29 = vrot.slane %v11848_v45, 1  ;;  %v11854_v20 = vshll.u32 %v8154_v17, 16 }
 0x248   : > { %v8346_v34 = vpack.c.b16 %v2239_v57, %v2239_v57  ;;  %v1697_v28 = vrot.slane %v11849_v8, 1  ;;  %v11860_v8 = vshll.u32 %v8032_v59, 16 }
 0x249   : > { %v1693_v26 = vor.u32 %v1692_v29, %v11851_v7  ;;  %v11855_v7 = vshll.u32 %v8165_v38, 16 }
 0x24a   : > { %2244 = vrot.lane.b32.xlu1 %v8346_v34, %s7455_s18  ;;  %v2258_v18 = vshrl.u32 %v8346_v34, 16  ;;  %v2254_v47 = vshll.u32 %v8346_v34, 16 }
 0x24b   : > { %v1753_v29 = vrot.slane %v11855_v7, 1 }
 0x24c   : > { %2262 = vrot.lane.b32.xlu2 %v2258_v18, %s7457_s25  ;;  %v3662_v61 = vrot.slane %v2258_v18, 1  ;;  %v3663_v5 = vrot.slane %v2254_v47, 2  ;;  %v2256_v13 = vrot.slane %v2254_v47, 1  ;;  %v8368_v18 = vsel %vm1574_vm4, %v1693_v26, %v1697_v28 }
 0x24d   : > { %11853 = vst [vmem:[#allocation55_spill] sm:$0xff] %v8368_v18  ;;  %v1748_v47 = vrot.slane %v11854_v20, 1  ;;  %v11856_v26 = vshrl.u32 %v8154_v17, 16  ;;  %v1706_v28 = vrot.slane %v11860_v8, 1 }
 0x24e   : > { %v3664_v57 = vor.u32 %v3663_v5, %v3662_v61  ;;  %v8358_v53 = vsel %vm1574_vm4, %v2252_v0, %v2256_v13  ;;  %v11858_v5 = vshrl.u32 %v7991_v6, 16  ;;  %v8394_v0 = vpop.permute.xlu2 %1534  ;;  %v11859_v13 = vshrl.u32 %v8165_v38, 16 }
 0x24f   : > { %11850 = vst [vmem:[#allocation53_spill] sm:$0xff] %v8358_v53  ;;  %2260 = vrot.lane.b32.xlu0 %v8358_v53, %s7457_s25  ;;  %7027 = vmatmul.msk.bf16.gmra.mxu3 %vm773_vm1, %v7286_v62  ;;  %v11861_v62 = vshll.u32 %v8046_v44, 16 }
 0x250   : > { %v8365_v45 = vsel %vm3041_vm5, %v3661_v55, %v3664_v57  ;;  %v1749_v55 = vor.u32 %v1748_v47, %v11856_v26  ;;  %v11862_v47 = vshll.u32 %v8077_v58, 16  ;;  %v11864_v26 = vshrl.u32 %v8032_v59, 16 }
 0x251   : > { %11852 = vst [vmem:[#allocation54_spill] sm:$0xff] %v8365_v45  ;;  %v1711_v20 = vrot.slane %v11861_v62, 1  ;;  %v11867_v62 = vshrl.u32 %v8077_v58, 16 }
 0x252   : > { %1831 = vrot.lane.b32.xlu1 %v8368_v18, %s7457_s25  ;;  %v8387_v61 = vsel %vm1574_vm4, %v1749_v55, %v1753_v29  ;;  %v1720_v7 = vrot.slane %v11862_v47, 1  ;;  %v11863_v29 = vshrl.u32 %v8046_v44, 16  ;;  %v1707_v55 = vor.u32 %v1706_v28, %v11864_v26 }
 0x253   : > { %11857 = vst [vmem:[#allocation56_spill] sm:$0xff] %v8387_v61 }
 0x254   : > { %1544 = vrot.lane.b32.xlu2 %v7991_v6, %s7455_s18  ;;  %v8419_v8 = vsel %vm1574_vm4, %v1707_v55, %v1711_v20  ;;  %v1721_v47 = vor.u32 %v1720_v7, %v11867_v62  ;;  %v11869_v20 = vshll.u32 %v8124_v30, 16  ;;  %v1904_v55 = vrot.slane %v8197_v3, 1  ;;  %v7284_v62 = vld [vmem:[%s7580_s29 + $0xd8] sm:$0xff] }
 0x255   : > { %11866 = vst [vmem:[#allocation57_spill] sm:$0xff] %v8419_v8  ;;  %v11870_v7 = vshll.u32 %v8135_v54, 16  ;;  %7025 = vmatmul.msk.bf16.gmra.mxu0 %vm773_vm1, %v7284_v62 }
 0x256   : > { %v1563_v57 = vpop.permute.xlu2 %1562  ;;  %v1734_v26 = vrot.slane %v11869_v20, 1  ;;  %v7192_v20 = vld [vmem:[%s11703_s5 + $0x2c] sm:$0x3] }
 0x257   : > { %1542 = vrot.lane.b32.xlu0 %v7976_v37, %s7455_s18 }
 0x25a   : > { %1558 = vrot.lane.b32.xlu1 %v8154_v17, %s7455_s18 }
 0x25c   : > { %1847 = vrot.lane.b32.xlu2 %v8387_v61, %s7457_s25  ;;  %v11871_v61 = vshrl.u32 %v8124_v30, 16 }
 0x25f   : > { %1833 = vrot.lane.b32.xlu0 %v11858_v5, %s7457_s25  ;;  %v11865_v5 = vshll.u32 %v8091_v50, 16 }
 0x262   : > { %1849 = vrot.lane.b32.xlu1 %v11859_v13, %s7457_s25  ;;  %v1725_v13 = vrot.slane %v11865_v5, 1 }
 0x264   : > { %1546 = vrot.lane.b32.xlu2 %v8032_v59, %s7455_s18  ;;  %v8426_v45 = vsel %vm1574_vm4, %v1721_v47, %v1725_v13  ;;  %v1739_v13 = vrot.slane %v11870_v7, 1  ;;  %v1903_v47 = vrot.slane %v8186_v51, 1 }
 0x265   : > { %11868 = vst [vmem:[#allocation58_spill] sm:$0xff] %v8426_v45 }
 0x267   : > { %1560 = vrot.lane.b32.xlu0 %v8165_v38, %s7455_s18 }
 0x26a   : > { %1548 = vrot.lane.b32.xlu1 %v8046_v44, %s7455_s18 }
 0x26c   : > { %1837 = vrot.lane.b32.xlu2 %v11863_v29, %s7457_s25  ;;  %v1854_v29 = vpop.permute.xlu2 %1853 }
 0x26f   : > { %1835 = vrot.lane.b32.xlu0 %v8419_v8, %s7457_s25 }
 0x272   : > { %1839 = vrot.lane.b32.xlu1 %v8426_v45, %s7457_s25  ;;  %v1735_v45 = vor.u32 %v1734_v26, %v11871_v61 }
 0x274   : > { %v1565_v28 = vpop.permute.xlu1 %1564  ;;  %1552 = vrot.lane.b32.xlu2 %v8091_v50, %s7455_s18  ;;  %v8461_v3 = vsel %vm1574_vm4, %v1735_v45, %v1739_v13  ;;  %v1826_v62 = vpop.permute.xlu2 %1825 }
 0x275   : > { %v1995_v5 = vsel %vm773_vm1, %v1565_v28, %v1854_v29  ;;  %v7126_v29 = vld [vmem:[%s11703_s5 + $0x14] sm:$0x3]  ;;  %v8453_v28 = vsel %vm1863_vm2, %v1903_v47, %v1904_v55  ;;  %v1883_v47 = vrot.slane %v7906_v15, 1 }
 0x276   : > { %v2063_v53 = vsel %vm1273_vm9, %v1995_v5, %v1904_v55  ;;  %11872 = vst [vmem:[#allocation59_spill] sm:$0xff] %v8453_v28  ;;  %v3855_v5 = vunpack.c.l.b16 %v7192_v20  ;;  %v3421_v61 = vunpack.c.l.b16 %v7126_v29 }
 0x277   : > { %1550 = vrot.lane.b32.xlu0 %v8077_v58, %s7455_s18  ;;  %v2208_v51 = vshll.u32 %v2063_v53, 16  ;;  %v11873_v53 = vshrl.u32 %v8091_v50, 16 }
 0x278   : > { %v3857_v55 = vpack.c.b16 %v3855_v5, %v3855_v5  ;;  %v1882_v5 = vrot.slane %v7890_v32, 1 }
 0x279   : > { %v1852_v41 = vpop.permute.xlu0 %1851  ;;  %v2210_v13 = vrot.slane %v2208_v51, 1 }
 0x27a   : > { %v1992_v7 = vsel %vm773_vm1, %v1563_v57, %v1852_v41  ;;  %1554 = vrot.lane.b32.xlu1 %v8124_v30, %s7455_s18  ;;  %v3423_v41 = vpack.c.b16 %v3421_v61, %v3421_v61 }
 0x27b   : > { %v2061_v26 = vsel %vm1273_vm9, %v1992_v7, %v8453_v28  ;;  %v3862_v7 = vsel %vm864_vm0, %v3857_v55, 0 }
 0x27c   : > { %v2204_v8 = vshll.u32 %v2061_v26, 16  ;;  %v1537_v18 = vpop.permute.xlu1 %1536  ;;  %1843 = vrot.lane.b32.xlu2 %v8461_v3, %s7457_s25  ;;  %v2202_v57 = vshrl.u32 %v2061_v26, 16  ;;  %v3459_v45 = vsel %vm864_vm0, %v3423_v41, 0  ;;  %3870 = vmatpush.bf16.msrb.mxu0 %v3862_v7  ;;  %v1856_v41 = vpop.permute.xlu2 %1855 }
 0x27d   : > { %v1953_v29 = vsel %vm773_vm1, %v1537_v18, %v1826_v62  ;;  %3467 = vmatpush.bf16.msrb.mxu1 %v3459_v45  ;;  %v11874_v62 = vshrl.u32 %v8135_v54, 16  ;;  %v1907_v45 = vrot.slane %v8249_v33, 1 }
 0x27e   : > { %v2206_v20 = vrot.slane %v2204_v8, 1  ;;  %v2035_v61 = vsel %vm1273_vm9, %v1953_v29, %v1883_v47  ;;  %v8475_v8 = vsel %vm1863_vm2, %v1882_v5, %v1883_v47 }
 0x27f   : > { %1841 = vrot.lane.b32.xlu0 %v11873_v53, %s7457_s25 }
 0x280   : > { %v2207_v28 = vor.u32 %v2206_v20, %v2202_v57  ;;  %v2138_v57 = vshll.u32 %v2035_v61, 16 }
 0x281   : > { %v1824_v26 = vpop.permute.xlu0 %1823 }
 0x282   : > { %v1950_v18 = vsel %vm773_vm1, %v8394_v0, %v1824_v26  ;;  %1845 = vrot.lane.b32.xlu1 %v11874_v62, %s7457_s25  ;;  %v8483_v55 = vsel %vm1574_vm4, %v2207_v28, %v2210_v13  ;;  %v2140_v28 = vrot.slane %v2138_v57, 1 }
 0x283   : > { %v2033_v51 = vsel %vm1273_vm9, %v1950_v18, %v8475_v8  ;;  %7078 = vmatmul.msk.bf16.vlgmr.msrb.gmra.mxu3 %vm2295_vm11, %v8483_v55 }
 0x284   : > { %v2134_v47 = vshll.u32 %v2033_v51, 16  ;;  %v8489_v20 = vpop.permute.xlu1 %1538  ;;  %2927 = vrot.lane.b32.xlu2 %v7610_v21, %s7458_s16  ;;  %v2132_v0 = vshrl.u32 %v2033_v51, 16  ;;  %v1906_v21 = vrot.slane %v8238_v27, 1  ;;  %v1828_v26 = vpop.permute.xlu2 %1827 }
 0x286   : > { %v2136_v29 = vrot.slane %v2134_v47, 1  ;;  %v8509_v61 = vsel %vm1863_vm2, %v1906_v21, %v1907_v45 }
 0x287   : > { %1556 = vrot.lane.b32.xlu0 %v8135_v54, %s7455_s18 }
 0x288   : > { %v2137_v7 = vor.u32 %v2136_v29, %v2132_v0 }
 0x28a   : > { %3009 = vrot.lane.b32.xlu1 %v7620_v42, %s7457_s25  ;;  %v8499_v53 = vsel %vm1574_vm4, %v2137_v7, %v2140_v28 }
 0x28b   : > { %7071 = vmatmul.msk.bf16.gmra.mxu1 %vm2295_vm11, %v8499_v53  ;;  %7092 = vmatmul.msk.bf16.gmra.mxu2 %vm2295_vm11, %v8499_v53 }
 0x28c   : > { %v1567_v13 = vpop.permute.xlu1 %1566  ;;  %v1569_v5 = vpop.permute.xlu0 %1568  ;;  %2929 = vrot.lane.b32.xlu2 %v7637_v60, %s7458_s16 }
 0x28d   : > { %v1998_v42 = vsel %vm773_vm1, %v1567_v13, %v1856_v41  ;;  %v1573_v0 = vpop.permute.xlu2 %1572 }
 0x28e   : > { %v2065_v18 = vsel %vm1273_vm9, %v1998_v42, %v8509_v61 }
 0x28f   : > { %2974 = vrot.lane.b32.xlu0 %v7627_v48, %s7455_s18  ;;  %v2214_v62 = vshll.u32 %v2065_v18, 16  ;;  %v2212_v28 = vshrl.u32 %v2065_v18, 16  ;;  %v3163_v18 = vrot.slane %v7687_v35, 2 }
 0x291   : > { %v2216_v47 = vrot.slane %v2214_v62, 1 }
 0x292   : > { %3205 = vrot.lane.b32.xlu1 %v7623_v46, %s7459_s23  ;;  %v3161_v46 = vrot.slane %v7653_v9, 2 }
 0x293   : > { %v2217_v21 = vor.u32 %v2216_v47, %v2212_v28  ;;  %v1909_v28 = vrot.slane %v8291_v1, 1 }
 0x294   : > { %v1541_v51 = vpop.permute.xlu0 %1540  ;;  %v1858_v57 = vpop.permute.xlu1 %1857  ;;  %3011 = vrot.lane.b32.xlu2 %v7852_v12, %s7457_s25  ;;  %v7290_v12 = vld [vmem:[%s11703_s5] sm:$0xff] }
 0x295   : > { %v2001_v41 = vsel %vm773_vm1, %v1569_v5, %v1858_v57  ;;  %3571 = vmatpush.bf16.msrb.mxu2 %v7290_v12 }
 0x296   : > { %v2067_v29 = vsel %vm1273_vm9, %v2001_v41, %v1907_v45  ;;  %v3164_v45 = vrot.slane %v7698_v49, 2  ;;  %v1910_v49 = vrot.slane %v8300_v43, 1  ;;  %v1885_v41 = vrot.slane %v7928_v14, 1 }
 0x297   : > { %v2218_v7 = vshll.u32 %v2067_v29, 16  ;;  %2976 = vrot.lane.b32.xlu0 %v7670_v24, %s7455_s18  ;;  %v3160_v24 = vrot.slane %v7637_v60, 2  ;;  %v1886_v60 = vrot.slane %v7943_v2, 1  ;;  %v1956_v29 = vsel %vm773_vm1, %v8489_v20, %v1828_v26 }
 0x298   : > { %v3165_v62 = vsel %vm2344_vm3, %v3163_v18, %v3164_v45 }
 0x299   : > { %v2220_v48 = vrot.slane %v2218_v7, 1  ;;  %v3162_v42 = vsel %vm2344_vm3, %v3160_v24, %v3161_v46  ;;  %v8561_v46 = vsel %vm1863_vm2, %v1885_v41, %v1886_v60 }
 0x29a   : > { %2931 = vrot.lane.b32.xlu1 %v7687_v35, %s7458_s16  ;;  %v3167_v35 = vrot.slane %v7730_v25, 2 }
 0x29b   : > { %v8531_v13 = vsel %vm1574_vm4, %v2217_v21, %v2220_v48  ;;  %v3166_v21 = vrot.slane %v7721_v11, 2 }
 0x29c   : > { %7079 = vmatmul.msk.bf16.gmra.mxu3 %vm2295_vm11, %v8531_v13  ;;  %2978 = vrot.lane.b32.xlu2 %v7709_v63, %s7455_s18  ;;  %v1571_v5 = vpop.permute.xlu0 %1570  ;;  %v8539_v9 = vpop.permute.xlu2 %2242 }
 0x29d   : > { %v3168_v26 = vsel %vm2344_vm3, %v3166_v21, %v3167_v35  ;;  %v2265_v21 = vrot.slane %v8346_v34, 1 }
 0x29f   : > { %3207 = vrot.lane.b32.xlu0 %v3162_v42, %s7459_s23 }
 0x2a2   : > { %3209 = vrot.lane.b32.xlu1 %v3165_v62, %s7459_s23 }
 0x2a4   : > { %2933 = vrot.lane.b32.xlu2 %v7721_v11, %s7458_s16 }
 0x2a6   : > { %v1862_v63 = vpop.permute.xlu0 %1861  ;;  %v2263_v57 = vpop.permute.xlu2 %2262 }
 0x2a7   : > { %v2007_v47 = vsel %vm773_vm1, %v1573_v0, %v1862_v63  ;;  %3013 = vrot.lane.b32.xlu0 %v7886_v23, %s7457_s25  ;;  %v8564_v0 = vsel %vm1863_vm2, %v1909_v28, %v1910_v49  ;;  %v2037_v23 = vsel %vm1273_vm9, %v1956_v29, %v8561_v46 }
 0x2a8   : > { %v2071_v7 = vsel %vm1273_vm9, %v2007_v47, %v1910_v49  ;;  %v2144_v24 = vshll.u32 %v2037_v23, 16  ;;  %v2142_v41 = vshrl.u32 %v2037_v23, 16 }
 0x2a9   : > { %v1860_v48 = vpop.permute.xlu1 %1859  ;;  %v2228_v11 = vshll.u32 %v2071_v7, 16 }
 0x2aa   : > { %v2004_v25 = vsel %vm773_vm1, %v1571_v5, %v1860_v48  ;;  %3015 = vrot.lane.b32.xlu1 %v7947_v19, %s7457_s25  ;;  %v2146_v49 = vrot.slane %v2144_v24, 1  ;;  %v3173_v48 = vrot.slane %v7802_v56, 2 }
 0x2ab   : > { %v2069_v20 = vsel %vm1273_vm9, %v2004_v25, %v8564_v0  ;;  %v2230_v19 = vrot.slane %v2228_v11, 1 }
 0x2ac   : > { %v2224_v12 = vshll.u32 %v2069_v20, 16  ;;  %3211 = vrot.lane.b32.xlu2 %v3168_v26, %s7459_s23  ;;  %v2222_v45 = vshrl.u32 %v2069_v20, 16  ;;  %v2147_v7 = vor.u32 %v2146_v49, %v2142_v41  ;;  %v2264_v26 = vrot.slane %v8332_v10, 1  ;;  %v11875_v49 = vld [vmem:[#allocation22_spill] sm:$0xff] }
 0x2ad   : > { %v1888_v41 = vrot.slane %v7976_v37, 1 }
 0x2ae   : > { %v2226_v42 = vrot.slane %v2224_v12, 1  ;;  %v8575_v18 = vpop.permute.xlu2 %1544  ;;  %v8617_v56 = vsel %vm1863_vm2, %v2264_v26, %v2265_v21 }
 0x2af   : > { %2980 = vrot.lane.b32.xlu0 %v7743_v40, %s7455_s18 }
 0x2b0   : > { %v2227_v5 = vor.u32 %v2226_v42, %v2222_v45 }
 0x2b1   : > { %v1830_v62 = vpop.permute.xlu1 %1829 }
 0x2b2   : > { %v1959_v63 = vsel %vm773_vm1, %v1541_v51, %v1830_v62  ;;  %2982 = vrot.lane.b32.xlu1 %v7775_v22, %s7455_s18  ;;  %v8583_v47 = vsel %vm1574_vm4, %v2227_v5, %v2230_v19  ;;  %v1889_v62 = vrot.slane %v7991_v6, 1 }
 0x2b3   : > { %v2039_v35 = vsel %vm1273_vm9, %v1959_v63, %v1886_v60  ;;  %7080 = vmatmul.msk.bf16.gmra.mxu3 %vm2295_vm11, %v8583_v47  ;;  %v3169_v60 = vrot.slane %v7753_v52, 2 }
 0x2b4   : > { %v2148_v29 = vshll.u32 %v2039_v35, 16  ;;  %3017 = vrot.lane.b32.xlu2 %v7995_v39, %s7457_s25  ;;  %v3170_v39 = vrot.slane %v7764_v4, 2  ;;  %v3172_v4 = vrot.slane %v7787_v36, 2 }
 0x2b6   : > { %v2150_v40 = vrot.slane %v2148_v29, 1  ;;  %v1848_v28 = vpop.permute.xlu2 %1847  ;;  %v3171_v20 = vsel %vm2344_vm3, %v3169_v60, %v3170_v39  ;;  %v8633_v39 = vsel %vm1863_vm2, %v1888_v41, %v1889_v62  ;;  %v11877_v60 = vld [vmem:[#allocation25_spill] sm:$0xff] }
 0x2b7   : > { %2935 = vrot.lane.b32.xlu0 %v7753_v52, %s7458_s16  ;;  %v3174_v52 = vsel %vm2344_vm3, %v3172_v4, %v3173_v48  ;;  %v1901_v4 = vrot.slane %v8165_v38, 1 }
 0x2b8   : > { %v8593_v22 = vsel %vm1574_vm4, %v2147_v7, %v2150_v40  ;;  %v3175_v7 = vrot.slane %v7829_v31, 2 }
 0x2b9   : > { %7072 = vmatmul.msk.bf16.gmra.mxu1 %vm2295_vm11, %v8593_v22  ;;  %7093 = vmatmul.msk.bf16.gmra.mxu2 %vm2295_vm11, %v8593_v22 }
 0x2ba   : > { %2937 = vrot.lane.b32.xlu1 %v7787_v36, %s7458_s16 }
 0x2bc   : > { %v2245_v51 = vpop.permute.xlu1 %2244  ;;  %2984 = vrot.lane.b32.xlu2 %v7819_v16, %s7455_s18 }
 0x2bd   : > { %v2272_v25 = vsel %vm773_vm1, %v2245_v51, %v2263_v57 }
 0x2be   : > { %v8608_v23 = vpop.permute.xlu2 %1546  ;;  %v2276_v16 = vsel %vm1273_vm9, %v2272_v25, %v2265_v21 }
 0x2bf   : > { %3213 = vrot.lane.b32.xlu0 %v3171_v20, %s7459_s23  ;;  %v2283_v24 = vshll.u32 %v2276_v16, 16  ;;  %v11878_v16 = vld [vmem:[#allocation15_spill] sm:$0xff] }
 0x2c1   : > { %v2261_v11 = vpop.permute.xlu0 %2260  ;;  %v2285_v35 = vrot.slane %v2283_v24, 1 }
 0x2c2   : > { %v2269_v57 = vsel %vm773_vm1, %v8539_v9, %v2261_v11  ;;  %3215 = vrot.lane.b32.xlu1 %v3174_v52, %s7459_s23  ;;  %v11876_v9 = vld [vmem:[#allocation14_spill] sm:$0xff]  ;;  %v1900_v11 = vrot.slane %v8154_v17, 1 }
 0x2c3   : > { %v2274_v12 = vsel %vm1273_vm9, %v2269_v57, %v8617_v56  ;;  %v3176_v63 = vrot.slane %v11876_v9, 2 }
 0x2c4   : > { %v2279_v36 = vshll.u32 %v2274_v12, 16  ;;  %v1832_v45 = vpop.permute.xlu1 %1831  ;;  %2939 = vrot.lane.b32.xlu2 %v7829_v31, %s7458_s16  ;;  %v2277_v42 = vshrl.u32 %v2274_v12, 16  ;;  %v8655_v24 = vsel %vm1863_vm2, %v1900_v11, %v1901_v4 }
 0x2c5   : > { %v3177_v25 = vsel %vm2344_vm3, %v3175_v7, %v3176_v63 }
 0x2c6   : > { %v2281_v19 = vrot.slane %v2279_v36, 1  ;;  %v1838_v5 = vpop.permute.xlu2 %1837 }
 0x2c7   : > { %3019 = vrot.lane.b32.xlu0 %v11875_v49, %s7457_s25 }
 0x2c8   : > { %v2282_v29 = vor.u32 %v2281_v19, %v2277_v42 }
 0x2c9   : > { %v1543_v40 = vpop.permute.xlu0 %1542 }
 0x2ca   : > { %v1962_v51 = vsel %vm773_vm1, %v1543_v40, %v1832_v45  ;;  %3021 = vrot.lane.b32.xlu1 %v11877_v60, %s7457_s25  ;;  %v8639_v48 = vsel %vm1574_vm4, %v2282_v29, %v2285_v35  ;;  %v11879_v45 = vld [vmem:[#allocation40_spill] sm:$0xff]  ;;  %v3179_v40 = vrot.slane %v7906_v15, 2  ;;  %v3182_v15 = vrot.slane %v7943_v2, 2 }
 0x2cb   : > { %v2041_v21 = vsel %vm1273_vm9, %v1962_v51, %v8633_v39  ;;  %7081 = vmatmul.msk.bf16.gmra.mxu3 %vm2295_vm11, %v8639_v48 }
 0x2cc   : > { %v1559_v31 = vpop.permute.xlu1 %1558  ;;  %3217 = vrot.lane.b32.xlu2 %v3177_v25, %s7459_s23  ;;  %v2154_v20 = vshll.u32 %v2041_v21, 16  ;;  %v2152_v49 = vshrl.u32 %v2041_v21, 16  ;;  %v3178_v21 = vrot.slane %v7890_v32, 2 }
 0x2cd   : > { %v1986_v52 = vsel %vm773_vm1, %v1559_v31, %v1848_v28 }
 0x2ce   : > { %v8648_v26 = vpop.permute.xlu2 %1552  ;;  %v2156_v12 = vrot.slane %v2154_v20, 1  ;;  %v2057_v42 = vsel %vm1273_vm9, %v1986_v52, %v8655_v24  ;;  %v3180_v11 = vsel %vm2344_vm3, %v3178_v21, %v3179_v40  ;;  %v3185_v40 = vrot.slane %v7991_v6, 2 }
 0x2cf   : > { %2986 = vrot.lane.b32.xlu0 %v11878_v16, %s7455_s18  ;;  %v2194_v28 = vshll.u32 %v2057_v42, 16  ;;  %v2192_v25 = vshrl.u32 %v2057_v42, 16  ;;  %v11880_v16 = vld [vmem:[#allocation47_spill] sm:$0xff]  ;;  %v1891_v42 = vrot.slane %v8032_v59, 1  ;;  %v3184_v21 = vrot.slane %v7976_v37, 2 }
 0x2d0   : > { %v2157_v29 = vor.u32 %v2156_v12, %v2152_v49  ;;  %v1892_v12 = vrot.slane %v8046_v44, 1 }
 0x2d1   : > { %v1834_v57 = vpop.permute.xlu0 %1833  ;;  %v2196_v7 = vrot.slane %v2194_v28, 1  ;;  %v3186_v6 = vsel %vm2344_vm3, %v3184_v21, %v3185_v40 }
 0x2d2   : > { %v1965_v36 = vsel %vm773_vm1, %v8575_v18, %v1834_v57  ;;  %2988 = vrot.lane.b32.xlu1 %v11879_v45, %s7455_s18  ;;  %v7291_v18 = vld [vmem:[%s11703_s5 + $0xc] sm:$0xff] }
 0x2d3   : > { %v2043_v19 = vsel %vm1273_vm9, %v1965_v36, %v1889_v62  ;;  %3468 = vmatpush.bf16.msrb.mxu1 %v7291_v18  ;;  %v2197_v52 = vor.u32 %v2196_v7, %v2192_v25  ;;  %v1895_v7 = vrot.slane %v8091_v50, 1  ;;  %v1894_v25 = vrot.slane %v8077_v58, 1 }
 0x2d4   : > { %v2158_v9 = vshll.u32 %v2043_v19, 16  ;;  %v1850_v63 = vpop.permute.xlu1 %1849  ;;  %3023 = vrot.lane.b32.xlu2 %v8475_v8, %s7457_s25 }
 0x2d6   : > { %v2160_v35 = vrot.slane %v2158_v9, 1  ;;  %v8666_v41 = vpop.permute.xlu2 %1843 }
 0x2d7   : > { %2941 = vrot.lane.b32.xlu0 %v7890_v32, %s7458_s16  ;;  %v3181_v32 = vrot.slane %v7928_v14, 2 }
 0x2d8   : > { %v8674_v62 = vsel %vm1574_vm4, %v2157_v29, %v2160_v35 }
 0x2d9   : > { %7073 = vmatmul.msk.bf16.gmra.mxu1 %vm2295_vm11, %v8674_v62  ;;  %7094 = vmatmul.msk.bf16.gmra.mxu2 %vm2295_vm11, %v8674_v62  ;;  %v1561_v8 = vpop.permute.xlu0 %1560  ;;  %v3183_v49 = vsel %vm2344_vm3, %v3181_v32, %v3182_v15  ;;  %v7289_v15 = vld [vmem:[%s11701_s3 + $0x10] sm:$0x30] }
 0x2da   : > { %v1989_v51 = vsel %vm773_vm1, %v1561_v8, %v1850_v63  ;;  %2943 = vrot.lane.b32.xlu1 %v7928_v14, %s7458_s16 }
 0x2db   : > { %v2059_v60 = vsel %vm1273_vm9, %v1989_v51, %v1901_v4 }
 0x2dc   : > { %v2198_v31 = vshll.u32 %v2059_v60, 16  ;;  %v1549_v20 = vpop.permute.xlu1 %1548  ;;  %2990 = vrot.lane.b32.xlu2 %v11880_v16, %s7455_s18 }
 0x2dd   : > { %v1971_v36 = vsel %vm773_vm1, %v1549_v20, %v1838_v5  ;;  %v1893_v5 = vsel %vm1863_vm2, %v1891_v42, %v1892_v12 }
 0x2de   : > { %v2200_v57 = vrot.slane %v2198_v31, 1  ;;  %v8692_v45 = vpop.permute.xlu2 %2927  ;;  %v2047_v19 = vsel %vm1273_vm9, %v1971_v36, %v1892_v12  ;;  %v11881_v12 = vld [vmem:[#allocation55_spill] sm:$0xff] }
 0x2df   : > { %3219 = vrot.lane.b32.xlu0 %v3180_v11, %s7459_s23  ;;  %v2168_v63 = vshll.u32 %v2047_v19, 16  ;;  %v7106_v11 = vld [vmem:[%s11701_s3 + $0x10] sm:$0xf] }
 0x2e0   : > { %v8697_v4 = vsel %vm1574_vm4, %v2197_v52, %v2200_v57  ;;  %v7107_v57 = vor.u32 %v7289_v15, %v7106_v11 }
 0x2e1   : > { %7098 = vmatmul.msk.bf16.vlgmr.msra.gmra.mxu3 %vm2295_vm11, %v8697_v4  ;;  %v1836_v2 = vpop.permute.xlu0 %1835 }
 0x2e2   : > { %v1968_v9 = vsel %vm773_vm1, %v8608_v23, %v1836_v2  ;;  %3221 = vrot.lane.b32.xlu1 %v3183_v49, %s7459_s23  ;;  %v2170_v23 = vrot.slane %v2168_v63, 1  ;;  %v2602_v32 = vsel %vm2344_vm3, %v7107_v57, 0  ;;  %v11882_v2 = vld [vmem:[#allocation57_spill] sm:$0xff] }
 0x2e3   : > { %v2045_v14 = vsel %vm1273_vm9, %v1968_v9, %v1893_v5  ;;  %2611 = vmatpush.bf16.msrb.mxu3 %v2602_v32 }
 0x2e4   : > { %v2164_v28 = vshll.u32 %v2045_v14, 16  ;;  %v1840_v35 = vpop.permute.xlu1 %1839  ;;  %2945 = vrot.lane.b32.xlu2 %v7976_v37, %s7458_s16  ;;  %v2162_v29 = vshrl.u32 %v2045_v14, 16  ;;  %v8731_v37 = vsel %vm1863_vm2, %v1894_v25, %v1895_v7 }
 0x2e6   : > { %v2166_v18 = vrot.slane %v2164_v28, 1  ;;  %v8711_v8 = vpop.permute.xlu2 %2929 }
 0x2e7   : > { %3025 = vrot.lane.b32.xlu0 %v8561_v46, %s7457_s25  ;;  %v1017_v46 = vpop.f32.mrf.mxu3 }
 0x2e8   : > { %v2167_v51 = vor.u32 %v2166_v18, %v2162_v29 }
 0x2e9   : > { %v1551_v60 = vpop.permute.xlu0 %1550 }
 0x2ea   : > { %v1974_v31 = vsel %vm773_vm1, %v1551_v60, %v1840_v35  ;;  %3027 = vrot.lane.b32.xlu1 %v8633_v39, %s7457_s25  ;;  %v8723_v20 = vsel %vm1574_vm4, %v2167_v51, %v2170_v23  ;;  %v3188_v51 = vrot.slane %v8046_v44, 2  ;;  %v1897_v60 = vrot.slane %v8124_v30, 1 }
 0x2eb   : > { %7074 = vmatmul.msk.bf16.gmra.mxu1 %vm2295_vm11, %v8723_v20  ;;  %7095 = vmatmul.msk.bf16.gmra.mxu2 %vm2295_vm11, %v8723_v20  ;;  %v2049_v39 = vsel %vm1273_vm9, %v1974_v31, %v8731_v37  ;;  %v11883_v31 = vld [vmem:[#allocation58_spill] sm:$0xff]  ;;  %v3187_v44 = vrot.slane %v8032_v59, 2 }
 0x2ec   : > { %v1555_v16 = vpop.permute.xlu1 %1554  ;;  %3223 = vrot.lane.b32.xlu2 %v3186_v6, %s7459_s23  ;;  %v2174_v36 = vshll.u32 %v2049_v39, 16  ;;  %v2172_v28 = vshrl.u32 %v2049_v39, 16  ;;  %v3191_v39 = vrot.slane %v8091_v50, 2 }
 0x2ed   : > { %v3189_v57 = vsel %vm2344_vm3, %v3187_v44, %v3188_v51  ;;  %v3193_v51 = vrot.slane %v8124_v30, 2 }
 0x2ee   : > { %v8742_v52 = vpop.permute.xlu2 %3011  ;;  %v2176_v9 = vrot.slane %v2174_v36, 1  ;;  %v3190_v36 = vrot.slane %v8077_v58, 2 }
 0x2ef   : > { %2992 = vrot.lane.b32.xlu0 %v11881_v12, %s7455_s18  ;;  %v8755_v35 = vpop.f32.mrf.mxu3 }
 0x2f0   : > { %v2177_v40 = vor.u32 %v2176_v9, %v2172_v28 }
 0x2f1   : > { %7099 = vmatmul.msk.bf16.gmra.mxu3 %vm2295_vm11, %v8483_v55  ;;  %v1842_v42 = vpop.permute.xlu0 %1841 }
 0x2f2   : > { %v1977_v19 = vsel %vm773_vm1, %v8648_v26, %v1842_v42  ;;  %2994 = vrot.lane.b32.xlu1 %v11882_v2, %s7455_s18  ;;  %v1898_v26 = vrot.slane %v8135_v54, 1  ;;  %v11884_v2 = vld [vmem:[#allocation5_spill] sm:$0xff] }
 0x2f3   : > { %v2051_v49 = vsel %vm1273_vm9, %v1977_v19, %v1895_v7  ;;  %v1980_v7 = vsel %vm773_vm1, %v1555_v16, %v8666_v41  ;;  %v6423_v41 = vld [vmem:[%s11705_s7] sm:$0x3]  ;;  %v3192_v19 = vsel %vm2344_vm3, %v3190_v36, %v3191_v39  ;;  %v1268_v36 = vadd.f32 %v11884_v2, %v8755_v35 }
 0x2f4   : > { %v2178_v14 = vshll.u32 %v2051_v49, 16  ;;  %v1846_v63 = vpop.permute.xlu1 %1845  ;;  %3029 = vrot.lane.b32.xlu2 %v1893_v5, %s7457_s25  ;;  %v1899_v6 = vsel %vm1863_vm2, %v1897_v60, %v1898_v26  ;;  %v6525_v16 = vsel %vm864_vm0, %v6423_v41, 0  ;;  %v1267_v49 = vadd.f32 %v11884_v2, %v1017_v46 }
 0x2f5   : > { %v2053_v11 = vsel %vm1273_vm9, %v1980_v7, %v1899_v6  ;;  %6534 = vmatpush.bf16.msra.mxu2 %v6525_v16  ;;  %v3194_v46 = vrot.slane %v8135_v54, 2 }
 0x2f6   : > { %v2180_v29 = vrot.slane %v2178_v14, 1  ;;  %v8757_v18 = vpop.permute.xlu2 %2978  ;;  %v2184_v42 = vshll.u32 %v2053_v11, 16  ;;  %v1375_v28 = vpack.c.bf16 %v1267_v49, %v1267_v49  ;;  %v11885_v49 = vld [vmem:[#allocation56_spill] sm:$0xff] }
 0x2f7   : > { %2947 = vrot.lane.b32.xlu0 %v8032_v59, %s7458_s16  ;;  %v1012_v59 = vpop.f32.mrf.mxu0  ;;  %v1022_v32 = vpop.f32.mrf.mxu3  ;;  %v3195_v54 = vsel %vm2344_vm3, %v3193_v51, %v3194_v46 }
 0x2f8   : > { %v8767_v5 = vsel %vm1574_vm4, %v2177_v40, %v2180_v29  ;;  %v2182_v40 = vshrl.u32 %v2053_v11, 16  ;;  %v2542_v41 = vunpack.c.l.b16 %v1375_v28 }
 0x2f9   : > { %v1557_v23 = vpop.permute.xlu0 %1556 }
 0x2fa   : > { %2949 = vrot.lane.b32.xlu1 %v8077_v58, %s7458_s16  ;;  %v1983_v21 = vsel %vm773_vm1, %v1557_v23, %v1846_v63  ;;  %v2186_v58 = vrot.slane %v2184_v42, 1  ;;  %v7293_v63 = vld [vmem:[%s11703_s5 + $0x24] sm:$0xff]  ;;  %v8829_v16 = vpack.c.b16 %v2542_v41, %v2542_v41 }
 0x2fb   : > { %7075 = vmatmul.msk.bf16.gmra.mxu1 %vm2295_vm11, %v8767_v5  ;;  %7096 = vmatmul.msk.bf16.gmra.mxu2 %vm2295_vm11, %v8767_v5  ;;  %v2055_v12 = vsel %vm1273_vm9, %v1983_v21, %v1898_v26 }
 0x2fc   : > { %v8779_v25 = vpop.permute.xlu1 %3009  ;;  %2996 = vrot.lane.b32.xlu2 %v11883_v31, %s7455_s18  ;;  %v2188_v9 = vshll.u32 %v2055_v12, 16  ;;  %3871 = vmatpush.bf16.msrb.mxu0 %v7293_v63  ;;  %v2187_v23 = vor.u32 %v2186_v58, %v2182_v40  ;;  %v11886_v40 = vld [vmem:[#allocation6_spill] sm:$0xff] }
 0x2fe   : > { %v8788_v15 = vpop.permute.xlu2 %2933  ;;  %v2190_v29 = vrot.slane %v2188_v9, 1 }
 0x2ff   : > { %3225 = vrot.lane.b32.xlu0 %v3189_v57, %s7459_s23  ;;  %v1014_v60 = vpop.f32.mrf.mxu0  ;;  %v1024_v21 = vpop.f32.mrf.mxu3 }
 0x300   : > { %v8816_v31 = vsel %vm1574_vm4, %v2187_v23, %v2190_v29  ;;  %v1270_v44 = vadd.f32 %v11884_v2, %v1024_v21 }
 0x301   : > { %7100 = vmatmul.msk.bf16.gmra.mxu3 %vm2295_vm11, %v8531_v13  ;;  %v2975_v50 = vpop.permute.xlu0 %2974 }
 0x302   : > { %3227 = vrot.lane.b32.xlu1 %v3192_v19, %s7459_s23  ;;  %v1381_v39 = vpack.c.bf16 %v1270_v44, %v1270_v44  ;;  %v3239_v42 = vsel %vm773_vm1, %v8692_v45, %v2975_v50 }
 0x303   : > { %v3286_v35 = vsel %vm1273_vm9, %v3239_v42, %v8779_v25 }
 0x304   : > { %v8799_v14 = vpop.permute.xlu1 %3205  ;;  %2951 = vrot.lane.b32.xlu2 %v8124_v30, %s7458_s16  ;;  %v1265_v30 = vadd.f32 %v11884_v2, %v1012_v59  ;;  %v1269_v59 = vadd.f32 %v11884_v2, %v1022_v32  ;;  %v3993_v9 = vunpack.c.l.b16 %v1381_v39  ;;  %v2561_v32 = vshrl.u32 %v8829_v16, 16  ;;  %v8880_v39 = vpop.f32.mrf.mxu1 }
 0x305   : > { %v3318_v25 = vsel %vm2295_vm11, %v3286_v35, %v11886_v40 }
 0x306   : > { %v8806_v26 = vpop.permute.xlu2 %3211  ;;  %v1373_v57 = vpack.c.bf16 %v1265_v30, %v1265_v30  ;;  %v1380_v28 = vpack.c.bf16 %v1269_v59, %v1269_v59  ;;  %v3828_v29 = vrot.slane %v2561_v32, 1  ;;  %v3351_v44 = vsel %vm3349_vm12, %v3318_v25, %v8799_v14  ;;  %v11891_v25 = vld [vmem:[#allocation19_spill] sm:$0xff] }
 0x307   : > { %3031 = vrot.lane.b32.xlu0 %v8731_v37, %s7457_s25  ;;  %v3197_v30 = vrot.slane %v8165_v38, 2  ;;  %v3196_v14 = vrot.slane %v8154_v17, 2 }
 0x308   : > { %v2540_v58 = vunpack.c.l.b16 %v1373_v57  ;;  %v3988_v41 = vunpack.c.l.b16 %v1380_v28 }
 0x309   : > { %v8811_v7 = vpop.permute.xlu0 %2976  ;;  %v3198_v35 = vsel %vm2344_vm3, %v3196_v14, %v3197_v30 }
 0x30a   : > { %3033 = vrot.lane.b32.xlu1 %v1899_v6, %s7457_s25  ;;  %v1266_v6 = vadd.f32 %v11884_v2, %v1014_v60  ;;  %v1379_v2 = vpack.c.bf16 %v1268_v36, %v1268_v36  ;;  %v11888_v36 = vld [vmem:[#allocation36_spill] sm:$0xff] }
 0x30b   : > { %7076 = vmatmul.msk.bf16.gmra.mxu1 %vm2295_vm11, %v8816_v31  ;;  %7097 = vmatmul.msk.bf16.gmra.mxu2 %vm2295_vm11, %v8816_v31 }
 0x30c   : > { %v8825_v37 = vpop.permute.xlu1 %2931  ;;  %3229 = vrot.lane.b32.xlu2 %v3195_v54, %s7459_s23  ;;  %v1374_v12 = vpack.c.bf16 %v1266_v6, %v1266_v6  ;;  %v3987_v60 = vunpack.c.l.b16 %v1379_v2  ;;  %v11887_v54 = vld [vmem:[#allocation33_spill] sm:$0xff]  ;;  %v8875_v6 = vpop.f32.mrf.mxu2 }
 0x30d   : > { %v3199_v2 = vrot.slane %v11887_v54, 2 }
 0x30e   : > { %v8831_v11 = vpop.permute.xlu2 %3017  ;;  %v2541_v45 = vunpack.c.l.b16 %v1374_v12  ;;  %v8888_v42 = vpack.c.b16 %v3988_v41, %v3987_v60 }
 0x30f   : > { %2998 = vrot.lane.b32.xlu0 %v8461_v3, %s7455_s18  ;;  %v2557_v3 = vshll.u32 %v8829_v16, 16 }
 0x310   : > { %v8866_v23 = vpack.c.b16 %v2541_v45, %v2540_v58  ;;  %v3998_v30 = vshll.u32 %v8888_v42, 16 }
 0x311   : > { %7101 = vmatmul.msk.bf16.gmra.mxu3 %vm2295_vm11, %v8583_v47  ;;  %v8842_v19 = vpop.permute.xlu0 %3207  ;;  %v3829_v50 = vrot.slane %v2557_v3, 2 }
 0x312   : > { %3000 = vrot.lane.b32.xlu1 %v11885_v49, %s7455_s18  ;;  %v2550_v59 = vshrl.u32 %v8866_v23, 16  ;;  %v2552_v38 = vshll.u32 %v8866_v23, 16  ;;  %v8890_v49 = vpop.f32.mrf.mxu3 }
 0x313   : > { %v3830_v51 = vor.u32 %v3829_v50, %v3828_v29  ;;  %11889 = vst [vmem:[#allocation22_spill] sm:$0xff] %v8890_v49 }
 0x314   : > { %v8849_v63 = vpop.permute.xlu1 %3209  ;;  %3035 = vrot.lane.b32.xlu2 %v8655_v24, %s7457_s25  ;;  %v8864_v24 = vpack.c.b16 %v3993_v9, %v3993_v9  ;;  %v11890_v9 = vld [vmem:[#allocation35_spill] sm:$0xff]  ;;  %v3825_v45 = vrot.slane %v2550_v59, 1  ;;  %v3826_v50 = vrot.slane %v2552_v38, 2 }
 0x315   : > { %v3200_v58 = vrot.slane %v11890_v9, 2  ;;  %v8911_v9 = vpop.f32.mrf.mxu2 }
 0x316   : > { %v8860_v46 = vpop.permute.xlu2 %2984  ;;  %v4017_v57 = vshrl.u32 %v8864_v24, 16  ;;  %v4003_v29 = vshll.u32 %v8864_v24, 16  ;;  %v3827_v14 = vor.u32 %v3826_v50, %v3825_v45 }
 0x317   : > { %2953 = vrot.lane.b32.xlu0 %v8154_v17, %s7458_s16  ;;  %v3996_v17 = vshrl.u32 %v8888_v42, 16  ;;  %v3201_v41 = vsel %vm2344_vm3, %v3199_v2, %v3200_v58  ;;  %v8919_v2 = vpop.f32.mrf.mxu1 }
 0x318   : > { %v4019_v28 = vrot.slane %v4017_v57, 1  ;;  %v4020_v57 = vrot.slane %v4003_v29, 2  ;;  %v8926_v45 = vsel %vm3041_vm5, %v3827_v14, %v3830_v51  ;;  %v11895_v51 = vld [vmem:[#allocation59_spill] sm:$0xff]  ;;  %v7169_v14 = vld [vmem:[%s11703_s5 + $0x20] sm:$0x3] }
 0x319   : > { %v8868_v21 = vpop.permute.xlu0 %3013 }
 0x31a   : > { %2955 = vrot.lane.b32.xlu1 %v11887_v54, %s7458_s16  ;;  %v4021_v50 = vor.u32 %v4020_v57, %v4019_v28 }
 0x31b   : > { %7077 = vmatmul.msk.bf16.gmra.mxu1 %vm2295_vm11, %v8697_v4  ;;  %7151 = vmatmul.msk.bf16.vlgmr.msrb.gmra.mxu2 %vm3425_vm13, %v3351_v44  ;;  %v2554_v44 = vrot.slane %v2552_v38, 1  ;;  %v3242_v38 = vsel %vm773_vm1, %v8711_v8, %v8811_v7 }
 0x31c   : > { %v3016_v12 = vpop.permute.xlu1 %3015  ;;  %3002 = vrot.lane.b32.xlu2 %v11888_v36, %s7455_s18  ;;  %v4014_v36 = vrot.slane %v3996_v17, 1 }
 0x31d   : > { %v2555_v7 = vor.u32 %v2554_v44, %v2550_v59 }
 0x31e   : > { %v8898_v40 = vpop.permute.xlu2 %2939 }
 0x31f   : > { %3231 = vrot.lane.b32.xlu0 %v3198_v35, %s7459_s23  ;;  %v4015_v35 = vrot.slane %v3998_v30, 2 }
 0x321   : > { %7108 = vmatmul.msk.bf16.vlgmr.msrb.gmra.mxu3 %vm2295_vm11, %v11891_v25  ;;  %v2981_v60 = vpop.permute.xlu0 %2980 }
 0x322   : > { %v3248_v54 = vsel %vm773_vm1, %v8788_v15, %v2981_v60  ;;  %3233 = vrot.lane.b32.xlu1 %v3201_v41, %s7459_s23  ;;  %v11892_v15 = vld [vmem:[#allocation11_spill] sm:$0xff]  ;;  %v4016_v41 = vor.u32 %v4015_v35, %v4014_v36 }
 0x323   : > { %v3292_v58 = vsel %vm1273_vm9, %v3248_v54, %v3016_v12  ;;  %v2559_v12 = vrot.slane %v2557_v3, 1  ;;  %v3288_v54 = vsel %vm1273_vm9, %v3242_v38, %v8742_v52  ;;  %v8963_v38 = vpop.f32.mrf.mxu2 }
 0x324   : > { %v3324_v25 = vsel %vm2295_vm11, %v3292_v58, %v11892_v15  ;;  %v2983_v60 = vpop.permute.xlu1 %2982  ;;  %2957 = vrot.lane.b32.xlu2 %v8238_v27, %s7458_s16  ;;  %v8938_v58 = vpop.f32.mrf.mxu3  ;;  %v8943_v28 = vsel %vm3041_vm5, %v4016_v41, %v4021_v50  ;;  %11897 = vst [vmem:[#allocation15_spill] sm:$0xff] %v8963_v38  ;;  %v3689_v15 = vunpack.c.l.b16 %v7169_v14  ;;  %v11899_v50 = vld [vmem:[#allocation44_spill] sm:$0xff]  ;;  %vm7462_vm5 = vmmov 1  }
 0x325   : > { %v8930_v8 = vsel %vm3349_vm12, %v3324_v25, %v8806_v26  ;;  %11894 = vst [vmem:[#allocation25_spill] sm:$0xff] %v8938_v58  ;;  %v11896_v26 = vld [vmem:[#allocation9_spill] sm:$0xff]  ;;  %v8948_v3 = vsel %vm1574_vm4, %v2555_v7, %v2559_v12  ;;  %v11900_v41 = vld [vmem:[#allocation20_spill] sm:$0xff]  ;;  %vm9486_vm7 = vmpackc.low %vm7462_vm5, %vm7462_vm5 }
 0x326   : > { %11893 = vst [vmem:[#allocation14_spill] sm:$0xff] %v8930_v8  ;;  %7197 = vmatmul.msk.bf16.vlgmr.msrb.gmra.mxu0 %vm3425_vm13, %v8930_v8  ;;  %v3320_v59 = vsel %vm2295_vm11, %v3288_v54, %v11896_v26  ;;  %v8954_v36 = vpop.permute.xlu2 %3217  ;;  %v3691_v7 = vpack.c.b16 %v3689_v15, %v3689_v15 }
 0x327   : > { %3037 = vrot.lane.b32.xlu0 %v11895_v51, %s7457_s25  ;;  %v3353_v52 = vsel %vm3349_vm12, %v3320_v59, %v8842_v19  ;;  %v8965_v19 = vpop.f32.mrf.mxu1  ;;  %v11901_v59 = vld [vmem:[#allocation12_spill] sm:$0xff] }
 0x328   : > { %v3696_v51 = vsel %vm864_vm0, %v3691_v7, 0 }
 0x329   : > { %v2936_v44 = vpop.permute.xlu0 %2935  ;;  %3704 = vmatpush.bf16.msra.mxu3 %v3696_v51 }
 0x32a   : > { %2545 = vrot.lane.b32.xlu1 %v8866_v23, %s7455_s18  ;;  %v3251_v35 = vsel %vm773_vm1, %v2936_v44, %v2983_v60  ;;  %v3245_v60 = vsel %vm773_vm1, %v8825_v37, %v8757_v18  ;;  %v11902_v18 = vld [vmem:[#allocation10_spill] sm:$0xff] }
 0x32b   : > { %7131 = vmatmul.msk.bf16.vlgmr.msrb.gmra.mxu1 %vm3425_vm13, %v3353_v52  ;;  %7152 = vmatmul.msk.bf16.gmra.mxu2 %vm3425_vm13, %v3353_v52  ;;  %v3294_v12 = vsel %vm1273_vm9, %v3251_v35, %v8831_v11  ;;  %v3290_v26 = vsel %vm1273_vm9, %v3245_v60, %v8868_v21  ;;  %v2487_v35 = vpop.f32.mrf.mxu2  ;;  %v11904_v60 = vld [vmem:[#allocation48_spill] sm:$0xff] }
 0x32c   : > { %v2938_v57 = vpop.permute.xlu1 %2937  ;;  %2563 = vrot.lane.b32.xlu2 %v8948_v3, %s7457_s25  ;;  %v8968_v25 = vpop.f32.mrf.mxu3  ;;  %v3326_v11 = vsel %vm2295_vm11, %v3294_v12, %v11901_v59  ;;  %v3322_v37 = vsel %vm2295_vm11, %v3290_v26, %v11902_v18  ;;  %v3202_v26 = vrot.slane %v8238_v27, 2  ;;  %v3398_v18 = vrot.slane %v8291_v1, 2  ;;  %v11906_v27 = vld [vmem:[#allocation23_spill] sm:$0xff] }
 0x32d   : > { %11898 = vst [vmem:[#allocation40_spill] sm:$0xff] %v8968_v25  ;;  %v11924_v25 = vld [vmem:[#allocation21_spill] sm:$0xff] }
 0x32e   : > { %v8989_v52 = vpop.permute.xlu2 %3023 }
 0x32f   : > { %3004 = vrot.lane.b32.xlu0 %v11899_v50, %s7455_s18 }
 0x331   : > { %7109 = vmatmul.msk.bf16.gmra.mxu3 %vm2295_vm11, %v11900_v41  ;;  %v3214_v54 = vpop.permute.xlu0 %3213  ;;  %v9011_v41 = vsel %vm3349_vm12, %v3322_v37, %v8849_v63  ;;  %v3399_v63 = vrot.slane %v8300_v43, 2 }
 0x332   : > { %2547 = vrot.lane.b32.xlu1 %v8829_v16, %s7455_s18  ;;  %v8992_v14 = vsel %vm3349_vm12, %v3326_v11, %v3214_v54  ;;  %v3203_v54 = vrot.slane %v8249_v33, 2  ;;  %v3254_v33 = vsel %vm773_vm1, %v2938_v57, %v8860_v46  ;;  %v11907_v46 = vld [vmem:[#allocation13_spill] sm:$0xff] }
 0x334   : > { %v3216_v44 = vpop.permute.xlu1 %3215  ;;  %2565 = vrot.lane.b32.xlu2 %v2561_v32, %s7457_s25  ;;  %v7215_v32 = vld [vmem:[%s11703_s5 + $0x38] sm:$0x3]  ;;  %v9005_v7 = vpop.f32.mrf.mxu3  ;;  %v3204_v11 = vsel %vm2344_vm3, %v3202_v26, %v3203_v54  ;;  %v3667_v54 = vrot.slane %v8346_v34, 2  ;;  %v3666_v26 = vrot.slane %v8332_v10, 2 }
 0x335   : > { %v4046_v50 = vunpack.c.l.b16 %v7215_v32  ;;  %11903 = vst [vmem:[#allocation47_spill] sm:$0xff] %v9005_v7  ;;  %v3400_v32 = vsel %vm2344_vm3, %v3398_v18, %v3399_v63  ;;  %v11910_v18 = vld [vmem:[#allocation27_spill] sm:$0xff] }
 0x336   : > { %v2387_v15 = vpop.f32.mrf.mxu1  ;;  %7198 = vmatmul.msk.bf16.gmra.mxu0 %vm3425_vm13, %v8992_v14 }
 0x337   : > { %v8998_v21 = vadd.f32 %v2487_v35, %v2387_v15  ;;  %3039 = vrot.lane.b32.xlu0 %v8509_v61, %s7457_s25  ;;  %v4048_v51 = vpack.c.b16 %v4046_v50, %v4046_v50  ;;  %v9026_v35 = vpop.permute.xlu2 %2990  ;;  %v9036_v50 = vpop.f32.mrf.mxu2 }
 0x339   : > { %v3020_v12 = vpop.permute.xlu0 %3019  ;;  %v4053_v59 = vsel %vm864_vm0, %v4048_v51, 0  ;;  %vm9477_vm0 = vmpackc.low %vm496_vm6, %vm496_vm6 }
 0x33a   : > { %3385 = vrot.lane.b32.xlu1 %v8291_v1, %s7458_s16  ;;  %4061 = vmatpush.bf16.msra.mxu1 %v4053_v59  ;;  %v3296_v15 = vsel %vm1273_vm9, %v3254_v33, %v3020_v12  ;;  %v11909_v33 = vld [vmem:[#allocation53_spill] sm:$0xff]  ;;  %vm9495_vm6 = vmpackc.low %vm561_vm8, %vm561_vm8  ;;  %vm6036_vm8 = vsmask.f32 3328 }
 0x33b   : > { %7132 = vmatmul.msk.bf16.gmra.mxu1 %vm3425_vm13, %v9011_v41  ;;  %7153 = vmatmul.msk.bf16.gmra.mxu2 %vm3425_vm13, %v9011_v41  ;;  %v3328_v57 = vsel %vm2295_vm11, %v3296_v15, %v11907_v46  ;;  %v4010_v15 = vrot.slane %v8864_v24, 1 }
 0x33c   : > { %v3022_v61 = vpop.permute.xlu1 %3021  ;;  %3387 = vrot.lane.b32.xlu2 %v11904_v60, %s7455_s18  ;;  %v9031_v37 = vpop.f32.mrf.mxu3  ;;  %v9044_v1 = vsel %vm3349_vm12, %v3328_v57, %v3216_v44 }
 0x33d   : > { %11905 = vst [vmem:[#allocation55_spill] sm:$0xff] %v9031_v37 }
 0x33e   : > { %11908 = vst [vmem:[#allocation57_spill] sm:$0xff] %v9044_v1 }
 0x33f   : > { %3235 = vrot.lane.b32.xlu0 %v3204_v11, %s7459_s23  ;;  %v9051_v51 = vpop.permute.xlu2 %2945  ;;  %v2492_v59 = vpop.f32.mrf.mxu2  ;;  %v4009_v11 = vrot.slane %v8888_v42, 1 }
 0x341   : > { %7110 = vmatmul.msk.bf16.gmra.mxu3 %vm2295_vm11, %v11906_v27  ;;  %v2987_v43 = vpop.permute.xlu0 %2986 }
 0x342   : > { %3401 = vrot.lane.b32.xlu1 %v3400_v32, %s7459_s23  ;;  %v3257_v34 = vsel %vm773_vm1, %v8898_v40, %v2987_v43  ;;  %v11911_v40 = vld [vmem:[#allocation16_spill] sm:$0xff]  ;;  %v2567_v32 = vrot.slane %v8866_v23, 1 }
 0x344   : > { %v2989_v12 = vpop.permute.xlu1 %2988  ;;  %3653 = vrot.lane.b32.xlu2 %v8332_v10, %s7458_s16  ;;  %v9056_v63 = vpop.f32.mrf.mxu3 }
 0x345   : > { %v9068_v10 = vpop.f32.mrf.mxu1 }
 0x346   : > { %7199 = vmatmul.msk.bf16.gmra.mxu0 %vm3425_vm13, %v9044_v1 }
 0x347   : > { %3389 = vrot.lane.b32.xlu0 %v8564_v0, %s7457_s25  ;;  %v3668_v0 = vsel %vm2344_vm3, %v3666_v26, %v3667_v54  ;;  %v9083_v46 = vpop.permute.xlu2 %3223  ;;  %v4011_v54 = vsel %vm1863_vm2, %v4009_v11, %v4010_v15  ;;  %v2494_v26 = vpop.f32.mrf.mxu2 }
 0x349   : > { %v2942_v60 = vpop.permute.xlu0 %2941 }
 0x34a   : > { %3657 = vrot.lane.b32.xlu1 %v8617_v56, %s7457_s25  ;;  %v3298_v56 = vsel %vm1273_vm9, %v3257_v34, %v3022_v61  ;;  %v11762_v61 = vrot.slane %v8829_v16, 1 }
 0x34b   : > { %7133 = vmatmul.msk.bf16.gmra.mxu1 %vm3425_vm13, %v8930_v8  ;;  %7154 = vmatmul.msk.bf16.gmra.mxu2 %vm3425_vm13, %v8930_v8  ;;  %v3330_v43 = vsel %vm2295_vm11, %v3298_v56, %v11911_v40  ;;  %v3832_v56 = vrot.slane %v8866_v23, 2 }
 0x34c   : > { %v9065_v44 = vpop.permute.xlu1 %2943  ;;  %3669 = vrot.lane.b32.xlu2 %v3668_v0, %s7459_s23  ;;  %v9091_v34 = vsel %vm3349_vm12, %v3330_v43, %v8954_v36  ;;  %v9100_v11 = vsel %vm1863_vm2, %v2567_v32, %v11762_v61 }
 0x34d   : > { %11912 = vst [vmem:[#allocation58_spill] sm:$0xff] %v9091_v34 }
 0x34e   : > { %v9085_v57 = vpop.f32.mrf.mxu3 }
 0x34f   : > { %3655 = vrot.lane.b32.xlu0 %v11909_v33, %s7455_s18  ;;  %v3833_v33 = vrot.slane %v8829_v16, 2  ;;  %v9116_v32 = vpop.permute.xlu2 %3029 }
 0x351   : > { %7111 = vmatmul.msk.bf16.gmra.mxu3 %vm2295_vm11, %v11910_v18  ;;  %v3220_v27 = vpop.permute.xlu0 %3219  ;;  %v3834_v40 = vsel %vm2344_vm3, %v3832_v56, %v3833_v33  ;;  %v4005_v56 = vrot.slane %v4003_v29, 1  ;;  %v3260_v33 = vsel %vm773_vm1, %v2942_v60, %v2989_v12  ;;  %v4023_v29 = vrot.slane %v8888_v42, 2  ;;  %v11913_v60 = vld [vmem:[#allocation17_spill] sm:$0xff] }
 0x352   : > { %3819 = vrot.lane.b32.xlu1 %v8866_v23, %s7458_s16  ;;  %v4000_v23 = vrot.slane %v3998_v30, 1  ;;  %v4024_v12 = vrot.slane %v8864_v24, 2 }
 0x354   : > { %v3222_v0 = vpop.permute.xlu1 %3221  ;;  %4012 = vrot.lane.b32.xlu2 %v4011_v54, %s7457_s25  ;;  %v4001_v30 = vor.u32 %v4000_v23, %v3996_v17 }
 0x356   : > { %v2392_v18 = vpop.f32.mrf.mxu1  ;;  %7200 = vmatmul.msk.bf16.gmra.mxu0 %vm3425_vm13, %v9091_v34  ;;  %v9118_v54 = vpop.f32.mrf.mxu3  ;;  %v4006_v17 = vsel %vm1574_vm4, %v4001_v30, %v4005_v56 }
 0x357   : > { %v9102_v15 = vadd.f32 %v2492_v59, %v2392_v18  ;;  %3823 = vrot.lane.b32.xlu0 %v9100_v11, %s7457_s25  ;;  %v9147_v30 = vpop.permute.xlu2 %2996  ;;  %s6793_s25 = sshll.u32 %s7664_s24, 4  ;;  %s6794_s25 = int_to_ptr.vmem [resolvable:$true] %s6793_s25 }
 0x359   : > { %v3026_v36 = vpop.permute.xlu0 %3025 }
 0x35a   : > { %3835 = vrot.lane.b32.xlu1 %v3834_v40, %s7459_s23 }
 0x35b   : > { %7134 = vmatmul.msk.bf16.gmra.mxu1 %vm3425_vm13, %v8992_v14  ;;  %7155 = vmatmul.msk.bf16.gmra.mxu2 %vm3425_vm13, %v8992_v14 }
 0x35c   : > { %v3028_v43 = vpop.permute.xlu1 %3027  ;;  %v2497_v59 = vpop.f32.mrf.mxu2  ;;  %3821 = vrot.lane.b32.xlu2 %v8948_v3, %s7455_s18  ;;  %v3300_v3 = vsel %vm1273_vm9, %v3260_v33, %v8989_v52 }
 0x35e   : > { %v2394_v18 = vpop.f32.mrf.mxu1 }
 0x35f   : > { %v9125_v40 = vadd.f32 %v2494_v26, %v2394_v18  ;;  %3990 = vrot.lane.b32.xlu0 %v8888_v42, %s7458_s16  ;;  %v3332_v26 = vsel %vm2295_vm11, %v3300_v3, %v11913_v60  ;;  %v9164_v60 = vpop.permute.xlu2 %2951  ;;  %s11789_s16 = smov 8  }
 0x360   : > { %v9140_v18 = vsel %vm3349_vm12, %v3332_v26, %v3220_v27 }
 0x361   : > { %7112 = vmatmul.msk.bf16.gmra.mxu3 %vm2295_vm11, %v8499_v53  ;;  %v2993_v61 = vpop.permute.xlu0 %2992  ;;  %11914 = vst [vmem:[#allocation5_spill] sm:$0xff] %v9140_v18  ;;  %v4025_v53 = vsel %vm2344_vm3, %v4023_v29, %v4024_v12 }
 0x362   : > { %4007 = vrot.lane.b32.xlu1 %v4006_v17, %s7455_s18  ;;  %v3263_v17 = vsel %vm773_vm1, %v9065_v44, %v9026_v35 }
 0x363   : > { %v3302_v12 = vsel %vm1273_vm9, %v3263_v17, %v3026_v36 }
 0x364   : > { %v2995_v23 = vpop.permute.xlu1 %2994  ;;  %v9142_v52 = vpop.f32.mrf.mxu3 }
 0x365   : > { %11915 = vst [vmem:[#allocation56_spill] sm:$0xff] %v9142_v52  ;;  %v2499_v33 = vpop.f32.mrf.mxu2 }
 0x366   : > { %7201 = vmatmul.msk.bf16.gmra.mxu0 %vm3425_vm13, %v9140_v18 }
 0x367   : > { %4026 = vrot.lane.b32.xlu0 %v4025_v53, %s7459_s23 }
 0x368   : > { %v2397_v24 = vpop.f32.mrf.mxu1 }
 0x369   : > { %v9150_v42 = vadd.f32 %v2497_v59, %v2397_v24  ;;  %v2948_v56 = vpop.permute.xlu0 %2947  ;;  %v11918_v24 = vld [vmem:[#allocation18_spill] sm:$0xff] }
 0x36a   : > { %v3334_v37 = vsel %vm2295_vm11, %v3302_v12, %v11918_v24 }
 0x36b   : > { %7135 = vmatmul.msk.bf16.gmra.mxu1 %vm3425_vm13, %v9044_v1  ;;  %7156 = vmatmul.msk.bf16.gmra.mxu2 %vm3425_vm13, %v9044_v1  ;;  %v9177_v35 = vsel %vm3349_vm12, %v3334_v37, %v3222_v0  ;;  %v3266_v37 = vsel %vm773_vm1, %v9051_v51, %v2993_v61 }
 0x36c   : > { %v9156_v27 = vpop.permute.xlu1 %2949  ;;  %v9158_v3 = vpop.f32.mrf.mxu3  ;;  %11920 = vst [vmem:[#allocation35_spill] sm:$0xff] %v9177_v35 }
 0x36d   : > { %11916 = vst [vmem:[#allocation6_spill] sm:$0xff] %v9158_v3 }
 0x36e   : > { %v2502_v29 = vpop.f32.mrf.mxu2 }
 0x370   : > { %v2399_v59 = vpop.f32.mrf.mxu1 }
 0x371   : > { %v9166_v26 = vadd.f32 %v2499_v33, %v2399_v59  ;;  %7113 = vmatmul.msk.bf16.gmra.mxu3 %vm2295_vm11, %v8593_v22  ;;  %v3226_v53 = vpop.permute.xlu0 %3225  ;;  %v9183_v22 = vpop.permute.xlu2 %3229 }
 0x373   : > { %11917 = vst [vmem:[#allocation33_spill] sm:$0xff] %v9166_v26 }
 0x374   : > { %v9172_v7 = vpop.permute.xlu1 %3227  ;;  %v9174_v1 = vpop.f32.mrf.mxu3 }
 0x375   : > { %11919 = vst [vmem:[#allocation36_spill] sm:$0xff] %v9174_v1 }
 0x376   : > { %v2504_v44 = vpop.f32.mrf.mxu2  ;;  %7202 = vmatmul.msk.bf16.gmra.mxu0 %vm3425_vm13, %v9177_v35 }
 0x378   : > { %v2402_v36 = vpop.f32.mrf.mxu1 }
 0x379   : > { %v9181_v33 = vadd.f32 %v2502_v29, %v2402_v36  ;;  %v3032_v17 = vpop.permute.xlu0 %3031  ;;  %v3304_v29 = vsel %vm1273_vm9, %v3266_v37, %v3028_v43  ;;  %v9206_v51 = vpop.permute.xlu2 %3035 }
 0x37b   : > { %11921 = vst [vmem:[#allocation19_spill] sm:$0xff] %v9181_v33  ;;  %7136 = vmatmul.msk.bf16.gmra.mxu1 %vm3425_vm13, %v9091_v34  ;;  %7157 = vmatmul.msk.bf16.gmra.mxu2 %vm3425_vm13, %v9091_v34  ;;  %v3336_v34 = vsel %vm2295_vm11, %v3304_v29, %v11924_v25 }
 0x37c   : > { %v9191_v0 = vpop.permute.xlu1 %3033  ;;  %v9193_v12 = vpop.f32.mrf.mxu3  ;;  %v9212_v43 = vsel %vm3349_vm12, %v3336_v34, %v9083_v46  ;;  %v3269_v46 = vsel %vm773_vm1, %v2948_v56, %v2995_v23 }
 0x37d   : > { %11922 = vst [vmem:[#allocation11_spill] sm:$0xff] %v9193_v12  ;;  %v11930_v12 = vld [vmem:[#allocation24_spill] sm:$0xff] }
 0x37e   : > { %v2507_v59 = vpop.f32.mrf.mxu2  ;;  %11926 = vst [vmem:[#allocation44_spill] sm:$0xff] %v9212_v43 }
 0x380   : > { %v2404_v24 = vpop.f32.mrf.mxu1 }
 0x381   : > { %v9196_v36 = vadd.f32 %v2504_v44, %v2404_v24  ;;  %7114 = vmatmul.msk.bf16.gmra.mxu3 %vm2295_vm11, %v8674_v62  ;;  %v9200_v1 = vpop.permute.xlu0 %2998 }
 0x383   : > { %11923 = vst [vmem:[#allocation59_spill] sm:$0xff] %v9196_v36  ;;  %v9230_v36 = vpop.permute.xlu2 %3002 }
 0x384   : > { %v9204_v3 = vpop.permute.xlu1 %3000  ;;  %v9208_v61 = vpop.f32.mrf.mxu3 }
 0x385   : > { %11925 = vst [vmem:[#allocation9_spill] sm:$0xff] %v9208_v61 }
 0x386   : > { %v2509_v44 = vpop.f32.mrf.mxu2  ;;  %7203 = vmatmul.msk.bf16.gmra.mxu0 %vm3425_vm13, %v9212_v43 }
 0x388   : > { %v2407_v62 = vpop.f32.mrf.mxu1 }
 0x389   : > { %v9216_v37 = vadd.f32 %v2507_v59, %v2407_v62  ;;  %v9218_v24 = vpop.permute.xlu0 %2953  ;;  %v3306_v62 = vsel %vm1273_vm9, %v3269_v46, %v9116_v32 }
 0x38a   : > { %v3338_v23 = vsel %vm2295_vm11, %v3306_v62, %v11930_v12  ;;  %v3272_v12 = vsel %vm773_vm1, %v9156_v27, %v9147_v30 }
 0x38b   : > { %11927 = vst [vmem:[#allocation20_spill] sm:$0xff] %v9216_v37  ;;  %7137 = vmatmul.msk.bf16.gmra.mxu1 %vm3425_vm13, %v9140_v18  ;;  %7158 = vmatmul.msk.bf16.gmra.mxu2 %vm3425_vm13, %v9140_v18 }
 0x38c   : > { %v9224_v25 = vpop.permute.xlu1 %2955  ;;  %v2529_v29 = vpop.f32.mrf.mxu3 }
 0x38d   : > { %v9228_v34 = vadd.f32 %v2529_v29, %v9056_v63  ;;  %v9245_v63 = vsel %vm3349_vm12, %v3338_v23, %v3226_v53  ;;  %v3308_v23 = vsel %vm1273_vm9, %v3272_v12, %v3032_v17 }
 0x38e   : > { %v2512_v61 = vpop.f32.mrf.mxu2  ;;  %11931 = vst [vmem:[#allocation48_spill] sm:$0xff] %v9245_v63 }
 0x38f   : > { %11928 = vst [vmem:[#allocation12_spill] sm:$0xff] %v9228_v34 }
 0x390   : > { %v2409_v59 = vpop.f32.mrf.mxu1 }
 0x391   : > { %v9234_v37 = vadd.f32 %v2509_v44, %v2409_v59  ;;  %7115 = vmatmul.msk.bf16.gmra.mxu3 %vm2295_vm11, %v8723_v20  ;;  %v9238_v18 = vpop.permute.xlu0 %3231  ;;  %v9252_v20 = vpop.permute.xlu2 %2957 }
 0x393   : > { %11929 = vst [vmem:[#allocation10_spill] sm:$0xff] %v9234_v37 }
 0x394   : > { %v9242_v56 = vpop.permute.xlu1 %3233  ;;  %v2532_v29 = vpop.f32.mrf.mxu3 }
 0x395   : > { %v9248_v34 = vadd.f32 %v2532_v29, %v9085_v57 }
 0x396   : > { %v2514_v32 = vpop.f32.mrf.mxu2  ;;  %7204 = vmatmul.msk.bf16.gmra.mxu0 %vm3425_vm13, %v9245_v63 }
 0x397   : > { %11932 = vst [vmem:[#allocation23_spill] sm:$0xff] %v9248_v34 }
 0x398   : > { %v2412_v44 = vpop.f32.mrf.mxu1 }
 0x399   : > { %v9254_v46 = vadd.f32 %v2512_v61, %v2412_v44  ;;  %v9256_v59 = vpop.permute.xlu0 %3037  ;;  %v9279_v37 = vpop.permute.xlu2 %2563 }
 0x39b   : > { %11933 = vst [vmem:[#allocation13_spill] sm:$0xff] %v9254_v46  ;;  %7138 = vmatmul.msk.bf16.gmra.mxu1 %vm3425_vm13, %v9177_v35  ;;  %7159 = vmatmul.msk.bf16.gmra.mxu2 %vm3425_vm13, %v9177_v35  ;;  %v11936_v35 = vld [vmem:[#allocation26_spill] sm:$0xff] }
 0x39c   : > { %v9262_v53 = vpop.permute.xlu1 %2545  ;;  %v2534_v57 = vpop.f32.mrf.mxu3  ;;  %v3340_v46 = vsel %vm2295_vm11, %v3308_v23, %v11936_v35 }
 0x39d   : > { %v9268_v62 = vadd.f32 %v2534_v57, %v9118_v54  ;;  %v9284_v54 = vld [vmem:[%s11702_s4] ss:$0 sm:$0xff]  ;;  %v9290_v17 = vsel %vm3349_vm12, %v3340_v46, %v9172_v7  ;;  %v11940_v7 = vld [vmem:[#allocation31_spill] sm:$0xff]  ;;  %v11941_v46 = vld [vmem:[#allocation30_spill] sm:$0xff] }
 0x39e   : > { %v3573_v61 = vpop.f32.mrf.mxu2  ;;  %11937 = vst [vmem:[#allocation16_spill] sm:$0xff] %v9290_v17 }
 0x39f   : > { %11934 = vst [vmem:[#allocation53_spill] sm:$0xff] %v9268_v62 }
 0x3a0   : > { %v2414_v29 = vpop.f32.mrf.mxu1 }
 0x3a1   : > { %v9271_v44 = vadd.f32 %v2514_v32, %v2414_v29  ;;  %7116 = vmatmul.msk.bf16.gmra.mxu3 %vm2295_vm11, %v8767_v5  ;;  %v9275_v34 = vpop.permute.xlu0 %3004  ;;  %v11938_v5 = vld [vmem:[#allocation29_spill] sm:$0xff] }
 0x3a3   : > { %11935 = vst [vmem:[#allocation27_spill] sm:$0xff] %v9271_v44 }
 0x3a4   : > { %v9286_v30 = vpop.permute.xlu1 %2547  ;;  %v2613_v27 = vpop.f32.mrf.mxu3 }
 0x3a5   : > { %v2693_v32 = vadd.f32 %v2613_v27, %v11938_v5  ;;  %v2460_v27 = vadd.f32 %v11941_v46, %v11940_v7  ;;  %v3275_v5 = vsel %vm773_vm1, %v9164_v60, %v9200_v1  ;;  %v7292_v7 = vld [vmem:[%s11703_s5 + $0x18] sm:$0xff] }
 0x3a6   : > { %v3575_v57 = vpop.f32.mrf.mxu2  ;;  %7205 = vmatmul.msk.bf16.gmra.mxu0 %vm3425_vm13, %v9290_v17  ;;  %v3310_v62 = vsel %vm1273_vm9, %v3275_v5, %v9191_v0  ;;  %v11943_v60 = vld [vmem:[#allocation28_spill] sm:$0xff]  ;;  %3705 = vmatpush.bf16.msra.mxu3 %v7292_v7 }
 0x3a7   : > { %v2729_v35 = vadd.f32 %v9284_v54, %v2693_v32  ;;  %v9312_v32 = vpop.permute.xlu2 %2565 }
 0x3a8   : > { %v3470_v12 = vpop.f32.mrf.mxu1 }
 0x3a9   : > { %v9296_v23 = vadd.f32 %v3573_v61, %v3470_v12  ;;  %v9298_v29 = vpop.permute.xlu0 %3039  ;;  %2793 = vrot.lane.b32.xlu2 %v2729_v35, %s11789_s16 }
 0x3ab   : > { %11939 = vst [vmem:[#allocation17_spill] sm:$0xff] %v9296_v23  ;;  %7139 = vmatmul.msk.bf16.gmra.mxu1 %vm3425_vm13, %v9212_v43  ;;  %7160 = vmatmul.msk.bf16.gmra.mxu2 %vm3425_vm13, %v9212_v43 }
 0x3ac   : > { %v9310_v61 = vpop.permute.xlu1 %3385  ;;  %v2615_v12 = vpop.f32.mrf.mxu3 }
 0x3ad   : > { %v2694_v23 = vadd.f32 %v2615_v12, %v2460_v27  ;;  %v3342_v27 = vsel %vm2295_vm11, %v3310_v62, %v11943_v60 }
 0x3ae   : > { %v3578_v35 = vpop.f32.mrf.mxu2  ;;  %v9333_v5 = vsel %vm3349_vm12, %v3342_v27, %v9183_v22  ;;  %v11947_v22 = vld [vmem:[#allocation38_spill] sm:$0xff]  ;;  %v11948_v27 = vld [vmem:[#allocation37_spill] sm:$0xff] }
 0x3af   : > { %v2730_v44 = vadd.f32 %v9284_v54, %v2694_v23  ;;  %11944 = vst [vmem:[#allocation21_spill] sm:$0xff] %v9333_v5 }
 0x3b0   : > { %v3472_v43 = vpop.f32.mrf.mxu1 }
 0x3b1   : > { %v9320_v46 = vadd.f32 %v3575_v57, %v3472_v43  ;;  %7117 = vmatmul.msk.bf16.gmra.mxu3 %vm2295_vm11, %v8816_v31  ;;  %v9324_v1 = vpop.permute.xlu0 %3235  ;;  %2795 = vrot.lane.b32.xlu0 %v2730_v44, %s11789_s16  ;;  %v11945_v43 = vld [vmem:[#allocation34_spill] sm:$0xff]  ;;  %v9338_v31 = vpop.permute.xlu2 %3387  ;;  %v7294_v44 = vld [vmem:[%s11703_s5 + $0x30] sm:$0xff] }
 0x3b2   : > { %4062 = vmatpush.bf16.msra.mxu1 %v7294_v44 }
 0x3b3   : > { %11942 = vst [vmem:[#allocation18_spill] sm:$0xff] %v9320_v46 }
 0x3b4   : > { %v9329_v0 = vpop.permute.xlu1 %3401  ;;  %v2618_v23 = vpop.f32.mrf.mxu3 }
 0x3b5   : > { %v2695_v57 = vadd.f32 %v2618_v23, %v11945_v43  ;;  %v2465_v23 = vadd.f32 %v11948_v27, %v11947_v22 }
 0x3b6   : > { %v3580_v12 = vpop.f32.mrf.mxu2  ;;  %7206 = vmatmul.msk.bf16.gmra.mxu0 %vm3425_vm13, %v9333_v5 }
 0x3b7   : > { %v2731_v62 = vadd.f32 %v9284_v54, %v2695_v57 }
 0x3b8   : > { %v3475_v60 = vpop.f32.mrf.mxu1 }
 0x3b9   : > { %v9344_v7 = vadd.f32 %v3578_v35, %v3475_v60  ;;  %v9346_v46 = vpop.permute.xlu0 %3389  ;;  %2797 = vrot.lane.b32.xlu1 %v2731_v62, %s11789_s16  ;;  %v3278_v35 = vsel %vm773_vm1, %v9218_v24, %v9204_v3  ;;  %v9363_v33 = vpop.permute.xlu2 %3653  ;;  %v11950_v3 = vld [vmem:[#allocation32_spill] sm:$0xff] }
 0x3ba   : > { %v3312_v58 = vsel %vm1273_vm9, %v3278_v35, %v9206_v51 }
 0x3bb   : > { %11946 = vst [vmem:[#allocation24_spill] sm:$0xff] %v9344_v7  ;;  %7140 = vmatmul.msk.bf16.gmra.mxu1 %vm3425_vm13, %v9245_v63  ;;  %7161 = vmatmul.msk.bf16.gmra.mxu2 %vm3425_vm13, %v9245_v63  ;;  %v3344_v24 = vsel %vm2295_vm11, %v3312_v58, %v11950_v3  ;;  %v11955_v3 = vld [vmem:[#allocation42_spill] sm:$0xff] }
 0x3bc   : > { %v9355_v43 = vpop.permute.xlu1 %3657  ;;  %v2620_v57 = vpop.f32.mrf.mxu3 }
 0x3bd   : > { %v2696_v60 = vadd.f32 %v2620_v57, %v2465_v23  ;;  %v9378_v23 = vsel %vm3349_vm12, %v3344_v24, %v9238_v18  ;;  %v11952_v57 = vld [vmem:[#allocation41_spill] sm:$0xff]  ;;  %v11954_v18 = vld [vmem:[#allocation43_spill] sm:$0xff] }
 0x3be   : > { %v3583_v7 = vpop.f32.mrf.mxu2  ;;  %11951 = vst [vmem:[#allocation29_spill] sm:$0xff] %v9378_v23  ;;  %v2470_v24 = vadd.f32 %v11955_v3, %v11954_v18  ;;  %v11958_v18 = vld [vmem:[#allocation39_spill] sm:$0xff] }
 0x3bf   : > { %v2732_v62 = vadd.f32 %v9284_v54, %v2696_v60 }
 0x3c0   : > { %v3477_v44 = vpop.f32.mrf.mxu1 }
 0x3c1   : > { %v9365_v63 = vadd.f32 %v3580_v12, %v3477_v44  ;;  %7118 = vmatmul.msk.bf16.gmra.mxu3 %vm2295_vm11, %v8697_v4  ;;  %v9369_v22 = vpop.permute.xlu0 %3655  ;;  %2799 = vrot.lane.b32.xlu2 %v2732_v62, %s11789_s16  ;;  %v9389_v44 = vpop.permute.xlu2 %3669 }
 0x3c3   : > { %11949 = vst [vmem:[#allocation26_spill] sm:$0xff] %v9365_v63 }
 0x3c4   : > { %v9374_v27 = vpop.permute.xlu1 %3819  ;;  %v2623_v51 = vpop.f32.mrf.mxu3 }
 0x3c5   : > { %v2697_v12 = vadd.f32 %v2623_v51, %v11952_v57 }
 0x3c6   : > { %v3585_v35 = vpop.f32.mrf.mxu2  ;;  %7207 = vmatmul.msk.bf16.gmra.mxu0 %vm3425_vm13, %v9378_v23 }
 0x3c7   : > { %v2733_v4 = vadd.f32 %v9284_v54, %v2697_v12 }
 0x3c8   : > { %v3480_v60 = vpop.f32.mrf.mxu1 }
 0x3c9   : > { %v9384_v62 = vadd.f32 %v3583_v7, %v3480_v60  ;;  %2801 = vrot.lane.b32.xlu0 %v2733_v4, %s11789_s16  ;;  %v9387_v58 = vpop.permute.xlu0 %3823  ;;  %v3281_v7 = vsel %vm773_vm1, %v9224_v25, %v9230_v36 }
 0x3ca   : > { %v3314_v60 = vsel %vm1273_vm9, %v3281_v7, %v9256_v59  ;;  %v4013_v59 = vpop.permute.xlu2 %4012 }
 0x3cb   : > { %11953 = vst [vmem:[#allocation31_spill] sm:$0xff] %v9384_v62  ;;  %7141 = vmatmul.msk.bf16.gmra.mxu1 %vm3425_vm13, %v9290_v17  ;;  %7162 = vmatmul.msk.bf16.gmra.mxu2 %vm3425_vm13, %v9290_v17  ;;  %v9404_v62 = vpop.f32.mrf.mxu0  ;;  %v3346_v3 = vsel %vm2295_vm11, %v3314_v60, %v11958_v18 }
 0x3cc   : > { %v9397_v51 = vpop.permute.xlu1 %3835  ;;  %v2625_v57 = vpop.f32.mrf.mxu3  ;;  %11956 = vst [vmem:[#allocation30_spill] sm:$0xff] %v9404_v62 }
 0x3cd   : > { %v2698_v12 = vadd.f32 %v2625_v57, %v2470_v24 }
 0x3ce   : > { %v3588_v4 = vpop.f32.mrf.mxu2 }
 0x3cf   : > { %v2734_v63 = vadd.f32 %v9284_v54, %v2698_v12 }
 0x3d0   : > { %v3482_v17 = vpop.f32.mrf.mxu1 }
 0x3d1   : > { %v9407_v8 = vadd.f32 %v3585_v35, %v3482_v17  ;;  %7119 = vmatmul.msk.bf16.gmra.mxu3 %vm2295_vm11, %v8483_v55  ;;  %2803 = vrot.lane.b32.xlu1 %v2734_v63, %s11789_s16  ;;  %v3991_v36 = vpop.permute.xlu0 %3990  ;;  %v9417_v17 = vsel %vm3349_vm12, %v3346_v3, %v9242_v56  ;;  %v11959_v35 = vld [vmem:[#allocation46_spill] sm:$0xff]  ;;  %v356_v3 = vld [vmem:[%s7580_s29 + $0x10] sm:$0xf] }
 0x3d2   : > { %v355_v56 = vld [vmem:[%s7580_s29 + $0xc] sm:$0xf] }
 0x3d3   : > { %11957 = vst [vmem:[#allocation28_spill] sm:$0xff] %v9407_v8 }
 0x3d4   : > { %v4008_v25 = vpop.permute.xlu1 %4007  ;;  %v2628_v24 = vpop.f32.mrf.mxu3 }
 0x3d5   : > { %v4030_v57 = vsel %vm773_vm1, %v3991_v36, %v4008_v25  ;;  %v2699_v55 = vadd.f32 %v2628_v24, %v11959_v35  ;;  %v9430_v25 = vpop.f32.mrf.mxu0  ;;  %v11967_v24 = vld [vmem:[#allocation49_spill] sm:$0xff]  ;;  %v4481_v35 = vsel %vm9440_vm15, %v355_v56, 4286644096 }
 0x3d6   : > { %v4032_v7 = vsel %vm1273_vm9, %v4030_v57, %v4013_v59  ;;  %v3590_v12 = vpop.f32.mrf.mxu2  ;;  %7208 = vmatmul.msk.bf16.gmra.mxu0 %vm3425_vm13, %v9417_v17  ;;  %11962 = vst [vmem:[#allocation37_spill] sm:$0xff] %v9430_v25  ;;  %v357_v59 = vld [vmem:[%s7580_s29 + $0x14] sm:$0xf]  ;;  %v359_v25 = vld [vmem:[%s7580_s29 + $0x1c] sm:$0xf] }
 0x3d7   : > { %v9425_v63 = vsel %vm2295_vm11, %v4032_v7, %v8943_v28  ;;  %v2735_v60 = vadd.f32 %v9284_v54, %v2699_v55  ;;  %v11963_v28 = vmov 0  ;;  %v4482_v55 = vsel %vm9440_vm15, %v356_v3, 4286644096 }
 0x3d8   : > { %11960 = vst [vmem:[#allocation34_spill] sm:$0xff] %v9425_v63  ;;  %v3485_v18 = vpop.f32.mrf.mxu1  ;;  %v11964_v28 = vsel %vm9440_vm15, 4294967295, %v11963_v28  ;;  %v4483_v7 = vsel %vm9440_vm15, %v357_v59, 4286644096  ;;  %v4535_v63 = vunpack.c.l.bf16 %v4481_v35 }
 0x3d9   : > { %v9428_v36 = vadd.f32 %v3588_v4, %v3485_v18  ;;  %2805 = vrot.lane.b32.xlu2 %v2735_v60, %s11789_s16  ;;  %11965 = vst [vmem:[#allocation32_spill] sm:$0xff] %v11964_v28  ;;  %v11966_v4 = vld [vmem:[#allocation51_spill] sm:$0xff]  ;;  %v3284_v60 = vsel %vm773_vm1, %v9252_v20, %v9275_v34  ;;  %v2572_v34 = vsel %vm773_vm1, %v9262_v53, %v9279_v37 }
 0x3da   : > { %v2475_v57 = vadd.f32 %v11967_v24, %v11966_v4  ;;  %v9455_v4 = vunpack.c.l.bf16 %v4483_v7  ;;  %v3316_v56 = vsel %vm1273_vm9, %v3284_v60, %v9298_v29  ;;  %v4632_v8 = vrot.slane %v4535_v63, 1  ;;  %v358_v7 = vld [vmem:[%s7580_s29 + $0x18] sm:$0xf] }
 0x3db   : > { %11961 = vst [vmem:[#allocation38_spill] sm:$0xff] %v9428_v36  ;;  %7142 = vmatmul.msk.bf16.gmra.mxu1 %vm3425_vm13, %v9333_v5  ;;  %7163 = vmatmul.msk.bf16.gmra.mxu2 %vm3425_vm13, %v9333_v5  ;;  %v4536_v36 = vunpack.c.l.bf16 %v4482_v55  ;;  %v2575_v20 = vsel %vm773_vm1, %v9286_v30, %v9312_v32  ;;  %v4904_v32 = vrot.slane %v4535_v63, 2  ;;  %v11979_v5 = vrot.slane %v8829_v16, 1 }
 0x3dc   : > { %v2630_v18 = vpop.f32.mrf.mxu3  ;;  %v4635_v59 = vrot.slane %v9455_v4, 1 }
 0x3dd   : > { %v2700_v24 = vadd.f32 %v2630_v18, %v2475_v57  ;;  %v4633_v28 = vrot.slane %v4536_v36, 1  ;;  %v360_v57 = vld [vmem:[%s7580_s29 + $0x20] sm:$0xf]  ;;  %v4905_v60 = vrot.slane %v4536_v36, 2 }
 0x3de   : > { %v3593_v3 = vpop.f32.mrf.mxu2  ;;  %v11972_v18 = vld [vmem:[#allocation45_spill] sm:$0xff] }
 0x3df   : > { %v2736_v35 = vadd.f32 %v9284_v54, %v2700_v24  ;;  %v4634_v53 = vsel %vm1863_vm2, %v4632_v8, %v4633_v28  ;;  %v4636_v30 = vsel %vm1863_vm2, %v4633_v28, %v4635_v59  ;;  %v4484_v24 = vsel %vm9477_vm0, %v358_v7, 4286644096 }
 0x3e0   : > { %v3487_v55 = vpop.f32.mrf.mxu1  ;;  %v4485_v28 = vsel %vm9486_vm7, %v359_v25, 4286644096  ;;  %v4486_v25 = vsel %vm9495_vm6, %v360_v57, 4286644096  ;;  %v361_v57 = vld [vmem:[%s7580_s29 + $0x24] sm:$0xf] }
 0x3e1   : > { %v9469_v29 = vadd.f32 %v3590_v12, %v3487_v55  ;;  %7120 = vmatmul.msk.bf16.gmra.mxu3 %vm2295_vm11, %v8531_v13  ;;  %v3348_v12 = vsel %vm2295_vm11, %v3316_v56, %v11972_v18  ;;  %2807 = vrot.lane.b32.xlu0 %v2736_v35, %s11789_s16  ;;  %v4760_v55 = vmax.f32 %v4535_v63, %v4634_v53  ;;  %v9501_v56 = vunpack.c.l.bf16 %v4484_v24 }
 0x3e2   : > { %v4761_v35 = vmax.f32 %v4536_v36, %v4636_v30  ;;  %v4907_v18 = vrot.slane %v9455_v4, 2  ;;  %v9506_v63 = vsel %vm1273_vm9, %v2572_v34, %v9100_v11  ;;  %v9510_v7 = vsel %vm3349_vm12, %v3348_v12, %v9324_v1  ;;  %v11980_v12 = vld [vmem:[#allocation52_spill] sm:$0xff] }
 0x3e3   : > { %11968 = vst [vmem:[#allocation41_spill] sm:$0xff] %v9469_v29  ;;  %v9512_v29 = vpop.f32.mrf.mxu0  ;;  %v4906_v36 = vsel %vm2344_vm3, %v4904_v32, %v4905_v60  ;;  %v9517_v30 = vunpack.c.l.bf16 %v4485_v28  ;;  %v9519_v24 = vunpack.c.l.bf16 %v4486_v25  ;;  %v4637_v11 = vrot.slane %v9501_v56, 1  ;;  %v362_v32 = vld [vmem:[%s7580_s29 + $0x28] sm:$0xf]  ;;  %v363_v28 = vld [vmem:[%s7580_s29 + $0x2c] sm:$0xf] }
 0x3e4   : > { %11978 = vst [vmem:[#allocation43_spill] sm:$0xff] %v9512_v29  ;;  %v2633_v53 = vpop.f32.mrf.mxu3  ;;  %v4908_v34 = vsel %vm2344_vm3, %v4905_v60, %v4907_v18  ;;  %v9526_v1 = vsel %vm1273_vm9, %v2575_v20, %v11979_v5  ;;  %v4762_v25 = vmax.f32 %v9455_v4, %v4635_v59  ;;  %v5032_v26 = vmax.f32 %v4760_v55, %v4906_v36 }
 0x3e5   : > { %v2701_v29 = vadd.f32 %v2633_v53, %v11980_v12  ;;  %v4487_v60 = vsel %vm9477_vm0, %v361_v57, 4286644096  ;;  %v4488_v16 = vsel %vm9486_vm7, %v362_v32, 4286644096  ;;  %v4489_v5 = vsel %vm9495_vm6, %v363_v28, 4286644096 }
 0x3e6   : > { %v3595_v62 = vpop.f32.mrf.mxu2  ;;  %7209 = vmatmul.msk.bf16.gmra.mxu0 %vm3425_vm13, %v9510_v7  ;;  %v5033_v20 = vmax.f32 %v4761_v35, %v4908_v34  ;;  %v9542_v52 = vunpack.c.l.bf16 %v4487_v60  ;;  %v9544_v49 = vunpack.c.l.bf16 %v4488_v16  ;;  %v9546_v38 = vunpack.c.l.bf16 %v4489_v5 }
 0x3e7   : > { %v2737_v53 = vadd.f32 %v9284_v54, %v2701_v29  ;;  %v4638_v59 = vrot.slane %v9517_v30, 1  ;;  %v9552_v55 = vrot.slane %v9519_v24, 1  ;;  %v4909_v36 = vrot.slane %v9501_v56, 2 }
 0x3e8   : > { %v3490_v12 = vpop.f32.mrf.mxu1  ;;  %v2480_v35 = vadd.f32 %v8875_v6, %v8880_v39  ;;  %v2483_v29 = vadd.f32 %v8911_v9, %v8919_v2  ;;  %v4910_v34 = vrot.slane %v9517_v30, 2  ;;  %v5034_v57 = vmax.f32 %v4762_v25, %v4907_v18 }
 0x3e9   : > { %v9548_v4 = vadd.f32 %v3593_v3, %v3490_v12  ;;  %2809 = vrot.lane.b32.xlu1 %v2737_v53, %s11789_s16  ;;  %v2582_v3 = vshll.u32 %v9506_v63, 16  ;;  %v9567_v32 = vsel %vm1863_vm2, %v4637_v11, %v4638_v59  ;;  %v9570_v6 = vrot.slane %v9519_v24, 2 }
 0x3ea   : > { %v5179_v39 = vmax.f32 %v5032_v26, %v9501_v56  ;;  %v2586_v9 = vshll.u32 %v9526_v1, 16  ;;  %v3405_v2 = vsel %vm773_vm1, %v9310_v61, %v9338_v31  ;;  %v9579_v18 = vsel %vm1863_vm2, %v4638_v59, %v9552_v55 }
 0x3eb   : > { %11981 = vst [vmem:[#allocation42_spill] sm:$0xff] %v9548_v4  ;;  %7143 = vmatmul.msk.bf16.gmra.mxu1 %vm3425_vm13, %v9378_v23  ;;  %7164 = vmatmul.msk.bf16.gmra.mxu2 %vm3425_vm13, %v9378_v23  ;;  %v4642_v28 = vrot.slane %v9542_v52, 1  ;;  %v4643_v11 = vrot.slane %v9544_v49, 1  ;;  %v9584_v60 = vrot.slane %v9546_v38, 1  ;;  %v4911_v26 = vsel %vm2344_vm3, %v4909_v36, %v4910_v34  ;;  %v9588_v16 = vpop.f32.mrf.mxu0 }
 0x3ec   : > { %v2635_v25 = vpop.f32.mrf.mxu3  ;;  %v5180_v1 = vmax.f32 %v5033_v20, %v9517_v30  ;;  %11982 = vst [vmem:[#allocation39_spill] sm:$0xff] %v9588_v16  ;;  %v4913_v31 = vsel %vm2344_vm3, %v4910_v34, %v9570_v6  ;;  %v5181_v53 = vmax.f32 %v5034_v57, %v9519_v24  ;;  %v5334_v12 = vmax.f32 %v5179_v39, %v9567_v32 }
 0x3ed   : > { %v2702_v5 = vadd.f32 %v2635_v25, %v2480_v35  ;;  %v3407_v59 = vsel %vm1273_vm9, %v3405_v2, %v9346_v46  ;;  %v4914_v4 = vrot.slane %v9542_v52, 2  ;;  %v4915_v36 = vrot.slane %v9544_v49, 2 }
 0x3ee   : > { %v3598_v61 = vpop.f32.mrf.mxu2  ;;  %v5335_v20 = vmax.f32 %v5180_v1, %v9579_v18  ;;  %v9601_v25 = vrot.slane %v9546_v38, 2  ;;  %v5336_v34 = vmax.f32 %v5181_v53, %v9552_v55  ;;  %v5486_v57 = vmax.f32 %v5334_v12, %v4911_v26  ;;  %v11984_v1 = vld [vmem:[#allocation50_spill] sm:$0xff] }
 0x3ef   : > { %v2738_v16 = vadd.f32 %v9284_v54, %v2702_v5  ;;  %v2584_v23 = vrot.slane %v2582_v3, 1  ;;  %v9609_v46 = vsel %vm1863_vm2, %v4642_v28, %v4643_v11  ;;  %v3409_v54 = vsel %vm2295_vm11, %v3407_v59, %v11984_v1 }
 0x3f0   : > { %v3492_v35 = vpop.f32.mrf.mxu1  ;;  %v5487_v2 = vmax.f32 %v5335_v20, %v4913_v31  ;;  %v9616_v5 = vsel %vm1863_vm2, %v4643_v11, %v9584_v60  ;;  %v5488_v3 = vmax.f32 %v5336_v34, %v9570_v6  ;;  %v2580_v53 = vshrl.u32 %v9506_v63, 16 }
 0x3f1   : > { %v9604_v39 = vadd.f32 %v3595_v62, %v3492_v35  ;;  %7121 = vmatmul.msk.bf16.gmra.mxu3 %vm2295_vm11, %v8583_v47  ;;  %2811 = vrot.lane.b32.xlu2 %v2738_v16, %s11789_s16  ;;  %v5633_v62 = vmax.f32 %v5486_v57, %v9542_v52  ;;  %v2588_v47 = vrot.slane %v2586_v9, 1  ;;  %v9622_v28 = vsel %vm2344_vm3, %v4914_v4, %v4915_v36 }
 0x3f2   : > { %v5634_v12 = vmax.f32 %v5487_v2, %v9544_v49  ;;  %v9627_v59 = vsel %vm2344_vm3, %v4915_v36, %v9601_v25  ;;  %v5635_v16 = vmax.f32 %v5488_v3, %v9546_v38  ;;  %v4763_v20 = vmax.f32 %v9501_v56, %v9567_v32  ;;  %v366_v3 = vld [vmem:[%s7580_s29 + $0x38] sm:$0xf] }
 0x3f3   : > { %11983 = vst [vmem:[#allocation46_spill] sm:$0xff] %v9604_v39  ;;  %v5788_v11 = vmax.f32 %v5633_v62, %v9609_v46  ;;  %v2585_v35 = vor.u32 %v2584_v23, %v2580_v53  ;;  %v9635_v4 = vsel %vm3349_vm12, %v3409_v54, %v9329_v0  ;;  %v4764_v36 = vmax.f32 %v9517_v30, %v9579_v18  ;;  %v364_v18 = vld [vmem:[%s7580_s29 + $0x30] sm:$0xf]  ;;  %v9655_v2 = vpop.f32.mrf.mxu0  ;;  %v365_v54 = vld [vmem:[%s7580_s29 + $0x34] sm:$0xf] }
 0x3f4   : > { %v2638_v63 = vpop.f32.mrf.mxu3  ;;  %11985 = vst [vmem:[#allocation51_spill] sm:$0xff] %v9635_v4  ;;  %v5789_v9 = vmax.f32 %v5634_v12, %v9616_v5  ;;  %v3673_v34 = vsel %vm773_vm1, %v9363_v33, %v9369_v22  ;;  %v5790_v0 = vmax.f32 %v5635_v16, %v9584_v60  ;;  %v9651_v32 = vadd.f32 %v9036_v50, %v9068_v10 }
 0x3f5   : > { %v9643_v57 = vadd.f32 %v2638_v63, %v2483_v29  ;;  %v5940_v23 = vmax.f32 %v5788_v11, %v9622_v28  ;;  %v9658_v22 = vsel %vm1574_vm4, %v2585_v35, %v2588_v47  ;;  %v5035_v62 = vmax.f32 %v4763_v20, %v4911_v26  ;;  %v3822_v20 = vpop.permute.xlu2 %3821 }
 0x3f6   : > { %v3600_v56 = vpop.f32.mrf.mxu2  ;;  %7210 = vmatmul.msk.bf16.gmra.mxu0 %vm3425_vm13, %v9635_v4  ;;  %v5941_v30 = vmax.f32 %v5789_v9, %v9627_v59  ;;  %v5942_v29 = vmax.f32 %v5790_v0, %v9601_v25  ;;  %v3675_v53 = vsel %vm1273_vm9, %v3673_v34, %v9355_v43  ;;  %v5036_v12 = vmax.f32 %v4764_v36, %v4913_v31  ;;  %v11987_v0 = vld [vmem:[#allocation54_spill] sm:$0xff] }
 0x3f7   : > { %v5988_v1 = vpack.c.bf16 %v5940_v23, %v5940_v23  ;;  %v4490_v63 = vsel %vm9477_vm0, %v364_v18, 4286644096  ;;  %v4765_v47 = vmax.f32 %v9519_v24, %v9552_v55  ;;  %v4492_v31 = vsel %vm9495_vm6, %v366_v3, 4286644096 }
 0x3f8   : > { %v3495_v33 = vpop.f32.mrf.mxu1  ;;  %v5989_v10 = vpack.c.bf16 %v5941_v30, %v5941_v30  ;;  %v5990_v35 = vpack.c.bf16 %v5942_v29, %v5942_v29  ;;  %v5182_v24 = vmax.f32 %v5035_v62, %v9542_v52  ;;  %v3839_v55 = vsel %vm773_vm1, %v9374_v27, %v3822_v20 }
 0x3f9   : > { %v9665_v50 = vadd.f32 %v3598_v61, %v3495_v33  ;;  %v6040_v16 = vshrl.u32 %v5988_v1, 16  ;;  %v6043_v11 = vshll.u32 %v5988_v1, 16  ;;  %v4491_v61 = vsel %vm9486_vm7, %v365_v54, 4286644096 }
 0x3fa   : > { %v6049_v26 = vshll.u32 %v5989_v10, 16  ;;  %v6053_v43 = vshrl.u32 %v5989_v10, 16  ;;  %v3677_v23 = vsel %vm2295_vm11, %v3675_v53, %v11987_v0  ;;  %v3841_v33 = vsel %vm1273_vm9, %v3839_v55, %v9387_v58  ;;  %vm9731_vm9 = vmor %vm6036_vm8, %vm6037_vm10 }
 0x3fb   : > { %11986 = vst [vmem:[#allocation49_spill] sm:$0xff] %v9665_v50  ;;  %7144 = vmatmul.msk.bf16.gmra.mxu1 %vm3425_vm13, %v9417_v17  ;;  %7165 = vmatmul.msk.bf16.gmra.mxu2 %vm3425_vm13, %v9417_v17  ;;  %v6042_v9 = vrot.slane %v6040_v16, 4  ;;  %v6045_v36 = vrot.slane %v6043_v11, 5  ;;  %v9690_v29 = vunpack.c.l.bf16 %v4490_v63  ;;  %v9692_v54 = vunpack.c.l.bf16 %v4491_v61 }
 0x3fc   : > { %v9682_v34 = vpop.f32.mrf.mxu3  ;;  %v9686_v30 = vrot.slane %v6049_v26, 5  ;;  %v6055_v18 = vrot.slane %v6053_v43, 4  ;;  %v9694_v3 = vunpack.c.l.bf16 %v4492_v31  ;;  %vm2889_vm4 = vcmask 130112   ;;  %v9708_v43 = vpop.f32.mrf.mxu0 }
 0x3fd   : > { %v5183_v27 = vmax.f32 %v5036_v12, %v9544_v49  ;;  %v6046_v53 = vor.u32 %v6045_v36, %v6042_v9  ;;  %v6059_v10 = vshll.u32 %v5990_v35, 16  ;;  %v5037_v16 = vmax.f32 %v4765_v47, %v9570_v6 }
 0x3fe   : > { %v3603_v1 = vpop.f32.mrf.mxu2  ;;  %v5337_v11 = vmax.f32 %v5182_v24, %v9609_v46  ;;  %v6056_v63 = vor.u32 %v6055_v18, %v9686_v30  ;;  %v4766_v26 = vmax.f32 %v9542_v52, %v9609_v46  ;;  %v4767_v12 = vmax.f32 %v9544_v49, %v9616_v5 }
 0x3ff   : > { %v4647_v6 = vrot.slane %v9690_v29, 1  ;;  %v4648_v47 = vrot.slane %v9692_v54, 1  ;;  %v4919_v61 = vrot.slane %v9690_v29, 2  ;;  %v4920_v31 = vrot.slane %v9692_v54, 2 }
 0x400   : > { %v3497_v62 = vpop.f32.mrf.mxu1  ;;  %v5038_v52 = vmax.f32 %v4766_v26, %v9622_v28  ;;  %v5039_v46 = vmax.f32 %v4767_v12, %v9627_v59  ;;  %v6047_v20 = vrot.slane %v6046_v53, 4  ;;  %v5338_v35 = vmax.f32 %v5183_v27, %v9616_v5 }
 0x401   : > { %v9699_v58 = vadd.f32 %v3600_v56, %v3497_v62  ;;  %7122 = vmatmul.msk.bf16.gmra.mxu3 %vm2295_vm11, %v8639_v48  ;;  %v9713_v56 = vrot.slane %v9694_v3, 1  ;;  %v5184_v48 = vmax.f32 %v5037_v16, %v9546_v38  ;;  %v5489_v36 = vmax.f32 %v5337_v11, %v9622_v28 }
 0x402   : > { %v9727_v55 = vsel %vm3349_vm12, %v3677_v23, %v9389_v44  ;;  %v6057_v18 = vrot.slane %v6056_v63, 4  ;;  %v6061_v62 = vrot.slane %v6059_v10, 5  ;;  %v9736_v5 = vrot.slane %v9694_v3, 2  ;;  %v367_v44 = vld [vmem:[%s7580_s29 + $0x3c] sm:$0xf] }
 0x403   : > { %11988 = vst [vmem:[#allocation7_spill] sm:$0xff] %v9699_v58  ;;  %v2794_v49 = vpop.permute.xlu2 %2793  ;;  %v5339_v9 = vmax.f32 %v5184_v48, %v9584_v60  ;;  %v368_v23 = vld [vmem:[%s7580_s29 + $0x40] sm:$0xf]  ;;  %v5185_v53 = vmax.f32 %v5038_v52, %v9690_v29  ;;  %v5490_v16 = vmax.f32 %v5338_v35, %v9627_v59  ;;  %v3843_v10 = vsel %vm2295_vm11, %v3841_v33, %v8926_v45 }
 0x404   : > { %2890 = vst.msk [vmem:[%s7664_s24] sm:$0xff] %vm2889_vm4, %v2794_v49  ;;  %v2643_v24 = vpop.f32.mrf.mxu3  ;;  %v9751_v63 = vsel %vm1863_vm2, %v4647_v6, %v4648_v47  ;;  %v5186_v26 = vmax.f32 %v5039_v46, %v9692_v54  ;;  %v6052_v48 = vsel %vm9731_vm9, %v6047_v20, %v9686_v30  ;;  %v4493_v59 = vsel %vm9477_vm0, %v367_v44, 4286644096  ;;  %v369_v30 = vld [vmem:[%s7580_s29 + $0x44] sm:$0xf] }
 0x405   : > { %11989 = vst [vmem:[#allocation45_spill] sm:$0xff] %v9727_v55  ;;  %v9739_v28 = vadd.f32 %v2643_v24, %v8998_v21  ;;  %v5491_v11 = vmax.f32 %v5339_v9, %v9601_v25  ;;  %v9755_v21 = vsel %vm1863_vm2, %v4648_v47, %v9713_v56  ;;  %v9764_v52 = vsel %vm2344_vm3, %v4919_v61, %v4920_v31  ;;  %v9794_v24 = vpop.f32.mrf.mxu0 }
 0x406   : > { %v3605_v27 = vpop.f32.mrf.mxu2  ;;  %7211 = vmatmul.msk.bf16.gmra.mxu0 %vm3425_vm13, %v9727_v55  ;;  %v5636_v45 = vmax.f32 %v5489_v36, %v9690_v29  ;;  %v4494_v6 = vsel %vm9486_vm7, %v368_v23, 4286644096  ;;  %v9773_v47 = vsel %vm2344_vm3, %v4920_v31, %v9736_v5  ;;  %v5637_v46 = vmax.f32 %v5490_v16, %v9692_v54 }
 0x407   : > { %v6062_v49 = vsel %vm9731_vm9, %v6057_v18, %v6061_v62  ;;  %v5340_v61 = vmax.f32 %v5185_v53, %v9751_v63  ;;  %v5638_v20 = vmax.f32 %v5491_v11, %v9694_v3  ;;  %v9784_v35 = vsel %vm3349_vm12, %v3843_v10, %v9397_v51 }
 0x408   : > { %v3500_v12 = vpop.f32.mrf.mxu1  ;;  %11993 = vst [vmem:[#allocation52_spill] sm:$0xff] %v9784_v35  ;;  %v9790_v31 = vunpack.c.l.bf16 %v4493_v59  ;;  %v5341_v9 = vmax.f32 %v5186_v26, %v9755_v21  ;;  %v5792_v36 = vmax.f32 %v5637_v46, %v9755_v21  ;;  %v9796_v18 = vunpack.c.l.bf16 %v4494_v6 }
 0x409   : > { %v9767_v33 = vadd.f32 %v3603_v1, %v3500_v12  ;;  %v5791_v1 = vmax.f32 %v5636_v45, %v9751_v63  ;;  %v5793_v62 = vmax.f32 %v5638_v20, %v9713_v56  ;;  %v4495_v44 = vsel %vm9495_vm6, %v369_v30, 4286644096 }
 0x40a   : > { %v6428_v53 = vunpack.c.l.b16 %v6052_v48  ;;  %v6429_v16 = vunpack.c.l.b16 %v6062_v49  ;;  %v5944_v11 = vmax.f32 %v5792_v36, %v9773_v47  ;;  %v4768_v10 = vmax.f32 %v9546_v38, %v9584_v60 }
 0x40b   : > { %11992 = vst [vmem:[#allocation8_spill] sm:$0xff] %v9767_v33  ;;  %7145 = vmatmul.msk.bf16.gmra.mxu1 %vm3425_vm13, %v9510_v7  ;;  %7166 = vmatmul.msk.bf16.gmra.mxu2 %vm3425_vm13, %v9510_v7  ;;  %v5943_v51 = vmax.f32 %v5791_v1, %v9764_v52  ;;  %v5492_v59 = vmax.f32 %v5340_v61, %v9764_v52  ;;  %v9811_v20 = vunpack.c.l.bf16 %v4495_v44  ;;  %v4652_v48 = vrot.slane %v9790_v31, 1 }
 0x40c   : > { %v2645_v23 = vpop.f32.mrf.mxu3  ;;  %v5945_v45 = vmax.f32 %v5793_v62, %v9736_v5  ;;  %v5493_v46 = vmax.f32 %v5341_v9, %v9773_v47  ;;  %v5992_v30 = vpack.c.bf16 %v5944_v11, %v5944_v11  ;;  %v4653_v60 = vrot.slane %v9796_v18, 1 }
 0x40d   : > { %v9806_v26 = vadd.f32 %v2645_v23, %v9651_v32  ;;  %v5991_v6 = vpack.c.bf16 %v5943_v51, %v5943_v51  ;;  %v4769_v61 = vmax.f32 %v9690_v29, %v9751_v63  ;;  %v4770_v51 = vmax.f32 %v9692_v54, %v9755_v21 }
 0x40e   : > { %v3608_v12 = vpop.f32.mrf.mxu2  ;;  %v5993_v1 = vpack.c.bf16 %v5945_v45, %v5945_v45  ;;  %v6073_v9 = vshll.u32 %v5992_v30, 16  ;;  %v6077_v62 = vshrl.u32 %v5992_v30, 16  ;;  %v4924_v11 = vrot.slane %v9790_v31, 2 }
 0x40f   : > { %v6064_v36 = vshrl.u32 %v5991_v6, 16  ;;  %v6067_v38 = vshll.u32 %v5991_v6, 16  ;;  %v9829_v29 = vsel %vm1863_vm2, %v4652_v48, %v4653_v60  ;;  %v5639_v54 = vmax.f32 %v5492_v59, %v9790_v31 }
 0x410   : > { %v3502_v49 = vpop.f32.mrf.mxu1  ;;  %v6075_v45 = vrot.slane %v6073_v9, 5  ;;  %v6079_v6 = vrot.slane %v6077_v62, 4  ;;  %v4925_v30 = vrot.slane %v9796_v18, 2  ;;  %v9837_v9 = vpop.f32.mrf.mxu0  ;;  %v6460_v48 = vpack.c.b16 %v6429_v16, %v6428_v53 }
 0x411   : > { %v9815_v32 = vadd.f32 %v3605_v27, %v3502_v49  ;;  %7123 = vmatmul.msk.bf16.gmra.mxu3 %vm2295_vm11, %v9658_v22  ;;  %v6066_v44 = vrot.slane %v6064_v36, 4  ;;  %v6069_v23 = vrot.slane %v6067_v38, 5  ;;  %v9825_v27 = vrot.slane %v9811_v20, 1 }
 0x412   : > { %v5040_v49 = vmax.f32 %v4768_v10, %v9601_v25  ;;  %v6080_v21 = vor.u32 %v6079_v6, %v6075_v45  ;;  %v9834_v36 = vrot.slane %v9811_v20, 2  ;;  %v5640_v59 = vmax.f32 %v5493_v46, %v9796_v18 }
 0x413   : > { %11994 = vst [vmem:[#allocation50_spill] sm:$0xff] %v9815_v32  ;;  %v6070_v22 = vor.u32 %v6069_v23, %v6066_v44  ;;  %v6083_v32 = vshll.u32 %v5993_v1, 16  ;;  %v5041_v1 = vmax.f32 %v4769_v61, %v9764_v52  ;;  %v370_v44 = vld [vmem:[%s7580_s29 + $0x48] sm:$0xf]  ;;  %v371_v23 = vld [vmem:[%s7580_s29 + $0x4c] sm:$0xf]  ;;  %v9850_v6 = vsel %vm1863_vm2, %v4653_v60, %v9825_v27 }
 0x414   : > { %v2648_v63 = vpop.f32.mrf.mxu3  ;;  %v5187_v38 = vmax.f32 %v5040_v49, %v9694_v3  ;;  %v6081_v33 = vrot.slane %v6080_v21, 4  ;;  %v5794_v53 = vmax.f32 %v5639_v54, %v9829_v29  ;;  %v9858_v52 = vsel %vm2344_vm3, %v4924_v11, %v4925_v30  ;;  %v9876_v11 = vpop.permute.xlu0 %4026 }
 0x415   : > { %v9840_v25 = vadd.f32 %v2648_v63, %v9102_v15  ;;  %v6071_v62 = vrot.slane %v6070_v22, 4  ;;  %v5042_v63 = vmax.f32 %v4770_v51, %v9773_v47  ;;  %v6085_v58 = vrot.slane %v6083_v32, 5  ;;  %11996 = vst [vmem:[#allocation60_spill] sm:$0xff] %v9876_v11 }
 0x416   : > { %v3610_v10 = vpop.f32.mrf.mxu2  ;;  %7212 = vmatmul.msk.bf16.gmra.mxu0 %vm3425_vm13, %v9784_v35  ;;  %v5342_v49 = vmax.f32 %v5187_v38, %v9713_v56  ;;  %v9862_v46 = vsel %vm2344_vm3, %v4925_v30, %v9834_v36  ;;  %v4496_v60 = vsel %vm9477_vm0, %v370_v44, 4286644096  ;;  %v4497_v47 = vsel %vm9486_vm7, %v371_v23, 4286644096 }
 0x417   : > { %v5188_v61 = vmax.f32 %v5041_v1, %v9790_v31  ;;  %v6076_v51 = vsel %vm9731_vm9, %v6071_v62, %v6075_v45  ;;  %v5189_v54 = vmax.f32 %v5042_v63, %v9796_v18  ;;  %v6086_v21 = vsel %vm9731_vm9, %v6081_v33, %v6085_v58 }
 0x418   : > { %v3505_v15 = vpop.f32.mrf.mxu1  ;;  %v5494_v32 = vmax.f32 %v5342_v49, %v9736_v5  ;;  %v5946_v38 = vmax.f32 %v5794_v53, %v9858_v52  ;;  %v9886_v1 = vunpack.c.l.bf16 %v4496_v60  ;;  %v9888_v44 = vunpack.c.l.bf16 %v4497_v47 }
 0x419   : > { %v9855_v16 = vadd.f32 %v3608_v12, %v3505_v15  ;;  %v5795_v12 = vmax.f32 %v5640_v59, %v9850_v6  ;;  %v372_v59 = vld [vmem:[%s7580_s29 + $0x50] sm:$0xf]  ;;  %v4771_v62 = vmax.f32 %v9694_v3, %v9713_v56  ;;  %v6430_v33 = vunpack.c.l.b16 %v6076_v51 }
 0x41a   : > { %v5641_v30 = vmax.f32 %v5494_v32, %v9811_v20  ;;  %v5994_v15 = vpack.c.bf16 %v5946_v38, %v5946_v38  ;;  %v6431_v63 = vunpack.c.l.b16 %v6086_v21  ;;  %v5343_v53 = vmax.f32 %v5188_v61, %v9829_v29 }
 0x41b   : > { %11995 = vst [vmem:[#allocation54_spill] sm:$0xff] %v9855_v16  ;;  %7146 = vmatmul.msk.bf16.gmra.mxu1 %vm3425_vm13, %v9635_v4  ;;  %7236 = vmatmul.msk.bf16.vlgmr.msra.gmra.mxu2 %vm773_vm1, %v6460_v48  ;;  %v2800_v22 = vpop.permute.xlu2 %2799  ;;  %v5947_v45 = vmax.f32 %v5795_v12, %v9862_v46  ;;  %v4498_v47 = vsel %vm9495_vm6, %v372_v59, 4286644096  ;;  %v5344_v12 = vmax.f32 %v5189_v54, %v9850_v6  ;;  %v12007_v16 = vld [vmem:[#allocation6_spill] sm:$0xff] }
 0x41c   : > { %2893 = vst.msk [vmem:[%s7664_s24 + $0x18] sm:$0xff] %vm2889_vm4, %v2800_v22  ;;  %v2650_v48 = vpop.f32.mrf.mxu3  ;;  %v5796_v49 = vmax.f32 %v5641_v30, %v9825_v27  ;;  %v6088_v56 = vshrl.u32 %v5994_v15, 16  ;;  %v4772_v61 = vmax.f32 %v9790_v31, %v9829_v29  ;;  %v4773_v30 = vmax.f32 %v9796_v18, %v9850_v6 }
 0x41d   : > { %v9894_v23 = vadd.f32 %v2650_v48, %v9125_v40  ;;  %v5995_v60 = vpack.c.bf16 %v5947_v45, %v5947_v45  ;;  %v6091_v40 = vshll.u32 %v5994_v15, 16  ;;  %v9910_v59 = vunpack.c.l.bf16 %v4498_v47 }
 0x41e   : > { %v3613_v58 = vpop.f32.mrf.mxu2  ;;  %v5948_v3 = vmax.f32 %v5796_v49, %v9834_v36  ;;  %v6090_v38 = vrot.slane %v6088_v56, 4  ;;  %v5495_v48 = vmax.f32 %v5343_v53, %v9858_v52  ;;  %v6461_v49 = vpack.c.b16 %v6431_v63, %v6430_v33 }
 0x41f   : > { %v6097_v51 = vshll.u32 %v5995_v60, 16  ;;  %v6101_v21 = vshrl.u32 %v5995_v60, 16  ;;  %v6093_v54 = vrot.slane %v6091_v40, 5  ;;  %v5496_v15 = vmax.f32 %v5344_v12, %v9862_v46 }
 0x420   : > { %v3507_v32 = vpop.f32.mrf.mxu1  ;;  %v5044_v18 = vmax.f32 %v4772_v61, %v9858_v52  ;;  %v4657_v29 = vrot.slane %v9886_v1, 1  ;;  %v4658_v6 = vrot.slane %v9888_v44, 1  ;;  %v5043_v53 = vmax.f32 %v4771_v62, %v9736_v5 }
 0x421   : > { %v9902_v22 = vadd.f32 %v3610_v10, %v3507_v32  ;;  %7174 = vmatmul.msk.bf16.vlgmr.msra.gmra.mxu3 %vm3425_vm13, %v9011_v41  ;;  %v5996_v10 = vpack.c.bf16 %v5948_v3, %v5948_v3  ;;  %v9914_v41 = vrot.slane %v6097_v51, 5  ;;  %v6103_v32 = vrot.slane %v6101_v21, 4 }
 0x422   : > { %v5045_v63 = vmax.f32 %v4773_v30, %v9862_v46  ;;  %v6094_v47 = vor.u32 %v6093_v54, %v6090_v38  ;;  %v9927_v12 = vrot.slane %v9910_v59, 1  ;;  %v4929_v52 = vrot.slane %v9886_v1, 2  ;;  %v374_v30 = vld [vmem:[%s7580_s29 + $0x58] sm:$0xf] }
 0x423   : > { %11997 = vst [vmem:[#allocation61_spill] sm:$0xff] %v9902_v22  ;;  %v2796_v45 = vpop.permute.xlu0 %2795  ;;  %v6107_v3 = vshll.u32 %v5996_v10, 16  ;;  %v4930_v56 = vrot.slane %v9888_v44, 2  ;;  %v5190_v40 = vmax.f32 %v5043_v53, %v9811_v20  ;;  %v6104_v5 = vor.u32 %v6103_v32, %v9914_v41 }
 0x424   : > { %2891 = vst.msk [vmem:[%s7664_s24 + $0x8] sm:$0xff] %vm2889_vm4, %v2796_v45  ;;  %v2653_v31 = vpop.f32.mrf.mxu3  ;;  %v9935_v62 = vrot.slane %v9910_v59, 2  ;;  %v5642_v46 = vmax.f32 %v5495_v48, %v9886_v1  ;;  %v5191_v21 = vmax.f32 %v5044_v18, %v9886_v1  ;;  %v9943_v38 = vsel %vm1863_vm2, %v4657_v29, %v4658_v6 }
 0x425   : > { %v9923_v60 = vadd.f32 %v2653_v31, %v9150_v42  ;;  %v373_v42 = vld [vmem:[%s7580_s29 + $0x54] sm:$0xf]  ;;  %v5345_v54 = vmax.f32 %v5190_v40, %v9825_v27  ;;  %v5192_v10 = vmax.f32 %v5045_v63, %v9888_v44  ;;  %v6095_v45 = vrot.slane %v6094_v47, 4  ;;  %v375_v47 = vld [vmem:[%s7580_s29 + $0x5c] sm:$0xf] }
 0x426   : > { %v3615_v33 = vpop.f32.mrf.mxu2  ;;  %v9949_v32 = vsel %vm1863_vm2, %v4658_v6, %v9927_v12  ;;  %v6109_v48 = vrot.slane %v6107_v3, 5  ;;  %v4499_v31 = vsel %vm9477_vm0, %v373_v42, 4286644096  ;;  %v9958_v18 = vsel %vm2344_vm3, %v4929_v52, %v4930_v56  ;;  %v11999_v3 = vld [vmem:[#allocation15_spill] sm:$0xff]  ;;  %v12000_v52 = vld [vmem:[#allocation22_spill] sm:$0xff] }
 0x427   : > { %v5497_v29 = vmax.f32 %v5345_v54, %v9834_v36  ;;  %v6105_v6 = vrot.slane %v6104_v5, 4  ;;  %v4500_v63 = vsel %vm9486_vm7, %v374_v30, 4286644096  ;;  %v9971_v40 = vadd.f32 %v11999_v3, %v8965_v19 }
 0x428   : > { %v3510_v61 = vpop.f32.mrf.mxu1  ;;  %v6100_v19 = vsel %vm9731_vm9, %v6095_v45, %v9914_v41  ;;  %v9987_v3 = vunpack.c.l.bf16 %v4499_v31  ;;  %v5346_v22 = vmax.f32 %v5191_v21, %v9943_v38  ;;  %v5347_v41 = vmax.f32 %v5192_v10, %v9949_v32 }
 0x429   : > { %v9938_v51 = vadd.f32 %v3613_v58, %v3510_v61  ;;  %v5643_v58 = vmax.f32 %v5496_v15, %v9888_v44  ;;  %v5797_v15 = vmax.f32 %v5642_v46, %v9943_v38  ;;  %v12001_v61 = vld [vmem:[#allocation56_spill] sm:$0xff]  ;;  %v5644_v30 = vmax.f32 %v5497_v29, %v9910_v59 }
 0x42a   : > { %v9975_v42 = vadd.f32 %v12001_v61, %v12000_v52  ;;  %v9990_v61 = vunpack.c.l.bf16 %v4500_v63  ;;  %v12004_v63 = vld [vmem:[#allocation14_spill] sm:$0xff] }
 0x42b   : > { %11998 = vst [vmem:[#allocation62_spill] sm:$0xff] %v9938_v51  ;;  %7237 = vmatmul.msk.bf16.gmra.mxu2 %vm773_vm1, %v6461_v49  ;;  %7220 = vmatmul.msk.bf16.vlgmr.msra.gmra.mxu1 %vm3425_vm13, %v8992_v14  ;;  %v2798_v53 = vpop.permute.xlu1 %2797  ;;  %v9965_v49 = vsel %vm2344_vm3, %v4930_v56, %v9935_v62  ;;  %v5798_v54 = vmax.f32 %v5643_v58, %v9949_v32  ;;  %v12002_v56 = vld [vmem:[#allocation33_spill] sm:$0xff]  ;;  %v4501_v58 = vsel %vm9495_vm6, %v375_v47, 4286644096 }
 0x42c   : > { %2892 = vst.msk [vmem:[%s7664_s24 + $0x10] sm:$0xff] %vm2889_vm4, %v2798_v53  ;;  %v2655_v5 = vpop.f32.mrf.mxu3  ;;  %v5949_v52 = vmax.f32 %v5797_v15, %v9958_v18  ;;  %v5799_v53 = vmax.f32 %v5644_v30, %v9927_v12  ;;  %v4774_v47 = vmax.f32 %v9811_v20, %v9825_v27  ;;  %v5499_v27 = vmax.f32 %v5347_v41, %v9965_v49 }
 0x42d   : > { %v9982_v51 = vadd.f32 %v2655_v5, %v12002_v56  ;;  %v5950_v29 = vmax.f32 %v5798_v54, %v9965_v49  ;;  %v6110_v56 = vsel %vm9731_vm9, %v6105_v6, %v6109_v48  ;;  %v6432_v54 = vunpack.c.l.b16 %v6100_v19 }
 0x42e   : > { %v3618_v46 = vpop.f32.mrf.mxu2  ;;  %v5997_v45 = vpack.c.bf16 %v5949_v52, %v5949_v52  ;;  %v5951_v15 = vmax.f32 %v5799_v53, %v9935_v62  ;;  %v10007_v6 = vunpack.c.l.bf16 %v4501_v58  ;;  %v6433_v21 = vunpack.c.l.b16 %v6110_v56 }
 0x42f   : > { %v5998_v30 = vpack.c.bf16 %v5950_v29, %v5950_v29  ;;  %v5498_v53 = vmax.f32 %v5346_v22, %v9958_v18  ;;  %v5046_v56 = vmax.f32 %v4774_v47, %v9834_v36  ;;  %v4776_v36 = vmax.f32 %v9888_v44, %v9949_v32 }
 0x430   : > { %v3512_v5 = vpop.f32.mrf.mxu1  ;;  %v6112_v11 = vshrl.u32 %v5997_v45, 16  ;;  %v6115_v48 = vshll.u32 %v5997_v45, 16  ;;  %v5999_v10 = vpack.c.bf16 %v5951_v15, %v5951_v15  ;;  %v12005_v45 = vld [vmem:[#allocation19_spill] sm:$0xff]  ;;  %v10024_v22 = vrot.slane %v10007_v6, 1 }
 0x431   : > { %v10000_v31 = vadd.f32 %v3615_v33, %v3512_v5  ;;  %7175 = vmatmul.msk.bf16.gmra.mxu3 %vm3425_vm13, %v12004_v63  ;;  %v6121_v52 = vshll.u32 %v5998_v30, 16  ;;  %v6125_v33 = vshrl.u32 %v5998_v30, 16  ;;  %v4775_v63 = vmax.f32 %v9886_v1, %v9943_v38 }
 0x432   : > { %v6117_v29 = vrot.slane %v6115_v48, 5  ;;  %v4662_v1 = vrot.slane %v9987_v3, 1  ;;  %v6462_v38 = vpack.c.b16 %v6433_v21, %v6432_v54  ;;  %v4934_v47 = vrot.slane %v9987_v3, 2 }
 0x433   : > { %12003 = vst [vmem:[#allocation15_spill] sm:$0xff] %v10000_v31  ;;  %v2806_v5 = vpop.permute.xlu2 %2805  ;;  %v6114_v31 = vrot.slane %v6112_v11, 4  ;;  %v10015_v19 = vrot.slane %v6121_v52, 5  ;;  %v6127_v58 = vrot.slane %v6125_v33, 4  ;;  %v4663_v11 = vrot.slane %v9990_v61, 1 }
 0x434   : > { %2896 = vst.msk [vmem:[%s7664_s24 + $0x30] sm:$0xff] %vm2889_vm4, %v2806_v5  ;;  %v2658_v20 = vpop.f32.mrf.mxu3  ;;  %v6131_v52 = vshll.u32 %v5999_v10, 16  ;;  %v4935_v5 = vrot.slane %v9990_v61, 2  ;;  %v5193_v21 = vmax.f32 %v5046_v56, %v9910_v59  ;;  %v376_v10 = vld [vmem:[%s7580_s29 + $0x60] sm:$0xf] }
 0x435   : > { %v10019_v15 = vadd.f32 %v2658_v20, %v12005_v45  ;;  %v6118_v41 = vor.u32 %v6117_v29, %v6114_v31  ;;  %v6128_v48 = vor.u32 %v6127_v58, %v10015_v19  ;;  %v10032_v20 = vrot.slane %v10007_v6, 2  ;;  %v12006_v45 = vld [vmem:[#allocation25_spill] sm:$0xff] }
 0x436   : > { %v3620_v30 = vpop.f32.mrf.mxu2  ;;  %v10036_v35 = vadd.f32 %v12007_v16, %v12006_v45  ;;  %v5047_v31 = vmax.f32 %v4775_v63, %v9958_v18  ;;  %v377_v29 = vld [vmem:[%s7580_s29 + $0x64] sm:$0xf]  ;;  %v10045_v44 = vsel %vm1863_vm2, %v4662_v1, %v4663_v11  ;;  %v10049_v32 = vsel %vm1863_vm2, %v4663_v11, %v10024_v22 }
 0x437   : > { %v5645_v58 = vmax.f32 %v5498_v53, %v9987_v3  ;;  %v5646_v16 = vmax.f32 %v5499_v27, %v9990_v61  ;;  %v12011_v18 = vld [vmem:[#allocation57_spill] sm:$0xff]  ;;  %v6119_v63 = vrot.slane %v6118_v41, 4  ;;  %v6129_v56 = vrot.slane %v6128_v48, 4 }
 0x438   : > { %v3515_v33 = vpop.f32.mrf.mxu1  ;;  %v6133_v1 = vrot.slane %v6131_v52, 5  ;;  %v5048_v11 = vmax.f32 %v4776_v36, %v9965_v49  ;;  %v10062_v53 = vsel %vm2344_vm3, %v4934_v47, %v4935_v5  ;;  %v10066_v27 = vsel %vm2344_vm3, %v4935_v5, %v10032_v20  ;;  %v12012_v36 = vld [vmem:[#allocation47_spill] sm:$0xff] }
 0x439   : > { %v10038_v54 = vadd.f32 %v3618_v46, %v3515_v33  ;;  %v12009_v46 = vld [vmem:[#allocation40_spill] sm:$0xff]  ;;  %v4502_v41 = vsel %vm9477_vm0, %v376_v10, 4286644096  ;;  %v4503_v48 = vsel %vm9486_vm7, %v377_v29, 4286644096  ;;  %v5800_v49 = vmax.f32 %v5645_v58, %v10045_v44  ;;  %v12013_v47 = vld [vmem:[#allocation11_spill] sm:$0xff] }
 0x43a   : > { %v12010_v33 = vld [vmem:[#allocation36_spill] sm:$0xff]  ;;  %v5801_v52 = vmax.f32 %v5646_v16, %v10049_v32  ;;  %v12014_v5 = vld [vmem:[#allocation59_spill] sm:$0xff]  ;;  %v378_v10 = vld [vmem:[%s7580_s29 + $0x68] sm:$0xf]  ;;  %v6124_v29 = vsel %vm9731_vm9, %v6119_v63, %v10015_v19  ;;  %v6134_v58 = vsel %vm9731_vm9, %v6129_v56, %v6133_v1 }
 0x43b   : > { %12008 = vst [vmem:[#allocation22_spill] sm:$0xff] %v10038_v54  ;;  %v10055_v45 = vadd.f32 %v12010_v33, %v12009_v46  ;;  %7238 = vmatmul.msk.bf16.gmra.mxu2 %vm773_vm1, %v6462_v38  ;;  %7221 = vmatmul.msk.bf16.gmra.mxu1 %vm3425_vm13, %v12011_v18  ;;  %v2802_v54 = vpop.permute.xlu0 %2801  ;;  %v5348_v46 = vmax.f32 %v5193_v21, %v9927_v12  ;;  %v4504_v56 = vsel %vm9495_vm6, %v378_v10, 4286644096  ;;  %v6434_v1 = vunpack.c.l.b16 %v6124_v29 }
 0x43c   : > { %2894 = vst.msk [vmem:[%s7664_s24 + $0x20] sm:$0xff] %vm2889_vm4, %v2802_v54  ;;  %v2660_v38 = vpop.f32.mrf.mxu3  ;;  %v10079_v33 = vadd.f32 %v12013_v47, %v12012_v36  ;;  %v5194_v54 = vmax.f32 %v5047_v31, %v9987_v3  ;;  %v5952_v16 = vmax.f32 %v5800_v49, %v10062_v53  ;;  %v5953_v36 = vmax.f32 %v5801_v52, %v10066_v27 }
 0x43d   : > { %v10082_v55 = vadd.f32 %v2660_v38, %v12014_v5  ;;  %v5500_v50 = vmax.f32 %v5348_v46, %v9935_v62  ;;  %v5195_v38 = vmax.f32 %v5048_v11, %v9990_v61  ;;  %v10095_v5 = vunpack.c.l.bf16 %v4502_v41 }
 0x43e   : > { %v3623_v21 = vpop.f32.mrf.mxu2  ;;  %v10097_v31 = vunpack.c.l.bf16 %v4503_v48  ;;  %v6000_v19 = vpack.c.bf16 %v5952_v16, %v5952_v16  ;;  %v6001_v63 = vpack.c.bf16 %v5953_v36, %v5953_v36  ;;  %v6435_v49 = vunpack.c.l.b16 %v6134_v58 }
 0x43f   : > { %12015 = vst [vmem:[#allocation56_spill] sm:$0xff] %v10082_v55  ;;  %v5647_v46 = vmax.f32 %v5500_v50, %v10007_v6  ;;  %v10107_v11 = vmax.f32 %v5194_v54, %v10045_v44  ;;  %v4779_v16 = vmax.f32 %v9990_v61, %v10049_v32  ;;  %v10115_v29 = vunpack.c.l.bf16 %v4504_v56  ;;  %v12019_v56 = vld [vmem:[#allocation55_spill] sm:$0xff] }
 0x440   : > { %v3517_v47 = vpop.f32.mrf.mxu1  ;;  %v6136_v48 = vshrl.u32 %v6000_v19, 16  ;;  %v6139_v50 = vshll.u32 %v6000_v19, 16  ;;  %v6149_v52 = vshrl.u32 %v6001_v63, 16  ;;  %v4777_v61 = vmax.f32 %v9910_v59, %v9927_v12 }
 0x441   : > { %v10100_v55 = vadd.f32 %v3620_v30, %v3517_v47  ;;  %7176 = vmatmul.msk.bf16.gmra.mxu3 %vm3425_vm13, %v8992_v14  ;;  %v5802_v41 = vmax.f32 %v5647_v46, %v10024_v22  ;;  %v6145_v30 = vshll.u32 %v6001_v63, 16  ;;  %v4778_v14 = vmax.f32 %v9987_v3, %v10045_v44  ;;  %v12017_v63 = vld [vmem:[#allocation20_spill] sm:$0xff] }
 0x442   : > { %v6138_v58 = vrot.slane %v6136_v48, 4  ;;  %v6141_v36 = vrot.slane %v6139_v50, 5  ;;  %v6151_v19 = vrot.slane %v6149_v52, 4  ;;  %v5350_v3 = vmax.f32 %v5195_v38, %v10049_v32  ;;  %v10134_v48 = vld [vmem:[%s11702_s4] ss:$0 sm:$0xff] }
 0x443   : > { %12016 = vst [vmem:[#allocation33_spill] sm:$0xff] %v10100_v55  ;;  %v2804_v47 = vpop.permute.xlu1 %2803  ;;  %v5954_v10 = vmax.f32 %v5802_v41, %v10032_v20  ;;  %v10119_v46 = vrot.slane %v6145_v30, 5  ;;  %v12020_v41 = vld [vmem:[#allocation9_spill] sm:$0xff]  ;;  %v10138_v50 = vadd.f32 %v10134_v48, %v9643_v57  ;;  %v6463_v30 = vpack.c.b16 %v6435_v49, %v6434_v1 }
 0x444   : > { %2895 = vst.msk [vmem:[%s7664_s24 + $0x28] sm:$0xff] %vm2889_vm4, %v2804_v47  ;;  %v2663_v54 = vpop.f32.mrf.mxu3  ;;  %v10129_v4 = vadd.f32 %v12020_v41, %v12019_v56  ;;  %v6142_v32 = vor.u32 %v6141_v36, %v6138_v58  ;;  %v5050_v52 = vmax.f32 %v4778_v14, %v10062_v53  ;;  %v5051_v59 = vmax.f32 %v4779_v16, %v10066_v27  ;;  %v379_v14 = vld [vmem:[%s7580_s29 + $0x6c] sm:$0xf] }
 0x445   : > { %v10122_v55 = vadd.f32 %v2663_v54, %v12017_v63  ;;  %v6002_v44 = vpack.c.bf16 %v5954_v10, %v5954_v10  ;;  %v6152_v12 = vor.u32 %v6151_v19, %v10119_v46  ;;  %v4667_v54 = vrot.slane %v10095_v5, 1  ;;  %v12022_v16 = vld [vmem:[#allocation58_spill] sm:$0xff] }
 0x446   : > { %v3625_v39 = vpop.f32.mrf.mxu2  ;;  %v4668_v63 = vrot.slane %v10097_v31, 1  ;;  %v10148_v56 = vrot.slane %v10115_v29, 1  ;;  %v2704_v57 = vadd.f32 %v9682_v34, %v9971_v40  ;;  %v5501_v1 = vmax.f32 %v10107_v11, %v10062_v53 }
 0x447   : > { %12018 = vst [vmem:[#allocation14_spill] sm:$0xff] %v10122_v55  ;;  %v6155_v47 = vshll.u32 %v6002_v44, 16  ;;  %v5502_v49 = vmax.f32 %v5350_v3, %v10066_v27  ;;  %v6143_v58 = vrot.slane %v6142_v32, 4  ;;  %v4939_v36 = vrot.slane %v10095_v5, 2  ;;  %v380_v3 = vld [vmem:[%s7580_s29 + $0x70] sm:$0xf] }
 0x448   : > { %v3520_v38 = vpop.f32.mrf.mxu1  ;;  %v4940_v19 = vrot.slane %v10097_v31, 2  ;;  %v10163_v34 = vrot.slane %v10115_v29, 2  ;;  %v5197_v53 = vmax.f32 %v5050_v52, %v10095_v5  ;;  %v6153_v27 = vrot.slane %v6152_v12, 4 }
 0x449   : > { %v10143_v10 = vadd.f32 %v3623_v21, %v3520_v38  ;;  %v5049_v21 = vmax.f32 %v4777_v61, %v9935_v62  ;;  %v6157_v11 = vrot.slane %v6155_v47, 5  ;;  %v5198_v61 = vmax.f32 %v5051_v59, %v10097_v31  ;;  %v12023_v38 = vld [vmem:[#allocation10_spill] sm:$0xff] }
 0x44a   : > { %v4505_v41 = vsel %vm9477_vm0, %v379_v14, 4286644096  ;;  %v10178_v32 = vsel %vm1863_vm2, %v4668_v63, %v10148_v56  ;;  %v5649_v59 = vmax.f32 %v5502_v49, %v10097_v31  ;;  %v6148_v14 = vsel %vm9731_vm9, %v6143_v58, %v10119_v46 }
 0x44b   : > { %12021 = vst [vmem:[#allocation19_spill] sm:$0xff] %v10143_v10  ;;  %7222 = vmatmul.msk.bf16.gmra.mxu1 %vm3425_vm13, %v12022_v16  ;;  %7239 = vmatmul.msk.bf16.gmra.mxu2 %vm773_vm1, %v6463_v30  ;;  %v2812_v40 = vpop.permute.xlu2 %2811  ;;  %v5196_v62 = vmax.f32 %v5049_v21, %v10007_v6  ;;  %v10174_v30 = vsel %vm1863_vm2, %v4667_v54, %v4668_v63  ;;  %v4506_v54 = vsel %vm9486_vm7, %v380_v3, 4286644096 }
 0x44c   : > { %2899 = vst.msk [vmem:[%s7664_s24 + $0x48] sm:$0xff] %vm2889_vm4, %v2812_v40  ;;  %v2665_v44 = vpop.f32.mrf.mxu3  ;;  %v5648_v21 = vmax.f32 %v5501_v1, %v10095_v5  ;;  %v10192_v63 = vsel %vm2344_vm3, %v4939_v36, %v4940_v19  ;;  %v10196_v40 = vsel %vm2344_vm3, %v4940_v19, %v10163_v34  ;;  %v6158_v1 = vsel %vm9731_vm9, %v6153_v27, %v6157_v11 }
 0x44d   : > { %v10181_v52 = vadd.f32 %v2665_v44, %v12023_v38  ;;  %v5351_v47 = vmax.f32 %v5196_v62, %v10024_v22  ;;  %v381_v44 = vld [vmem:[%s7580_s29 + $0x74] sm:$0xf]  ;;  %v5804_v46 = vmax.f32 %v5649_v59, %v10178_v32  ;;  %v10205_v58 = vadd.f32 %v10134_v48, %v2704_v57 }
 0x44e   : > { %v3628_v12 = vpop.f32.mrf.mxu2  ;;  %v5803_v38 = vmax.f32 %v5648_v21, %v10174_v30  ;;  %v10211_v19 = vunpack.c.l.bf16 %v4505_v41  ;;  %v5352_v3 = vmax.f32 %v5197_v53, %v10174_v30  ;;  %v4507_v57 = vsel %vm9495_vm6, %v381_v44, 4286644096 }
 0x44f   : > { %12024 = vst [vmem:[#allocation25_spill] sm:$0xff] %v10181_v52  ;;  %v5503_v49 = vmax.f32 %v5351_v47, %v10032_v20  ;;  %v5956_v47 = vmax.f32 %v5804_v46, %v10196_v40  ;;  %v6436_v21 = vunpack.c.l.b16 %v6148_v14  ;;  %v10219_v59 = vunpack.c.l.bf16 %v4506_v54 }
 0x450   : > { %v3522_v62 = vpop.f32.mrf.mxu1  ;;  %v5955_v11 = vmax.f32 %v5803_v38, %v10192_v63  ;;  %v4781_v44 = vmax.f32 %v10095_v5, %v10174_v30  ;;  %v4782_v14 = vmax.f32 %v10097_v31, %v10178_v32  ;;  %v5504_v54 = vmax.f32 %v5352_v3, %v10192_v63 }
 0x451   : > { %v10207_v36 = vadd.f32 %v3625_v39, %v3522_v62  ;;  %7177 = vmatmul.msk.bf16.gmra.mxu3 %vm3425_vm13, %v12011_v18  ;;  %v5650_v27 = vmax.f32 %v5503_v49, %v10115_v29  ;;  %v6437_v39 = vunpack.c.l.b16 %v6158_v1  ;;  %v5353_v18 = vmax.f32 %v5198_v61, %v10178_v32  ;;  %v12026_v1 = vld [vmem:[#allocation13_spill] sm:$0xff] }
 0x452   : > { %v6004_v53 = vpack.c.bf16 %v5956_v47, %v5956_v47  ;;  %v4780_v49 = vmax.f32 %v10007_v6, %v10024_v22  ;;  %v10232_v61 = vunpack.c.l.bf16 %v4507_v57 }
 0x453   : > { %12025 = vst [vmem:[#allocation6_spill] sm:$0xff] %v10207_v36  ;;  %v2808_v62 = vpop.permute.xlu0 %2807  ;;  %v5805_v41 = vmax.f32 %v5650_v27, %v10148_v56  ;;  %v6003_v36 = vpack.c.bf16 %v5955_v11, %v5955_v11  ;;  %v6464_v47 = vpack.c.b16 %v6437_v39, %v6436_v21  ;;  %v4673_v21 = vrot.slane %v10219_v59, 1 }
 0x454   : > { %2897 = vst.msk [vmem:[%s7664_s24 + $0x38] sm:$0xff] %vm2889_vm4, %v2808_v62  ;;  %v2668_v38 = vpop.f32.mrf.mxu3  ;;  %v5505_v62 = vmax.f32 %v5353_v18, %v10196_v40  ;;  %v6169_v10 = vshll.u32 %v6004_v53, 16  ;;  %v6173_v5 = vshrl.u32 %v6004_v53, 16  ;;  %v5052_v3 = vmax.f32 %v4780_v49, %v10032_v20  ;;  %v12029_v18 = vld [vmem:[#allocation5_spill] sm:$0xff] }
 0x455   : > { %v10235_v46 = vadd.f32 %v2668_v38, %v12026_v1  ;;  %v5957_v11 = vmax.f32 %v5805_v41, %v10163_v34  ;;  %v6160_v6 = vshrl.u32 %v6003_v36, 16  ;;  %v6163_v22 = vshll.u32 %v6003_v36, 16 }
 0x456   : > { %v3630_v27 = vpop.f32.mrf.mxu2  ;;  %v6171_v38 = vrot.slane %v6169_v10, 5  ;;  %v6175_v1 = vrot.slane %v6173_v5, 4  ;;  %v10245_v39 = vrot.slane %v10232_v61, 1  ;;  %v5053_v20 = vmax.f32 %v4781_v44, %v10192_v63  ;;  %v382_v63 = vld [vmem:[%s7580_s29 + $0x78] sm:$0xf] }
 0x457   : > { %12027 = vst [vmem:[#allocation40_spill] sm:$0xff] %v10235_v46  ;;  %v6005_v52 = vpack.c.bf16 %v5957_v11, %v5957_v11  ;;  %v6162_v31 = vrot.slane %v6160_v6, 4  ;;  %v6165_v32 = vrot.slane %v6163_v22, 5  ;;  %v4672_v46 = vrot.slane %v10211_v19, 1  ;;  %v383_v44 = vld [vmem:[%s7580_s29 + $0x7c] sm:$0xf] }
 0x458   : > { %v3525_v30 = vpop.f32.mrf.mxu1  ;;  %v6176_v10 = vor.u32 %v6175_v1, %v6171_v38  ;;  %v4945_v53 = vrot.slane %v10219_v59, 2  ;;  %v10254_v6 = vrot.slane %v10232_v61, 2  ;;  %v5199_v22 = vmax.f32 %v5052_v3, %v10115_v29  ;;  %v12030_v1 = vld [vmem:[#allocation27_spill] sm:$0xff] }
 0x459   : > { %v10240_v57 = vadd.f32 %v3628_v12, %v3525_v30  ;;  %v6166_v41 = vor.u32 %v6165_v32, %v6162_v31  ;;  %v6179_v36 = vshll.u32 %v6005_v52, 16  ;;  %v4944_v12 = vrot.slane %v10211_v19, 2 }
 0x45a   : > { %v5054_v5 = vmax.f32 %v4782_v14, %v10196_v40  ;;  %v6177_v30 = vrot.slane %v6176_v10, 4  ;;  %v5651_v31 = vmax.f32 %v5504_v54, %v10211_v19  ;;  %v5652_v32 = vmax.f32 %v5505_v62, %v10219_v59 }
 0x45b   : > { %12028 = vst [vmem:[#allocation36_spill] sm:$0xff] %v10240_v57  ;;  %7240 = vmatmul.msk.bf16.gmra.mxu2 %vm773_vm1, %v6464_v47  ;;  %7223 = vmatmul.msk.bf16.gmra.mxu1 %vm3425_vm13, %v12029_v18  ;;  %v2810_v52 = vpop.permute.xlu1 %2809  ;;  %v6167_v49 = vrot.slane %v6166_v41, 4  ;;  %v6181_v11 = vrot.slane %v6179_v36, 5  ;;  %v4674_v57 = vsel %vm1863_vm2, %v4672_v46, %v4673_v21  ;;  %v4676_v3 = vsel %vm1863_vm2, %v4673_v21, %v10245_v39 }
 0x45c   : > { %2898 = vst.msk [vmem:[%s7664_s24 + $0x40] sm:$0xff] %vm2889_vm4, %v2810_v52  ;;  %v2670_v47 = vpop.f32.mrf.mxu3  ;;  %v5354_v52 = vmax.f32 %v5199_v22, %v10148_v56  ;;  %v5200_v40 = vmax.f32 %v5053_v20, %v10211_v19  ;;  %v10277_v62 = vsel %vm2344_vm3, %v4944_v12, %v4945_v53  ;;  %v4508_v46 = vsel %vm9477_vm0, %v382_v63, 4286644096 }
 0x45d   : > { %v10265_v41 = vadd.f32 %v2670_v47, %v12030_v1  ;;  %v6172_v14 = vsel %vm9731_vm9, %v6167_v49, %v6171_v38  ;;  %v6182_v54 = vsel %vm9731_vm9, %v6177_v30, %v6181_v11  ;;  %v4509_v21 = vsel %vm9486_vm7, %v383_v44, 4286644096  ;;  %v384_v38 = vld [vmem:[%s7580_s29 + $0x80] sm:$0xf] }
 0x45e   : > { %v3633_v36 = vpop.f32.mrf.mxu2  ;;  %v10285_v22 = vsel %vm2344_vm3, %v4945_v53, %v10254_v6  ;;  %v5506_v20 = vmax.f32 %v5354_v52, %v10163_v34  ;;  %v4784_v12 = vmax.f32 %v10211_v19, %v4674_v57  ;;  %v5806_v11 = vmax.f32 %v5651_v31, %v4674_v57 }
 0x45f   : > { %12031 = vst [vmem:[#allocation57_spill] sm:$0xff] %v10265_v41  ;;  %v5807_v47 = vmax.f32 %v5652_v32, %v4676_v3  ;;  %v5201_v30 = vmax.f32 %v5054_v5, %v10219_v59  ;;  %v6438_v63 = vunpack.c.l.b16 %v6172_v14  ;;  %v6439_v44 = vunpack.c.l.b16 %v6182_v54 }
 0x460   : > { %v3527_v10 = vpop.f32.mrf.mxu1  ;;  %v5653_v1 = vmax.f32 %v5506_v20, %v10232_v61  ;;  %v10296_v53 = vunpack.c.l.bf16 %v4508_v46  ;;  %v5958_v52 = vmax.f32 %v5806_v11, %v10277_v62  ;;  %v4785_v19 = vmax.f32 %v10219_v59, %v4676_v3 }
 0x461   : > { %v10289_v49 = vadd.f32 %v3630_v27, %v3527_v10  ;;  %7178 = vmatmul.msk.bf16.gmra.mxu3 %vm3425_vm13, %v12022_v16  ;;  %v5959_v27 = vmax.f32 %v5807_v47, %v10285_v22  ;;  %v4510_v10 = vsel %vm9495_vm6, %v384_v38, 4286644096  ;;  %v10302_v16 = vunpack.c.l.bf16 %v4509_v21 }
 0x462   : > { %v5808_v31 = vmax.f32 %v5653_v1, %v10245_v39  ;;  %v4783_v5 = vmax.f32 %v10115_v29, %v10148_v56  ;;  %v10309_v14 = vmax.f32 %v4784_v12, %v10277_v62  ;;  %v5355_v54 = vmax.f32 %v5200_v40, %v4674_v57 }
 0x463   : > { %12032 = vst [vmem:[#allocation47_spill] sm:$0xff] %v10289_v49  ;;  %v6006_v46 = vpack.c.bf16 %v5958_v52, %v5958_v52  ;;  %v6007_v20 = vpack.c.bf16 %v5959_v27, %v5959_v27  ;;  %v6465_v21 = vpack.c.b16 %v6439_v44, %v6438_v63  ;;  %v10315_v59 = vunpack.c.l.bf16 %v4510_v10 }
 0x464   : > { %v2673_v32 = vpop.f32.mrf.mxu3  ;;  %v5960_v47 = vmax.f32 %v5808_v31, %v10254_v6  ;;  %v10318_v12 = vmax.f32 %v4785_v19, %v10285_v22  ;;  %v5356_v57 = vmax.f32 %v5201_v30, %v4676_v3  ;;  %v5055_v52 = vmax.f32 %v4783_v5, %v10163_v34  ;;  %v385_v5 = vld [vmem:[%s7580_s29 + $0x84] sm:$0xf] }
 0x465   : > { %v10312_v11 = vadd.f32 %v2673_v32, %v9975_v42  ;;  %v6184_v1 = vshrl.u32 %v6006_v46, 16  ;;  %v6187_v49 = vshll.u32 %v6006_v46, 16  ;;  %v6193_v41 = vshll.u32 %v6007_v20, 16 }
 0x466   : > { %v3635_v38 = vpop.f32.mrf.mxu2  ;;  %v6197_v29 = vshrl.u32 %v6007_v20, 16  ;;  %v6008_v40 = vpack.c.bf16 %v5960_v47, %v5960_v47  ;;  %v4677_v32 = vrot.slane %v10296_v53, 1  ;;  %v4678_v46 = vrot.slane %v10302_v16, 1  ;;  %v12035_v20 = vld [vmem:[#allocation35_spill] sm:$0xff] }
 0x467   : > { %12033 = vst [vmem:[#allocation11_spill] sm:$0xff] %v10312_v11  ;;  %v6186_v27 = vrot.slane %v6184_v1, 4  ;;  %v6189_v63 = vrot.slane %v6187_v49, 5  ;;  %v6195_v44 = vrot.slane %v6193_v41, 5  ;;  %v10329_v34 = vrot.slane %v10315_v59, 1 }
 0x468   : > { %v3530_v56 = vpop.f32.mrf.mxu1  ;;  %v6199_v10 = vrot.slane %v6197_v29, 4  ;;  %v6203_v31 = vshll.u32 %v6008_v40, 16  ;;  %v4950_v41 = vrot.slane %v10302_v16, 2  ;;  %v5507_v49 = vmax.f32 %v5355_v54, %v10277_v62 }
 0x469   : > { %v10321_v42 = vadd.f32 %v3633_v36, %v3530_v56  ;;  %v6190_v3 = vor.u32 %v6189_v63, %v6186_v27  ;;  %v4949_v36 = vrot.slane %v10296_v53, 2  ;;  %v5202_v47 = vmax.f32 %v5055_v52, %v10232_v61  ;;  %v386_v27 = vld [vmem:[%s7580_s29 + $0x88] sm:$0xf] }
 0x46a   : > { %v6200_v30 = vor.u32 %v6199_v10, %v6195_v44  ;;  %v6205_v19 = vrot.slane %v6203_v31, 5  ;;  %v5204_v29 = vmax.f32 %v10318_v12, %v10302_v16  ;;  %v5508_v56 = vmax.f32 %v5356_v57, %v10285_v22 }
 0x46b   : > { %12034 = vst [vmem:[#allocation59_spill] sm:$0xff] %v10321_v42  ;;  %7224 = vmatmul.msk.bf16.gmra.mxu1 %vm3425_vm13, %v12035_v20  ;;  %7241 = vmatmul.msk.bf16.gmra.mxu2 %vm773_vm1, %v6465_v21  ;;  %v5203_v21 = vmax.f32 %v10309_v14, %v10296_v53  ;;  %v6191_v40 = vrot.slane %v6190_v3, 4  ;;  %v4679_v10 = vsel %vm1863_vm2, %v4677_v32, %v4678_v46  ;;  %v4511_v31 = vsel %vm9477_vm0, %v385_v5, 4286644096 }
 0x46c   : > { %v2675_v1 = vpop.f32.mrf.mxu3  ;;  %v6201_v54 = vrot.slane %v6200_v30, 4  ;;  %v5357_v52 = vmax.f32 %v5202_v47, %v10245_v39  ;;  %v4681_v14 = vsel %vm1863_vm2, %v4678_v46, %v10329_v34  ;;  %v10352_v12 = vsel %vm2344_vm3, %v4949_v36, %v4950_v41 }
 0x46d   : > { %v10343_v63 = vadd.f32 %v2675_v1, %v10036_v35  ;;  %v10355_v22 = vrot.slane %v10315_v59, 2  ;;  %v387_v35 = vld [vmem:[%s7580_s29 + $0x8c] sm:$0xf]  ;;  %v6196_v3 = vsel %vm9731_vm9, %v6191_v40, %v6195_v44  ;;  %v4512_v30 = vsel %vm9486_vm7, %v386_v27, 4286644096 }
 0x46e   : > { %v3638_v62 = vpop.f32.mrf.mxu2  ;;  %v6206_v32 = vsel %vm9731_vm9, %v6201_v54, %v6205_v19  ;;  %v5509_v5 = vmax.f32 %v5357_v52, %v10254_v6  ;;  %v4787_v36 = vmax.f32 %v10296_v53, %v4679_v10  ;;  %v4788_v47 = vmax.f32 %v10302_v16, %v4681_v14 }
 0x46f   : > { %12036 = vst [vmem:[#allocation20_spill] sm:$0xff] %v10343_v63  ;;  %v5654_v1 = vmax.f32 %v5507_v49, %v10296_v53  ;;  %v10372_v44 = vunpack.c.l.bf16 %v4511_v31  ;;  %v5655_v19 = vmax.f32 %v5508_v56, %v10302_v16  ;;  %v4513_v27 = vsel %vm9495_vm6, %v387_v35, 4286644096 }
 0x470   : > { %v3532_v57 = vpop.f32.mrf.mxu1  ;;  %v5656_v40 = vmax.f32 %v5509_v5, %v10315_v59  ;;  %v6441_v54 = vunpack.c.l.b16 %v6206_v32  ;;  %v10386_v53 = vunpack.c.l.bf16 %v4512_v30  ;;  %v10390_v31 = vmax.f32 %v4787_v36, %v10352_v12 }
 0x471   : > { %v10365_v46 = vadd.f32 %v3635_v38, %v3532_v57  ;;  %7179 = vmatmul.msk.bf16.gmra.mxu3 %vm3425_vm13, %v12029_v18  ;;  %v6440_v38 = vunpack.c.l.b16 %v6196_v3  ;;  %v10380_v18 = vsel %vm2344_vm3, %v4950_v41, %v10355_v22  ;;  %v5809_v52 = vmax.f32 %v5654_v1, %v4679_v10 }
 0x472   : > { %v10384_v57 = vadd.f32 %v10134_v48, %v9739_v28  ;;  %v5810_v49 = vmax.f32 %v5655_v19, %v4681_v14  ;;  %v5811_v16 = vmax.f32 %v5656_v40, %v10329_v34  ;;  %v10393_v35 = vmax.f32 %v4788_v47, %v10380_v18 }
 0x473   : > { %12037 = vst [vmem:[#allocation55_spill] sm:$0xff] %v10365_v46  ;;  %v5961_v41 = vmax.f32 %v5809_v52, %v10352_v12  ;;  %v10396_v3 = vunpack.c.l.bf16 %v4513_v27  ;;  %v5358_v30 = vmax.f32 %v5203_v21, %v4679_v10  ;;  %v6466_v19 = vpack.c.b16 %v6441_v54, %v6440_v38 }
 0x474   : > { %v2678_v56 = vpop.f32.mrf.mxu3  ;;  %v5962_v5 = vmax.f32 %v5810_v49, %v10380_v18  ;;  %v5963_v1 = vmax.f32 %v5811_v16, %v10355_v22  ;;  %v5359_v40 = vmax.f32 %v5204_v29, %v4681_v14  ;;  %v4682_v42 = vrot.slane %v10372_v44, 1  ;;  %v12040_v16 = vld [vmem:[#allocation44_spill] sm:$0xff] }
 0x475   : > { %v10399_v32 = vadd.f32 %v2678_v56, %v10055_v45  ;;  %v6009_v36 = vpack.c.bf16 %v5961_v41, %v5961_v41  ;;  %v4683_v27 = vrot.slane %v10386_v53, 1  ;;  %v4786_v45 = vmax.f32 %v10232_v61, %v10245_v39 }
 0x476   : > { %v3640_v28 = vpop.f32.mrf.mxu2  ;;  %v6010_v46 = vpack.c.bf16 %v5962_v5, %v5962_v5  ;;  %v6011_v11 = vpack.c.bf16 %v5963_v1, %v5963_v1  ;;  %v10410_v38 = vrot.slane %v10396_v3, 1  ;;  %v4954_v49 = vrot.slane %v10372_v44, 2  ;;  %v389_v1 = vld [vmem:[%s7580_s29 + $0x94] sm:$0xf] }
 0x477   : > { %12038 = vst [vmem:[#allocation9_spill] sm:$0xff] %v10399_v32  ;;  %v6208_v21 = vshrl.u32 %v6009_v36, 16  ;;  %v6211_v10 = vshll.u32 %v6009_v36, 16  ;;  %v10418_v56 = vrot.slane %v10396_v3, 2  ;;  %v5206_v41 = vmax.f32 %v10390_v31, %v10372_v44 }
 0x478   : > { %v3535_v47 = vpop.f32.mrf.mxu1  ;;  %v6217_v29 = vshll.u32 %v6010_v46, 16  ;;  %v6221_v14 = vshrl.u32 %v6010_v46, 16  ;;  %v6227_v54 = vshll.u32 %v6011_v11, 16  ;;  %v388_v11 = vld [vmem:[%s7580_s29 + $0x90] sm:$0xf]  ;;  %v5058_v36 = vmax.f32 %v4786_v45, %v10254_v6 }
 0x479   : > { %v10407_v52 = vadd.f32 %v3638_v62, %v3535_v47  ;;  %v6210_v61 = vrot.slane %v6208_v21, 4  ;;  %v6213_v39 = vrot.slane %v6211_v10, 5  ;;  %v4955_v62 = vrot.slane %v10386_v53, 2 }
 0x47a   : > { %v6219_v5 = vrot.slane %v6217_v29, 5  ;;  %v6223_v46 = vrot.slane %v6221_v14, 4  ;;  %v4684_v10 = vsel %vm1863_vm2, %v4682_v42, %v4683_v27  ;;  %v6229_v31 = vrot.slane %v6227_v54, 5 }
 0x47b   : > { %12039 = vst [vmem:[#allocation58_spill] sm:$0xff] %v10407_v52  ;;  %7225 = vmatmul.msk.bf16.gmra.mxu1 %vm3425_vm13, %v12040_v16  ;;  %7242 = vmatmul.msk.bf16.gmra.mxu2 %vm773_vm1, %v6466_v19  ;;  %v5510_v52 = vmax.f32 %v5358_v30, %v10352_v12  ;;  %v5511_v19 = vmax.f32 %v5359_v40, %v10380_v18  ;;  %v4514_v6 = vsel %vm9477_vm0, %v388_v11, 4286644096  ;;  %v4515_v12 = vsel %vm9486_vm7, %v389_v1, 4286644096 }
 0x47c   : > { %v2680_v47 = vpop.f32.mrf.mxu3  ;;  %v6214_v21 = vor.u32 %v6213_v39, %v6210_v61  ;;  %v6224_v55 = vor.u32 %v6223_v46, %v6219_v5  ;;  %v5205_v29 = vmax.f32 %v5058_v36, %v10315_v59  ;;  %v4686_v18 = vsel %vm1863_vm2, %v4683_v27, %v10410_v38  ;;  %v390_v46 = vld [vmem:[%s7580_s29 + $0x98] sm:$0xf] }
 0x47d   : > { %v10429_v32 = vadd.f32 %v2680_v47, %v10079_v33  ;;  %v10439_v33 = vsel %vm2344_vm3, %v4954_v49, %v4955_v62  ;;  %v10443_v40 = vsel %vm2344_vm3, %v4955_v62, %v10418_v56  ;;  %v5657_v27 = vmax.f32 %v5510_v52, %v10372_v44 }
 0x47e   : > { %v3643_v63 = vpop.f32.mrf.mxu2  ;;  %v6215_v14 = vrot.slane %v6214_v21, 4  ;;  %v6225_v30 = vrot.slane %v6224_v55, 4  ;;  %v5360_v45 = vmax.f32 %v5205_v29, %v10329_v34  ;;  %v5658_v55 = vmax.f32 %v5511_v19, %v10386_v53 }
 0x47f   : > { %v4790_v39 = vmax.f32 %v10372_v44, %v4684_v10  ;;  %v4791_v62 = vmax.f32 %v10386_v53, %v4686_v18  ;;  %v5207_v52 = vmax.f32 %v10393_v35, %v10386_v53  ;;  %v10466_v47 = vunpack.c.l.bf16 %v4514_v6 }
 0x480   : > { %v3537_v42 = vpop.f32.mrf.mxu1  ;;  %v6220_v61 = vsel %vm9731_vm9, %v6215_v14, %v6219_v5  ;;  %v6230_v49 = vsel %vm9731_vm9, %v6225_v30, %v6229_v31  ;;  %v5813_v36 = vmax.f32 %v5658_v55, %v4686_v18  ;;  %v10462_v5 = vadd.f32 %v10134_v48, %v9806_v26 }
 0x481   : > { %v10446_v54 = vadd.f32 %v3640_v28, %v3537_v42  ;;  %7180 = vmatmul.msk.bf16.gmra.mxu3 %vm3425_vm13, %v12035_v20  ;;  %v5512_v28 = vmax.f32 %v5360_v45, %v10355_v22  ;;  %v6442_v11 = vunpack.c.l.b16 %v6220_v61  ;;  %v6443_v1 = vunpack.c.l.b16 %v6230_v49 }
 0x482   : > { %v5812_v20 = vmax.f32 %v5657_v27, %v4684_v10  ;;  %v10469_v21 = vunpack.c.l.bf16 %v4515_v12  ;;  %v5965_v29 = vmax.f32 %v5813_v36, %v10443_v40  ;;  %v4516_v14 = vsel %vm9495_vm6, %v390_v46, 4286644096 }
 0x483   : > { %12041 = vst [vmem:[#allocation10_spill] sm:$0xff] %v10446_v54  ;;  %v5659_v44 = vmax.f32 %v5512_v28, %v10396_v3  ;;  %v10479_v53 = vmax.f32 %v4790_v39, %v10439_v33  ;;  %v10482_v35 = vmax.f32 %v4791_v62, %v10443_v40  ;;  %v6467_v12 = vpack.c.b16 %v6443_v1, %v6442_v11 }
 0x484   : > { %v2683_v19 = vpop.f32.mrf.mxu3  ;;  %v5964_v31 = vmax.f32 %v5812_v20, %v10439_v33  ;;  %v5361_v30 = vmax.f32 %v5206_v41, %v4684_v10  ;;  %v6013_v61 = vpack.c.bf16 %v5965_v29, %v5965_v29  ;;  %v5362_v55 = vmax.f32 %v5207_v52, %v4686_v18  ;;  %v12043_v18 = vld [vmem:[#allocation48_spill] sm:$0xff] }
 0x485   : > { %v10476_v26 = vadd.f32 %v2683_v19, %v10129_v4  ;;  %v5814_v6 = vmax.f32 %v5659_v44, %v10410_v38  ;;  %v10486_v28 = vunpack.c.l.bf16 %v4516_v14  ;;  %v4789_v4 = vmax.f32 %v10315_v59, %v10329_v34  ;;  %v391_v29 = vld [vmem:[%s7580_s29 + $0x9c] sm:$0xf] }
 0x486   : > { %v3645_v42 = vpop.f32.mrf.mxu2  ;;  %v6012_v45 = vpack.c.bf16 %v5964_v31, %v5964_v31  ;;  %v6241_v20 = vshll.u32 %v6013_v61, 16  ;;  %v6245_v11 = vshrl.u32 %v6013_v61, 16  ;;  %v4687_v41 = vrot.slane %v10466_v47, 1  ;;  %v392_v61 = vld [vmem:[%s7580_s29 + $0xa0] sm:$0xf] }
 0x487   : > { %v5966_v49 = vmax.f32 %v5814_v6, %v10418_v56  ;;  %v4688_v10 = vrot.slane %v10469_v21, 1  ;;  %v5209_v59 = vmax.f32 %v10479_v53, %v10466_v47  ;;  %v5210_v52 = vmax.f32 %v10482_v35, %v10469_v21 }
 0x488   : > { %v3540_v27 = vpop.f32.mrf.mxu1  ;;  %v6232_v46 = vshrl.u32 %v6012_v45, 16  ;;  %v6235_v62 = vshll.u32 %v6012_v45, 16  ;;  %v6243_v1 = vrot.slane %v6241_v20, 5  ;;  %v5513_v44 = vmax.f32 %v5361_v30, %v10439_v33 }
 0x489   : > { %v10490_v39 = vadd.f32 %v3643_v63, %v3540_v27  ;;  %v6014_v36 = vpack.c.bf16 %v5966_v49, %v5966_v49  ;;  %v6247_v19 = vrot.slane %v6245_v11, 4  ;;  %v5514_v6 = vmax.f32 %v5362_v55, %v10443_v40  ;;  %v12044_v27 = vld [vmem:[#allocation12_spill] sm:$0xff] }
 0x48a   : > { %v6234_v34 = vrot.slane %v6232_v46, 4  ;;  %v6237_v63 = vrot.slane %v6235_v62, 5  ;;  %v5061_v53 = vmax.f32 %v4789_v4, %v10355_v22  ;;  %v4689_v33 = vsel %vm1863_vm2, %v4687_v41, %v4688_v10 }
 0x48b   : > { %12042 = vst [vmem:[#allocation13_spill] sm:$0xff] %v10490_v39  ;;  %7226 = vmatmul.msk.bf16.gmra.mxu1 %vm3425_vm13, %v12043_v18  ;;  %7243 = vmatmul.msk.bf16.gmra.mxu2 %vm773_vm1, %v6467_v12  ;;  %v6251_v31 = vshll.u32 %v6014_v36, 16  ;;  %v10506_v12 = vrot.slane %v10486_v28, 1  ;;  %v6248_v35 = vor.u32 %v6247_v19, %v6243_v1  ;;  %v4517_v20 = vsel %vm9477_vm0, %v391_v29, 4286644096 }
 0x48c   : > { %v2685_v14 = vpop.f32.mrf.mxu3  ;;  %v6238_v45 = vor.u32 %v6237_v63, %v6234_v34  ;;  %v4959_v40 = vrot.slane %v10466_v47, 2  ;;  %v5208_v55 = vmax.f32 %v5061_v53, %v10396_v3  ;;  %v4518_v22 = vsel %vm9486_vm7, %v392_v61, 4286644096 }
 0x48d   : > { %v10510_v49 = vadd.f32 %v2685_v14, %v12044_v27  ;;  %v6253_v62 = vrot.slane %v6251_v31, 5  ;;  %v6249_v11 = vrot.slane %v6248_v35, 4  ;;  %v4960_v4 = vrot.slane %v10469_v21, 2  ;;  %v393_v27 = vld [vmem:[%s7580_s29 + $0xa4] sm:$0xf] }
 0x48e   : > { %v3648_v46 = vpop.f32.mrf.mxu2  ;;  %v6239_v30 = vrot.slane %v6238_v45, 4  ;;  %v10521_v34 = vrot.slane %v10486_v28, 2  ;;  %v4691_v19 = vsel %vm1863_vm2, %v4688_v10, %v10506_v12  ;;  %v5363_v31 = vmax.f32 %v5208_v55, %v10410_v38 }
 0x48f   : > { %v6254_v29 = vsel %vm9731_vm9, %v6249_v11, %v6253_v62  ;;  %v4793_v45 = vmax.f32 %v10466_v47, %v4689_v33  ;;  %v10540_v35 = vunpack.c.l.bf16 %v4517_v20  ;;  %v10542_v10 = vunpack.c.l.bf16 %v4518_v22 }
 0x490   : > { %v3542_v36 = vpop.f32.mrf.mxu1  ;;  %v6244_v63 = vsel %vm9731_vm9, %v6239_v30, %v6243_v1  ;;  %v6445_v61 = vunpack.c.l.b16 %v6254_v29  ;;  %v5515_v53 = vmax.f32 %v5363_v31, %v10418_v56  ;;  %v5661_v1 = vmax.f32 %v5514_v6, %v10469_v21  ;;  %v12046_v6 = vld [vmem:[#allocation23_spill] sm:$0xff] }
 0x491   : > { %v10523_v41 = vadd.f32 %v3645_v42, %v3542_v36  ;;  %7181 = vmatmul.msk.bf16.gmra.mxu3 %vm3425_vm13, %v12040_v16  ;;  %v6444_v14 = vunpack.c.l.b16 %v6244_v63  ;;  %v4794_v42 = vmax.f32 %v10469_v21, %v4691_v19  ;;  %v5660_v16 = vmax.f32 %v5513_v44, %v10466_v47 }
 0x492   : > { %v10545_v30 = vsel %vm2344_vm3, %v4959_v40, %v4960_v4  ;;  %v10549_v62 = vsel %vm2344_vm3, %v4960_v4, %v10521_v34  ;;  %v10553_v55 = vadd.f32 %v10134_v48, %v9840_v25  ;;  %v5662_v47 = vmax.f32 %v5515_v53, %v10486_v28 }
 0x493   : > { %12045 = vst [vmem:[#allocation5_spill] sm:$0xff] %v10523_v41  ;;  %v5815_v21 = vmax.f32 %v5660_v16, %v4689_v33  ;;  %v5816_v44 = vmax.f32 %v5661_v1, %v4691_v19  ;;  %v10560_v40 = vmax.f32 %v4793_v45, %v10545_v30  ;;  %v10563_v22 = vmax.f32 %v4794_v42, %v10549_v62  ;;  %v395_v41 = vld [vmem:[%s7580_s29 + $0xac] sm:$0xf] }
 0x494   : > { %v2688_v36 = vpop.f32.mrf.mxu3  ;;  %v4519_v4 = vsel %vm9495_vm6, %v393_v27, 4286644096  ;;  %v6468_v25 = vpack.c.b16 %v6445_v61, %v6444_v14  ;;  %v5817_v48 = vmax.f32 %v5662_v47, %v10506_v12  ;;  %v5364_v53 = vmax.f32 %v5209_v59, %v4689_v33  ;;  %v12049_v14 = vld [vmem:[#allocation53_spill] sm:$0xff] }
 0x495   : > { %v10557_v20 = vadd.f32 %v2688_v36, %v12046_v6  ;;  %v5967_v63 = vmax.f32 %v5815_v21, %v10545_v30  ;;  %v5968_v31 = vmax.f32 %v5816_v44, %v10549_v62  ;;  %v5365_v16 = vmax.f32 %v5210_v52, %v4691_v19  ;;  %v12048_v52 = vld [vmem:[#allocation16_spill] sm:$0xff] }
 0x496   : > { %v3650_v11 = vpop.f32.mrf.mxu2  ;;  %v4692_v1 = vrot.slane %v10540_v35, 1  ;;  %v4693_v45 = vrot.slane %v10542_v10, 1  ;;  %v5969_v42 = vmax.f32 %v5817_v48, %v10521_v34  ;;  %v10579_v47 = vunpack.c.l.bf16 %v4519_v4 }
 0x497   : > { %v6015_v6 = vpack.c.bf16 %v5967_v63, %v5967_v63  ;;  %v6016_v27 = vpack.c.bf16 %v5968_v31, %v5968_v31  ;;  %v4792_v59 = vmax.f32 %v10396_v3, %v10410_v38  ;;  %v5516_v4 = vmax.f32 %v5364_v53, %v10545_v30 }
 0x498   : > { %v3545_v29 = vpop.f32.mrf.mxu1  ;;  %v6017_v33 = vpack.c.bf16 %v5969_v42, %v5969_v42  ;;  %v5517_v3 = vmax.f32 %v5365_v16, %v10549_v62  ;;  %v10594_v48 = vsel %vm1863_vm2, %v4692_v1, %v4693_v45  ;;  %v10602_v30 = vrot.slane %v10579_v47, 1 }
 0x499   : > { %v10572_v36 = vadd.f32 %v3648_v46, %v3545_v29  ;;  %v10589_v46 = vld [vmem:[%s11706_s8] ss:$0 sm:$0xff]  ;;  %v6256_v19 = vshrl.u32 %v6015_v6, 16  ;;  %v6259_v21 = vshll.u32 %v6015_v6, 16  ;;  %v6265_v44 = vshll.u32 %v6016_v27, 16 }
 0x49a   : > { %v6269_v38 = vshrl.u32 %v6016_v27, 16  ;;  %v6275_v61 = vshll.u32 %v6017_v33, 16  ;;  %v394_v6 = vld [vmem:[%s7580_s29 + $0xa8] sm:$0xf]  ;;  %v5064_v62 = vmax.f32 %v4792_v59, %v10418_v56  ;;  %v4964_v1 = vrot.slane %v10540_v35, 2 }
 0x49b   : > { %12047 = vst [vmem:[#allocation27_spill] sm:$0xff] %v10572_v36  ;;  %7227 = vmatmul.msk.bf16.gmra.mxu1 %vm3425_vm13, %v12048_v52  ;;  %7244 = vmatmul.msk.bf16.gmra.mxu2 %vm773_vm1, %v6468_v25  ;;  %v6258_v63 = vrot.slane %v6256_v19, 4  ;;  %v6261_v31 = vrot.slane %v6259_v21, 5  ;;  %v6267_v29 = vrot.slane %v6265_v44, 5  ;;  %v4965_v27 = vrot.slane %v10542_v10, 2 }
 0x49c   : > { %v2690_v25 = vpop.f32.mrf.mxu3  ;;  %v6271_v54 = vrot.slane %v6269_v38, 4  ;;  %v10609_v21 = vrot.slane %v10579_v47, 2  ;;  %v5211_v44 = vmax.f32 %v5064_v62, %v10486_v28  ;;  %v4696_v59 = vsel %vm1863_vm2, %v4693_v45, %v10602_v30 }
 0x49d   : > { %v10597_v42 = vadd.f32 %v2690_v25, %v12049_v14  ;;  %v6262_v16 = vor.u32 %v6261_v31, %v6258_v63  ;;  %v6277_v14 = vrot.slane %v6275_v61, 5  ;;  %v5663_v31 = vmax.f32 %v5516_v4, %v10540_v35 }
 0x49e   : > { %v6536_v36 = vpop.f32.mrf.mxu2  ;;  %v6272_v19 = vor.u32 %v6271_v54, %v6267_v29  ;;  %v4521_v54 = vsel %vm9486_vm7, %v395_v41, 4286644096  ;;  %v5366_v25 = vmax.f32 %v5211_v44, %v10506_v12  ;;  %v396_v41 = vld [vmem:[%s7580_s29 + $0xb0] sm:$0xf]  ;;  %v12052_v44 = vld [vmem:[#allocation17_spill] sm:$0xff] }
 0x49f   : > { %12050 = vst [vmem:[#allocation35_spill] sm:$0xff] %v10597_v42  ;;  %v6537_v53 = vadd.f32 %v10589_v46, %v6536_v36  ;;  %v6263_v56 = vrot.slane %v6262_v16, 4  ;;  %v4520_v36 = vsel %vm9477_vm0, %v394_v6, 4286644096  ;;  %v5664_v6 = vmax.f32 %v5517_v3, %v10542_v10 }
 0x4a0   : > { %v3547_v33 = vpop.f32.mrf.mxu1  ;;  %v6273_v61 = vrot.slane %v6272_v19, 4  ;;  %v5518_v16 = vmax.f32 %v5366_v25, %v10521_v34  ;;  %v5818_v19 = vmax.f32 %v5663_v31, %v10594_v48  ;;  %v12053_v31 = vld [vmem:[#allocation30_spill] sm:$0xff] }
 0x4a1   : > { %v10612_v38 = vadd.f32 %v3650_v11, %v3547_v33  ;;  %6648 = vrot.lane.b32.xlu0 %v6537_v53, %s7463_s26  ;;  %7182 = vmatmul.msk.bf16.gmra.mxu3 %vm3425_vm13, %v12043_v18  ;;  %v4796_v11 = vmax.f32 %v10540_v35, %v10594_v48  ;;  %v6268_v63 = vsel %vm9731_vm9, %v6263_v56, %v6267_v29 }
 0x4a2   : > { %v10629_v18 = vsel %vm2344_vm3, %v4964_v1, %v4965_v27  ;;  %v6278_v62 = vsel %vm9731_vm9, %v6273_v61, %v6277_v14  ;;  %v6446_v45 = vunpack.c.l.b16 %v6268_v63  ;;  %v10638_v53 = vsel %vm2344_vm3, %v4965_v27, %v10609_v21 }
 0x4a3   : > { %12051 = vst [vmem:[#allocation44_spill] sm:$0xff] %v10612_v38  ;;  %v6447_v29 = vunpack.c.l.b16 %v6278_v62  ;;  %v4797_v1 = vmax.f32 %v10542_v10, %v4696_v59  ;;  %v5819_v4 = vmax.f32 %v5664_v6, %v4696_v59  ;;  %v10645_v38 = vmax.f32 %v4796_v11, %v10629_v18 }
 0x4a4   : > { %v3707_v33 = vpop.f32.mrf.mxu3  ;;  %v5665_v14 = vmax.f32 %v5518_v16, %v10579_v47  ;;  %v4522_v27 = vsel %vm9495_vm6, %v396_v41, 4286644096  ;;  %v5970_v63 = vmax.f32 %v5818_v19, %v10629_v18 }
 0x4a5   : > { %v3787_v3 = vadd.f32 %v3707_v33, %v12052_v44  ;;  %v6469_v25 = vpack.c.b16 %v6447_v29, %v6446_v45  ;;  %v5971_v62 = vmax.f32 %v5819_v4, %v10638_v53  ;;  %v10654_v33 = vunpack.c.l.bf16 %v4520_v36  ;;  %v12055_v4 = vld [vmem:[#allocation21_spill] sm:$0xff] }
 0x4a6   : > { %v6538_v56 = vpop.f32.mrf.mxu2  ;;  %v10656_v44 = vunpack.c.l.bf16 %v4521_v54  ;;  %v5820_v11 = vmax.f32 %v5665_v14, %v10602_v30  ;;  %v10663_v41 = vmax.f32 %v4797_v1, %v10638_v53  ;;  %v6018_v45 = vpack.c.bf16 %v5970_v63, %v5970_v63 }
 0x4a7   : > { %v6539_v61 = vadd.f32 %v10589_v46, %v6538_v56  ;;  %v3953_v6 = vadd.f32 %v12053_v31, %v3787_v3  ;;  %v6019_v16 = vpack.c.bf16 %v5971_v62, %v5971_v62  ;;  %v5215_v36 = vmax.f32 %v10645_v38, %v10654_v33 }
 0x4a8   : > { %v4064_v39 = vpop.f32.mrf.mxu1  ;;  %v5972_v54 = vmax.f32 %v5820_v11, %v10609_v21  ;;  %v10670_v19 = vunpack.c.l.bf16 %v4522_v27  ;;  %v6283_v3 = vshll.u32 %v6018_v45, 16  ;;  %v4697_v38 = vrot.slane %v10654_v33, 1  ;;  %v12057_v11 = vld [vmem:[#allocation18_spill] sm:$0xff] }
 0x4a9   : > { %6650 = vrot.lane.b32.xlu1 %v6539_v61, %s7463_s26  ;;  %2813 = vrot.lane.b32.xlu0 %v10138_v50, %s11789_s16  ;;  %v10665_v29 = vadd.f32 %v4064_v39, %v3953_v6  ;;  %v6280_v50 = vshrl.u32 %v6018_v45, 16  ;;  %v6289_v1 = vshll.u32 %v6019_v16, 16  ;;  %v6293_v56 = vshrl.u32 %v6019_v16, 16 }
 0x4aa   : > { %v12056_v39 = vmax.f32 %v10560_v40, %v10540_v35  ;;  %v6020_v61 = vpack.c.bf16 %v5972_v54, %v5972_v54  ;;  %v4698_v27 = vrot.slane %v10656_v44, 1  ;;  %v6285_v31 = vrot.slane %v6283_v3, 5  ;;  %v12059_v3 = vld [vmem:[#allocation37_spill] sm:$0xff] }
 0x4ab   : > { %12054 = vst [vmem:[#allocation48_spill] sm:$0xff] %v10665_v29  ;;  %7228 = vmatmul.msk.bf16.gmra.mxu1 %vm3425_vm13, %v12055_v4  ;;  %7245 = vmatmul.msk.bf16.gmra.mxu2 %vm773_vm1, %v6469_v25  ;;  %v6282_v62 = vrot.slane %v6280_v50, 4  ;;  %v6291_v6 = vrot.slane %v6289_v1, 5  ;;  %v6295_v25 = vrot.slane %v6293_v56, 4  ;;  %v12058_v16 = vmax.f32 %v10563_v22, %v10542_v10 }
 0x4ac   : > { %v5367_v14 = vmax.f32 %v12056_v39, %v10594_v48  ;;  %v3709_v63 = vpop.f32.mrf.mxu3  ;;  %v6299_v35 = vshll.u32 %v6020_v61, 16  ;;  %v4795_v40 = vmax.f32 %v10486_v28, %v10506_v12  ;;  %v10689_v50 = vrot.slane %v10670_v19, 1 }
 0x4ad   : > { %v3788_v45 = vadd.f32 %v3709_v63, %v12057_v11  ;;  %v5368_v42 = vmax.f32 %v12058_v16, %v4696_v59  ;;  %v6286_v54 = vor.u32 %v6285_v31, %v6282_v62  ;;  %v6296_v39 = vor.u32 %v6295_v25, %v6291_v6  ;;  %v397_v11 = vld [vmem:[%s7580_s29 + $0xb4] sm:$0xf]  ;;  %v398_v31 = vld [vmem:[%s7580_s29 + $0xb8] sm:$0xf] }
 0x4ae   : > { %v6541_v29 = vpop.f32.mrf.mxu2  ;;  %v6301_v63 = vrot.slane %v6299_v35, 5  ;;  %v4699_v10 = vsel %vm1863_vm2, %v4697_v38, %v4698_v27  ;;  %v4969_v22 = vrot.slane %v10654_v33, 2  ;;  %v4970_v59 = vrot.slane %v10656_v44, 2 }
 0x4af   : > { %v6542_v48 = vadd.f32 %v10589_v46, %v6541_v29  ;;  %v3954_v1 = vadd.f32 %v12059_v3, %v3788_v45  ;;  %v6287_v28 = vrot.slane %v6286_v54, 4  ;;  %v6297_v12 = vrot.slane %v6296_v39, 4 }
 0x4b0   : > { %v4066_v56 = vpop.f32.mrf.mxu1  ;;  %v5067_v29 = vmax.f32 %v4795_v40, %v10521_v34  ;;  %v5216_v38 = vmax.f32 %v10663_v41, %v10656_v44  ;;  %v5519_v62 = vmax.f32 %v5367_v14, %v10629_v18  ;;  %v5520_v25 = vmax.f32 %v5368_v42, %v10638_v53 }
 0x4b1   : > { %2815 = vrot.lane.b32.xlu1 %v10205_v58, %s11789_s16  ;;  %6652 = vrot.lane.b32.xlu2 %v6542_v48, %s7463_s26  ;;  %v10700_v61 = vadd.f32 %v4066_v56, %v3954_v1  ;;  %v4799_v58 = vmax.f32 %v10654_v33, %v4699_v10  ;;  %v6292_v45 = vsel %vm9731_vm9, %v6287_v28, %v6291_v6  ;;  %v4523_v16 = vsel %vm9477_vm0, %v397_v11, 4286644096  ;;  %v12060_v48 = vld [vmem:[#allocation24_spill] sm:$0xff] }
 0x4b2   : > { %7183 = vmatmul.msk.bf16.gmra.mxu3 %vm3425_vm13, %v12048_v52  ;;  %v6302_v34 = vsel %vm9731_vm9, %v6297_v12, %v6301_v63  ;;  %v6448_v52 = vunpack.c.l.b16 %v6292_v45  ;;  %v4701_v41 = vsel %vm1863_vm2, %v4698_v27, %v10689_v50  ;;  %v10719_v18 = vrot.slane %v10670_v19, 2  ;;  %v399_v28 = vld [vmem:[%s7580_s29 + $0xbc] sm:$0xf]  ;;  %v12061_v12 = vld [vmem:[#allocation43_spill] sm:$0xff] }
 0x4b3   : > { %v6449_v35 = vunpack.c.l.b16 %v6302_v34  ;;  %v4524_v42 = vsel %vm9486_vm7, %v398_v31, 4286644096  ;;  %v4800_v53 = vmax.f32 %v10656_v44, %v4701_v41  ;;  %v10725_v6 = vsel %vm2344_vm3, %v4969_v22, %v4970_v59 }
 0x4b4   : > { %v3712_v14 = vpop.f32.mrf.mxu3  ;;  %v5214_v40 = vmax.f32 %v5067_v29, %v10579_v47  ;;  %v10730_v27 = vmax.f32 %v4799_v58, %v10725_v6  ;;  %v10732_v3 = vmax.f32 %v5215_v36, %v4699_v10  ;;  %v5666_v1 = vmax.f32 %v5519_v62, %v10654_v33  ;;  %v10749_v33 = vld [vmem:[%s11702_s4] ss:$0 sm:$0xff] }
 0x4b5   : > { %v3789_v54 = vadd.f32 %v3712_v14, %v12060_v48  ;;  %v6470_v63 = vpack.c.b16 %v6449_v35, %v6448_v52  ;;  %v5667_v22 = vmax.f32 %v5520_v25, %v10656_v44  ;;  %v10742_v58 = vsel %vm2344_vm3, %v4970_v59, %v10719_v18  ;;  %v12062_v35 = vld [vmem:[#allocation29_spill] sm:$0xff] }
 0x4b6   : > { %v6543_v39 = vpop.f32.mrf.mxu2  ;;  %v5369_v11 = vmax.f32 %v5214_v40, %v10602_v30  ;;  %v10744_v36 = vmax.f32 %v5216_v38, %v4701_v41  ;;  %v5821_v45 = vmax.f32 %v5666_v1, %v4699_v10  ;;  %v10753_v62 = vadd.f32 %v10749_v33, %v9894_v23  ;;  %v400_v10 = vld [vmem:[%s7580_s29 + $0xc0] sm:$0xf]  ;;  %v401_v40 = vld [vmem:[%s7580_s29 + $0xc4] sm:$0xf] }
 0x4b7   : > { %v6544_v56 = vadd.f32 %v10589_v46, %v6543_v39  ;;  %v3955_v29 = vadd.f32 %v12061_v12, %v3789_v54  ;;  %v10758_v44 = vunpack.c.l.bf16 %v4523_v16  ;;  %v5822_v38 = vmax.f32 %v5667_v22, %v4701_v41 }
 0x4b8   : > { %v4069_v31 = vpop.f32.mrf.mxu1  ;;  %v5521_v59 = vmax.f32 %v5369_v11, %v10609_v21  ;;  %v10765_v34 = vmax.f32 %v4800_v53, %v10742_v58  ;;  %v5973_v52 = vmax.f32 %v5821_v45, %v10725_v6  ;;  %v4525_v23 = vsel %vm9495_vm6, %v399_v28, 4286644096  ;;  %v12063_v11 = vld [vmem:[#allocation26_spill] sm:$0xff] }
 0x4b9   : > { %6654 = vrot.lane.b32.xlu0 %v6544_v56, %s7463_s26  ;;  %2817 = vrot.lane.b32.xlu2 %v10384_v57, %s11789_s16  ;;  %v10762_v25 = vadd.f32 %v4069_v31, %v3955_v29  ;;  %v10773_v57 = vunpack.c.l.bf16 %v4524_v42  ;;  %v5974_v14 = vmax.f32 %v5822_v38, %v10742_v58  ;;  %v5522_v53 = vmax.f32 %v10732_v3, %v10725_v6 }
 0x4ba   : > { %v5668_v41 = vmax.f32 %v5521_v59, %v10670_v19  ;;  %v6021_v48 = vpack.c.bf16 %v5973_v52, %v5973_v52  ;;  %v4526_v54 = vsel %vm9477_vm0, %v400_v10, 4286644096  ;;  %v10786_v56 = vunpack.c.l.bf16 %v4525_v23  ;;  %v12064_v52 = vld [vmem:[#allocation39_spill] sm:$0xff] }
 0x4bb   : > { %7229 = vmatmul.msk.bf16.gmra.mxu1 %vm3425_vm13, %v12062_v35  ;;  %7246 = vmatmul.msk.bf16.gmra.mxu2 %vm773_vm1, %v6470_v63  ;;  %v6022_v1 = vpack.c.bf16 %v5974_v14, %v5974_v14  ;;  %v4702_v63 = vrot.slane %v10758_v44, 1  ;;  %v4798_v31 = vmax.f32 %v10579_v47, %v10602_v30  ;;  %v10862_v6 = vadd.f32 %v10749_v33, %v9923_v60 }
 0x4bc   : > { %v3714_v39 = vpop.f32.mrf.mxu3  ;;  %v5823_v42 = vmax.f32 %v5668_v41, %v10689_v50  ;;  %v6304_v12 = vshrl.u32 %v6021_v48, 16  ;;  %v6307_v29 = vshll.u32 %v6021_v48, 16 }
 0x4bd   : > { %v3790_v22 = vadd.f32 %v3714_v39, %v12063_v11  ;;  %v6313_v38 = vshll.u32 %v6022_v1, 16  ;;  %v6317_v10 = vshrl.u32 %v6022_v1, 16  ;;  %v4703_v39 = vrot.slane %v10773_v57, 1 }
 0x4be   : > { %v6546_v28 = vpop.f32.mrf.mxu2  ;;  %v5975_v59 = vmax.f32 %v5823_v42, %v10719_v18  ;;  %v6306_v14 = vrot.slane %v6304_v12, 4  ;;  %v6309_v16 = vrot.slane %v6307_v29, 5 }
 0x4bf   : > { %v6547_v45 = vadd.f32 %v10589_v46, %v6546_v28  ;;  %v3956_v41 = vadd.f32 %v12064_v52, %v3790_v22  ;;  %v6315_v48 = vrot.slane %v6313_v38, 5  ;;  %v6319_v42 = vrot.slane %v6317_v10, 4 }
 0x4c0   : > { %v4071_v23 = vpop.f32.mrf.mxu1  ;;  %v6023_v30 = vpack.c.bf16 %v5975_v59, %v5975_v59  ;;  %v6310_v11 = vor.u32 %v6309_v16, %v6306_v14  ;;  %v10807_v22 = vrot.slane %v10786_v56, 1  ;;  %v5070_v28 = vmax.f32 %v4798_v31, %v10609_v21 }
 0x4c1   : > { %6656 = vrot.lane.b32.xlu1 %v6547_v45, %s7463_s26  ;;  %2819 = vrot.lane.b32.xlu0 %v10462_v5, %s11789_s16  ;;  %v10802_v1 = vadd.f32 %v4071_v23, %v3956_v41  ;;  %v6320_v12 = vor.u32 %v6319_v42, %v6315_v48  ;;  %v4527_v5 = vsel %vm9486_vm7, %v401_v40, 4286644096  ;;  %v10812_v45 = vunpack.c.l.bf16 %v4526_v54  ;;  %v12065_v23 = vld [vmem:[#allocation31_spill] sm:$0xff]  ;;  %v402_v42 = vld [vmem:[%s7580_s29 + $0xc8] sm:$0xf] }
 0x4c2   : > { %7184 = vmatmul.msk.bf16.gmra.mxu3 %vm3425_vm13, %v12055_v4  ;;  %v6323_v29 = vshll.u32 %v6023_v30, 16  ;;  %v6311_v59 = vrot.slane %v6310_v11, 4  ;;  %v4704_v38 = vsel %vm1863_vm2, %v4702_v63, %v4703_v39  ;;  %v4974_v10 = vrot.slane %v10758_v44, 2 }
 0x4c3   : > { %v4975_v4 = vrot.slane %v10773_v57, 2  ;;  %v6321_v52 = vrot.slane %v6320_v12, 4  ;;  %v4802_v21 = vmax.f32 %v10758_v44, %v4704_v38  ;;  %v5217_v31 = vmax.f32 %v5070_v28, %v10670_v19 }
 0x4c4   : > { %v3717_v16 = vpop.f32.mrf.mxu3  ;;  %v6325_v41 = vrot.slane %v6323_v29, 5  ;;  %v6316_v54 = vsel %vm9731_vm9, %v6311_v59, %v6315_v48  ;;  %v4706_v63 = vsel %vm1863_vm2, %v4703_v39, %v10807_v22  ;;  %v10825_v30 = vrot.slane %v10786_v56, 2 }
 0x4c5   : > { %v3791_v14 = vadd.f32 %v3717_v16, %v12065_v23  ;;  %v6450_v29 = vunpack.c.l.b16 %v6316_v54  ;;  %v4803_v28 = vmax.f32 %v10773_v57, %v4706_v63  ;;  %v10834_v48 = vsel %vm2344_vm3, %v4974_v10, %v4975_v4 }
 0x4c6   : > { %v6548_v40 = vpop.f32.mrf.mxu2  ;;  %v6326_v12 = vsel %vm9731_vm9, %v6321_v52, %v6325_v41  ;;  %v5372_v39 = vmax.f32 %v5217_v31, %v10689_v50  ;;  %v10841_v59 = vmax.f32 %v4802_v21, %v10834_v48  ;;  %v12066_v10 = vmax.f32 %v10744_v36, %v10742_v58 }
 0x4c7   : > { %v6549_v11 = vadd.f32 %v10589_v46, %v6548_v40  ;;  %v3957_v16 = vadd.f32 %v9655_v2, %v3791_v14  ;;  %v6451_v47 = vunpack.c.l.b16 %v6326_v12  ;;  %v5669_v2 = vmax.f32 %v5522_v53, %v10758_v44  ;;  %v10868_v53 = vpop.f32.mrf.mxu0 }
 0x4c8   : > { %v4074_v23 = vpop.f32.mrf.mxu1  ;;  %v5670_v52 = vmax.f32 %v12066_v10, %v10773_v57  ;;  %v4528_v41 = vsel %vm9495_vm6, %v402_v42, 4286644096  ;;  %v10857_v21 = vsel %vm2344_vm3, %v4975_v4, %v10825_v30  ;;  %v5524_v14 = vmax.f32 %v5372_v39, %v10719_v18 }
 0x4c9   : > { %2821 = vrot.lane.b32.xlu1 %v10553_v55, %s11789_s16  ;;  %6658 = vrot.lane.b32.xlu2 %v6549_v11, %s7463_s26  ;;  %v10853_v31 = vadd.f32 %v4074_v23, %v3957_v16  ;;  %v6471_v55 = vpack.c.b16 %v6451_v47, %v6450_v29  ;;  %v10866_v3 = vunpack.c.l.bf16 %v4527_v5  ;;  %v5824_v58 = vmax.f32 %v5669_v2, %v4704_v38  ;;  %v12068_v29 = vld [vmem:[#allocation28_spill] sm:$0xff] }
 0x4ca   : > { %v5825_v36 = vmax.f32 %v5670_v52, %v4706_v63  ;;  %v10872_v47 = vadd.f32 %v10749_v33, %v9982_v51  ;;  %v12067_v4 = vmax.f32 %v10730_v27, %v10758_v44  ;;  %v5671_v40 = vmax.f32 %v5524_v14, %v10786_v56 }
 0x4cb   : > { %7230 = vmatmul.msk.bf16.gmra.mxu1 %vm3425_vm13, %v9417_v17  ;;  %7247 = vmatmul.msk.bf16.gmra.mxu2 %vm773_vm1, %v6471_v55  ;;  %v10879_v54 = vunpack.c.l.bf16 %v4528_v41  ;;  %v10882_v42 = vmax.f32 %v4803_v28, %v10857_v21  ;;  %v5221_v11 = vmax.f32 %v10841_v59, %v10812_v45  ;;  %v5976_v51 = vmax.f32 %v5824_v58, %v10834_v48  ;;  %v12071_v59 = vld [vmem:[#allocation41_spill] sm:$0xff] }
 0x4cc   : > { %v5373_v60 = vmax.f32 %v12067_v4, %v4704_v38  ;;  %v3719_v5 = vpop.f32.mrf.mxu3  ;;  %v5977_v12 = vmax.f32 %v5825_v36, %v10857_v21  ;;  %v12069_v27 = vmax.f32 %v10765_v34, %v10773_v57  ;;  %v5826_v38 = vmax.f32 %v5671_v40, %v10807_v22 }
 0x4cd   : > { %v3792_v16 = vadd.f32 %v3719_v5, %v12068_v29  ;;  %v4707_v39 = vrot.slane %v10812_v45, 1  ;;  %v6024_v2 = vpack.c.bf16 %v5976_v51, %v5976_v51  ;;  %v4708_v52 = vrot.slane %v10866_v3, 1 }
 0x4ce   : > { %v6551_v23 = vpop.f32.mrf.mxu2  ;;  %v5374_v44 = vmax.f32 %v12069_v27, %v4706_v63  ;;  %v6025_v10 = vpack.c.bf16 %v5977_v12, %v5977_v12  ;;  %v5978_v14 = vmax.f32 %v5826_v38, %v10825_v30  ;;  %v10899_v58 = vrot.slane %v10879_v54, 1 }
 0x4cf   : > { %v6552_v28 = vadd.f32 %v10589_v46, %v6551_v23  ;;  %v3958_v41 = vadd.f32 %v9708_v43, %v3792_v16  ;;  %v4801_v34 = vmax.f32 %v10670_v19, %v10689_v50  ;;  %v6328_v57 = vshrl.u32 %v6024_v2, 16 }
 0x4d0   : > { %v4076_v55 = vpop.f32.mrf.mxu1  ;;  %v6331_v63 = vshll.u32 %v6024_v2, 16  ;;  %v6337_v36 = vshll.u32 %v6025_v10, 16  ;;  %v6341_v4 = vshrl.u32 %v6025_v10, 16  ;;  %v6026_v43 = vpack.c.bf16 %v5978_v14, %v5978_v14 }
 0x4d1   : > { %6660 = vrot.lane.b32.xlu0 %v6552_v28, %s7463_s26  ;;  %2823 = vrot.lane.b32.xlu2 %v10753_v62, %s11789_s16  ;;  %v10906_v40 = vadd.f32 %v4076_v55, %v3958_v41  ;;  %v4979_v5 = vrot.slane %v10812_v45, 2  ;;  %v4980_v51 = vrot.slane %v10866_v3, 2  ;;  %v6330_v19 = vrot.slane %v6328_v57, 4  ;;  %v10921_v41 = vpop.f32.mrf.mxu0  ;;  %v12070_v55 = vld [vmem:[#allocation38_spill] sm:$0xff] }
 0x4d2   : > { %7185 = vmatmul.msk.bf16.gmra.mxu3 %vm3425_vm13, %v12062_v35  ;;  %v6333_v50 = vrot.slane %v6331_v63, 5  ;;  %v6339_v12 = vrot.slane %v6337_v36, 5  ;;  %v6343_v29 = vrot.slane %v6341_v4, 4  ;;  %v5525_v62 = vmax.f32 %v5373_v60, %v10834_v48 }
 0x4d3   : > { %v6347_v16 = vshll.u32 %v6026_v43, 16  ;;  %v10914_v23 = vrot.slane %v10879_v54, 2  ;;  %v5073_v27 = vmax.f32 %v4801_v34, %v10719_v18  ;;  %v5526_v35 = vmax.f32 %v5374_v44, %v10857_v21  ;;  %v403_v34 = vld [vmem:[%s7580_s29 + $0xcc] sm:$0xf] }
 0x4d4   : > { %v3722_v38 = vpop.f32.mrf.mxu3  ;;  %v6334_v28 = vor.u32 %v6333_v50, %v6330_v19  ;;  %v6344_v2 = vor.u32 %v6343_v29, %v6339_v12  ;;  %v10919_v10 = vsel %vm1863_vm2, %v4707_v39, %v4708_v52  ;;  %v10926_v57 = vsel %vm1863_vm2, %v4708_v52, %v10899_v58  ;;  %v404_v50 = vld [vmem:[%s7580_s29 + $0xd0] sm:$0xf] }
 0x4d5   : > { %v3793_v14 = vadd.f32 %v3722_v38, %v12070_v55  ;;  %v6349_v60 = vrot.slane %v6347_v16, 5  ;;  %v5220_v18 = vmax.f32 %v5073_v27, %v10786_v56  ;;  %v10932_v39 = vsel %vm2344_vm3, %v4979_v5, %v4980_v51 }
 0x4d6   : > { %v6553_v48 = vpop.f32.mrf.mxu2  ;;  %v6335_v44 = vrot.slane %v6334_v28, 4  ;;  %v6345_v63 = vrot.slane %v6344_v2, 4  ;;  %v10937_v43 = vsel %vm2344_vm3, %v4980_v51, %v10914_v23  ;;  %v5672_v19 = vmax.f32 %v5525_v62, %v10812_v45  ;;  %v405_v28 = vld [vmem:[%s7580_s29 + $0xd4] sm:$0xf] }
 0x4d7   : > { %v6554_v21 = vadd.f32 %v10589_v46, %v6553_v48  ;;  %v3959_v36 = vadd.f32 %v9794_v24, %v3793_v14  ;;  %v5375_v52 = vmax.f32 %v5220_v18, %v10807_v22  ;;  %v5673_v29 = vmax.f32 %v5526_v35, %v10866_v3 }
 0x4d8   : > { %v4079_v4 = vpop.f32.mrf.mxu1  ;;  %v6340_v5 = vsel %vm9731_vm9, %v6335_v44, %v6339_v12  ;;  %v6350_v24 = vsel %vm9731_vm9, %v6345_v63, %v6349_v60  ;;  %v4529_v51 = vsel %vm9477_vm0, %v403_v34, 4286644096  ;;  %v5827_v12 = vmax.f32 %v5672_v19, %v10919_v10 }
 0x4d9   : > { %6662 = vrot.lane.b32.xlu1 %v6554_v21, %s7463_s26  ;;  %2825 = vrot.lane.b32.xlu0 %v10862_v6, %s11789_s16  ;;  %v10952_v16 = vadd.f32 %v4079_v4, %v3959_v36  ;;  %v6452_v62 = vunpack.c.l.b16 %v6340_v5  ;;  %v6453_v27 = vunpack.c.l.b16 %v6350_v24  ;;  %v5527_v38 = vmax.f32 %v5375_v52, %v10825_v30  ;;  %v10987_v52 = vpop.f32.mrf.mxu0 }
 0x4da   : > { %v5222_v6 = vmax.f32 %v10882_v42, %v10866_v3  ;;  %v5828_v35 = vmax.f32 %v5673_v29, %v10926_v57  ;;  %v4530_v37 = vsel %vm9486_vm7, %v404_v50, 4286644096  ;;  %v10968_v55 = vmax.f32 %v5221_v11, %v10919_v10 }
 0x4db   : > { %7231 = vmatmul.msk.bf16.gmra.mxu1 %vm3425_vm13, %v9510_v7  ;;  %v6472_v2 = vpack.c.b16 %v6453_v27, %v6452_v62  ;;  %v5674_v14 = vmax.f32 %v5527_v38, %v10879_v54  ;;  %v4804_v48 = vmax.f32 %v10786_v56, %v10807_v22  ;;  %v5979_v60 = vmax.f32 %v5827_v12, %v10932_v39 }
 0x4dc   : > { %v3724_v42 = vpop.f32.mrf.mxu3  ;;  %v5980_v18 = vmax.f32 %v5828_v35, %v10937_v43  ;;  %v4531_v13 = vsel %vm9495_vm6, %v405_v28, 4286644096  ;;  %v10977_v34 = vunpack.c.l.bf16 %v4529_v51  ;;  %v10983_v56 = vunpack.c.l.bf16 %v4530_v37 }
 0x4dd   : > { %7248 = vmatmul.msk.bf16.gmra.mxu2 %vm773_vm1, %v6472_v2  ;;  %v3794_v11 = vadd.f32 %v3724_v42, %v12071_v59  ;;  %v5829_v44 = vmax.f32 %v5674_v14, %v10899_v58  ;;  %v5076_v63 = vmax.f32 %v4804_v48, %v10825_v30  ;;  %v5377_v36 = vmax.f32 %v5222_v6, %v10926_v57  ;;  %v12072_v59 = vld [vmem:[#allocation42_spill] sm:$0xff] }
 0x4de   : > { %v6556_v21 = vpop.f32.mrf.mxu2  ;;  %v6027_v4 = vpack.c.bf16 %v5979_v60, %v5979_v60  ;;  %v6028_v8 = vpack.c.bf16 %v5980_v18, %v5980_v18  ;;  %v10991_v24 = vunpack.c.l.bf16 %v4531_v13  ;;  %v5326_v28 = vrot.slane %v10977_v34, 1 }
 0x4df   : > { %v6557_v22 = vadd.f32 %v10589_v46, %v6556_v21  ;;  %v3960_v19 = vadd.f32 %v9837_v9, %v3794_v11  ;;  %v5981_v5 = vmax.f32 %v5829_v44, %v10914_v23  ;;  %v5223_v29 = vmax.f32 %v5076_v63, %v10879_v54 }
 0x4e0   : > { %v4081_v50 = vpop.f32.mrf.mxu1  ;;  %v6352_v30 = vshrl.u32 %v6027_v4, 16  ;;  %v6355_v51 = vshll.u32 %v6027_v4, 16  ;;  %v6361_v62 = vshll.u32 %v6028_v8, 16  ;;  %v6365_v27 = vshrl.u32 %v6028_v8, 16 }
 0x4e1   : > { %2827 = vrot.lane.b32.xlu1 %v10872_v47, %s11789_s16  ;;  %6664 = vrot.lane.b32.xlu2 %v6557_v22, %s7463_s26  ;;  %v10997_v38 = vadd.f32 %v4081_v50, %v3960_v19  ;;  %v6029_v9 = vpack.c.bf16 %v5981_v5, %v5981_v5  ;;  %v5327_v6 = vrot.slane %v10983_v56, 1  ;;  %v2747_v2 = vadd.f32 %v10749_v33, %v10019_v15 }
 0x4e2   : > { %7186 = vmatmul.msk.bf16.gmra.mxu3 %vm3425_vm13, %v9417_v17  ;;  %v6354_v12 = vrot.slane %v6352_v30, 4  ;;  %v6357_v35 = vrot.slane %v6355_v51, 5  ;;  %v6363_v37 = vrot.slane %v6361_v62, 5  ;;  %v6367_v47 = vrot.slane %v6365_v27, 4  ;;  %v11031_v62 = vpop.f32.mrf.mxu0 }
 0x4e3   : > { %v5528_v14 = vmax.f32 %v10968_v55, %v10932_v39  ;;  %v6371_v48 = vshll.u32 %v6029_v9, 16  ;;  %v5529_v60 = vmax.f32 %v5377_v36, %v10937_v43  ;;  %v5378_v13 = vmax.f32 %v5223_v29, %v10899_v58 }
 0x4e4   : > { %v3727_v42 = vpop.f32.mrf.mxu3  ;;  %v6358_v17 = vor.u32 %v6357_v35, %v6354_v12  ;;  %v6368_v18 = vor.u32 %v6367_v47, %v6363_v37  ;;  %v11011_v63 = vsel %vm1863_vm2, %v5326_v28, %v5327_v6  ;;  %v11014_v15 = vrot.slane %v10991_v24, 1  ;;  %v12073_v35 = vld [vmem:[#allocation51_spill] sm:$0xff] }
 0x4e5   : > { %v3795_v11 = vadd.f32 %v3727_v42, %v12072_v59  ;;  %v6373_v44 = vrot.slane %v6371_v48, 5  ;;  %v5478_v36 = vrot.slane %v10977_v34, 2  ;;  %v5479_v50 = vrot.slane %v10983_v56, 2 }
 0x4e6   : > { %v6558_v21 = vpop.f32.mrf.mxu2  ;;  %v6359_v22 = vrot.slane %v6358_v17, 4  ;;  %v6369_v4 = vrot.slane %v6368_v18, 4  ;;  %v11021_v5 = vrot.slane %v10991_v24, 2  ;;  %v5530_v29 = vmax.f32 %v5378_v13, %v10914_v23  ;;  %v12074_v13 = vld [vmem:[#allocation46_spill] sm:$0xff] }
 0x4e7   : > { %v6559_v55 = vadd.f32 %v10589_v46, %v6558_v21  ;;  %v3961_v8 = vadd.f32 %v10868_v53, %v3795_v11  ;;  %v5675_v53 = vmax.f32 %v5528_v14, %v10977_v34  ;;  %v11037_v12 = vsel %vm1863_vm2, %v5327_v6, %v11014_v15  ;;  %v12075_v21 = vld [vmem:[#allocation56_spill] sm:$0xff] }
 0x4e8   : > { %v4084_v19 = vpop.f32.mrf.mxu1  ;;  %v6364_v30 = vsel %vm9731_vm9, %v6359_v22, %v6363_v37  ;;  %v6374_v51 = vsel %vm9731_vm9, %v6369_v4, %v6373_v44  ;;  %v11042_v37 = vsel %vm2344_vm3, %v5478_v36, %v5479_v50  ;;  %v5676_v47 = vmax.f32 %v5529_v60, %v10983_v56 }
 0x4e9   : > { %6666 = vrot.lane.b32.xlu0 %v6559_v55, %s7463_s26  ;;  %2829 = vrot.lane.b32.xlu2 %v2747_v2, %s11789_s16  ;;  %v11033_v27 = vadd.f32 %v4084_v19, %v3961_v8  ;;  %v6454_v9 = vunpack.c.l.b16 %v6364_v30  ;;  %v6455_v28 = vunpack.c.l.b16 %v6374_v51  ;;  %v5677_v2 = vmax.f32 %v5530_v29, %v10991_v24 }
 0x4ea   : > { %v11048_v48 = vsel %vm2344_vm3, %v5479_v50, %v11021_v5  ;;  %v5830_v42 = vmax.f32 %v5675_v53, %v11011_v63  ;;  %v5831_v6 = vmax.f32 %v5676_v47, %v11037_v12  ;;  %v2748_v44 = vadd.f32 %v10749_v33, %v12075_v21  ;;  %v12077_v21 = vld [vmem:[#allocation14_spill] sm:$0xff] }
 0x4eb   : > { %7232 = vmatmul.msk.bf16.gmra.mxu1 %vm3425_vm13, %v12073_v35  ;;  %v6473_v14 = vpack.c.b16 %v6455_v28, %v6454_v9  ;;  %v5832_v18 = vmax.f32 %v5677_v2, %v11014_v15  ;;  %v3903_v2 = vpop.f32.mrf.mxu0 }
 0x4ec   : > { %v3729_v17 = vpop.f32.mrf.mxu3  ;;  %v5982_v60 = vmax.f32 %v5830_v42, %v11042_v37  ;;  %v5983_v22 = vmax.f32 %v5831_v6, %v11048_v48 }
 0x4ed   : > { %7249 = vmatmul.msk.bf16.gmra.mxu2 %vm773_vm1, %v6473_v14  ;;  %v3796_v59 = vadd.f32 %v3729_v17, %v12074_v13  ;;  %v5984_v4 = vmax.f32 %v5832_v18, %v11021_v5  ;;  %v4805_v18 = vmax.f32 %v10812_v45, %v10919_v10  ;;  %v4806_v13 = vmax.f32 %v10866_v3, %v10926_v57 }
 0x4ee   : > { %v6561_v11 = vpop.f32.mrf.mxu2  ;;  %v6030_v19 = vpack.c.bf16 %v5982_v60, %v5982_v60  ;;  %v6031_v50 = vpack.c.bf16 %v5983_v22, %v5983_v22 }
 0x4ef   : > { %v6562_v55 = vadd.f32 %v10589_v46, %v6561_v11  ;;  %v3962_v36 = vadd.f32 %v10921_v41, %v3796_v59  ;;  %v6032_v29 = vpack.c.bf16 %v5984_v4, %v5984_v4  ;;  %v12076_v59 = vld [vmem:[#allocation49_spill] sm:$0xff]  ;;  %v5077_v3 = vmax.f32 %v4805_v18, %v10932_v39 }
 0x4f0   : > { %v4086_v8 = vpop.f32.mrf.mxu1  ;;  %v6376_v51 = vshrl.u32 %v6030_v19, 16  ;;  %v6379_v53 = vshll.u32 %v6030_v19, 16  ;;  %v6385_v9 = vshll.u32 %v6031_v50, 16  ;;  %v6389_v28 = vshrl.u32 %v6031_v50, 16 }
 0x4f1   : > { %6668 = vrot.lane.b32.xlu1 %v6562_v55, %s7463_s26  ;;  %2831 = vrot.lane.b32.xlu0 %v2748_v44, %s11789_s16  ;;  %v11064_v30 = vadd.f32 %v4086_v8, %v3962_v36  ;;  %v6395_v47 = vshll.u32 %v6032_v29, 16  ;;  %v2749_v44 = vadd.f32 %v10749_v33, %v12077_v21  ;;  %v5078_v10 = vmax.f32 %v4806_v13, %v10937_v43  ;;  %v12078_v29 = vld [vmem:[#allocation45_spill] sm:$0xff] }
 0x4f2   : > { %7187 = vmatmul.msk.bf16.gmra.mxu3 %vm3425_vm13, %v9510_v7  ;;  %v6378_v41 = vrot.slane %v6376_v51, 4  ;;  %v6381_v14 = vrot.slane %v6379_v53, 5  ;;  %v6387_v17 = vrot.slane %v6385_v9, 5  ;;  %v6391_v6 = vrot.slane %v6389_v28, 4 }
 0x4f3   : > { %v6397_v4 = vrot.slane %v6395_v47, 5  ;;  %v11089_v28 = vpop.f32.mrf.mxu0  ;;  %v5224_v39 = vmax.f32 %v5077_v3, %v10977_v34  ;;  %v5225_v43 = vmax.f32 %v5078_v10, %v10983_v56 }
 0x4f4   : > { %v3732_v42 = vpop.f32.mrf.mxu3  ;;  %v6382_v60 = vor.u32 %v6381_v14, %v6378_v41  ;;  %v6392_v22 = vor.u32 %v6391_v6, %v6387_v17  ;;  %v12079_v41 = vld [vmem:[#allocation7_spill] sm:$0xff] }
 0x4f5   : > { %v3797_v11 = vadd.f32 %v3732_v42, %v12076_v59  ;;  %v5379_v34 = vmax.f32 %v5224_v39, %v11011_v63  ;;  %v5380_v56 = vmax.f32 %v5225_v43, %v11037_v12  ;;  %v406_v12 = vld [vmem:[%s7580_s29 + $0xd8] sm:$0xf] }
 0x4f6   : > { %v6563_v7 = vpop.f32.mrf.mxu2  ;;  %v6383_v19 = vrot.slane %v6382_v60, 4  ;;  %v6393_v45 = vrot.slane %v6392_v22, 4  ;;  %v12081_v60 = vld [vmem:[#allocation40_spill] sm:$0xff] }
 0x4f7   : > { %v6564_v55 = vadd.f32 %v10589_v46, %v6563_v7  ;;  %v3963_v36 = vadd.f32 %v10987_v52, %v3797_v11  ;;  %v2751_v21 = vadd.f32 %v10749_v33, %v12081_v60  ;;  %v12082_v22 = vld [vmem:[#allocation8_spill] sm:$0xff] }
 0x4f8   : > { %v4089_v8 = vpop.f32.mrf.mxu1  ;;  %v6388_v50 = vsel %vm9731_vm9, %v6383_v19, %v6387_v17  ;;  %v6398_v52 = vsel %vm9731_vm9, %v6393_v45, %v6397_v4  ;;  %v12080_v17 = vld [vmem:[#allocation25_spill] sm:$0xff]  ;;  %v4532_v45 = vsel %vm9440_vm15, %v406_v12, 4286644096  ;;  %v12084_v43 = vld [vmem:[#allocation52_spill] sm:$0xff] }
 0x4f9   : > { %2833 = vrot.lane.b32.xlu1 %v2749_v44, %s11789_s16  ;;  %6670 = vrot.lane.b32.xlu2 %v6564_v55, %s7463_s26  ;;  %v11081_v57 = vadd.f32 %v4089_v8, %v3963_v36  ;;  %v6456_v51 = vunpack.c.l.b16 %v6388_v50  ;;  %v6457_v53 = vunpack.c.l.b16 %v6398_v52  ;;  %v2750_v6 = vadd.f32 %v10749_v33, %v12080_v17  ;;  %v407_v36 = vld [vmem:[%s7580_s29 + $0xdc] sm:$0xf]  ;;  %v408_v8 = vld [vmem:[%s7580_s29 + $0xe0] sm:$0xf] }
 0x4fa   : > { %v5531_v44 = vmax.f32 %v5379_v34, %v11042_v37  ;;  %v5532_v55 = vmax.f32 %v5380_v56, %v11048_v48  ;;  %v5630_v50 = vunpack.c.l.bf16 %v4532_v45  ;;  %v12085_v34 = vld [vmem:[#allocation50_spill] sm:$0xff] }
 0x4fb   : > { %7233 = vmatmul.msk.bf16.gmra.mxu1 %vm3425_vm13, %v12078_v29  ;;  %v6474_v47 = vpack.c.b16 %v6457_v53, %v6456_v51  ;;  %v11124_v37 = vpop.f32.mrf.mxu0 }
 0x4fc   : > { %v3734_v9 = vpop.f32.mrf.mxu3  ;;  %v5932_v17 = vrot.slane %v5630_v50, 2 }
 0x4fd   : > { %v3798_v14 = vadd.f32 %v3734_v9, %v12079_v41  ;;  %7250 = vmatmul.msk.bf16.gmra.mxu2 %vm773_vm1, %v6474_v47  ;;  %v5780_v9 = vrot.slane %v5630_v50, 1  ;;  %v5678_v47 = vmax.f32 %v5531_v44, %v5630_v50 }
 0x4fe   : > { %v6566_v42 = vpop.f32.mrf.mxu2 }
 0x4ff   : > { %v6567_v18 = vadd.f32 %v10589_v46, %v6566_v42  ;;  %v3964_v13 = vadd.f32 %v11031_v62, %v3798_v14  ;;  %v4807_v62 = vmax.f32 %v10879_v54, %v10899_v58  ;;  %v4533_v54 = vsel %vm9440_vm15, %v407_v36, 4286644096 }
 0x500   : > { %v4091_v59 = vpop.f32.mrf.mxu1  ;;  %v4534_v58 = vsel %vm9440_vm15, %v408_v8, 4286644096  ;;  %v5631_v52 = vunpack.c.l.bf16 %v4533_v54 }
 0x501   : > { %6672 = vrot.lane.b32.xlu0 %v6567_v18, %s7463_s26  ;;  %2835 = vrot.lane.b32.xlu2 %v2750_v6, %s11789_s16  ;;  %v11103_v11 = vadd.f32 %v4091_v59, %v3964_v13  ;;  %v5079_v10 = vmax.f32 %v4807_v62, %v10914_v23 }
 0x502   : > { %7188 = vmatmul.msk.bf16.gmra.mxu3 %vm3425_vm13, %v12073_v35  ;;  %v5781_v39 = vrot.slane %v5631_v52, 1  ;;  %v5679_v23 = vmax.f32 %v5532_v55, %v5631_v52 }
 0x503   : > { %v5226_v53 = vmax.f32 %v5079_v10, %v10991_v24  ;;  %v5933_v24 = vrot.slane %v5631_v52, 2 }
 0x504   : > { %v3737_v7 = vpop.f32.mrf.mxu3  ;;  %v5782_v42 = vsel %vm1863_vm2, %v5780_v9, %v5781_v39  ;;  %v12087_v9 = vld [vmem:[#allocation54_spill] sm:$0xff] }
 0x505   : > { %v3799_v63 = vadd.f32 %v3737_v7, %v12082_v22  ;;  %v5381_v14 = vmax.f32 %v5226_v53, %v11014_v15  ;;  %v5833_v13 = vmax.f32 %v5678_v47, %v5782_v42  ;;  %v11146_v15 = vld [vmem:[%s11706_s8] ss:$0 sm:$0xff]  ;;  %v5934_v22 = vsel %vm2344_vm3, %v5932_v17, %v5933_v24 }
 0x506   : > { %v6568_v4 = vpop.f32.mrf.mxu2 }
 0x507   : > { %v6569_v19 = vadd.f32 %v10589_v46, %v6568_v4  ;;  %v3965_v48 = vadd.f32 %v3903_v2, %v3799_v63  ;;  %v5632_v46 = vunpack.c.l.bf16 %v4534_v58  ;;  %v5533_v62 = vmax.f32 %v5381_v14, %v11021_v5 }
 0x508   : > { %v4094_v3 = vpop.f32.mrf.mxu1  ;;  %v5985_v36 = vmax.f32 %v5833_v13, %v5934_v22 }
 0x509   : > { %6674 = vrot.lane.b32.xlu1 %v6569_v19, %s7463_s26  ;;  %2837 = vrot.lane.b32.xlu0 %v2751_v21, %s11789_s16  ;;  %v11129_v51 = vadd.f32 %v4094_v3, %v3965_v48  ;;  %v5783_v41 = vrot.slane %v5632_v46, 1  ;;  %v5935_v59 = vrot.slane %v5632_v46, 2  ;;  %v12086_v21 = vld [vmem:[#allocation57_spill] sm:$0xff]  ;;  %v5680_v5 = vmax.f32 %v5533_v62, %v5632_v46  ;;  %v3910_v19 = vpop.f32.mrf.mxu0 }
 0x50a   : > { %v2752_v44 = vadd.f32 %v10749_v33, %v12086_v21  ;;  %v6033_v54 = vpack.c.bf16 %v5985_v36, %v5985_v36 }
 0x50b   : > { %7234 = vmatmul.msk.bf16.gmra.mxu1 %vm3425_vm13, %v12084_v43  ;;  %v11134_v2 = vpop.permute.xlu2 %6652  ;;  %v5784_v18 = vsel %vm1863_vm2, %v5781_v39, %v5783_v41  ;;  %v5936_v63 = vsel %vm2344_vm3, %v5933_v24, %v5935_v59  ;;  %v5835_v45 = vmax.f32 %v5680_v5, %v5783_v41  ;;  %v12088_v41 = vld [vmem:[#allocation20_spill] sm:$0xff]  ;;  %vm6744_vm2 = vcmask 261312  }
 0x50c   : > { %v3739_v6 = vpop.f32.mrf.mxu3  ;;  %v5834_v60 = vmax.f32 %v5679_v23, %v5784_v18  ;;  %v6400_v10 = vshrl.u32 %v6033_v54, 16  ;;  %v6403_v50 = vshll.u32 %v6033_v54, 16  ;;  %v2754_v14 = vadd.f32 %v10749_v33, %v12088_v41 }
 0x50d   : > { %v3800_v56 = vadd.f32 %v3739_v6, %v12085_v34  ;;  %v5987_v3 = vmax.f32 %v5835_v45, %v5935_v59 }
 0x50e   : > { %v6571_v7 = vpop.f32.mrf.mxu2  ;;  %v5986_v8 = vmax.f32 %v5834_v60, %v5936_v63  ;;  %v6402_v23 = vrot.slane %v6400_v10, 4 }
 0x50f   : > { %v6572_v55 = vadd.f32 %v11146_v15, %v6571_v7  ;;  %v3966_v4 = vadd.f32 %v11089_v28, %v3800_v56  ;;  %v6035_v47 = vpack.c.bf16 %v5987_v3, %v5987_v3  ;;  %v12089_v56 = vld [vmem:[#allocation60_spill] sm:$0xff]  ;;  %v12090_v7 = vld [vmem:[#allocation34_spill] sm:$0xff] }
 0x510   : > { %v4096_v12 = vpop.f32.mrf.mxu1  ;;  %v6034_v58 = vpack.c.bf16 %v5986_v8, %v5986_v8  ;;  %v4036_v62 = vsel %vm3349_vm12, %v12090_v7, %v12089_v56  ;;  %v12091_v8 = vld [vmem:[#allocation61_spill] sm:$0xff]  ;;  %v2756_v7 = vadd.f32 %v10749_v33, %v10429_v32 }
 0x511   : > { %2839 = vrot.lane.b32.xlu1 %v2752_v44, %s11789_s16  ;;  %6676 = vrot.lane.b32.xlu2 %v6572_v55, %s7463_s26  ;;  %v11154_v35 = vadd.f32 %v4096_v12, %v3966_v4  ;;  %v6419_v59 = vshll.u32 %v6035_v47, 16  ;;  %v3913_v63 = vpop.f32.mrf.mxu0  ;;  %v12093_v47 = vld [vmem:[#allocation62_spill] sm:$0xff] }
 0x512   : > { %7189 = vmatmul.msk.bf16.gmra.mxu3 %vm3425_vm13, %v12078_v29  ;;  %v6409_v46 = vshll.u32 %v6034_v58, 16  ;;  %v6413_v53 = vshrl.u32 %v6034_v58, 16  ;;  %v6405_v29 = vrot.slane %v6403_v50, 5 }
 0x513   : > { %v11158_v48 = vpop.permute.xlu0 %6648  ;;  %v2818_v28 = vpop.permute.xlu2 %2817  ;;  %v6421_v44 = vrot.slane %v6419_v59, 5  ;;  %v12095_v59 = vld [vmem:[#allocation15_spill] sm:$0xff] }
 0x514   : > { %2902 = vst.msk [vmem:[%s7664_s24 + $0x60] sm:$0xff] %vm2889_vm4, %v2818_v28  ;;  %v3742_v52 = vpop.f32.mrf.mxu3  ;;  %v6411_v17 = vrot.slane %v6409_v46, 5  ;;  %v6415_v6 = vrot.slane %v6413_v53, 4  ;;  %v6406_v24 = vor.u32 %v6405_v29, %v6402_v23  ;;  %v12092_v28 = vld [vmem:[#allocation11_spill] sm:$0xff]  ;;  %v12094_v29 = vld [vmem:[#allocation9_spill] sm:$0xff] }
 0x515   : > { %v3801_v39 = vadd.f32 %v3742_v52, %v12087_v9  ;;  %v2753_v3 = vadd.f32 %v10749_v33, %v12092_v28  ;;  %v2755_v41 = vadd.f32 %v10749_v33, %v12094_v29 }
 0x516   : > { %v6573_v43 = vpop.f32.mrf.mxu2  ;;  %v6416_v34 = vor.u32 %v6415_v6, %v6411_v17  ;;  %v6407_v21 = vrot.slane %v6406_v24, 4 }
 0x517   : > { %v6574_v42 = vadd.f32 %v11146_v15, %v6573_v43  ;;  %v3967_v18 = vadd.f32 %v11124_v37, %v3801_v39 }
 0x518   : > { %v4099_v13 = vpop.f32.mrf.mxu1  ;;  %v6417_v22 = vrot.slane %v6416_v34, 4  ;;  %v6412_v4 = vsel %vm9731_vm9, %v6407_v21, %v6411_v17 }
 0x519   : > { %6678 = vrot.lane.b32.xlu0 %v6574_v42, %s7463_s26  ;;  %2843 = vrot.lane.b32.xlu2 %v2754_v14, %s11789_s16  ;;  %v11172_v60 = vadd.f32 %v4099_v13, %v3967_v18  ;;  %v6458_v36 = vunpack.c.l.b16 %v6412_v4  ;;  %v3915_v43 = vpop.f32.mrf.mxu0 }
 0x51a   : > { %v6422_v5 = vsel %vm9731_vm9, %v6417_v22, %v6421_v44 }
 0x51b   : > { %v11174_v55 = vpop.permute.xlu1 %6650  ;;  %v2814_v37 = vpop.permute.xlu0 %2813  ;;  %7235 = vmatmul.msk.bf16.gmra.mxu1 %vm3425_vm13, %v4036_v62  ;;  %v6459_v58 = vunpack.c.l.b16 %v6422_v5  ;;  %v12096_v5 = vld [vmem:[#allocation22_spill] sm:$0xff] }
 0x51c   : > { %2900 = vst.msk [vmem:[%s7664_s24 + $0x50] sm:$0xff] %vm2889_vm4, %v2814_v37  ;;  %v3744_v12 = vpop.f32.mrf.mxu3 }
 0x51d   : > { %v3802_v45 = vadd.f32 %v3744_v12, %v12091_v8  ;;  %v6475_v46 = vpack.c.b16 %v6459_v58, %v6458_v36  ;;  %v2757_v8 = vadd.f32 %v10749_v33, %v10476_v26 }
 0x51e   : > { %v6576_v54 = vpop.f32.mrf.mxu2 }
 0x51f   : > { %v6577_v10 = vadd.f32 %v11146_v15, %v6576_v54  ;;  %v3968_v50 = vadd.f32 %v3910_v19, %v3802_v45  ;;  %7251 = vmatmul.msk.bf16.gmra.mxu2 %vm773_vm1, %v6475_v46  ;;  %v12097_v46 = vld [vmem:[#allocation33_spill] sm:$0xff]  ;;  %vm4340_vm1 = vcmask 195712  }
 0x520   : > { %v4101_v52 = vpop.f32.mrf.mxu1 }
 0x521   : > { %6680 = vrot.lane.b32.xlu1 %v6577_v10, %s7463_s26  ;;  %2841 = vrot.lane.b32.xlu0 %v2753_v3, %s11789_s16  ;;  %v11189_v0 = vadd.f32 %v4101_v52, %v3968_v50  ;;  %v3918_v21 = vpop.f32.mrf.mxu0 }
 0x523   : > { %v2816_v53 = vpop.permute.xlu1 %2815  ;;  %v11192_v9 = vpop.permute.xlu2 %6658 }
 0x524   : > { %2901 = vst.msk [vmem:[%s7664_s24 + $0x58] sm:$0xff] %vm2889_vm4, %v2816_v53  ;;  %v3747_v39 = vpop.f32.mrf.mxu3 }
 0x525   : > { %v3803_v19 = vadd.f32 %v3747_v39, %v12093_v47  ;;  %v2758_v39 = vadd.f32 %v10749_v33, %v10510_v49 }
 0x526   : > { %v6578_v23 = vpop.f32.mrf.mxu2 }
 0x527   : > { %v6579_v14 = vadd.f32 %v11146_v15, %v6578_v23  ;;  %v3969_v42 = vadd.f32 %v3913_v63, %v3803_v19 }
 0x528   : > { %v4104_v17 = vpop.f32.mrf.mxu1 }
 0x529   : > { %2845 = vrot.lane.b32.xlu1 %v2755_v41, %s11789_s16  ;;  %6682 = vrot.lane.b32.xlu2 %v6579_v14, %s7463_s26  ;;  %v11202_v6 = vadd.f32 %v4104_v17, %v3969_v42  ;;  %v3920_v28 = vpop.f32.mrf.mxu0  ;;  %v12098_v17 = vld [vmem:[#allocation19_spill] sm:$0xff] }
 0x52b   : > { %v11204_v18 = vpop.permute.xlu0 %6654  ;;  %v2824_v13 = vpop.permute.xlu2 %2823 }
 0x52c   : > { %2905 = vst.msk [vmem:[%s7664_s24 + $0x78] sm:$0xff] %vm2889_vm4, %v2824_v13  ;;  %v3749_v24 = vpop.f32.mrf.mxu3 }
 0x52d   : > { %v3804_v34 = vadd.f32 %v3749_v24, %v12095_v59  ;;  %v2759_v24 = vadd.f32 %v10749_v33, %v10557_v20  ;;  %v7374_v33 = vld [vmem:[%s11702_s4] ss:$0 sm:$0xff] }
 0x52e   : > { %v6581_v56 = vpop.f32.mrf.mxu2 }
 0x52f   : > { %v6582_v62 = vadd.f32 %v11146_v15, %v6581_v56  ;;  %v3970_v44 = vadd.f32 %v3915_v43, %v3804_v34 }
 0x530   : > { %v4106_v37 = vpop.f32.mrf.mxu1 }
 0x531   : > { %6684 = vrot.lane.b32.xlu0 %v6582_v62, %s7463_s26  ;;  %2847 = vrot.lane.b32.xlu2 %v2756_v7, %s11789_s16  ;;  %v11214_v22 = vadd.f32 %v4106_v37, %v3970_v44  ;;  %v3923_v14 = vpop.f32.mrf.mxu0  ;;  %v12099_v37 = vld [vmem:[#allocation6_spill] sm:$0xff] }
 0x533   : > { %v11216_v63 = vpop.permute.xlu1 %6656  ;;  %v2820_v4 = vpop.permute.xlu0 %2819 }
 0x534   : > { %2903 = vst.msk [vmem:[%s7664_s24 + $0x68] sm:$0xff] %vm2889_vm4, %v2820_v4 }
 0x535   : > { %v3752_v12 = vpop.f32.mrf.mxu3 }
 0x536   : > { %v3805_v32 = vadd.f32 %v3752_v12, %v12096_v5  ;;  %v6583_v36 = vpop.f32.mrf.mxu2  ;;  %v12100_v12 = vld [vmem:[#allocation35_spill] sm:$0xff] }
 0x537   : > { %v6584_v45 = vadd.f32 %v11146_v15, %v6583_v36  ;;  %v2760_v5 = vadd.f32 %v7374_v33, %v12100_v12 }
 0x538   : > { %v3971_v54 = vadd.f32 %v3918_v21, %v3805_v32  ;;  %v4109_v58 = vpop.f32.mrf.mxu1 }
 0x539   : > { %6686 = vrot.lane.b32.xlu1 %v6584_v45, %s7463_s26  ;;  %2849 = vrot.lane.b32.xlu0 %v2757_v8, %s11789_s16  ;;  %v3925_v20 = vpop.f32.mrf.mxu0 }
 0x53a   : > { %v11226_v3 = vadd.f32 %v4109_v58, %v3971_v54 }
 0x53b   : > { %v2822_v10 = vpop.permute.xlu1 %2821  ;;  %v11228_v50 = vpop.permute.xlu2 %6664 }
 0x53c   : > { %2904 = vst.msk [vmem:[%s7664_s24 + $0x70] sm:$0xff] %vm2889_vm4, %v2822_v10  ;;  %v11271_v10 = vld [vmem:[%s11704_s6] ss:$0 sm:$0xff] }
 0x53d   : > { %v3754_v52 = vpop.f32.mrf.mxu3 }
 0x53e   : > { %v3806_v26 = vadd.f32 %v3754_v52, %v12097_v46  ;;  %v6586_v53 = vpop.f32.mrf.mxu2  ;;  %v12101_v46 = vld [vmem:[#allocation48_spill] sm:$0xff] }
 0x53f   : > { %v6587_v43 = vadd.f32 %v11146_v15, %v6586_v53 }
 0x540   : > { %v3972_v47 = vadd.f32 %v3920_v28, %v3806_v26  ;;  %v4111_v19 = vpop.f32.mrf.mxu1  ;;  %v4180_v26 = vadd.f32 %v11271_v10, %v12101_v46 }
 0x541   : > { %2851 = vrot.lane.b32.xlu1 %v2758_v39, %s11789_s16  ;;  %6688 = vrot.lane.b32.xlu2 %v6587_v43, %s7463_s26 }
 0x542   : > { %v11238_v23 = vadd.f32 %v4111_v19, %v3972_v47  ;;  %v11286_v19 = vpop.f32.mrf.mxu0 }
 0x543   : > { %v11240_v29 = vpop.permute.xlu0 %6660  ;;  %v2830_v41 = vpop.permute.xlu2 %2829 }
 0x544   : > { %2908 = vst.msk [vmem:[%s7664_s24 + $0x90] sm:$0xff] %vm2889_vm4, %v2830_v41  ;;  %v4181_v41 = vadd.f32 %v11271_v10, %v10700_v61 }
 0x545   : > { %v3757_v42 = vpop.f32.mrf.mxu3 }
 0x546   : > { %v3807_v49 = vadd.f32 %v3757_v42, %v12098_v17  ;;  %v6588_v13 = vpop.f32.mrf.mxu2 }
 0x547   : > { %v6589_v59 = vadd.f32 %v11146_v15, %v6588_v13 }
 0x548   : > { %v3973_v34 = vadd.f32 %v3923_v14, %v3807_v49  ;;  %v4114_v56 = vpop.f32.mrf.mxu1 }
 0x549   : > { %6690 = vrot.lane.b32.xlu0 %v6589_v59, %s7463_s26  ;;  %2853 = vrot.lane.b32.xlu2 %v2759_v24, %s11789_s16 }
 0x54a   : > { %v11250_v7 = vadd.f32 %v4114_v56, %v3973_v34  ;;  %v11301_v59 = vpop.f32.mrf.mxu0  ;;  %v4182_v34 = vadd.f32 %v11271_v10, %v10762_v25  ;;  %v4183_v25 = vadd.f32 %v11271_v10, %v10802_v1  ;;  %v4184_v1 = vadd.f32 %v11271_v10, %v10853_v31 }
 0x54b   : > { %v11252_v62 = vpop.permute.xlu1 %6662  ;;  %v2826_v21 = vpop.permute.xlu0 %2825  ;;  %v4185_v31 = vadd.f32 %v11271_v10, %v10906_v40 }
 0x54c   : > { %2906 = vst.msk [vmem:[%s7664_s24 + $0x80] sm:$0xff] %vm2889_vm4, %v2826_v21 }
 0x54d   : > { %v3759_v44 = vpop.f32.mrf.mxu3 }
 0x54e   : > { %v3808_v4 = vadd.f32 %v3759_v44, %v12099_v37  ;;  %v6591_v32 = vpop.f32.mrf.mxu2 }
 0x54f   : > { %v6592_v36 = vadd.f32 %v11146_v15, %v6591_v32 }
 0x550   : > { %v3974_v8 = vadd.f32 %v3925_v20, %v3808_v4  ;;  %v4116_v45 = vpop.f32.mrf.mxu1 }
 0x551   : > { %2855 = vrot.lane.b32.xlu0 %v2760_v5, %s11789_s16  ;;  %6692 = vrot.lane.b32.xlu1 %v6592_v36, %s7463_s26 }
 0x552   : > { %v11263_v54 = vadd.f32 %v4116_v45, %v3974_v8  ;;  %v11316_v33 = vpop.f32.mrf.mxu0 }
 0x553   : > { %v2828_v58 = vpop.permute.xlu1 %2827  ;;  %v11266_v28 = vpop.permute.xlu2 %6670 }
 0x554   : > { %2907 = vst.msk [vmem:[%s7664_s24 + $0x88] sm:$0xff] %vm2889_vm4, %v2828_v58 }
 0x555   : > { %v11277_v53 = vpop.f32.mrf.mxu3 }
 0x556   : > { %v6593_v52 = vpop.f32.mrf.mxu2 }
 0x557   : > { %v6594_v39 = vadd.f32 %v11146_v15, %v6593_v52 }
 0x558   : > { %v11290_v14 = vpop.f32.mrf.mxu1 }
 0x559   : > { %6694 = vrot.lane.b32.xlu2 %v6594_v39, %s7463_s26  ;;  %4244 = vrot.lane.b32.xlu1 %v4180_v26, %s7464_s28 }
 0x55a   : > { %v11336_v26 = vpop.f32.mrf.mxu0 }
 0x55b   : > { %v11282_v43 = vpop.permute.xlu0 %6666  ;;  %v2836_v47 = vpop.permute.xlu2 %2835 }
 0x55c   : > { %2911 = vst.msk [vmem:[%s7664_s24 + $0xa8] sm:$0xff] %vm2889_vm4, %v2836_v47 }
 0x55d   : > { %v11292_v17 = vpop.f32.mrf.mxu3 }
 0x560   : > { %v6596_v42 = vpop.f32.mrf.mxu2  ;;  %v11305_v56 = vpop.f32.mrf.mxu1 }
 0x561   : > { %v6597_v49 = vadd.f32 %v11146_v15, %v6596_v42  ;;  %4246 = vrot.lane.b32.xlu2 %v4181_v41, %s7464_s28  ;;  %v4187_v41 = vadd.f32 %v11271_v10, %v10997_v38  ;;  %v4188_v38 = vadd.f32 %v11271_v10, %v11033_v27 }
 0x563   : > { %v11296_v13 = vpop.permute.xlu1 %6668  ;;  %v2832_v24 = vpop.permute.xlu0 %2831  ;;  %6696 = vrot.lane.b32.xlu0 %v6597_v49, %s7463_s26 }
 0x564   : > { %2909 = vst.msk [vmem:[%s7664_s24 + $0x98] sm:$0xff] %vm2889_vm4, %v2832_v24 }
 0x565   : > { %v11314_v4 = vpop.f32.mrf.mxu3 }
 0x568   : > { %v6598_v61 = vpop.f32.mrf.mxu2  ;;  %v11323_v36 = vpop.f32.mrf.mxu1 }
 0x569   : > { %v6599_v21 = vadd.f32 %v11146_v15, %v6598_v61 }
 0x56b   : > { %v2834_v44 = vpop.permute.xlu1 %2833  ;;  %v11308_v37 = vpop.permute.xlu2 %6676  ;;  %6698 = vrot.lane.b32.xlu1 %v6599_v21, %s7463_s26  ;;  %4248 = vrot.lane.b32.xlu0 %v4182_v34, %s7464_s28  ;;  %v4190_v21 = vadd.f32 %v11271_v10, %v11081_v57  ;;  %v4191_v57 = vadd.f32 %v11271_v10, %v11103_v11 }
 0x56c   : > { %2910 = vst.msk [vmem:[%s7664_s24 + $0xa0] sm:$0xff] %vm2889_vm4, %v2834_v44  ;;  %v11357_v34 = vpop.f32.mrf.mxu0 }
 0x56d   : > { %v11329_v8 = vpop.f32.mrf.mxu3 }
 0x570   : > { %v6601_v20 = vpop.f32.mrf.mxu2  ;;  %v11342_v39 = vpop.f32.mrf.mxu1 }
 0x571   : > { %v6602_v12 = vadd.f32 %v11146_v15, %v6601_v20 }
 0x573   : > { %v11321_v5 = vpop.permute.xlu0 %6672  ;;  %v2844_v32 = vpop.permute.xlu2 %2843  ;;  %6700 = vrot.lane.b32.xlu2 %v6602_v12, %s7463_s26  ;;  %4250 = vrot.lane.b32.xlu1 %v4183_v25, %s7464_s28  ;;  %v4186_v25 = vadd.f32 %v11271_v10, %v10952_v16 }
 0x574   : > { %2915 = vst.msk [vmem:[%s7664_s24 + $0xc8] sm:$0xff] %vm2889_vm4, %v2844_v32  ;;  %v11377_v27 = vpop.f32.mrf.mxu0  ;;  %v4193_v32 = vadd.f32 %v11271_v10, %v11154_v35  ;;  %v4194_v35 = vadd.f32 %v11271_v10, %v11172_v60 }
 0x575   : > { %v11344_v47 = vpop.f32.mrf.mxu3 }
 0x578   : > { %v6603_v45 = vpop.f32.mrf.mxu2  ;;  %v11360_v40 = vpop.f32.mrf.mxu1 }
 0x579   : > { %v6604_v58 = vadd.f32 %v11146_v15, %v6603_v45 }
 0x57b   : > { %v11334_v52 = vpop.permute.xlu1 %6674  ;;  %v2838_v46 = vpop.permute.xlu0 %2837  ;;  %6702 = vrot.lane.b32.xlu0 %v6604_v58, %s7463_s26  ;;  %4252 = vrot.lane.b32.xlu2 %v4184_v1, %s7464_s28  ;;  %v4189_v58 = vadd.f32 %v11271_v10, %v11064_v30  ;;  %v4192_v30 = vadd.f32 %v11271_v10, %v11129_v51  ;;  %v4199_v51 = vadd.f32 %v11271_v10, %v11238_v23 }
 0x57c   : > { %2912 = vst.msk [vmem:[%s7664_s24 + $0xb0] sm:$0xff] %vm2889_vm4, %v2838_v46  ;;  %v3943_v11 = vpop.f32.mrf.mxu0 }
 0x57d   : > { %v11366_v44 = vpop.f32.mrf.mxu3 }
 0x580   : > { %v6606_v42 = vpop.f32.mrf.mxu2  ;;  %v11383_v45 = vpop.f32.mrf.mxu1 }
 0x581   : > { %v6607_v24 = vadd.f32 %v11146_v15, %v6606_v42 }
 0x583   : > { %v2840_v49 = vpop.permute.xlu1 %2839  ;;  %4254 = vrot.lane.b32.xlu0 %v4185_v31, %s7464_s28  ;;  %4258 = vrot.lane.b32.xlu2 %v4187_v41, %s7464_s28  ;;  %v11355_v61 = vpop.permute.xlu2 %6682  ;;  %v4196_v31 = vadd.f32 %v11271_v10, %v11202_v6 }
 0x584   : > { %2913 = vst.msk [vmem:[%s7664_s24 + $0xb8] sm:$0xff] %vm2889_vm4, %v2840_v49  ;;  %6704 = vrot.lane.b32.xlu1 %v6607_v24, %s7463_s26  ;;  %v12102_v24 = vld [vmem:[#allocation36_spill] sm:$0xff] }
 0x585   : > { %v3777_v46 = vpop.f32.mrf.mxu3  ;;  %v3809_v60 = vadd.f32 %v11277_v53, %v12102_v24  ;;  %v3945_v53 = vpop.f32.mrf.mxu0 }
 0x588   : > { %v4134_v49 = vpop.f32.mrf.mxu1 }
 0x58b   : > { %v11368_v20 = vpop.permute.xlu0 %6678  ;;  %4260 = vrot.lane.b32.xlu0 %v4188_v38, %s7464_s28  ;;  %4264 = vrot.lane.b32.xlu2 %v4190_v21, %s7464_s28  ;;  %v2848_v12 = vpop.permute.xlu2 %2847  ;;  %v4197_v38 = vadd.f32 %v11271_v10, %v11214_v22  ;;  %v3975_v21 = vadd.f32 %v11286_v19, %v3809_v60  ;;  %v12104_v19 = vld [vmem:[#allocation55_spill] sm:$0xff] }
 0x58c   : > { %2917 = vst.msk [vmem:[%s7664_s24 + $0xd8] sm:$0xff] %vm2889_vm4, %v2848_v12  ;;  %4256 = vrot.lane.b32.xlu1 %v4186_v25, %s7464_s28 }
 0x58d   : > { %v3779_v6 = vpop.f32.mrf.mxu3  ;;  %v4166_v22 = vadd.f32 %v11290_v14, %v3975_v21 }
 0x593   : > { %v11385_v16 = vpop.permute.xlu1 %6680  ;;  %v2842_v1 = vpop.permute.xlu0 %2841  ;;  %4266 = vrot.lane.b32.xlu0 %v4191_v57, %s7464_s28  ;;  %4270 = vrot.lane.b32.xlu2 %v4193_v32, %s7464_s28  ;;  %v4195_v57 = vadd.f32 %v11271_v10, %v11189_v0  ;;  %v12103_v32 = vld [vmem:[#allocation47_spill] sm:$0xff] }
 0x594   : > { %2914 = vst.msk [vmem:[%s7664_s24 + $0xc0] sm:$0xff] %vm2889_vm4, %v2842_v1  ;;  %4262 = vrot.lane.b32.xlu1 %v4189_v58, %s7464_s28  ;;  %v3810_v23 = vadd.f32 %v11292_v17, %v12103_v32  ;;  %v3812_v1 = vadd.f32 %v11329_v8, %v12104_v19  ;;  %v4136_v58 = vpop.f32.mrf.mxu1  ;;  %v4198_v17 = vadd.f32 %v11271_v10, %v11226_v3  ;;  %v12105_v8 = vld [vmem:[#allocation58_spill] sm:$0xff]  ;;  %v12107_v3 = vld [vmem:[#allocation59_spill] sm:$0xff] }
 0x595   : > { %v3782_v0 = vpop.f32.mrf.mxu3  ;;  %v3811_v21 = vadd.f32 %v11314_v4, %v12107_v3 }
 0x59b   : > { %v2846_v41 = vpop.permute.xlu1 %2845  ;;  %v11398_v42 = vpop.permute.xlu2 %6688  ;;  %4272 = vrot.lane.b32.xlu0 %v4194_v35, %s7464_s28  ;;  %4276 = vrot.lane.b32.xlu2 %v4196_v31, %s7464_s28  ;;  %v4200_v35 = vadd.f32 %v11271_v10, %v11250_v7  ;;  %v4202_v31 = vadd.f32 %v11271_v10, %v4166_v22  ;;  %v3813_v7 = vadd.f32 %v11344_v47, %v12105_v8 }
 0x59c   : > { %2916 = vst.msk [vmem:[%s7664_s24 + $0xd0] sm:$0xff] %vm2889_vm4, %v2846_v41  ;;  %4268 = vrot.lane.b32.xlu1 %v4192_v30, %s7464_s28  ;;  %v3976_v41 = vadd.f32 %v11301_v59, %v3810_v23  ;;  %v3978_v30 = vadd.f32 %v11336_v26, %v3812_v1  ;;  %v12106_v26 = vld [vmem:[#allocation13_spill] sm:$0xff] }
 0x59d   : > { %v12108_v1 = vld [vmem:[#allocation5_spill] sm:$0xff] }
 0x59e   : > { %v4167_v60 = vadd.f32 %v11305_v56, %v3976_v41  ;;  %v4169_v59 = vadd.f32 %v11342_v39, %v3978_v30  ;;  %v3784_v56 = vpop.f32.mrf.mxu3  ;;  %v4201_v39 = vadd.f32 %v11271_v10, %v11263_v54 }
 0x5a0   : > { %v4203_v22 = vadd.f32 %v11271_v10, %v4167_v60  ;;  %v4205_v47 = vadd.f32 %v11271_v10, %v4169_v59  ;;  %v6608_v59 = vpop.f32.mrf.mxu2 }
 0x5a3   : > { %v11414_v25 = vpop.permute.xlu0 %6684  ;;  %v2854_v12 = vpop.permute.xlu2 %2853  ;;  %4278 = vrot.lane.b32.xlu0 %v4197_v38, %s7464_s28  ;;  %4282 = vrot.lane.b32.xlu2 %v4199_v51, %s7464_s28  ;;  %v3815_v38 = vadd.f32 %v3777_v46, %v12106_v26  ;;  %v3977_v46 = vadd.f32 %v11316_v33, %v3811_v21  ;;  %v12110_v33 = vld [vmem:[#allocation10_spill] sm:$0xff] }
 0x5a4   : > { %2920 = vst.msk [vmem:[%s7664_s24 + $0xf0] sm:$0xff] %vm2889_vm4, %v2854_v12  ;;  %4274 = vrot.lane.b32.xlu1 %v4195_v57, %s7464_s28  ;;  %v3948_v51 = vpop.f32.mrf.mxu0  ;;  %v3979_v12 = vadd.f32 %v11357_v34, %v3813_v7  ;;  %v4139_v57 = vpop.f32.mrf.mxu1  ;;  %v3814_v41 = vadd.f32 %v11366_v44, %v12110_v33 }
 0x5a5   : > { %v3981_v32 = vadd.f32 %v3943_v11, %v3815_v38  ;;  %v3816_v11 = vadd.f32 %v3779_v6, %v12108_v1  ;;  %v4168_v54 = vadd.f32 %v11323_v36, %v3977_v46  ;;  %v12111_v38 = vld [vmem:[#allocation27_spill] sm:$0xff] }
 0x5a6   : > { %v4170_v34 = vadd.f32 %v11360_v40, %v3979_v12  ;;  %v3980_v36 = vadd.f32 %v11377_v27, %v3814_v41  ;;  %v3817_v27 = vadd.f32 %v3782_v0, %v12111_v38 }
 0x5a7   : > { %v4172_v19 = vadd.f32 %v4134_v49, %v3981_v32  ;;  %v3982_v40 = vadd.f32 %v3945_v53, %v3816_v11  ;;  %v4204_v7 = vadd.f32 %v11271_v10, %v4168_v54  ;;  %v6609_v32 = vadd.f32 %v11146_v15, %v6608_v59 }
 0x5a8   : > { %v4171_v26 = vadd.f32 %v11383_v45, %v3980_v36  ;;  %v6611_v45 = vpop.f32.mrf.mxu2 }
 0x5a9   : > { %v4173_v60 = vadd.f32 %v4136_v58, %v3982_v40  ;;  %v3983_v58 = vadd.f32 %v3948_v51, %v3817_v27 }
 0x5ab   : > { %v11433_v14 = vpop.permute.xlu1 %6686  ;;  %v2850_v24 = vpop.permute.xlu0 %2849  ;;  %4284 = vrot.lane.b32.xlu0 %v4200_v35, %s7464_s28  ;;  %4288 = vrot.lane.b32.xlu2 %v4202_v31, %s7464_s28  ;;  %v12109_v35 = vld [vmem:[#allocation44_spill] sm:$0xff]  ;;  %v4209_v3 = vadd.f32 %v11271_v10, %v4173_v60  ;;  %v4174_v0 = vadd.f32 %v4139_v57, %v3983_v58 }
 0x5ac   : > { %2918 = vst.msk [vmem:[%s7664_s24 + $0xe0] sm:$0xff] %vm2889_vm4, %v2850_v24  ;;  %4280 = vrot.lane.b32.xlu1 %v4198_v17, %s7464_s28  ;;  %v3818_v31 = vadd.f32 %v3784_v56, %v12109_v35  ;;  %v3950_v30 = vpop.f32.mrf.mxu0  ;;  %v4206_v24 = vadd.f32 %v11271_v10, %v4170_v34  ;;  %v4208_v17 = vadd.f32 %v11271_v10, %v4172_v19  ;;  %v4141_v6 = vpop.f32.mrf.mxu1 }
 0x5ad   : > { %v4210_v51 = vadd.f32 %v11271_v10, %v4174_v0 }
 0x5ae   : > { %v3984_v49 = vadd.f32 %v3950_v30, %v3818_v31 }
 0x5b0   : > { %v4175_v53 = vadd.f32 %v4141_v6, %v3984_v49 }
 0x5b2   : > { %v4211_v21 = vadd.f32 %v11271_v10, %v4175_v53 }
 0x5b3   : > { %v2852_v23 = vpop.permute.xlu1 %2851  ;;  %4290 = vrot.lane.b32.xlu0 %v4203_v22, %s7464_s28  ;;  %4294 = vrot.lane.b32.xlu2 %v4205_v47, %s7464_s28  ;;  %v11459_v4 = vpop.permute.xlu2 %6694  ;;  %v4207_v22 = vadd.f32 %v11271_v10, %v4171_v26  ;;  %v6612_v47 = vadd.f32 %v11146_v15, %v6611_v45 }
 0x5b4   : > { %2919 = vst.msk [vmem:[%s7664_s24 + $0xe8] sm:$0xff] %vm2889_vm4, %v2852_v23  ;;  %4286 = vrot.lane.b32.xlu1 %v4201_v39, %s7464_s28  ;;  %v6613_v10 = vpop.f32.mrf.mxu2 }
 0x5b5   : > { %v6614_v23 = vadd.f32 %v11146_v15, %v6613_v10 }
 0x5bb   : > { %v11470_v8 = vpop.permute.xlu0 %6690  ;;  %4296 = vrot.lane.b32.xlu0 %v4206_v24, %s7464_s28  ;;  %4300 = vrot.lane.b32.xlu2 %v4208_v17, %s7464_s28  ;;  %v4247_v44 = vpop.permute.xlu2 %4246 }
 0x5bc   : > { %4342 = vst.msk [vmem:[%s7664_s24 + $0x8] sm:$0xff] %vm4340_vm1, %v4247_v44  ;;  %4292 = vrot.lane.b32.xlu1 %v4204_v7, %s7464_s28 }
 0x5bd   : > { %6746 = vst.msk [vmem:[%s7664_s24 + $0x8] sm:$0xff] %vm6744_vm2, %v11174_v55 }
 0x5c3   : > { %v2856_v12 = vpop.permute.xlu0 %2855  ;;  %4302 = vrot.lane.b32.xlu0 %v4209_v3, %s7464_s28  ;;  %4306 = vrot.lane.b32.xlu2 %v4211_v21, %s7464_s28  ;;  %v11489_v55 = vpop.permute.xlu1 %6692 }
 0x5c4   : > { %2921 = vst.msk [vmem:[%s7664_s24 + $0xf8] sm:$0xff] %vm2889_vm4, %v2856_v12  ;;  %4298 = vrot.lane.b32.xlu1 %v4207_v22, %s7464_s28 }
 0x5cb   : > { %6708 = vrot.lane.b32.xlu0 %v6612_v47, %s7463_s26  ;;  %6706 = vrot.lane.b32.xlu2 %v6609_v32, %s7463_s26  ;;  %v4245_v56 = vpop.permute.xlu1 %4244 }
 0x5cc   : > { %4341 = vst.msk [vmem:[%s7664_s24] sm:$0xff] %vm4340_vm1, %v4245_v56  ;;  %4304 = vrot.lane.b32.xlu1 %v4210_v51, %s7464_s28 }
 0x5cd   : > { %6745 = vst.msk [vmem:[%s7664_s24] sm:$0xff] %vm6744_vm2, %v11158_v48  ;;  %v11505_v57 = vpop.permute.xlu2 %6700 }
 0x5d4   : > { %6710 = vrot.lane.b32.xlu1 %v6614_v23, %s7463_s26  ;;  %s7295_s26 = sshll.u32 %s7445_s12, 8  ;;  %s6778_s12 = scalar_lea.sflag [#allocation3], %s337_s20 }
 0x5d5   : > { %v11509_v39 = vpop.permute.xlu0 %6696  ;;  %v4253_v46 = vpop.permute.xlu2 %4252  ;;  %s6792_s18 = scalar_lea.hbm %s11707_s9, %s7295_s26 }
 0x5d6   : > { %4345 = vst.msk [vmem:[%s7664_s24 + $0x20] sm:$0xff] %vm4340_vm1, %v4253_v46  ;;  %s6795_s23 = sshll.u32 %s6792_s18, 4  ;;  %s6796_s23 = int_to_ptr.hbm [resolvable:$true] %s6795_s23 }
 0x5d7   : > { %6749 = vst.msk [vmem:[%s7664_s24 + $0x20] sm:$0xff] %vm6744_vm2, %v11216_v63  ;;  %s7389_s27 = sshra.s32 %s6796_s23, 4  ;;  %s7390_s27 = int_to_ptr.hbm [resolvable:$true] %s7389_s27 }
 0x5d8   : > { %s7391_s28 = scalar_lea.hbm %s7390_s27, 256  ;;  %p7396_p1 = scmp.lt.s32.totalorder %s7390_s27, %s11707_s9 }
 0x5d9   : > { %p7392_p12 = scmp.ne.s32.totalorder %s7390_s27, %s7391_s28  ;;  %p7397_p2 = scmp.lt.s32.totalorder %s7395_s15, %s7391_s28 }
 0x5db   : > { %p7393_p13 = pnand %p7392_p12, %p7556_p4  ;;  %p7398_p3 = por %p7397_p2, %p7396_p1 }
 0x5dd   : > { %v6699_v48 = vpop.permute.xlu1 %6698  ;;  %v4249_v34 = vpop.permute.xlu0 %4248  ;;  %p7394_p0 = pneg %p7393_p13 }
 0x5de   : > { %4343 = vst.msk [vmem:[%s7664_s24 + $0x10] sm:$0xff] %vm4340_vm1, %v4249_v34  ;;  %v4259_v15 = vpop.permute.xlu2 %4258 }
 0x5df   : > { %6747 = vst.msk [vmem:[%s7664_s24 + $0x10] sm:$0xff] %vm6744_vm2, %v11134_v2  ;;  %p7399_p5 = pnand %p7398_p3, %p7394_p0 }
 0x5e0   : > { %4348 = vst.msk [vmem:[%s7664_s24 + $0x38] sm:$0xff] %vm4340_vm1, %v4259_v15 }
 0x5e1   : > { %6752 = vst.msk [vmem:[%s7664_s24 + $0x38] sm:$0xff] %vm6744_vm2, %v11252_v62 }
 0x5e5   : > { %v4251_v19 = vpop.permute.xlu1 %4250 }
 0x5e6   : > { %4344 = vst.msk [vmem:[%s7664_s24 + $0x18] sm:$0xff] %vm4340_vm1, %v4251_v19  ;;  %v4265_v63 = vpop.permute.xlu2 %4264 }
 0x5e7   : > { %6748 = vst.msk [vmem:[%s7664_s24 + $0x18] sm:$0xff] %vm6744_vm2, %v11204_v18 }
 0x5e8   : > { %4351 = vst.msk [vmem:[%s7664_s24 + $0x50] sm:$0xff] %vm4340_vm1, %v4265_v63 }
 0x5e9   : > { %6755 = vst.msk [vmem:[%s7664_s24 + $0x50] sm:$0xff] %vm6744_vm2, %v11296_v13 }
 0x5ed   : > { %v11536_v2 = vpop.permute.xlu0 %6702 }
 0x5ee   : > { %v4271_v62 = vpop.permute.xlu2 %4270 }
 0x5ef   : > { %4354 = vst.msk [vmem:[%s7664_s24 + $0x68] sm:$0xff] %vm4340_vm1, %v4271_v62 }
 0x5f0   : > { %6758 = vst.msk [vmem:[%s7664_s24 + $0x68] sm:$0xff] %vm6744_vm2, %v11334_v52 }
 0x5f5   : > { %v4255_v1 = vpop.permute.xlu0 %4254 }
 0x5f6   : > { %4346 = vst.msk [vmem:[%s7664_s24 + $0x28] sm:$0xff] %vm4340_vm1, %v4255_v1  ;;  %v4277_v18 = vpop.permute.xlu2 %4276  ;;  %v6705_v11 = vpop.permute.xlu1 %6704 }
 0x5f7   : > { %6750 = vst.msk [vmem:[%s7664_s24 + $0x28] sm:$0xff] %vm6744_vm2, %v11192_v9 }
 0x5f8   : > { %4357 = vst.msk [vmem:[%s7664_s24 + $0x80] sm:$0xff] %vm4340_vm1, %v4277_v18 }
 0x5f9   : > { %6761 = vst.msk [vmem:[%s7664_s24 + $0x80] sm:$0xff] %vm6744_vm2, %v11385_v16 }
 0x5fd   : > { %v4261_v13 = vpop.permute.xlu0 %4260 }
 0x5fe   : > { %4349 = vst.msk [vmem:[%s7664_s24 + $0x40] sm:$0xff] %vm4340_vm1, %v4261_v13  ;;  %v4283_v52 = vpop.permute.xlu2 %4282  ;;  %v4257_v35 = vpop.permute.xlu1 %4256 }
 0x5ff   : > { %6753 = vst.msk [vmem:[%s7664_s24 + $0x40] sm:$0xff] %vm6744_vm2, %v11228_v50 }
 0x600   : > { %4347 = vst.msk [vmem:[%s7664_s24 + $0x30] sm:$0xff] %vm4340_vm1, %v4257_v35 }
 0x601   : > { %6751 = vst.msk [vmem:[%s7664_s24 + $0x30] sm:$0xff] %vm6744_vm2, %v11240_v29 }
 0x602   : > { %4360 = vst.msk [vmem:[%s7664_s24 + $0x98] sm:$0xff] %vm4340_vm1, %v4283_v52 }
 0x603   : > { %6764 = vst.msk [vmem:[%s7664_s24 + $0x98] sm:$0xff] %vm6744_vm2, %v11433_v14 }
 0x605   : > { %v4267_v9 = vpop.permute.xlu0 %4266 }
 0x606   : > { %4352 = vst.msk [vmem:[%s7664_s24 + $0x58] sm:$0xff] %vm4340_vm1, %v4267_v9  ;;  %v4289_v16 = vpop.permute.xlu2 %4288  ;;  %v4263_v50 = vpop.permute.xlu1 %4262 }
 0x607   : > { %6756 = vst.msk [vmem:[%s7664_s24 + $0x58] sm:$0xff] %vm6744_vm2, %v11266_v28 }
 0x608   : > { %4350 = vst.msk [vmem:[%s7664_s24 + $0x48] sm:$0xff] %vm4340_vm1, %v4263_v50 }
 0x609   : > { %6754 = vst.msk [vmem:[%s7664_s24 + $0x48] sm:$0xff] %vm6744_vm2, %v11282_v43 }
 0x60a   : > { %4363 = vst.msk [vmem:[%s7664_s24 + $0xb0] sm:$0xff] %vm4340_vm1, %v4289_v16 }
 0x60b   : > { %6767 = vst.msk [vmem:[%s7664_s24 + $0xb0] sm:$0xff] %vm6744_vm2, %v11489_v55 }
 0x60d   : > { %v4273_v29 = vpop.permute.xlu0 %4272 }
 0x60e   : > { %4355 = vst.msk [vmem:[%s7664_s24 + $0x70] sm:$0xff] %vm4340_vm1, %v4273_v29  ;;  %v4295_v14 = vpop.permute.xlu2 %4294  ;;  %v4269_v28 = vpop.permute.xlu1 %4268 }
 0x60f   : > { %6759 = vst.msk [vmem:[%s7664_s24 + $0x70] sm:$0xff] %vm6744_vm2, %v11308_v37 }
 0x610   : > { %4353 = vst.msk [vmem:[%s7664_s24 + $0x60] sm:$0xff] %vm4340_vm1, %v4269_v28 }
 0x611   : > { %6757 = vst.msk [vmem:[%s7664_s24 + $0x60] sm:$0xff] %vm6744_vm2, %v11321_v5 }
 0x612   : > { %4366 = vst.msk [vmem:[%s7664_s24 + $0xc8] sm:$0xff] %vm4340_vm1, %v4295_v14 }
 0x613   : > { %6770 = vst.msk [vmem:[%s7664_s24 + $0xc8] sm:$0xff] %vm6744_vm2, %v6699_v48 }
 0x615   : > { %v4279_v43 = vpop.permute.xlu0 %4278 }
 0x616   : > { %4358 = vst.msk [vmem:[%s7664_s24 + $0x88] sm:$0xff] %vm4340_vm1, %v4279_v43  ;;  %v4301_v31 = vpop.permute.xlu2 %4300  ;;  %v4275_v54 = vpop.permute.xlu1 %4274 }
 0x617   : > { %6762 = vst.msk [vmem:[%s7664_s24 + $0x88] sm:$0xff] %vm6744_vm2, %v11355_v61 }
 0x618   : > { %4356 = vst.msk [vmem:[%s7664_s24 + $0x78] sm:$0xff] %vm4340_vm1, %v4275_v54 }
 0x619   : > { %6760 = vst.msk [vmem:[%s7664_s24 + $0x78] sm:$0xff] %vm6744_vm2, %v11368_v20 }
 0x61a   : > { %4369 = vst.msk [vmem:[%s7664_s24 + $0xe0] sm:$0xff] %vm4340_vm1, %v4301_v31 }
 0x61b   : > { %6773 = vst.msk [vmem:[%s7664_s24 + $0xe0] sm:$0xff] %vm6744_vm2, %v6705_v11 }
 0x61d   : > { %v4285_v37 = vpop.permute.xlu0 %4284 }
 0x61e   : > { %4361 = vst.msk [vmem:[%s7664_s24 + $0xa0] sm:$0xff] %vm4340_vm1, %v4285_v37  ;;  %v4281_v5 = vpop.permute.xlu1 %4280  ;;  %v4307_v61 = vpop.permute.xlu2 %4306 }
 0x61f   : > { %6765 = vst.msk [vmem:[%s7664_s24 + $0xa0] sm:$0xff] %vm6744_vm2, %v11398_v42 }
 0x620   : > { %4359 = vst.msk [vmem:[%s7664_s24 + $0x90] sm:$0xff] %vm4340_vm1, %v4281_v5 }
 0x621   : > { %6763 = vst.msk [vmem:[%s7664_s24 + $0x90] sm:$0xff] %vm6744_vm2, %v11414_v25 }
 0x622   : > { %4372 = vst.msk [vmem:[%s7664_s24 + $0xf8] sm:$0xff] %vm4340_vm1, %v4307_v61 }
 0x625   : > { %v4291_v20 = vpop.permute.xlu0 %4290 }
 0x626   : > { %4364 = vst.msk [vmem:[%s7664_s24 + $0xb8] sm:$0xff] %vm4340_vm1, %v4291_v20  ;;  %v4287_v33 = vpop.permute.xlu1 %4286  ;;  %v6707_v41 = vpop.permute.xlu2 %6706 }
 0x627   : > { %6768 = vst.msk [vmem:[%s7664_s24 + $0xb8] sm:$0xff] %vm6744_vm2, %v11459_v4 }
 0x628   : > { %4362 = vst.msk [vmem:[%s7664_s24 + $0xa8] sm:$0xff] %vm4340_vm1, %v4287_v33 }
 0x629   : > { %6766 = vst.msk [vmem:[%s7664_s24 + $0xa8] sm:$0xff] %vm6744_vm2, %v11470_v8 }
 0x62d   : > { %v4297_v42 = vpop.permute.xlu0 %4296 }
 0x62e   : > { %4367 = vst.msk [vmem:[%s7664_s24 + $0xd0] sm:$0xff] %vm4340_vm1, %v4297_v42  ;;  %v4293_v25 = vpop.permute.xlu1 %4292 }
 0x62f   : > { %6771 = vst.msk [vmem:[%s7664_s24 + $0xd0] sm:$0xff] %vm6744_vm2, %v11505_v57 }
 0x630   : > { %4365 = vst.msk [vmem:[%s7664_s24 + $0xc0] sm:$0xff] %vm4340_vm1, %v4293_v25 }
 0x631   : > { %6769 = vst.msk [vmem:[%s7664_s24 + $0xc0] sm:$0xff] %vm6744_vm2, %v11509_v39 }
 0x635   : > { %v4303_v4 = vpop.permute.xlu0 %4302 }
 0x636   : > { %4370 = vst.msk [vmem:[%s7664_s24 + $0xe8] sm:$0xff] %vm4340_vm1, %v4303_v4  ;;  %v4299_v30 = vpop.permute.xlu1 %4298 }
 0x637   : > { %6774 = vst.msk [vmem:[%s7664_s24 + $0xe8] sm:$0xff] %vm6744_vm2, %v6707_v41 }
 0x638   : > { %4368 = vst.msk [vmem:[%s7664_s24 + $0xd8] sm:$0xff] %vm4340_vm1, %v4299_v30 }
 0x639   : > { %6772 = vst.msk [vmem:[%s7664_s24 + $0xd8] sm:$0xff] %vm6744_vm2, %v11536_v2 }
 0x63d   : > { %v6709_v24 = vpop.permute.xlu0 %6708 }
 0x63e   : > { %v4305_v17 = vpop.permute.xlu1 %4304 }
 0x63f   : > { %4371 = vst.msk [vmem:[%s7664_s24 + $0xf0] sm:$0xff] %vm4340_vm1, %v4305_v17 }
 0x640   : > { %6775 = vst.msk [vmem:[%s7664_s24 + $0xf0] sm:$0xff] %vm6744_vm2, %v6709_v24 }
 0x646   : > { %v6711_v40 = vpop.permute.xlu1 %6710 }
 0x647   : > { %6776 = vst.msk [vmem:[%s7664_s24 + $0xf8] sm:$0xff] %vm6744_vm2, %v6711_v40 }
 0x648   : > { %7402 = shalt.err (!%p7399_p5)
}
 0x649   : > { %s7465_s20 = smov 128   ;;  %s12112_s24 = smov 8  }
 0x64a   : > { %7300 = dma.vmem_to_hbm [thread:$0]  (%p7556_p4), %s6794_s25, 4096, %s6796_s23, %s6778_s12, %s7465_s20, %s7465_s20, %s12112_s24  }
 0x64b PF: > { %p7306_p6 = scmp.ge.s32.totalorder %s7453_s14, 2  ;;  %s6810_s29 = sand.u32 1, %s7433_s30  }
 0x64c   : > { %s6811_s16 = scalar_lea.sflag [#allocation3], %s6810_s29 }
 0x64d   : > { %p7303_p7 = pnand %p7306_p6, %p7563_p8 }
 0x64f   : > { %p7304_p9 = pneg %p7303_p7 }
 0x651   : > { %7428 = dma.done.wait (%p7304_p9), %s6811_s16, 4096  }
 0x652   : > { %7430 = vsyncadd (%p7304_p9), %s6811_s16, 4294963200  ;;  %s22_s14 = sadd.s32 1, %s7453_s14   ;;  %s12113_s30 = smov %s7437_s10 }
 0x653   : > { %p19_p10 = scmp.ge.s32.totalorder %s22_s14, 4   ;;  %s12114_s10 = smov %s7441_s11 }
 0x654   : > { %s12115_s11 = smov %s7569_s22  ;;  %s12116_s12 = smov %s7449_s13 }
 0x655   : > { %s12117_s13 = smov %s12119_s17  ;;  %21 = sbr.rel (!%p19_p10) target bundleno = 4 (0x4), region = 98 }
 0x65a   :  { %6817 = vsyncpa [#allocation3], 1 }
 0x65b   :  { %6819 = vsyncpa [#allocation3 + $0x1], 1 }

</bundles_post_ra>
